<compile_context>
chip_gen: v7x
topology: tpu7x:2x2x1
jax: 0.10.0
libtpu: 0.0.40
codegen_flags: <defaults>
</compile_context>

<pallas_src>
import functools

import jax
import jax.numpy as jnp
import numpy as np
from jax import lax
from jax.experimental import pallas as pl
from jax.experimental.pallas import tpu as pltpu


def _round_up(x, m):
    return ((x + m - 1) // m) * m


def _row_chunk(H, W):
    """Rows per im2col chunk so that chunk M ~ 128 and HC divides H."""
    hc = min(H, max(1, 128 // W))
    while H % hc != 0:
        hc -= 1
    return hc


# ----------------------------------------------------------------------------
# Kernel 1: Conv3x3(stride=1, pad=1) + folded-BN + ReLU.
# One batch element per grid step; im2col matmul per row chunk.
# ----------------------------------------------------------------------------
def conv_bn_relu_kernel(x_ref, w_ref, scale_ref, shift_ref, o_ref, xpad_ref):
    # x_ref:     [1, H, W, Cin]      (bf16)
    # w_ref:     [9*Cin, Cout]       (bf16, HWIO reshaped)
    # scale_ref: [1, Cout]  shift_ref: [1, Cout]   (f32)
    # o_ref:     [1, H, W, Cout]     (bf16)
    # xpad_ref:  [H+2, W+2, Cin]     VMEM scratch (bf16)
    H, W, Cout = o_ref.shape[1], o_ref.shape[2], o_ref.shape[3]
    Cin = x_ref.shape[3]

    # In-kernel "SAME" padding: zero the scratch, copy image into the interior.
    xpad_ref[...] = jnp.zeros_like(xpad_ref)
    xpad_ref[1:H + 1, 1:W + 1, :] = x_ref[0]
    xp = xpad_ref[...]

    w = w_ref[...]
    scale = scale_ref[0]
    shift = shift_ref[0]

    HC = _row_chunk(H, W)
    for h0 in range(0, H, HC):
        taps = [xp[h0 + kh:h0 + kh + HC, kw:kw + W, :]
                for kh in range(3) for kw in range(3)]
        slab = jnp.concatenate(taps, axis=-1).reshape(HC * W, 9 * Cin)
        acc = jnp.dot(slab, w, preferred_element_type=jnp.float32)
        y = jnp.maximum(acc * scale + shift, 0.0)
        o_ref[0, h0:h0 + HC] = y.reshape(HC, W, Cout).astype(o_ref.dtype)


def conv_bn_relu(x, w2d, scale, shift):
    B, H, W, Cin = x.shape
    Cout = w2d.shape[1]
    return pl.pallas_call(
        conv_bn_relu_kernel,
        out_shape=jax.ShapeDtypeStruct((B, H, W, Cout), jnp.bfloat16),
        grid=(B,),
        in_specs=[
            pl.BlockSpec((1, H, W, Cin), lambda b: (b, 0, 0, 0)),
            pl.BlockSpec((9 * Cin, Cout), lambda b: (0, 0)),
            pl.BlockSpec((1, Cout), lambda b: (0, 0)),
            pl.BlockSpec((1, Cout), lambda b: (0, 0)),
        ],
        out_specs=pl.BlockSpec((1, H, W, Cout), lambda b: (b, 0, 0, 0)),
        scratch_shapes=[pltpu.VMEM((H + 2, W + 2, Cin), jnp.bfloat16)],
        compiler_params=pltpu.CompilerParams(
            dimension_semantics=("parallel",)),
    )(x, w2d, scale, shift)


# ----------------------------------------------------------------------------
# Kernel 2 (fused tail): last Conv3x3 + folded-BN + ReLU + AdaptiveAvgPool2d
# + Linear. Batch folded in; output is lane-dense [B, CPAD].
# ----------------------------------------------------------------------------
def conv_pool_linear_kernel(x_ref, w_ref, scale_ref, shift_ref,
                            lw_ref, lb_ref, o_ref, xpad_ref):
    # x_ref: [B, H, W, Cin] (bf16); w_ref: [9*Cin, Cout] (bf16)
    # scale/shift: [1, Cout] (f32); lw_ref: [Cout, Cout] (f32, in->out)
    # lb_ref: [1, Cout] (f32); o_ref: [B, Cout] (f32)
    # xpad_ref: [H+2, W+2, Cin] scratch (bf16)
    B, H, W, Cin = x_ref.shape
    Cout = o_ref.shape[1]

    w = w_ref[...]
    scale = scale_ref[0]
    shift = shift_ref[0]
    inv_hw = 1.0 / float(H * W)

    HC = _row_chunk(H, W)
    pooled_rows = []
    for b in range(B):
        xpad_ref[...] = jnp.zeros_like(xpad_ref)
        xpad_ref[1:H + 1, 1:W + 1, :] = x_ref[b]
        xp = xpad_ref[...]
        csum = jnp.zeros((1, Cout), jnp.float32)
        for h0 in range(0, H, HC):
            taps = [xp[h0 + kh:h0 + kh + HC, kw:kw + W, :]
                    for kh in range(3) for kw in range(3)]
            slab = jnp.concatenate(taps, axis=-1).reshape(HC * W, 9 * Cin)
            acc = jnp.dot(slab, w, preferred_element_type=jnp.float32)
            y = jnp.maximum(acc * scale + shift, 0.0)
            csum = csum + jnp.sum(y, axis=0, keepdims=True)
        pooled_rows.append(csum * inv_hw)
    pooled = jnp.concatenate(pooled_rows, axis=0)  # [B, Cout] (== pool+squeeze)
    o_ref[...] = (jnp.dot(pooled, lw_ref[...],
                          preferred_element_type=jnp.float32) + lb_ref[0])


def conv_pool_linear(x, w2d, scale, shift, lw, lb):
    B, H, W, Cin = x.shape
    Cout = w2d.shape[1]
    vmem = pl.BlockSpec(memory_space=pltpu.MemorySpace.VMEM)
    return pl.pallas_call(
        conv_pool_linear_kernel,
        out_shape=jax.ShapeDtypeStruct((B, Cout), jnp.float32),
        in_specs=[vmem] * 6,
        out_specs=vmem,
        scratch_shapes=[pltpu.VMEM((H + 2, W + 2, Cin), jnp.bfloat16)],
    )(x, w2d, scale, shift, lw, lb)


# ----------------------------------------------------------------------------
# Parameter construction (deterministic, synthetic) + padding to lane-dense.
# ----------------------------------------------------------------------------
def init_decoder_params(key, decoder_channels, decoder_blocks, message_length):
    eps = 1e-5
    chans = [3] + [decoder_channels] * decoder_blocks + [message_length]
    params = {"conv": []}
    for i in range(len(chans) - 1):
        cin, cout = chans[i], chans[i + 1]
        key, kw, kg, kb, km, kv = jax.random.split(key, 6)
        w = jax.random.normal(kw, (3, 3, cin, cout), jnp.float32) * jnp.sqrt(
            2.0 / (9.0 * cin))
        gamma = 1.0 + 0.1 * jax.random.normal(kg, (cout,), jnp.float32)
        beta = 0.1 * jax.random.normal(kb, (cout,), jnp.float32)
        r_mean = 0.1 * jax.random.normal(km, (cout,), jnp.float32)
        r_var = 0.5 + jax.random.uniform(kv, (cout,), jnp.float32)
        scale = gamma / jnp.sqrt(r_var + eps)
        shift = beta - r_mean * scale
        params["conv"].append((w, scale, shift))
    key, kl, klb = jax.random.split(key, 3)
    # PyTorch Linear weight is [out, in].
    lin_w = jax.random.normal(
        kl, (message_length, message_length), jnp.float32
    ) * (1.0 / jnp.sqrt(message_length))
    lin_b = 0.1 * jax.random.normal(klb, (message_length,), jnp.float32)
    params["linear"] = (lin_w, lin_b)
    return params


def pad_params(params, message_length):
    """Zero-pad all channel dims to a common multiple of 128; weights -> bf16.

    shift pad is 0 so ReLU of padded lanes stays exactly 0 and never leaks.
    """
    max_c = 3
    for (w, _, _) in params["conv"]:
        max_c = max(max_c, w.shape[2], w.shape[3])
    max_c = max(max_c, message_length)
    cpad = _round_up(max_c, 128)

    padded = {"conv": []}
    for (w, scale, shift) in params["conv"]:
        _, _, cin, cout = w.shape
        wp = jnp.zeros((3, 3, cpad, cpad), jnp.float32)
        wp = wp.at[:, :, :cin, :cout].set(w)
        w2d = wp.reshape(9 * cpad, cpad).astype(jnp.bfloat16)
        sp = jnp.zeros((1, cpad), jnp.float32).at[0, :cout].set(scale)
        hp = jnp.zeros((1, cpad), jnp.float32).at[0, :cout].set(shift)
        padded["conv"].append((w2d, sp, hp))

    lin_w, lin_b = params["linear"]
    lwp = jnp.zeros((cpad, cpad), jnp.float32)
    lwp = lwp.at[:message_length, :message_length].set(lin_w.T)
    lbp = jnp.zeros((1, cpad), jnp.float32).at[0, :message_length].set(lin_b)
    padded["linear"] = (lwp, lbp)
    return padded


# ----------------------------------------------------------------------------
# Full forward (Pallas) and pure-JAX reference.
# ----------------------------------------------------------------------------
def decoder_forward(image_nchw, padded_params, msg_len):
    cpad = padded_params["conv"][0][0].shape[1]
    # NCHW -> NHWC, bf16, one-time channel pad of the (tiny) raw input.
    x = jnp.transpose(image_nchw, (0, 2, 3, 1)).astype(jnp.bfloat16)
    x = jnp.pad(x, ((0, 0), (0, 0), (0, 0), (0, cpad - x.shape[-1])))

    convs = padded_params["conv"]
    for (w2d, scale, shift) in convs[:-1]:
        x = conv_bn_relu(x, w2d, scale, shift)
    w2d, scale, shift = convs[-1]
    lw, lb = padded_params["linear"]
    out = conv_pool_linear(x, w2d, scale, shift, lw, lb)   # [B, cpad]
    return out[:, :msg_len]


def decoder_reference(image_nchw, params):
    """Mirrors the kernel's dtype handling (bf16 conv inputs, f32 accumulate)."""
    x = jnp.transpose(image_nchw, (0, 2, 3, 1)).astype(jnp.bfloat16)
    convs = params["conv"]
    n = len(convs)
    for i, (w, scale, shift) in enumerate(convs):
        y = lax.conv_general_dilated(
            x, w.astype(jnp.bfloat16),
            window_strides=(1, 1), padding="SAME",
            dimension_numbers=("NHWC", "HWIO", "NHWC"),
            preferred_element_type=jnp.float32)
        z = jnp.maximum(y * scale + shift, 0.0)
        x = z.astype(jnp.bfloat16) if i < n - 1 else z
    pooled = jnp.mean(x, axis=(1, 2))
    lin_w, lin_b = params["linear"]
    return pooled @ lin_w.T + lin_b


if __name__ == "__main__":
    key = jax.random.PRNGKey(0)
    key, k_img = jax.random.split(key)

    # Small configuration consistent with the module's constructor signature.
    decoder_channels = 32
    decoder_blocks = 3
    message_length = 8
    B, H, W = 2, 16, 16

    image = jax.random.normal(k_img, (B, 3, H, W), jnp.float32)  # NCHW input
    params = init_decoder_params(
        key, decoder_channels, decoder_blocks, message_length)
    padded = pad_params(params, message_length)

    fwd = jax.jit(functools.partial(decoder_forward, msg_len=message_length))
    out = jax.block_until_ready(fwd(image, padded))
    assert out.shape == (B, message_length), out.shape

    ref = jax.block_until_ready(decoder_reference(image, params))
    np.testing.assert_allclose(np.asarray(out), np.asarray(ref),
                               rtol=1e-2, atol=1e-2)

    print("KERNEL_OK")
</pallas_src>

<mosaic_0001>
module attributes {stable_mosaic.version = 11 : i64} {
  func.func @conv_bn_relu_kernel(%arg0: i32, %arg1: memref<1x16x16x128xbf16, #tpu.memory_space<vmem>>, %arg2: memref<1152x128xbf16, #tpu.memory_space<vmem>>, %arg3: memref<1x128xf32, #tpu.memory_space<vmem>>, %arg4: memref<1x128xf32, #tpu.memory_space<vmem>>, %arg5: memref<1x16x16x128xbf16, #tpu.memory_space<vmem>>, %arg6: memref<18x18x128xbf16, #tpu.memory_space<vmem>>) attributes {dimension_semantics = [#tpu.dimension_semantics<parallel>], iteration_bounds = array<i64: 2>, scalar_prefetch = 0 : i64, scratch_operands = 1 : i64, tpu.core_type = #tpu.core_type<tc>, window_params = [{transform_indices = @transform_0, window_bounds = array<i64: 1, 16, 16, 128>}, {pipeline_mode = #tpu.pipeline_mode<synchronous>, transform_indices = @transform_1, window_bounds = array<i64: 1152, 128>}, {pipeline_mode = #tpu.pipeline_mode<synchronous>, transform_indices = @transform_2, window_bounds = array<i64: 1, 128>}, {pipeline_mode = #tpu.pipeline_mode<synchronous>, transform_indices = @transform_3, window_bounds = array<i64: 1, 128>}, {transform_indices = @transform_4, window_bounds = array<i64: 1, 16, 16, 128>}]} {
    %cst = arith.constant 0.000000e+00 : bf16
    %0 = vector.broadcast %cst : bf16 to vector<18x18x128xbf16>
    %c0 = arith.constant 0 : index
    %c0_0 = arith.constant 0 : index
    %c0_1 = arith.constant 0 : index
    %1 = vector.load %arg6[%c0, %c0_0, %c0_1] : memref<18x18x128xbf16, #tpu.memory_space<vmem>>, vector<18x18x128xbf16>
    tpu.vector_store %arg6[%c0, %c0_0, %c0_1], %0 {strides = array<i32>} : memref<18x18x128xbf16, #tpu.memory_space<vmem>>, vector<18x18x128xbf16>,
    %c0_2 = arith.constant 0 : index
    %c0_3 = arith.constant 0 : index
    %c0_4 = arith.constant 0 : index
    %c0_5 = arith.constant 0 : index
    %2 = vector.load %arg1[%c0_2, %c0_3, %c0_4, %c0_5] : memref<1x16x16x128xbf16, #tpu.memory_space<vmem>>, vector<1x16x16x128xbf16>
    %3 = vector.shape_cast %2 : vector<1x16x16x128xbf16> to vector<16x16x128xbf16>
    %c1 = arith.constant 1 : index
    %c1_6 = arith.constant 1 : index
    %c0_7 = arith.constant 0 : index
    %4 = vector.load %arg6[%c1, %c1_6, %c0_7] : memref<18x18x128xbf16, #tpu.memory_space<vmem>>, vector<16x16x128xbf16>
    tpu.vector_store %arg6[%c1, %c1_6, %c0_7], %3 {strides = array<i32>} : memref<18x18x128xbf16, #tpu.memory_space<vmem>>, vector<16x16x128xbf16>,
    %c0_8 = arith.constant 0 : index
    %c0_9 = arith.constant 0 : index
    %c0_10 = arith.constant 0 : index
    %5 = vector.load %arg6[%c0_8, %c0_9, %c0_10] : memref<18x18x128xbf16, #tpu.memory_space<vmem>>, vector<18x18x128xbf16>
    %c0_11 = arith.constant 0 : index
    %c0_12 = arith.constant 0 : index
    %6 = vector.load %arg2[%c0_11, %c0_12] : memref<1152x128xbf16, #tpu.memory_space<vmem>>, vector<1152x128xbf16>
    %c0_13 = arith.constant 0 : index
    %c0_14 = arith.constant 0 : index
    %7 = vector.load %arg3[%c0_13, %c0_14] : memref<1x128xf32, #tpu.memory_space<vmem>>, vector<1x128xf32>
    %8 = vector.shape_cast %7 : vector<1x128xf32> to vector<128xf32>
    %c0_15 = arith.constant 0 : index
    %c0_16 = arith.constant 0 : index
    %9 = vector.load %arg4[%c0_15, %c0_16] : memref<1x128xf32, #tpu.memory_space<vmem>>, vector<1x128xf32>
    %10 = vector.shape_cast %9 : vector<1x128xf32> to vector<128xf32>
    %11 = vector.extract_strided_slice %5 {offsets = [0, 0, 0], sizes = [8, 16, 128], strides = [1, 1, 1]} : vector<18x18x128xbf16> to vector<8x16x128xbf16>
    %12 = vector.extract_strided_slice %5 {offsets = [0, 1, 0], sizes = [8, 16, 128], strides = [1, 1, 1]} : vector<18x18x128xbf16> to vector<8x16x128xbf16>
    %13 = vector.extract_strided_slice %5 {offsets = [0, 2, 0], sizes = [8, 16, 128], strides = [1, 1, 1]} : vector<18x18x128xbf16> to vector<8x16x128xbf16>
    %14 = vector.extract_strided_slice %5 {offsets = [1, 0, 0], sizes = [8, 16, 128], strides = [1, 1, 1]} : vector<18x18x128xbf16> to vector<8x16x128xbf16>
    %15 = vector.extract_strided_slice %5 {offsets = [1, 1, 0], sizes = [8, 16, 128], strides = [1, 1, 1]} : vector<18x18x128xbf16> to vector<8x16x128xbf16>
    %16 = vector.extract_strided_slice %5 {offsets = [1, 2, 0], sizes = [8, 16, 128], strides = [1, 1, 1]} : vector<18x18x128xbf16> to vector<8x16x128xbf16>
    %17 = vector.extract_strided_slice %5 {offsets = [2, 0, 0], sizes = [8, 16, 128], strides = [1, 1, 1]} : vector<18x18x128xbf16> to vector<8x16x128xbf16>
    %18 = vector.extract_strided_slice %5 {offsets = [2, 1, 0], sizes = [8, 16, 128], strides = [1, 1, 1]} : vector<18x18x128xbf16> to vector<8x16x128xbf16>
    %19 = vector.extract_strided_slice %5 {offsets = [2, 2, 0], sizes = [8, 16, 128], strides = [1, 1, 1]} : vector<18x18x128xbf16> to vector<8x16x128xbf16>
    %20 = tpu.concatenate %11, %12, %13, %14, %15, %16, %17, %18, %19 in 2 : vector<8x16x128xbf16>, vector<8x16x128xbf16>, vector<8x16x128xbf16>, vector<8x16x128xbf16>, vector<8x16x128xbf16>, vector<8x16x128xbf16>, vector<8x16x128xbf16>, vector<8x16x128xbf16>, vector<8x16x128xbf16> -> vector<8x16x1152xbf16>
    %21 = vector.shape_cast %20 : vector<8x16x1152xbf16> to vector<128x1152xbf16>
    %cst_17 = arith.constant dense<0.000000e+00> : vector<128x128xf32>
    %22 = tpu.matmul %21, %6, %cst_17 {dimension_numbers = #tpu.dot_dimension_numbers<[1], [0], [0], [1], [0, 0, 1, 1], [], []>} : vector<128x1152xbf16>, vector<1152x128xbf16>, vector<128x128xf32> -> vector<128x128xf32>
    %23 = vector.shape_cast %8 : vector<128xf32> to vector<1x128xf32>
    %24 = vector.broadcast %23 : vector<1x128xf32> to vector<128x128xf32>
    %25 = arith.mulf %22, %24 : vector<128x128xf32>
    %26 = vector.shape_cast %10 : vector<128xf32> to vector<1x128xf32>
    %27 = vector.broadcast %26 : vector<1x128xf32> to vector<128x128xf32>
    %28 = arith.addf %25, %27 : vector<128x128xf32>
    %cst_18 = arith.constant 0.000000e+00 : f32
    %29 = vector.broadcast %cst_18 : f32 to vector<128x128xf32>
    %30 = arith.maximumf %28, %29 : vector<128x128xf32>
    %31 = vector.shape_cast %30 : vector<128x128xf32> to vector<8x16x128xf32>
    %32 = arith.truncf %31 : vector<8x16x128xf32> to vector<8x16x128xbf16>
    %c0_19 = arith.constant 0 : index
    %c0_20 = arith.constant 0 : index
    %c0_21 = arith.constant 0 : index
    %c0_22 = arith.constant 0 : index
    %33 = vector.load %arg5[%c0_19, %c0_20, %c0_21, %c0_22] : memref<1x16x16x128xbf16, #tpu.memory_space<vmem>>, vector<1x8x16x128xbf16>
    %34 = vector.shape_cast %33 : vector<1x8x16x128xbf16> to vector<8x16x128xbf16>
    %35 = vector.shape_cast %32 : vector<8x16x128xbf16> to vector<1x8x16x128xbf16>
    tpu.vector_store %arg5[%c0_19, %c0_20, %c0_21, %c0_22], %35 {strides = array<i32>} : memref<1x16x16x128xbf16, #tpu.memory_space<vmem>>, vector<1x8x16x128xbf16>,
    %36 = vector.extract_strided_slice %5 {offsets = [8, 0, 0], sizes = [8, 16, 128], strides = [1, 1, 1]} : vector<18x18x128xbf16> to vector<8x16x128xbf16>
    %37 = vector.extract_strided_slice %5 {offsets = [8, 1, 0], sizes = [8, 16, 128], strides = [1, 1, 1]} : vector<18x18x128xbf16> to vector<8x16x128xbf16>
    %38 = vector.extract_strided_slice %5 {offsets = [8, 2, 0], sizes = [8, 16, 128], strides = [1, 1, 1]} : vector<18x18x128xbf16> to vector<8x16x128xbf16>
    %39 = vector.extract_strided_slice %5 {offsets = [9, 0, 0], sizes = [8, 16, 128], strides = [1, 1, 1]} : vector<18x18x128xbf16> to vector<8x16x128xbf16>
    %40 = vector.extract_strided_slice %5 {offsets = [9, 1, 0], sizes = [8, 16, 128], strides = [1, 1, 1]} : vector<18x18x128xbf16> to vector<8x16x128xbf16>
    %41 = vector.extract_strided_slice %5 {offsets = [9, 2, 0], sizes = [8, 16, 128], strides = [1, 1, 1]} : vector<18x18x128xbf16> to vector<8x16x128xbf16>
    %42 = vector.extract_strided_slice %5 {offsets = [10, 0, 0], sizes = [8, 16, 128], strides = [1, 1, 1]} : vector<18x18x128xbf16> to vector<8x16x128xbf16>
    %43 = vector.extract_strided_slice %5 {offsets = [10, 1, 0], sizes = [8, 16, 128], strides = [1, 1, 1]} : vector<18x18x128xbf16> to vector<8x16x128xbf16>
    %44 = vector.extract_strided_slice %5 {offsets = [10, 2, 0], sizes = [8, 16, 128], strides = [1, 1, 1]} : vector<18x18x128xbf16> to vector<8x16x128xbf16>
    %45 = tpu.concatenate %36, %37, %38, %39, %40, %41, %42, %43, %44 in 2 : vector<8x16x128xbf16>, vector<8x16x128xbf16>, vector<8x16x128xbf16>, vector<8x16x128xbf16>, vector<8x16x128xbf16>, vector<8x16x128xbf16>, vector<8x16x128xbf16>, vector<8x16x128xbf16>, vector<8x16x128xbf16> -> vector<8x16x1152xbf16>
    %46 = vector.shape_cast %45 : vector<8x16x1152xbf16> to vector<128x1152xbf16>
    %cst_23 = arith.constant dense<0.000000e+00> : vector<128x128xf32>
    %47 = tpu.matmul %46, %6, %cst_23 {dimension_numbers = #tpu.dot_dimension_numbers<[1], [0], [0], [1], [0, 0, 1, 1], [], []>} : vector<128x1152xbf16>, vector<1152x128xbf16>, vector<128x128xf32> -> vector<128x128xf32>
    %48 = vector.shape_cast %8 : vector<128xf32> to vector<1x128xf32>
    %49 = vector.broadcast %48 : vector<1x128xf32> to vector<128x128xf32>
    %50 = arith.mulf %47, %49 : vector<128x128xf32>
    %51 = vector.shape_cast %10 : vector<128xf32> to vector<1x128xf32>
    %52 = vector.broadcast %51 : vector<1x128xf32> to vector<128x128xf32>
    %53 = arith.addf %50, %52 : vector<128x128xf32>
    %cst_24 = arith.constant 0.000000e+00 : f32
    %54 = vector.broadcast %cst_24 : f32 to vector<128x128xf32>
    %55 = arith.maximumf %53, %54 : vector<128x128xf32>
    %56 = vector.shape_cast %55 : vector<128x128xf32> to vector<8x16x128xf32>
    %57 = arith.truncf %56 : vector<8x16x128xf32> to vector<8x16x128xbf16>
    %c0_25 = arith.constant 0 : index
    %c8 = arith.constant 8 : index
    %c0_26 = arith.constant 0 : index
    %c0_27 = arith.constant 0 : index
    %58 = vector.load %arg5[%c0_25, %c8, %c0_26, %c0_27] : memref<1x16x16x128xbf16, #tpu.memory_space<vmem>>, vector<1x8x16x128xbf16>
    %59 = vector.shape_cast %58 : vector<1x8x16x128xbf16> to vector<8x16x128xbf16>
    %60 = vector.shape_cast %57 : vector<8x16x128xbf16> to vector<1x8x16x128xbf16>
    tpu.vector_store %arg5[%c0_25, %c8, %c0_26, %c0_27], %60 {strides = array<i32>} : memref<1x16x16x128xbf16, #tpu.memory_space<vmem>>, vector<1x8x16x128xbf16>,
    return
  }
  func.func @transform_0(%arg0: i32) -> (i32, i32, i32, i32) {
    %c0_i32 = arith.constant 0 : i32
    %c0_i32_0 = arith.constant 0 : i32
    %c0_i32_1 = arith.constant 0 : i32
    %c0_i32_2 = arith.constant 0 : i32
    return %arg0, %c0_i32, %c0_i32_0, %c0_i32_1 : i32, i32, i32, i32
  }
  func.func @transform_1(%arg0: i32) -> (i32, i32) {
    %c0_i32 = arith.constant 0 : i32
    %c0_i32_0 = arith.constant 0 : i32
    %c0_i32_1 = arith.constant 0 : i32
    return %c0_i32, %c0_i32_0 : i32, i32
  }
  func.func @transform_2(%arg0: i32) -> (i32, i32) {
    %c0_i32 = arith.constant 0 : i32
    %c0_i32_0 = arith.constant 0 : i32
    %c0_i32_1 = arith.constant 0 : i32
    return %c0_i32, %c0_i32_0 : i32, i32
  }
  func.func @transform_3(%arg0: i32) -> (i32, i32) {
    %c0_i32 = arith.constant 0 : i32
    %c0_i32_0 = arith.constant 0 : i32
    %c0_i32_1 = arith.constant 0 : i32
    return %c0_i32, %c0_i32_0 : i32, i32
  }
  func.func @transform_4(%arg0: i32) -> (i32, i32, i32, i32) {
    %c0_i32 = arith.constant 0 : i32
    %c0_i32_0 = arith.constant 0 : i32
    %c0_i32_1 = arith.constant 0 : i32
    %c0_i32_2 = arith.constant 0 : i32
    return %arg0, %c0_i32, %c0_i32_0, %c0_i32_1 : i32, i32, i32, i32
  }
}

module attributes {stable_mosaic.version = 11 : i64} {
  func.func @conv_pool_linear_kernel(%arg0: memref<2x16x16x128xbf16, #tpu.memory_space<vmem>>, %arg1: memref<1152x128xbf16, #tpu.memory_space<vmem>>, %arg2: memref<1x128xf32, #tpu.memory_space<vmem>>, %arg3: memref<1x128xf32, #tpu.memory_space<vmem>>, %arg4: memref<128x128xf32, #tpu.memory_space<vmem>>, %arg5: memref<1x128xf32, #tpu.memory_space<vmem>>, %arg6: memref<2x128xf32, #tpu.memory_space<vmem>>, %arg7: memref<18x18x128xbf16, #tpu.memory_space<vmem>>) attributes {dimension_semantics = [], scalar_prefetch = 0 : i64, scratch_operands = 1 : i64, tpu.core_type = #tpu.core_type<tc>} {
    %c0 = arith.constant 0 : index
    %c0_0 = arith.constant 0 : index
    %0 = vector.load %arg1[%c0, %c0_0] : memref<1152x128xbf16, #tpu.memory_space<vmem>>, vector<1152x128xbf16>
    %c0_1 = arith.constant 0 : index
    %c0_2 = arith.constant 0 : index
    %1 = vector.load %arg2[%c0_1, %c0_2] : memref<1x128xf32, #tpu.memory_space<vmem>>, vector<1x128xf32>
    %2 = vector.shape_cast %1 : vector<1x128xf32> to vector<128xf32>
    %c0_3 = arith.constant 0 : index
    %c0_4 = arith.constant 0 : index
    %3 = vector.load %arg3[%c0_3, %c0_4] : memref<1x128xf32, #tpu.memory_space<vmem>>, vector<1x128xf32>
    %4 = vector.shape_cast %3 : vector<1x128xf32> to vector<128xf32>
    %cst = arith.constant 0.000000e+00 : bf16
    %5 = vector.broadcast %cst : bf16 to vector<18x18x128xbf16>
    %c0_5 = arith.constant 0 : index
    %c0_6 = arith.constant 0 : index
    %c0_7 = arith.constant 0 : index
    %6 = vector.load %arg7[%c0_5, %c0_6, %c0_7] : memref<18x18x128xbf16, #tpu.memory_space<vmem>>, vector<18x18x128xbf16>
    tpu.vector_store %arg7[%c0_5, %c0_6, %c0_7], %5 {strides = array<i32>} : memref<18x18x128xbf16, #tpu.memory_space<vmem>>, vector<18x18x128xbf16>,
    %c0_8 = arith.constant 0 : index
    %c0_9 = arith.constant 0 : index
    %c0_10 = arith.constant 0 : index
    %c0_11 = arith.constant 0 : index
    %7 = vector.load %arg0[%c0_8, %c0_9, %c0_10, %c0_11] : memref<2x16x16x128xbf16, #tpu.memory_space<vmem>>, vector<1x16x16x128xbf16>
    %8 = vector.shape_cast %7 : vector<1x16x16x128xbf16> to vector<16x16x128xbf16>
    %c1 = arith.constant 1 : index
    %c1_12 = arith.constant 1 : index
    %c0_13 = arith.constant 0 : index
    %9 = vector.load %arg7[%c1, %c1_12, %c0_13] : memref<18x18x128xbf16, #tpu.memory_space<vmem>>, vector<16x16x128xbf16>
    tpu.vector_store %arg7[%c1, %c1_12, %c0_13], %8 {strides = array<i32>} : memref<18x18x128xbf16, #tpu.memory_space<vmem>>, vector<16x16x128xbf16>,
    %c0_14 = arith.constant 0 : index
    %c0_15 = arith.constant 0 : index
    %c0_16 = arith.constant 0 : index
    %10 = vector.load %arg7[%c0_14, %c0_15, %c0_16] : memref<18x18x128xbf16, #tpu.memory_space<vmem>>, vector<18x18x128xbf16>
    %cst_17 = arith.constant 0.000000e+00 : f32
    %11 = vector.broadcast %cst_17 : f32 to vector<1x128xf32>
    %12 = vector.extract_strided_slice %10 {offsets = [0, 0, 0], sizes = [8, 16, 128], strides = [1, 1, 1]} : vector<18x18x128xbf16> to vector<8x16x128xbf16>
    %13 = vector.extract_strided_slice %10 {offsets = [0, 1, 0], sizes = [8, 16, 128], strides = [1, 1, 1]} : vector<18x18x128xbf16> to vector<8x16x128xbf16>
    %14 = vector.extract_strided_slice %10 {offsets = [0, 2, 0], sizes = [8, 16, 128], strides = [1, 1, 1]} : vector<18x18x128xbf16> to vector<8x16x128xbf16>
    %15 = vector.extract_strided_slice %10 {offsets = [1, 0, 0], sizes = [8, 16, 128], strides = [1, 1, 1]} : vector<18x18x128xbf16> to vector<8x16x128xbf16>
    %16 = vector.extract_strided_slice %10 {offsets = [1, 1, 0], sizes = [8, 16, 128], strides = [1, 1, 1]} : vector<18x18x128xbf16> to vector<8x16x128xbf16>
    %17 = vector.extract_strided_slice %10 {offsets = [1, 2, 0], sizes = [8, 16, 128], strides = [1, 1, 1]} : vector<18x18x128xbf16> to vector<8x16x128xbf16>
    %18 = vector.extract_strided_slice %10 {offsets = [2, 0, 0], sizes = [8, 16, 128], strides = [1, 1, 1]} : vector<18x18x128xbf16> to vector<8x16x128xbf16>
    %19 = vector.extract_strided_slice %10 {offsets = [2, 1, 0], sizes = [8, 16, 128], strides = [1, 1, 1]} : vector<18x18x128xbf16> to vector<8x16x128xbf16>
    %20 = vector.extract_strided_slice %10 {offsets = [2, 2, 0], sizes = [8, 16, 128], strides = [1, 1, 1]} : vector<18x18x128xbf16> to vector<8x16x128xbf16>
    %21 = tpu.concatenate %12, %13, %14, %15, %16, %17, %18, %19, %20 in 2 : vector<8x16x128xbf16>, vector<8x16x128xbf16>, vector<8x16x128xbf16>, vector<8x16x128xbf16>, vector<8x16x128xbf16>, vector<8x16x128xbf16>, vector<8x16x128xbf16>, vector<8x16x128xbf16>, vector<8x16x128xbf16> -> vector<8x16x1152xbf16>
    %22 = vector.shape_cast %21 : vector<8x16x1152xbf16> to vector<128x1152xbf16>
    %cst_18 = arith.constant dense<0.000000e+00> : vector<128x128xf32>
    %23 = tpu.matmul %22, %0, %cst_18 {dimension_numbers = #tpu.dot_dimension_numbers<[1], [0], [0], [1], [0, 0, 1, 1], [], []>} : vector<128x1152xbf16>, vector<1152x128xbf16>, vector<128x128xf32> -> vector<128x128xf32>
    %24 = vector.shape_cast %2 : vector<128xf32> to vector<1x128xf32>
    %25 = vector.broadcast %24 : vector<1x128xf32> to vector<128x128xf32>
    %26 = arith.mulf %23, %25 : vector<128x128xf32>
    %27 = vector.shape_cast %4 : vector<128xf32> to vector<1x128xf32>
    %28 = vector.broadcast %27 : vector<1x128xf32> to vector<128x128xf32>
    %29 = arith.addf %26, %28 : vector<128x128xf32>
    %cst_19 = arith.constant 0.000000e+00 : f32
    %30 = vector.broadcast %cst_19 : f32 to vector<128x128xf32>
    %31 = arith.maximumf %29, %30 : vector<128x128xf32>
    %cst_20 = arith.constant dense<0.000000e+00> : vector<128xf32>
    %32 = vector.multi_reduction <add>, %31, %cst_20 [0] : vector<128x128xf32> to vector<128xf32>
    %33 = vector.shape_cast %32 : vector<128xf32> to vector<1x128xf32>
    %34 = arith.addf %11, %33 : vector<1x128xf32>
    %35 = vector.extract_strided_slice %10 {offsets = [8, 0, 0], sizes = [8, 16, 128], strides = [1, 1, 1]} : vector<18x18x128xbf16> to vector<8x16x128xbf16>
    %36 = vector.extract_strided_slice %10 {offsets = [8, 1, 0], sizes = [8, 16, 128], strides = [1, 1, 1]} : vector<18x18x128xbf16> to vector<8x16x128xbf16>
    %37 = vector.extract_strided_slice %10 {offsets = [8, 2, 0], sizes = [8, 16, 128], strides = [1, 1, 1]} : vector<18x18x128xbf16> to vector<8x16x128xbf16>
    %38 = vector.extract_strided_slice %10 {offsets = [9, 0, 0], sizes = [8, 16, 128], strides = [1, 1, 1]} : vector<18x18x128xbf16> to vector<8x16x128xbf16>
    %39 = vector.extract_strided_slice %10 {offsets = [9, 1, 0], sizes = [8, 16, 128], strides = [1, 1, 1]} : vector<18x18x128xbf16> to vector<8x16x128xbf16>
    %40 = vector.extract_strided_slice %10 {offsets = [9, 2, 0], sizes = [8, 16, 128], strides = [1, 1, 1]} : vector<18x18x128xbf16> to vector<8x16x128xbf16>
    %41 = vector.extract_strided_slice %10 {offsets = [10, 0, 0], sizes = [8, 16, 128], strides = [1, 1, 1]} : vector<18x18x128xbf16> to vector<8x16x128xbf16>
    %42 = vector.extract_strided_slice %10 {offsets = [10, 1, 0], sizes = [8, 16, 128], strides = [1, 1, 1]} : vector<18x18x128xbf16> to vector<8x16x128xbf16>
    %43 = vector.extract_strided_slice %10 {offsets = [10, 2, 0], sizes = [8, 16, 128], strides = [1, 1, 1]} : vector<18x18x128xbf16> to vector<8x16x128xbf16>
    %44 = tpu.concatenate %35, %36, %37, %38, %39, %40, %41, %42, %43 in 2 : vector<8x16x128xbf16>, vector<8x16x128xbf16>, vector<8x16x128xbf16>, vector<8x16x128xbf16>, vector<8x16x128xbf16>, vector<8x16x128xbf16>, vector<8x16x128xbf16>, vector<8x16x128xbf16>, vector<8x16x128xbf16> -> vector<8x16x1152xbf16>
    %45 = vector.shape_cast %44 : vector<8x16x1152xbf16> to vector<128x1152xbf16>
    %cst_21 = arith.constant dense<0.000000e+00> : vector<128x128xf32>
    %46 = tpu.matmul %45, %0, %cst_21 {dimension_numbers = #tpu.dot_dimension_numbers<[1], [0], [0], [1], [0, 0, 1, 1], [], []>} : vector<128x1152xbf16>, vector<1152x128xbf16>, vector<128x128xf32> -> vector<128x128xf32>
    %47 = vector.shape_cast %2 : vector<128xf32> to vector<1x128xf32>
    %48 = vector.broadcast %47 : vector<1x128xf32> to vector<128x128xf32>
    %49 = arith.mulf %46, %48 : vector<128x128xf32>
    %50 = vector.shape_cast %4 : vector<128xf32> to vector<1x128xf32>
    %51 = vector.broadcast %50 : vector<1x128xf32> to vector<128x128xf32>
    %52 = arith.addf %49, %51 : vector<128x128xf32>
    %cst_22 = arith.constant 0.000000e+00 : f32
    %53 = vector.broadcast %cst_22 : f32 to vector<128x128xf32>
    %54 = arith.maximumf %52, %53 : vector<128x128xf32>
    %cst_23 = arith.constant dense<0.000000e+00> : vector<128xf32>
    %55 = vector.multi_reduction <add>, %54, %cst_23 [0] : vector<128x128xf32> to vector<128xf32>
    %56 = vector.shape_cast %55 : vector<128xf32> to vector<1x128xf32>
    %57 = arith.addf %34, %56 : vector<1x128xf32>
    %cst_24 = arith.constant 3.906250e-03 : f32
    %58 = vector.broadcast %cst_24 : f32 to vector<1x128xf32>
    %59 = arith.mulf %57, %58 : vector<1x128xf32>
    %cst_25 = arith.constant 0.000000e+00 : bf16
    %60 = vector.broadcast %cst_25 : bf16 to vector<18x18x128xbf16>
    %c0_26 = arith.constant 0 : index
    %c0_27 = arith.constant 0 : index
    %c0_28 = arith.constant 0 : index
    %61 = vector.load %arg7[%c0_26, %c0_27, %c0_28] : memref<18x18x128xbf16, #tpu.memory_space<vmem>>, vector<18x18x128xbf16>
    tpu.vector_store %arg7[%c0_26, %c0_27, %c0_28], %60 {strides = array<i32>} : memref<18x18x128xbf16, #tpu.memory_space<vmem>>, vector<18x18x128xbf16>,
    %c1_29 = arith.constant 1 : index
    %c0_30 = arith.constant 0 : index
    %c0_31 = arith.constant 0 : index
    %c0_32 = arith.constant 0 : index
    %62 = vector.load %arg0[%c1_29, %c0_30, %c0_31, %c0_32] : memref<2x16x16x128xbf16, #tpu.memory_space<vmem>>, vector<1x16x16x128xbf16>
    %63 = vector.shape_cast %62 : vector<1x16x16x128xbf16> to vector<16x16x128xbf16>
    %c1_33 = arith.constant 1 : index
    %c1_34 = arith.constant 1 : index
    %c0_35 = arith.constant 0 : index
    %64 = vector.load %arg7[%c1_33, %c1_34, %c0_35] : memref<18x18x128xbf16, #tpu.memory_space<vmem>>, vector<16x16x128xbf16>
    tpu.vector_store %arg7[%c1_33, %c1_34, %c0_35], %63 {strides = array<i32>} : memref<18x18x128xbf16, #tpu.memory_space<vmem>>, vector<16x16x128xbf16>,
    %c0_36 = arith.constant 0 : index
    %c0_37 = arith.constant 0 : index
    %c0_38 = arith.constant 0 : index
    %65 = vector.load %arg7[%c0_36, %c0_37, %c0_38] : memref<18x18x128xbf16, #tpu.memory_space<vmem>>, vector<18x18x128xbf16>
    %cst_39 = arith.constant 0.000000e+00 : f32
    %66 = vector.broadcast %cst_39 : f32 to vector<1x128xf32>
    %67 = vector.extract_strided_slice %65 {offsets = [0, 0, 0], sizes = [8, 16, 128], strides = [1, 1, 1]} : vector<18x18x128xbf16> to vector<8x16x128xbf16>
    %68 = vector.extract_strided_slice %65 {offsets = [0, 1, 0], sizes = [8, 16, 128], strides = [1, 1, 1]} : vector<18x18x128xbf16> to vector<8x16x128xbf16>
    %69 = vector.extract_strided_slice %65 {offsets = [0, 2, 0], sizes = [8, 16, 128], strides = [1, 1, 1]} : vector<18x18x128xbf16> to vector<8x16x128xbf16>
    %70 = vector.extract_strided_slice %65 {offsets = [1, 0, 0], sizes = [8, 16, 128], strides = [1, 1, 1]} : vector<18x18x128xbf16> to vector<8x16x128xbf16>
    %71 = vector.extract_strided_slice %65 {offsets = [1, 1, 0], sizes = [8, 16, 128], strides = [1, 1, 1]} : vector<18x18x128xbf16> to vector<8x16x128xbf16>
    %72 = vector.extract_strided_slice %65 {offsets = [1, 2, 0], sizes = [8, 16, 128], strides = [1, 1, 1]} : vector<18x18x128xbf16> to vector<8x16x128xbf16>
    %73 = vector.extract_strided_slice %65 {offsets = [2, 0, 0], sizes = [8, 16, 128], strides = [1, 1, 1]} : vector<18x18x128xbf16> to vector<8x16x128xbf16>
    %74 = vector.extract_strided_slice %65 {offsets = [2, 1, 0], sizes = [8, 16, 128], strides = [1, 1, 1]} : vector<18x18x128xbf16> to vector<8x16x128xbf16>
    %75 = vector.extract_strided_slice %65 {offsets = [2, 2, 0], sizes = [8, 16, 128], strides = [1, 1, 1]} : vector<18x18x128xbf16> to vector<8x16x128xbf16>
    %76 = tpu.concatenate %67, %68, %69, %70, %71, %72, %73, %74, %75 in 2 : vector<8x16x128xbf16>, vector<8x16x128xbf16>, vector<8x16x128xbf16>, vector<8x16x128xbf16>, vector<8x16x128xbf16>, vector<8x16x128xbf16>, vector<8x16x128xbf16>, vector<8x16x128xbf16>, vector<8x16x128xbf16> -> vector<8x16x1152xbf16>
    %77 = vector.shape_cast %76 : vector<8x16x1152xbf16> to vector<128x1152xbf16>
    %cst_40 = arith.constant dense<0.000000e+00> : vector<128x128xf32>
    %78 = tpu.matmul %77, %0, %cst_40 {dimension_numbers = #tpu.dot_dimension_numbers<[1], [0], [0], [1], [0, 0, 1, 1], [], []>} : vector<128x1152xbf16>, vector<1152x128xbf16>, vector<128x128xf32> -> vector<128x128xf32>
    %79 = vector.shape_cast %2 : vector<128xf32> to vector<1x128xf32>
    %80 = vector.broadcast %79 : vector<1x128xf32> to vector<128x128xf32>
    %81 = arith.mulf %78, %80 : vector<128x128xf32>
    %82 = vector.shape_cast %4 : vector<128xf32> to vector<1x128xf32>
    %83 = vector.broadcast %82 : vector<1x128xf32> to vector<128x128xf32>
    %84 = arith.addf %81, %83 : vector<128x128xf32>
    %cst_41 = arith.constant 0.000000e+00 : f32
    %85 = vector.broadcast %cst_41 : f32 to vector<128x128xf32>
    %86 = arith.maximumf %84, %85 : vector<128x128xf32>
    %cst_42 = arith.constant dense<0.000000e+00> : vector<128xf32>
    %87 = vector.multi_reduction <add>, %86, %cst_42 [0] : vector<128x128xf32> to vector<128xf32>
    %88 = vector.shape_cast %87 : vector<128xf32> to vector<1x128xf32>
    %89 = arith.addf %66, %88 : vector<1x128xf32>
    %90 = vector.extract_strided_slice %65 {offsets = [8, 0, 0], sizes = [8, 16, 128], strides = [1, 1, 1]} : vector<18x18x128xbf16> to vector<8x16x128xbf16>
    %91 = vector.extract_strided_slice %65 {offsets = [8, 1, 0], sizes = [8, 16, 128], strides = [1, 1, 1]} : vector<18x18x128xbf16> to vector<8x16x128xbf16>
    %92 = vector.extract_strided_slice %65 {offsets = [8, 2, 0], sizes = [8, 16, 128], strides = [1, 1, 1]} : vector<18x18x128xbf16> to vector<8x16x128xbf16>
    %93 = vector.extract_strided_slice %65 {offsets = [9, 0, 0], sizes = [8, 16, 128], strides = [1, 1, 1]} : vector<18x18x128xbf16> to vector<8x16x128xbf16>
    %94 = vector.extract_strided_slice %65 {offsets = [9, 1, 0], sizes = [8, 16, 128], strides = [1, 1, 1]} : vector<18x18x128xbf16> to vector<8x16x128xbf16>
    %95 = vector.extract_strided_slice %65 {offsets = [9, 2, 0], sizes = [8, 16, 128], strides = [1, 1, 1]} : vector<18x18x128xbf16> to vector<8x16x128xbf16>
    %96 = vector.extract_strided_slice %65 {offsets = [10, 0, 0], sizes = [8, 16, 128], strides = [1, 1, 1]} : vector<18x18x128xbf16> to vector<8x16x128xbf16>
    %97 = vector.extract_strided_slice %65 {offsets = [10, 1, 0], sizes = [8, 16, 128], strides = [1, 1, 1]} : vector<18x18x128xbf16> to vector<8x16x128xbf16>
    %98 = vector.extract_strided_slice %65 {offsets = [10, 2, 0], sizes = [8, 16, 128], strides = [1, 1, 1]} : vector<18x18x128xbf16> to vector<8x16x128xbf16>
    %99 = tpu.concatenate %90, %91, %92, %93, %94, %95, %96, %97, %98 in 2 : vector<8x16x128xbf16>, vector<8x16x128xbf16>, vector<8x16x128xbf16>, vector<8x16x128xbf16>, vector<8x16x128xbf16>, vector<8x16x128xbf16>, vector<8x16x128xbf16>, vector<8x16x128xbf16>, vector<8x16x128xbf16> -> vector<8x16x1152xbf16>
    %100 = vector.shape_cast %99 : vector<8x16x1152xbf16> to vector<128x1152xbf16>
    %cst_43 = arith.constant dense<0.000000e+00> : vector<128x128xf32>
    %101 = tpu.matmul %100, %0, %cst_43 {dimension_numbers = #tpu.dot_dimension_numbers<[1], [0], [0], [1], [0, 0, 1, 1], [], []>} : vector<128x1152xbf16>, vector<1152x128xbf16>, vector<128x128xf32> -> vector<128x128xf32>
    %102 = vector.shape_cast %2 : vector<128xf32> to vector<1x128xf32>
    %103 = vector.broadcast %102 : vector<1x128xf32> to vector<128x128xf32>
    %104 = arith.mulf %101, %103 : vector<128x128xf32>
    %105 = vector.shape_cast %4 : vector<128xf32> to vector<1x128xf32>
    %106 = vector.broadcast %105 : vector<1x128xf32> to vector<128x128xf32>
    %107 = arith.addf %104, %106 : vector<128x128xf32>
    %cst_44 = arith.constant 0.000000e+00 : f32
    %108 = vector.broadcast %cst_44 : f32 to vector<128x128xf32>
    %109 = arith.maximumf %107, %108 : vector<128x128xf32>
    %cst_45 = arith.constant dense<0.000000e+00> : vector<128xf32>
    %110 = vector.multi_reduction <add>, %109, %cst_45 [0] : vector<128x128xf32> to vector<128xf32>
    %111 = vector.shape_cast %110 : vector<128xf32> to vector<1x128xf32>
    %112 = arith.addf %89, %111 : vector<1x128xf32>
    %cst_46 = arith.constant 3.906250e-03 : f32
    %113 = vector.broadcast %cst_46 : f32 to vector<1x128xf32>
    %114 = arith.mulf %112, %113 : vector<1x128xf32>
    %115 = tpu.concatenate %59, %114 in 0 : vector<1x128xf32>, vector<1x128xf32> -> vector<2x128xf32>
    %c0_47 = arith.constant 0 : index
    %c0_48 = arith.constant 0 : index
    %116 = vector.load %arg4[%c0_47, %c0_48] : memref<128x128xf32, #tpu.memory_space<vmem>>, vector<128x128xf32>
    %cst_49 = arith.constant dense<0.000000e+00> : vector<2x128xf32>
    %117 = tpu.matmul %115, %116, %cst_49 {dimension_numbers = #tpu.dot_dimension_numbers<[1], [0], [0], [1], [0, 0, 1, 1], [], []>} : vector<2x128xf32>, vector<128x128xf32>, vector<2x128xf32> -> vector<2x128xf32>
    %c0_50 = arith.constant 0 : index
    %c0_51 = arith.constant 0 : index
    %118 = vector.load %arg5[%c0_50, %c0_51] : memref<1x128xf32, #tpu.memory_space<vmem>>, vector<1x128xf32>
    %119 = vector.shape_cast %118 : vector<1x128xf32> to vector<128xf32>
    %120 = vector.shape_cast %119 : vector<128xf32> to vector<1x128xf32>
    %121 = vector.broadcast %120 : vector<1x128xf32> to vector<2x128xf32>
    %122 = arith.addf %117, %121 : vector<2x128xf32>
    %c0_52 = arith.constant 0 : index
    %c0_53 = arith.constant 0 : index
    %123 = vector.load %arg6[%c0_52, %c0_53] : memref<2x128xf32, #tpu.memory_space<vmem>>, vector<2x128xf32>
    tpu.vector_store %arg6[%c0_52, %c0_53], %122 {strides = array<i32>} : memref<2x128xf32, #tpu.memory_space<vmem>>, vector<2x128xf32>,
    return
  }
}

</mosaic_0001>

<bundles_post_ra>
// kernel: decoder_forward.4
= control target key start
LH: loop header
LB: loop body
LE: loop exit
PB: predicated region body
PF: predicated region fallthrough
CT: control target
= control target key end

     0   :  { %s4242_s15 = smov 0   ;;  %s5522_s0 = inlined_call_operand.vmem [shape: bf16[2,16,16,128], index: 0, kind: input, shape index: {}]   ;;  %s5523_s1 = inlined_call_operand.vmem [shape: bf16[1152,128], index: 1, kind: input, shape index: {}]   ;;  %s5524_s2 = inlined_call_operand.vmem [shape: f32[1,128], index: 2, kind: input, shape index: {}]   ;;  %s5525_s3 = inlined_call_operand.vmem [shape: f32[1,128], index: 3, kind: input, shape index: {}]   ;;  %s5526_s4 = inlined_call_operand.vmem [shape: bf16[2,16,16,128], index: 4, kind: output, shape index: {}]  }
   0x1 LB: > { %s3122_s16 = sadd.s32 4294967295, %s4214_s15   ;;  %p3126_p0 = scmp.ge.s32.totalorder %s4214_s15, 1  ;;  %s4214_s15 = sphi %s4242_s15, %s14_s15  }
   0x2   : > { %p162_p1 = scmp.lt.s32.totalorder %s4214_s15, 3 }
   0x4   : > { %p163_p2 = pnand %p3126_p0, %p162_p1 }
   0x5   : > { %v4037_v0 = vld [vmem:[%s5523_s1 + $0x40] sm:$0xff] (!%p163_p2)   ;;  %v4216_v2 = vmov (!%p163_p2), 0   ;;  %v4041_v5 = vld [vmem:[%s5523_s1 + $0x48] sm:$0xff] (!%p163_p2)   ;;  %v4045_v9 = vld [vmem:[%s5523_s1 + $0x50] sm:$0xff] (!%p163_p2)   ;;  %p188_p3 = scmp.lt.s32.totalorder (!%p163_p2), %s3122_s16, 1  ;;  %vm609_vm0 = vcmask (!%p163_p2), 1043456  }
   0x6   : > { %166 = sbr.rel (%p163_p2) target bundleno = 557 (0x22d), region = 36  ;;  %v4038_v1 = vld [vmem:[%s5523_s1 + $0xc0] sm:$0xff] (!%p163_p2)   ;;  %199 = vst [vmem:[#allocation2] sm:$0xf] (!%p163_p2), %v4216_v2  ;;  %200 = vst [vmem:[#allocation2 + $0x4] sm:$0xf] (!%p163_p2), %v4216_v2  ;;  %3420 = vmatprep.subr.bf16.mxu0 (!%p163_p2), %v4037_v0 }
   0x7   : > { %201 = vst [vmem:[#allocation2 + $0x8] sm:$0x1] (!%p163_p2), %v4216_v2  ;;  %202 = vst [vmem:[#allocation2 + $0xc] sm:$0xf] (!%p163_p2), %v4216_v2  ;;  %v4039_v3 = vld [vmem:[%s5523_s1] sm:$0xff] (!%p163_p2)   ;;  %3484 = vmatprep.subr.bf16.mxu1 (!%p163_p2), %v4038_v1  ;;  %v4042_v6 = vld [vmem:[%s5523_s1 + $0xc8] sm:$0xff] (!%p163_p2)  }
   0x8   : > { %203 = vst [vmem:[#allocation2 + $0x10] sm:$0xf] (!%p163_p2), %v4216_v2  ;;  %204 = vst [vmem:[#allocation2 + $0x14] sm:$0x1] (!%p163_p2), %v4216_v2  ;;  %v4040_v4 = vld [vmem:[%s5523_s1 + $0x80] sm:$0xff] (!%p163_p2)   ;;  %3421 = vmatpush3.bf16.msra.mxu0 (!%p163_p2), %v4039_v3  ;;  %v4043_v7 = vld [vmem:[%s5523_s1 + $0x8] sm:$0xff] (!%p163_p2)  }
   0x9   : > { %205 = vst [vmem:[#allocation2 + $0x18] sm:$0xf] (!%p163_p2), %v4216_v2  ;;  %206 = vst [vmem:[#allocation2 + $0x1c] sm:$0xf] (!%p163_p2), %v4216_v2  ;;  %3485 = vmatpush3.bf16.msra.mxu1 (!%p163_p2), %v4040_v4  ;;  %3422 = vmatprep.subr.bf16.mxu0 (!%p163_p2), %v4041_v5  ;;  %v4044_v8 = vld [vmem:[%s5523_s1 + $0x88] sm:$0xff] (!%p163_p2)   ;;  %v4046_v10 = vld [vmem:[%s5523_s1 + $0xd0] sm:$0xff] (!%p163_p2)  }
   0xa   : > { %207 = vst [vmem:[#allocation2 + $0x20] sm:$0x1] (!%p163_p2), %v4216_v2  ;;  %208 = vst [vmem:[#allocation2 + $0x24] sm:$0xf] (!%p163_p2), %v4216_v2  ;;  %3486 = vmatprep.subr.bf16.mxu1 (!%p163_p2), %v4042_v6  ;;  %v4047_v11 = vld [vmem:[%s5523_s1 + $0x10] sm:$0xff] (!%p163_p2)   ;;  %v4049_v13 = vld [vmem:[%s5523_s1 + $0x58] sm:$0xff] (!%p163_p2)  }
   0xb   : > { %209 = vst [vmem:[#allocation2 + $0x28] sm:$0xf] (!%p163_p2), %v4216_v2  ;;  %210 = vst [vmem:[#allocation2 + $0x2c] sm:$0x1] (!%p163_p2), %v4216_v2  ;;  %v4048_v12 = vld [vmem:[%s5523_s1 + $0x90] sm:$0xff] (!%p163_p2)   ;;  %v4050_v14 = vld [vmem:[%s5523_s1 + $0xd8] sm:$0xff] (!%p163_p2)  }
   0xc   : > { %211 = vst [vmem:[#allocation2 + $0x30] sm:$0xf] (!%p163_p2), %v4216_v2  ;;  %212 = vst [vmem:[#allocation2 + $0x34] sm:$0xf] (!%p163_p2), %v4216_v2  ;;  %3423 = vmatpush3.bf16.msra.mxu0 (!%p163_p2), %v4043_v7  ;;  %v4051_v15 = vld [vmem:[%s5523_s1 + $0x18] sm:$0xff] (!%p163_p2)   ;;  %v4053_v17 = vld [vmem:[%s5523_s1 + $0x60] sm:$0xff] (!%p163_p2)  }
   0xd   : > { %213 = vst [vmem:[#allocation2 + $0x38] sm:$0x1] %v4216_v2  ;;  %214 = vst [vmem:[#allocation2 + $0x3c] sm:$0xf] %v4216_v2  ;;  %3487 = vmatpush3.bf16.msra.mxu1 %v4044_v8  ;;  %3424 = vmatprep.subr.bf16.mxu0 %v4045_v9  ;;  %v4052_v16 = vld [vmem:[%s5523_s1 + $0x98] sm:$0xff]   ;;  %v4054_v18 = vld [vmem:[%s5523_s1 + $0xe0] sm:$0xff]  }
   0xe   : > { %215 = vst [vmem:[#allocation2 + $0x40] sm:$0xf] %v4216_v2  ;;  %216 = vst [vmem:[#allocation2 + $0x44] sm:$0x1] %v4216_v2  ;;  %3488 = vmatprep.subr.bf16.mxu1 %v4046_v10  ;;  %v4055_v19 = vld [vmem:[%s5523_s1 + $0x20] sm:$0xff]   ;;  %v4057_v21 = vld [vmem:[%s5523_s1 + $0x68] sm:$0xff]  }
   0xf   : > { %217 = vst [vmem:[#allocation2 + $0x48] sm:$0xf] %v4216_v2  ;;  %218 = vst [vmem:[#allocation2 + $0x4c] sm:$0xf] %v4216_v2  ;;  %v4056_v20 = vld [vmem:[%s5523_s1 + $0xa0] sm:$0xff]   ;;  %v4058_v22 = vld [vmem:[%s5523_s1 + $0xe8] sm:$0xff]  }
  0x10   : > { %219 = vst [vmem:[#allocation2 + $0x50] sm:$0x1] %v4216_v2  ;;  %220 = vst [vmem:[#allocation2 + $0x54] sm:$0xf] %v4216_v2  ;;  %3425 = vmatpush3.bf16.msra.mxu0 %v4047_v11  ;;  %v4059_v23 = vld [vmem:[%s5523_s1 + $0x28] sm:$0xff]   ;;  %v4061_v25 = vld [vmem:[%s5523_s1 + $0x70] sm:$0xff]  }
  0x11   : > { %221 = vst [vmem:[#allocation2 + $0x58] sm:$0xf] %v4216_v2  ;;  %222 = vst [vmem:[#allocation2 + $0x5c] sm:$0x1] %v4216_v2  ;;  %3489 = vmatpush3.bf16.msra.mxu1 %v4048_v12  ;;  %3426 = vmatprep.subr.bf16.mxu0 %v4049_v13  ;;  %v4060_v24 = vld [vmem:[%s5523_s1 + $0xa8] sm:$0xff]   ;;  %s5534_s16 = smov (!%p188_p3, %s3122_s16), 1 }
  0x12   : > { %223 = vst [vmem:[#allocation2 + $0x60] sm:$0xf] %v4216_v2  ;;  %224 = vst [vmem:[#allocation2 + $0x64] sm:$0xf] %v4216_v2  ;;  %3490 = vmatprep.subr.bf16.mxu1 %v4050_v14  ;;  %v4062_v26 = vld [vmem:[%s5523_s1 + $0xf0] sm:$0xff]   ;;  %v4065_v29 = vld [vmem:[%s5523_s1 + $0x78] sm:$0xff]  }
  0x13   : > { %225 = vst [vmem:[#allocation2 + $0x68] sm:$0x1] %v4216_v2  ;;  %226 = vst [vmem:[#allocation2 + $0x6c] sm:$0xf] %v4216_v2  ;;  %v4063_v27 = vld [vmem:[%s5523_s1 + $0x30] sm:$0xff]   ;;  %s3291_s27 = sshll.u32 %s5534_s16, 7 }
  0x14   : > { %227 = vst [vmem:[#allocation2 + $0x70] sm:$0xf] %v4216_v2  ;;  %228 = vst [vmem:[#allocation2 + $0x74] sm:$0x1] %v4216_v2  ;;  %3427 = vmatpush3.bf16.msra.mxu0 %v4051_v15  ;;  %v4064_v28 = vld [vmem:[%s5523_s1 + $0xb0] sm:$0xff]   ;;  %v4066_v30 = vld [vmem:[%s5523_s1 + $0xf8] sm:$0xff]   ;;  %s4358_s10 = scalar_lea.vmem %s5522_s0, %s3291_s27  ;;  %s5330_s22 = scalar_lea.vmem %s5526_s4, %s3291_s27 }
  0x15   : > { %229 = vst [vmem:[#allocation2 + $0x78] sm:$0xf] %v4216_v2  ;;  %230 = vst [vmem:[#allocation2 + $0x7c] sm:$0xf] %v4216_v2  ;;  %3491 = vmatpush3.bf16.msra.mxu1 %v4052_v16  ;;  %3428 = vmatprep.subr.bf16.mxu0 %v4053_v17  ;;  %v4067_v31 = vld [vmem:[%s5523_s1 + $0x38] sm:$0xff]   ;;  %vm616_vm1 = vcmask 1040384  }
  0x16   : > { %231 = vst [vmem:[#allocation2 + $0x80] sm:$0x1] %v4216_v2  ;;  %232 = vst [vmem:[#allocation2 + $0x84] sm:$0xf] %v4216_v2  ;;  %3492 = vmatprep.subr.bf16.mxu1 %v4054_v18  ;;  %v4068_v32 = vld [vmem:[%s5523_s1 + $0xb8] sm:$0xff]   ;;  %v4360_v33 = vld [vmem:[#allocation2] sm:$0xff]  }
  0x17   : > { %233 = vst [vmem:[#allocation2 + $0x88] sm:$0xf] %v4216_v2  ;;  %234 = vst [vmem:[#allocation2 + $0x8c] sm:$0x1] %v4216_v2  ;;  %vm998_vm2 = vsmask.f32 7424 }
  0x18   : > { %235 = vst [vmem:[#allocation2 + $0x90] sm:$0xf] %v4216_v2  ;;  %236 = vst [vmem:[#allocation2 + $0x94] sm:$0xf] %v4216_v2  ;;  %3429 = vmatpush3.bf16.msra.mxu0 %v4055_v19  ;;  %v253_v35 = vld [vmem:[%s4358_s10] sm:$0xf] }
  0x19   : > { %237 = vst [vmem:[#allocation2 + $0x98] sm:$0x1] %v4216_v2  ;;  %238 = vst [vmem:[#allocation2 + $0x9c] sm:$0xf] %v4216_v2  ;;  %3493 = vmatpush3.bf16.msra.mxu1 %v4056_v20  ;;  %3430 = vmatprep.subr.bf16.mxu0 %v4057_v21  ;;  %v254_v36 = vld [vmem:[%s4358_s10 + $0x4] sm:$0xf] }
  0x1a   : > { %239 = vst [vmem:[#allocation2 + $0xa0] sm:$0xf] %v4216_v2  ;;  %240 = vst [vmem:[#allocation2 + $0xa4] sm:$0x1] %v4216_v2  ;;  %3494 = vmatprep.subr.bf16.mxu1 %v4058_v22  ;;  %vm285_vm3 = vsmask.f32 256 }
  0x1b   : > { %241 = vst [vmem:[#allocation2 + $0xa8] sm:$0xf] %v4216_v2  ;;  %242 = vst [vmem:[#allocation2 + $0xac] sm:$0xf] %v4216_v2  ;;  %v1000_v37 = vshrl.u32 %v4360_v33, 16  ;;  %v1002_v38 = vshll.u32 %v4360_v33, 16 }
  0x1c   : > { %243 = vst [vmem:[#allocation2 + $0xb0] sm:$0x1] %v4216_v2  ;;  %244 = vst [vmem:[#allocation2 + $0xb4] sm:$0xf] %v4216_v2  ;;  %3431 = vmatpush3.bf16.msra.mxu0 %v4059_v23  ;;  %vm286_vm4 = vsmask.f32 4368 }
  0x1d   : > { %245 = vst [vmem:[#allocation2 + $0xb8] sm:$0xf] %v4216_v2  ;;  %246 = vst [vmem:[#allocation2 + $0xbc] sm:$0x1] %v4216_v2  ;;  %3495 = vmatpush3.bf16.msra.mxu1 %v4060_v24  ;;  %3432 = vmatprep.subr.bf16.mxu0 %v4061_v25  ;;  %v4072_v40 = vld [vmem:[%s5523_s1 + $0x140] sm:$0xff]   ;;  %v289_v41 = vshrl.u32 %v253_v35, 16 }
  0x1e   : > { %247 = vst [vmem:[#allocation2 + $0xc0] sm:$0xf] %v4216_v2  ;;  %248 = vst [vmem:[#allocation2 + $0xc4] sm:$0xf] %v4216_v2  ;;  %3496 = vmatprep.subr.bf16.mxu1 %v4062_v26  ;;  %v292_v42 = vshll.u32 %v253_v35, 16  ;;  %v297_v43 = vshrl.u32 %v254_v36, 16 }
  0x1f   : > { %249 = vst [vmem:[#allocation2 + $0xc8] sm:$0x1] %v4216_v2  ;;  %250 = vst [vmem:[#allocation2 + $0xcc] sm:$0xf] %v4216_v2  ;;  %v300_v44 = vshll.u32 %v254_v36, 16  ;;  %v1004_v45 = vrot.slane %v1002_v38, 1 }
  0x20   : > { %251 = vst [vmem:[#allocation2 + $0xd0] sm:$0xf] %v4216_v2  ;;  %252 = vst [vmem:[#allocation2 + $0xd4] sm:$0x1] %v4216_v2  ;;  %3433 = vmatpush3.bf16.msra.mxu0 %v4063_v27  ;;  %vm610_vm6 = vsmask.f32 7938 }
  0x21   : > { %3497 = vmatpush3.bf16.msra.mxu1 %v4064_v28  ;;  %3434 = vmatprep.subr.bf16.mxu0 %v4065_v29  ;;  %v4362_v34 = vld [vmem:[#allocation2 + $0x8] ss:$0 sps:$4 sm:$0x11]   ;;  %vm4373_vm5 = vmor %vm285_vm3, %vm286_vm4  ;;  %v612_v48 = vld [vmem:[#allocation2 + $0xc] sm:$0xf]  ;;  %v291_v49 = vrot.slane %v289_v41, 7  ;;  %v1005_v55 = vor.u32 %v1004_v45, %v1000_v37 }
  0x22   : > { %3498 = vmatprep.subr.bf16.mxu1 %v4066_v30  ;;  %v1007_v39 = vshll.u32 %v4362_v34, 16  ;;  %v299_v50 = vrot.slane %v297_v43, 7  ;;  %vm4378_vm7 = vmand %vm609_vm0, %vm610_vm6  ;;  %v1104_v52 = vrot.slane %v4360_v33, 1  ;;  %v4073_v53 = vld [vmem:[%s5523_s1 + $0x100] sm:$0xff]   ;;  %vm1103_vm8 = vcmask 1046528   ;;  %v4078_v63 = vld [vmem:[%s5523_s1 + $0x148] sm:$0xff]  }
  0x23   : > { %v4074_v54 = vld [vmem:[%s5523_s1 + $0x1c0] sm:$0xff]   ;;  %v294_v56 = vor.u32 %v292_v42, %v291_v49  ;;  %v295_v57 = vrot.slane %v291_v49, 4  ;;  %v1105_v59 = vrot.slane %v4362_v34, 1  ;;  %vm4392_vm9 = vmand %vm616_vm1, %vm285_vm3  ;;  %v618_v2 = vld [vmem:[#allocation2 + $0x14] sm:$0x1] }
  0x24   : > { %3435 = vmatpush3.bf16.msra.mxu0 %v4067_v31  ;;  %v1009_v46 = vrot.slane %v1007_v39, 1  ;;  %v302_v58 = vor.u32 %v300_v44, %v299_v50  ;;  %v304_v62 = vrot.slane %v299_v50, 4  ;;  %v255_v3 = vld [vmem:[%s4358_s10 + $0x8] sm:$0xf]  ;;  %v256_v4 = vld [vmem:[%s4358_s10 + $0xc] sm:$0xf] }
  0x25   : > { %3499 = vmatpush3.bf16.msra.mxu1 %v4068_v32  ;;  %3548 = vmatprep.subr.bf16.mxu0 %v4072_v40  ;;  %v613_v1 = vsel %vm4378_vm7, %v294_v56, %v612_v48  ;;  %v306_v6 = vshrl.u32 %v255_v3, 16  ;;  %v309_v7 = vshll.u32 %v255_v3, 16  ;;  %v314_v8 = vshrl.u32 %v256_v4, 16  ;;  %v621_v10 = vld [vmem:[#allocation2 + $0x18] sm:$0xf]  ;;  %v4079_v11 = vld [vmem:[%s5523_s1 + $0x108] sm:$0xff]  }
  0x26   : > { %3612 = vmatprep.subr.bf16.mxu1 %v4074_v54  ;;  %v1010_v61 = vsel %vm998_vm2, %v1005_v55, %v1009_v46  ;;  %v303_v0 = vsel %vm4373_vm5, %v295_v57, %v302_v58  ;;  %614 = vst [vmem:[#allocation2 + $0xc] sm:$0xf] %v613_v1  ;;  %v619_v5 = vsel %vm4392_vm9, %v304_v62, %v618_v2  ;;  %v317_v9 = vshll.u32 %v256_v4, 16  ;;  %v4084_v18 = vld [vmem:[%s5523_s1 + $0x150] sm:$0xff]   ;;  %v4075_v19 = vld [vmem:[%s5523_s1 + $0x180] sm:$0xff]   ;;  %v4080_v24 = vld [vmem:[%s5523_s1 + $0x1c8] sm:$0xff]  }
  0x27   : > { %1652 = vmatprep.mubr.bf16.mxu0 %v1010_v61  ;;  %615 = vst [vmem:[#allocation2 + $0x10] sm:$0xf] %v303_v0  ;;  %620 = vst [vmem:[#allocation2 + $0x14] sm:$0x1] %v619_v5  ;;  %v308_v12 = vrot.slane %v306_v6, 7  ;;  %v316_v13 = vrot.slane %v314_v8, 7  ;;  %v1106_v30 = vsel %vm1103_vm8, %v1104_v52, %v1105_v59 }
  0x28   : > { %1653 = vmatmul.mubr.bf16.vlgmr.msra.gmra.mrb[0].mxu0 %v4360_v33  ;;  %v625_v20 = vld [vmem:[#allocation2 + $0x20] sm:$0x1]  ;;  %v257_v21 = vld [vmem:[%s4358_s10 + $0x10] sm:$0xf]  ;;  %v258_v26 = vld [vmem:[%s4358_s10 + $0x14] sm:$0xf] }
  0x29   : > { %3549 = vmatpush3.bf16.msra.mxu0 %v4073_v53  ;;  %v311_v14 = vor.u32 %v309_v7, %v308_v12  ;;  %v312_v15 = vrot.slane %v308_v12, 4  ;;  %v319_v16 = vor.u32 %v317_v9, %v316_v13  ;;  %v321_v17 = vrot.slane %v316_v13, 4  ;;  %v4085_v28 = vld [vmem:[%s5523_s1 + $0x110] sm:$0xff]   ;;  %v628_v32 = vld [vmem:[#allocation2 + $0x24] sm:$0xf]  ;;  %v4081_v41 = vld [vmem:[%s5523_s1 + $0x188] sm:$0xff]  }
  0x2a   : > { %3550 = vmatprep.subr.bf16.mxu0 %v4078_v63  ;;  %v323_v27 = vshrl.u32 %v257_v21, 16  ;;  %v326_v31 = vshll.u32 %v257_v21, 16  ;;  %v331_v38 = vshrl.u32 %v258_v26, 16  ;;  %v334_v46 = vshll.u32 %v258_v26, 16  ;;  %v4086_v48 = vld [vmem:[%s5523_s1 + $0x1d0] sm:$0xff]   ;;  %v4090_v52 = vld [vmem:[%s5523_s1 + $0x158] sm:$0xff]  }
  0x2b   : > { %v320_v22 = vsel %vm4373_vm5, %v312_v15, %v319_v16  ;;  %v622_v23 = vsel %vm4378_vm7, %v311_v14, %v621_v10  ;;  %v626_v25 = vsel %vm4392_vm9, %v321_v17, %v625_v20  ;;  %v4091_v56 = vld [vmem:[%s5523_s1 + $0x118] sm:$0xff]   ;;  %v4087_v63 = vld [vmem:[%s5523_s1 + $0x190] sm:$0xff]   ;;  %v632_v3 = vld [vmem:[#allocation2 + $0x2c] sm:$0x1] }
  0x2c   : > { %623 = vst [vmem:[#allocation2 + $0x18] sm:$0xf] %v622_v23  ;;  %624 = vst [vmem:[#allocation2 + $0x1c] sm:$0xf] %v320_v22  ;;  %v325_v34 = vrot.slane %v323_v27, 7  ;;  %v333_v45 = vrot.slane %v331_v38, 7 }
  0x2d   : > { %3551 = vmatpush3.bf16.msra.mxu0 %v4079_v11  ;;  %627 = vst [vmem:[#allocation2 + $0x20] sm:$0x1] %v626_v25  ;;  %v4092_v4 = vld [vmem:[%s5523_s1 + $0x1d8] sm:$0xff]   ;;  %v635_v17 = vld [vmem:[#allocation2 + $0x30] sm:$0xf]  ;;  %v4096_v25 = vld [vmem:[%s5523_s1 + $0x160] sm:$0xff]  }
  0x2e   : > { %3552 = vmatprep.subr.bf16.mxu0 %v4084_v18  ;;  %v4071_v29 = vld [vmem:[#allocation2 + $0xc] sm:$0xff]   ;;  %v4076_v33 = vld [vmem:[#allocation2 + $0x14] ss:$0 sps:$4 sm:$0x11]   ;;  %v328_v42 = vor.u32 %v326_v31, %v325_v34  ;;  %v329_v43 = vrot.slane %v325_v34, 4  ;;  %v336_v54 = vor.u32 %v334_v46, %v333_v45  ;;  %v338_v55 = vrot.slane %v333_v45, 4 }
  0x2f   : > { %1749 = vmatprep.mubr.bf16.mxu1 %v4071_v29  ;;  %v1012_v35 = vshrl.u32 %v4071_v29, 16  ;;  %v1014_v36 = vshll.u32 %v4071_v29, 16  ;;  %v1107_v37 = vrot.slane %v4071_v29, 1  ;;  %v1019_v39 = vshll.u32 %v4076_v33, 16  ;;  %v259_v8 = vld [vmem:[%s4358_s10 + $0x18] sm:$0xf] }
  0x30   : > { %1750 = vmatmul.mubr.bf16.vlgmr.msra.gmra.mrb[0].mxu1 %v1106_v30  ;;  %v1108_v40 = vrot.slane %v4076_v33, 1  ;;  %v629_v50 = vsel %vm4378_vm7, %v328_v42, %v628_v32  ;;  %v337_v62 = vsel %vm4373_vm5, %v329_v43, %v336_v54  ;;  %v633_v7 = vsel %vm4392_vm9, %v338_v55, %v632_v3  ;;  %v260_v9 = vld [vmem:[%s4358_s10 + $0x1c] sm:$0xf]  ;;  %v261_v32 = vld [vmem:[%s4358_s10 + $0x20] sm:$0xf] }
  0x31   : > { %3553 = vmatpush3.bf16.msra.mxu0 %v4085_v28  ;;  %3613 = vmatpush3.bf16.msra.mxu1 %v4075_v19  ;;  %v1016_v44 = vrot.slane %v1014_v36, 1  ;;  %v1021_v49 = vrot.slane %v1019_v39, 1  ;;  %630 = vst [vmem:[#allocation2 + $0x24] sm:$0xf] %v629_v50  ;;  %631 = vst [vmem:[#allocation2 + $0x28] sm:$0xf] %v337_v62 }
  0x32   : > { %3614 = vmatprep.subr.bf16.mxu1 %v4080_v24  ;;  %3554 = vmatprep.subr.bf16.mxu0 %v4090_v52  ;;  %v4453_v59 = vsel %vm1103_vm8, %v1107_v37, %v1108_v40  ;;  %634 = vst [vmem:[#allocation2 + $0x2c] sm:$0x1] %v633_v7  ;;  %v340_v11 = vshrl.u32 %v259_v8, 16  ;;  %v343_v12 = vshll.u32 %v259_v8, 16  ;;  %v348_v13 = vshrl.u32 %v260_v9, 16  ;;  %v4093_v14 = vld [vmem:[%s5523_s1 + $0x198] sm:$0xff]  }
  0x33   : > { %v1017_v53 = vor.u32 %v1016_v44, %v1012_v35  ;;  %v4447_v57 = vld [vmem:[#allocation2 + $0x18] sm:$0xff]   ;;  %v351_v16 = vshll.u32 %v260_v9, 16  ;;  %v262_v33 = vld [vmem:[%s4358_s10 + $0x24] sm:$0xf]  ;;  %v357_v39 = vshrl.u32 %v261_v32, 16  ;;  %v360_v40 = vshll.u32 %v261_v32, 16 }
  0x34   : > { %v4082_v61 = vld [vmem:[#allocation2 + $0x20] ss:$0 sps:$4 sm:$0x11]   ;;  %1757 = vmatprep.mubr.bf16.mxu1 %v4447_v57  ;;  %v1024_v0 = vshrl.u32 %v4447_v57, 16  ;;  %v1026_v1 = vshll.u32 %v4447_v57, 16  ;;  %v1110_v2 = vrot.slane %v4447_v57, 1 }
  0x35   : > { %v4450_v58 = vsel %vm998_vm2, %v1017_v53, %v1021_v49  ;;  %3615 = vmatpush3.bf16.msra.mxu1 %v4081_v41  ;;  %3555 = vmatpush3.bf16.msra.mxu0 %v4091_v56  ;;  %v1031_v5 = vshll.u32 %v4082_v61, 16  ;;  %v1111_v6 = vrot.slane %v4082_v61, 1  ;;  %v342_v19 = vrot.slane %v340_v11, 7  ;;  %v642_v45 = vld [vmem:[#allocation2 + $0x3c] sm:$0xf]  ;;  %v4097_v52 = vld [vmem:[%s5523_s1 + $0x120] sm:$0xff]  }
  0x36   : > { %1660 = vmatprep.mubr.bf16.mxu0 %v4450_v58  ;;  %3616 = vmatprep.subr.bf16.mxu1 %v4086_v48  ;;  %v1028_v10 = vrot.slane %v1026_v1, 1  ;;  %v350_v20 = vrot.slane %v348_v13, 7  ;;  %v365_v43 = vshrl.u32 %v262_v33, 16  ;;  %v368_v44 = vshll.u32 %v262_v33, 16  ;;  %v4098_v53 = vld [vmem:[%s5523_s1 + $0x1e0] sm:$0xff]   ;;  %v4102_v1 = vld [vmem:[%s5523_s1 + $0x168] sm:$0xff]  }
  0x37   : > { %1661 = vmatmul.mubr.bf16.gmra.mrb[4].mxu0 %v4071_v29  ;;  %v1033_v15 = vrot.slane %v1031_v5, 1  ;;  %v345_v22 = vor.u32 %v343_v12, %v342_v19  ;;  %v346_v23 = vrot.slane %v342_v19, 4  ;;  %v4486_v27 = vsel %vm1103_vm8, %v1110_v2, %v1111_v6  ;;  %v639_v29 = vld [vmem:[#allocation2 + $0x38] sm:$0x1]  ;;  %3556 = vmatprep.subr.bf16.mxu0 %v4096_v25  ;;  %v4099_v61 = vld [vmem:[%s5523_s1 + $0x1a0] sm:$0xff]   ;;  %v4103_v9 = vld [vmem:[%s5523_s1 + $0x128] sm:$0xff]  }
  0x38   : > { %1758 = vmatmul.mubr.bf16.gmra.mrb[4].mxu1 %v4453_v59  ;;  %v1029_v18 = vor.u32 %v1028_v10, %v1024_v0  ;;  %v353_v24 = vor.u32 %v351_v16, %v350_v20  ;;  %v4483_v26 = vld [vmem:[#allocation2 + $0x24] sm:$0xff]   ;;  %v355_v28 = vrot.slane %v350_v20, 4  ;;  %v359_v48 = vrot.slane %v357_v39, 7  ;;  %v4108_v32 = vld [vmem:[%s5523_s1 + $0x170] sm:$0xff]  }
  0x39   : > { %3617 = vmatpush3.bf16.msra.mxu1 %v4087_v63  ;;  %v636_v31 = vsel %vm4378_vm7, %v345_v22, %v635_v17  ;;  %1765 = vmatprep.mubr.bf16.mxu1 %v4483_v26  ;;  %v4088_v34 = vld [vmem:[#allocation2 + $0x2c] ss:$0 sps:$4 sm:$0x11]   ;;  %v1036_v35 = vshrl.u32 %v4483_v26, 16  ;;  %v1038_v37 = vshll.u32 %v4483_v26, 16  ;;  %v1113_v38 = vrot.slane %v4483_v26, 1 }
  0x3a   : > { %3618 = vmatprep.subr.bf16.mxu1 %v4092_v4  ;;  %v4477_v21 = vsel %vm998_vm2, %v1029_v18, %v1033_v15  ;;  %v354_v30 = vsel %vm4373_vm5, %v346_v23, %v353_v24  ;;  %637 = vst [vmem:[#allocation2 + $0x30] sm:$0xf] %v636_v31  ;;  %v640_v36 = vsel %vm4392_vm9, %v355_v28, %v639_v29  ;;  %v1043_v41 = vshll.u32 %v4088_v34, 16  ;;  %v646_v0 = vld [vmem:[#allocation2 + $0x44] sm:$0x1]  ;;  %v4105_v25 = vld [vmem:[%s5523_s1 + $0x1a8] sm:$0xff]  }
  0x3b   : > { %1668 = vmatprep.mubr.bf16.mxu0 %v4477_v21  ;;  %638 = vst [vmem:[#allocation2 + $0x34] sm:$0xf] %v354_v30  ;;  %641 = vst [vmem:[#allocation2 + $0x38] sm:$0x1] %v640_v36  ;;  %v1114_v42 = vrot.slane %v4088_v34, 1  ;;  %v1040_v46 = vrot.slane %v1038_v37, 1  ;;  %v362_v55 = vor.u32 %v360_v40, %v359_v48  ;;  %3557 = vmatpush3.bf16.msra.mxu0 %v4097_v52 }
  0x3c   : > { %v1045_v49 = vrot.slane %v1043_v41, 1  ;;  %v367_v50 = vrot.slane %v365_v43, 7  ;;  %v363_v56 = vrot.slane %v359_v48, 4  ;;  %3558 = vmatprep.subr.bf16.mxu0 %v4102_v1  ;;  %v263_v13 = vld [vmem:[%s4358_s10 + $0x28] sm:$0xf] }
  0x3d   : > { %3619 = vmatpush3.bf16.msra.mxu1 %v4093_v14  ;;  %v1041_v54 = vor.u32 %v1040_v46, %v1036_v35  ;;  %v4520_v4 = vsel %vm1103_vm8, %v1113_v38, %v1114_v42  ;;  %v643_v5 = vsel %vm4378_vm7, %v362_v55, %v642_v45  ;;  %v4104_v14 = vld [vmem:[%s5523_s1 + $0x1e8] sm:$0xff]   ;;  %v374_v18 = vshrl.u32 %v263_v13, 16  ;;  %v4109_v35 = vld [vmem:[%s5523_s1 + $0x130] sm:$0xff]  }
  0x3e   : > { %v370_v62 = vor.u32 %v368_v44, %v367_v50  ;;  %3620 = vmatprep.subr.bf16.mxu1 %v4098_v53  ;;  %v372_v63 = vrot.slane %v367_v50, 4  ;;  %644 = vst [vmem:[#allocation2 + $0x3c] sm:$0xf] %v643_v5  ;;  %v264_v17 = vld [vmem:[%s4358_s10 + $0x2c] sm:$0xf]  ;;  %v377_v19 = vshll.u32 %v263_v13, 16 }
  0x3f   : > { %1669 = vmatmul.mubr.bf16.gmra.mrb[8].mxu0 %v4447_v57  ;;  %v4515_v2 = vsel %vm998_vm2, %v1041_v54, %v1045_v49  ;;  %v382_v22 = vshrl.u32 %v264_v17, 16  ;;  %v385_v23 = vshll.u32 %v264_v17, 16  ;;  %v649_v24 = vld [vmem:[#allocation2 + $0x48] sm:$0xf]  ;;  %v376_v29 = vrot.slane %v374_v18, 7  ;;  %v4110_v45 = vld [vmem:[%s5523_s1 + $0x1f0] sm:$0xff]  }
  0x40   : > { %1766 = vmatmul.mubr.bf16.gmra.mrb[8].mxu1 %v4486_v27  ;;  %1676 = vmatprep.mubr.bf16.mxu0 %v4515_v2  ;;  %v371_v7 = vsel %vm4373_vm5, %v363_v56, %v370_v62  ;;  %v647_v8 = vsel %vm4392_vm9, %v372_v63, %v646_v0  ;;  %v653_v44 = vld [vmem:[#allocation2 + $0x50] sm:$0x1]  ;;  %v266_v56 = vld [vmem:[%s4358_s10 + $0x34] sm:$0xf] }
  0x41   : > { %3621 = vmatpush3.bf16.msra.mxu1 %v4099_v61  ;;  %645 = vst [vmem:[#allocation2 + $0x40] sm:$0xf] %v371_v7  ;;  %648 = vst [vmem:[#allocation2 + $0x44] sm:$0x1] %v647_v8  ;;  %3559 = vmatpush3.bf16.msra.mxu0 %v4103_v9  ;;  %v384_v31 = vrot.slane %v382_v22, 7  ;;  %v379_v33 = vor.u32 %v377_v19, %v376_v29  ;;  %v380_v34 = vrot.slane %v376_v29, 4 }
  0x42   : > { %v4517_v3 = vld [vmem:[#allocation2 + $0x30] sm:$0xff]   ;;  %v4094_v6 = vld [vmem:[#allocation2 + $0x38] ss:$0 sps:$4 sm:$0x11]   ;;  %3622 = vmatprep.subr.bf16.mxu1 %v4104_v14  ;;  %3560 = vmatprep.subr.bf16.mxu0 %v4108_v32  ;;  %v399_v0 = vshrl.u32 %v266_v56, 16  ;;  %v402_v1 = vshll.u32 %v266_v56, 16 }
  0x43   : > { %1773 = vmatprep.mubr.bf16.mxu1 %v4517_v3  ;;  %v1048_v10 = vshrl.u32 %v4517_v3, 16  ;;  %v1050_v11 = vshll.u32 %v4517_v3, 16  ;;  %v1116_v12 = vrot.slane %v4517_v3, 1  ;;  %v1055_v15 = vshll.u32 %v4094_v6, 16  ;;  %v265_v52 = vld [vmem:[%s4358_s10 + $0x30] sm:$0xf] }
  0x44   : > { %v1117_v16 = vrot.slane %v4094_v6, 1  ;;  %v387_v37 = vor.u32 %v385_v23, %v384_v31  ;;  %v650_v40 = vsel %vm4378_vm7, %v379_v33, %v649_v24  ;;  %v389_v41 = vrot.slane %v384_v31, 4  ;;  %v4111_v53 = vld [vmem:[%s5523_s1 + $0x1b0] sm:$0xff]   ;;  %v4584_v6 = vld [vmem:[%s5523_s1 + $0x178] sm:$0xff]   ;;  %v4622_v32 = vld [vmem:[%s5523_s1 + $0x200] sm:$0xff]  }
  0x45   : > { %v1052_v20 = vrot.slane %v1050_v11, 1  ;;  %v1057_v28 = vrot.slane %v1055_v15, 1  ;;  %3623 = vmatpush3.bf16.msra.mxu1 %v4105_v25  ;;  %3561 = vmatpush3.bf16.msra.mxu0 %v4109_v35  ;;  %651 = vst [vmem:[#allocation2 + $0x48] sm:$0xf] %v650_v40  ;;  %v391_v61 = vshrl.u32 %v265_v52, 16  ;;  %v394_v62 = vshll.u32 %v265_v52, 16 }
  0x46   : > { %v4559_v39 = vsel %vm1103_vm8, %v1116_v12, %v1117_v16  ;;  %v388_v43 = vsel %vm4373_vm5, %v380_v34, %v387_v37  ;;  %v654_v50 = vsel %vm4392_vm9, %v389_v41, %v653_v44  ;;  %3624 = vmatprep.subr.bf16.mxu1 %v4110_v45  ;;  %v656_v5 = vld [vmem:[#allocation2 + $0x54] sm:$0xf]  ;;  %3562 = vmatprep.subr.bf16.mxu0 %v4584_v6  ;;  %v4590_v11 = vld [vmem:[%s5523_s1 + $0x138] sm:$0xff]   ;;  %v663_v45 = vld [vmem:[#allocation2 + $0x60] sm:$0xf] }
  0x47   : > { %1677 = vmatmul.mubr.bf16.gmra.mrb[12].mxu0 %v4483_v26  ;;  %v1053_v30 = vor.u32 %v1052_v20, %v1048_v10  ;;  %652 = vst [vmem:[#allocation2 + $0x4c] sm:$0xf] %v388_v43  ;;  %655 = vst [vmem:[#allocation2 + $0x50] sm:$0x1] %v654_v50  ;;  %v393_v8 = vrot.slane %v391_v61, 7  ;;  %v401_v10 = vrot.slane %v399_v0, 7 }
  0x48   : > { %1774 = vmatmul.mubr.bf16.gmra.mrb[12].mxu1 %v4520_v4  ;;  %v4556_v38 = vld [vmem:[#allocation2 + $0x3c] sm:$0xff]   ;;  %v4100_v42 = vld [vmem:[#allocation2 + $0x44] ss:$0 sps:$4 sm:$0x11]   ;;  %v267_v31 = vld [vmem:[%s4358_s10 + $0x38] sm:$0xf] }
  0x49   : > { %v4553_v36 = vsel %vm998_vm2, %v1053_v30, %v1057_v28  ;;  %1781 = vmatprep.mubr.bf16.mxu1 %v4556_v38  ;;  %v1060_v46 = vshrl.u32 %v4556_v38, 16  ;;  %v1062_v48 = vshll.u32 %v4556_v38, 16  ;;  %v1119_v49 = vrot.slane %v4556_v38, 1  ;;  %3625 = vmatpush3.bf16.msra.mxu1 %v4111_v53  ;;  %v4116_v14 = vld [vmem:[%s5523_s1 + $0x1f8] sm:$0xff]  }
  0x4a   : > { %1684 = vmatprep.mubr.bf16.mxu0 %v4553_v36  ;;  %v1067_v54 = vshll.u32 %v4100_v42, 16  ;;  %v1120_v55 = vrot.slane %v4100_v42, 1  ;;  %v396_v12 = vor.u32 %v394_v62, %v393_v8  ;;  %v397_v13 = vrot.slane %v393_v8, 4  ;;  %3563 = vmatpush3.bf16.msra.mxu0 %v4590_v11  ;;  %v660_v22 = vld [vmem:[#allocation2 + $0x5c] sm:$0x1] }
  0x4b   : > { %v1064_v63 = vrot.slane %v1062_v48, 1  ;;  %v404_v16 = vor.u32 %v402_v1, %v401_v10  ;;  %v406_v20 = vrot.slane %v401_v10, 4  ;;  %3626 = vmatprep.subr.bf16.mxu1 %v4116_v14  ;;  %v4117_v25 = vld [vmem:[%s5523_s1 + $0x1b8] sm:$0xff]   ;;  %v408_v37 = vshrl.u32 %v267_v31, 16  ;;  %3964 = vmatprep.subr.bf16.mxu0 %v4622_v32 }
  0x4c   : > { %v1069_v7 = vrot.slane %v1067_v54, 1  ;;  %v4603_v18 = vsel %vm1103_vm8, %v1119_v49, %v1120_v55  ;;  %v657_v19 = vsel %vm4378_vm7, %v396_v12, %v656_v5  ;;  %v268_v35 = vld [vmem:[%s4358_s10 + $0x3c] sm:$0xf]  ;;  %v411_v40 = vshll.u32 %v267_v31, 16  ;;  %v4145_v49 = vld [vmem:[%s5523_s1 + $0x40] sm:$0xff]  }
  0x4d   : > { %v1065_v9 = vor.u32 %v1064_v63, %v1060_v46  ;;  %v405_v24 = vsel %vm4373_vm5, %v397_v13, %v404_v16  ;;  %658 = vst [vmem:[#allocation2 + $0x54] sm:$0xf] %v657_v19  ;;  %v661_v30 = vsel %vm4392_vm9, %v406_v20, %v660_v22  ;;  %v416_v43 = vshrl.u32 %v268_v35, 16  ;;  %3627 = vmatpush3.bf16.msra.mxu1 %v4117_v25  ;;  %v667_v19 = vld [vmem:[#allocation2 + $0x68] sm:$0x1] }
  0x4e   : > { %v4600_v17 = vld [vmem:[#allocation2 + $0x48] sm:$0xff]   ;;  %v4106_v23 = vld [vmem:[#allocation2 + $0x50] ss:$0 sps:$4 sm:$0x11]   ;;  %659 = vst [vmem:[#allocation2 + $0x58] sm:$0xf] %v405_v24  ;;  %3692 = vmatprep.subr.bf16.mxu1 %v4145_v49 }
  0x4f   : > { %1685 = vmatmul.mubr.bf16.gmra.mrb[16].mxu0 %v4517_v3  ;;  %v4596_v15 = vsel %vm998_vm2, %v1065_v9, %v1069_v7  ;;  %v1072_v28 = vshrl.u32 %v4600_v17, 16  ;;  %v1074_v29 = vshll.u32 %v4600_v17, 16  ;;  %v1079_v33 = vshll.u32 %v4106_v23, 16  ;;  %662 = vst [vmem:[#allocation2 + $0x5c] sm:$0x1] %v661_v30 }
  0x50   : > { %1782 = vmatmul.mubr.bf16.gmra.mrb[16].mxu1 %v4559_v39  ;;  %1692 = vmatprep.mubr.bf16.mxu0 %v4596_v15  ;;  %v1122_v34 = vrot.slane %v4600_v17, 1  ;;  %v1123_v42 = vrot.slane %v4106_v23, 1  ;;  %v419_v44 = vshll.u32 %v268_v35, 16  ;;  %v410_v48 = vrot.slane %v408_v37, 7  ;;  %v269_v23 = vld [vmem:[%s4358_s10 + $0x40] sm:$0xf] }
  0x51   : > { %1789 = vmatprep.mubr.bf16.mxu1 %v4600_v17  ;;  %v1076_v41 = vrot.slane %v1074_v29, 1  ;;  %v1081_v46 = vrot.slane %v1079_v33, 1  ;;  %v418_v52 = vrot.slane %v416_v43, 7  ;;  %v425_v29 = vshrl.u32 %v269_v23, 16  ;;  %v670_v35 = vld [vmem:[#allocation2 + $0x6c] sm:$0xf] }
  0x52   : > { %v413_v53 = vor.u32 %v411_v40, %v410_v48  ;;  %v414_v54 = vrot.slane %v410_v48, 4  ;;  %v4638_v62 = vsel %vm1103_vm8, %v1122_v34, %v1123_v42  ;;  %v428_v30 = vshll.u32 %v269_v23, 16  ;;  %v674_v37 = vld [vmem:[#allocation2 + $0x74] sm:$0x1]  ;;  %v271_v43 = vld [vmem:[%s4358_s10 + $0x48] sm:$0xf] }
  0x53   : > { %v1077_v50 = vor.u32 %v1076_v41, %v1072_v28  ;;  %v421_v56 = vor.u32 %v419_v44, %v418_v52  ;;  %v423_v9 = vrot.slane %v418_v52, 4  ;;  %v270_v28 = vld [vmem:[%s4358_s10 + $0x44] sm:$0xf]  ;;  %v427_v34 = vrot.slane %v425_v29, 7  ;;  %v272_v44 = vld [vmem:[%s4358_s10 + $0x4c] sm:$0xf] }
  0x54   : > { %v664_v63 = vsel %vm4378_vm7, %v413_v53, %v663_v45  ;;  %v433_v31 = vshrl.u32 %v270_v28, 16  ;;  %v436_v33 = vshll.u32 %v270_v28, 16  ;;  %v442_v48 = vshrl.u32 %v271_v43, 16  ;;  %v273_v53 = vld [vmem:[%s4358_s10 + $0x50] sm:$0xf] }
  0x55   : > { %v4632_v55 = vsel %vm998_vm2, %v1077_v50, %v1081_v46  ;;  %v4635_v61 = vld [vmem:[#allocation2 + $0x54] sm:$0xff]   ;;  %v422_v1 = vsel %vm4373_vm5, %v414_v54, %v421_v56  ;;  %665 = vst [vmem:[#allocation2 + $0x60] sm:$0xf] %v664_v63  ;;  %v668_v22 = vsel %vm4392_vm9, %v423_v9, %v667_v19  ;;  %v430_v41 = vor.u32 %v428_v30, %v427_v34  ;;  %v4676_v54 = vld [vmem:[%s5523_s1 + $0x208] sm:$0xff]   ;;  %v684_v23 = vld [vmem:[#allocation2 + $0x84] sm:$0xf] }
  0x56   : > { %v4112_v0 = vld [vmem:[#allocation2 + $0x5c] ss:$0 sps:$4 sm:$0x11]   ;;  %v1084_v5 = vshrl.u32 %v4635_v61, 16  ;;  %v1086_v7 = vshll.u32 %v4635_v61, 16  ;;  %v1125_v12 = vrot.slane %v4635_v61, 1 }
  0x57   : > { %1693 = vmatmul.mubr.bf16.gmra.mrb[20].mxu0 %v4556_v38  ;;  %666 = vst [vmem:[#allocation2 + $0x64] sm:$0xf] %v422_v1  ;;  %v1091_v8 = vshll.u32 %v4112_v0, 16  ;;  %v1126_v14 = vrot.slane %v4112_v0, 1  ;;  %669 = vst [vmem:[#allocation2 + $0x68] sm:$0x1] %v668_v22 }
  0x58   : > { %1790 = vmatmul.mubr.bf16.gmra.mrb[20].mxu1 %v4603_v18  ;;  %1700 = vmatprep.mubr.bf16.mxu0 %v4632_v55  ;;  %v1088_v10 = vrot.slane %v1086_v7, 1  ;;  %v435_v40 = vrot.slane %v433_v31, 7  ;;  %v431_v42 = vrot.slane %v427_v34, 4  ;;  %v445_v49 = vshll.u32 %v271_v43, 16  ;;  %v677_v1 = vld [vmem:[#allocation2 + $0x78] sm:$0xf] }
  0x59   : > { %1797 = vmatprep.mubr.bf16.mxu1 %v4635_v61  ;;  %v1093_v13 = vrot.slane %v1091_v8, 1  ;;  %v4660_v25 = vsel %vm1103_vm8, %v1125_v12, %v1126_v14  ;;  %v450_v50 = vshrl.u32 %v272_v44, 16  ;;  %v453_v52 = vshll.u32 %v272_v44, 16  ;;  %v274_v7 = vld [vmem:[%s4358_s10 + $0x54] sm:$0xf] }
  0x5a   : > { %v1089_v16 = vor.u32 %v1088_v10, %v1084_v5  ;;  %v438_v45 = vor.u32 %v436_v33, %v435_v40  ;;  %v440_v46 = vrot.slane %v435_v40, 4  ;;  %v444_v0 = vrot.slane %v442_v48, 7  ;;  %v275_v30 = vld [vmem:[%s4358_s10 + $0x58] sm:$0xf]  ;;  %v276_v31 = vld [vmem:[%s4358_s10 + $0x5c] sm:$0xf] }
  0x5b   : > { %v452_v5 = vrot.slane %v450_v50, 7  ;;  %v459_v8 = vshrl.u32 %v273_v53, 16  ;;  %v462_v9 = vshll.u32 %v273_v53, 16  ;;  %v467_v22 = vshrl.u32 %v274_v7, 16  ;;  %v4146_v33 = vld [vmem:[%s5523_s1] sm:$0xff]   ;;  %v4711_v40 = vld [vmem:[%s5523_s1 + $0x218] sm:$0xff]  }
  0x5c   : > { %v4651_v20 = vsel %vm998_vm2, %v1089_v16, %v1093_v13  ;;  %v439_v56 = vsel %vm4373_vm5, %v431_v42, %v438_v45  ;;  %v675_v63 = vsel %vm4392_vm9, %v440_v46, %v674_v37  ;;  %v447_v10 = vor.u32 %v445_v49, %v444_v0  ;;  %v681_v13 = vld [vmem:[#allocation2 + $0x80] sm:$0x1]  ;;  %v4147_v37 = vld [vmem:[%s5523_s1 + $0x48] sm:$0xff]  }
  0x5d   : > { %673 = vst [vmem:[#allocation2 + $0x70] sm:$0xf] %v439_v56  ;;  %676 = vst [vmem:[#allocation2 + $0x74] sm:$0x1] %v675_v63  ;;  %v448_v12 = vrot.slane %v444_v0, 4  ;;  %v455_v14 = vor.u32 %v453_v52, %v452_v5  ;;  %v457_v16 = vrot.slane %v452_v5, 4 }
  0x5e   : > { %v4657_v24 = vld [vmem:[#allocation2 + $0x60] sm:$0xff]   ;;  %v461_v19 = vrot.slane %v459_v8, 7  ;;  %v678_v28 = vsel %vm4378_vm7, %v447_v10, %v677_v1  ;;  %v470_v29 = vshll.u32 %v274_v7, 16  ;;  %v469_v42 = vrot.slane %v467_v22, 7  ;;  %v688_v43 = vld [vmem:[#allocation2 + $0x8c] sm:$0x1] }
  0x5f   : > { %1701 = vmatmul.mubr.bf16.gmra.mrb[24].mxu0 %v4600_v17  ;;  %679 = vst [vmem:[#allocation2 + $0x78] sm:$0xf] %v678_v28  ;;  %v682_v34 = vsel %vm4392_vm9, %v457_v16, %v681_v13  ;;  %v476_v44 = vshrl.u32 %v275_v30, 16  ;;  %v479_v46 = vshll.u32 %v275_v30, 16  ;;  %v484_v48 = vshrl.u32 %v276_v31, 16  ;;  %v4148_v53 = vld [vmem:[%s5523_s1 + $0x8] sm:$0xff]  }
  0x60   : > { %1798 = vmatmul.mubr.bf16.gmra.mrb[24].mxu1 %v4638_v62  ;;  %1708 = vmatprep.mubr.bf16.mxu0 %v4651_v20  ;;  %683 = vst [vmem:[#allocation2 + $0x80] sm:$0x1] %v682_v34  ;;  %v277_v49 = vld [vmem:[%s4358_s10 + $0x60] sm:$0xf]  ;;  %v474_v50 = vrot.slane %v469_v42, 4  ;;  %v487_v52 = vshll.u32 %v276_v31, 16 }
  0x61   : > { %1805 = vmatprep.mubr.bf16.mxu1 %v4657_v24  ;;  %v478_v56 = vrot.slane %v476_v44, 7  ;;  %v486_v63 = vrot.slane %v484_v48, 7  ;;  %v4149_v0 = vld [vmem:[%s5523_s1 + $0x50] sm:$0xff]   ;;  %v493_v8 = vshrl.u32 %v277_v49, 16  ;;  %v695_v10 = vld [vmem:[#allocation2 + $0x98] sm:$0x1] }
  0x62   : > { %v689_v5 = vsel %vm4392_vm9, %v474_v50, %v688_v43  ;;  %v691_v7 = vld [vmem:[#allocation2 + $0x90] sm:$0xf]  ;;  %v278_v16 = vld [vmem:[%s4358_s10 + $0x64] sm:$0xf]  ;;  %v279_v30 = vld [vmem:[%s4358_s10 + $0x68] sm:$0xf] }
  0x63   : > { %690 = vst [vmem:[#allocation2 + $0x8c] sm:$0x1] %v689_v5  ;;  %v489_v13 = vor.u32 %v487_v52, %v486_v63  ;;  %v496_v31 = vshll.u32 %v277_v49, 16  ;;  %v504_v34 = vshll.u32 %v278_v16, 16  ;;  %v510_v44 = vshrl.u32 %v279_v30, 16 }
  0x64   : > { %v280_v50 = vld [vmem:[%s4358_s10 + $0x6c] sm:$0xf]  ;;  %v705_v5 = vld [vmem:[#allocation2 + $0xa8] sm:$0xf]  ;;  %v1158_v51 = vrot.slane %v4657_v24, 1 }
  0x65   : > { %v512_v52 = vrot.slane %v510_v44, 7 }
  0x67   : > { %1709 = vmatmul.mubr.bf16.gmra.mrb[28].mxu0 %v4635_v61 }
  0x68   : > { %1846 = vmatprep.mubr.bf16.mxu0 %v4453_v59  ;;  %1806 = vmatmul.mubr.bf16.gmra.mrb[28].mxu1 %v4660_v25  ;;  %v671_v59 = vsel %vm4378_vm7, %v430_v41, %v670_v35  ;;  %v464_v35 = vor.u32 %v462_v9, %v461_v19  ;;  %v465_v41 = vrot.slane %v461_v19, 4  ;;  %v481_v9 = vor.u32 %v479_v46, %v478_v56  ;;  %v4150_v19 = vld [vmem:[%s5523_s1 + $0x10] sm:$0xff]   ;;  %v702_v46 = vld [vmem:[#allocation2 + $0xa4] sm:$0x1] }
  0x69   : > { %1943 = vmatprep.mubr.bf16.mxu1 %v4477_v21  ;;  %672 = vst [vmem:[#allocation2 + $0x6c] sm:$0xf] %v671_v59  ;;  %v472_v59 = vor.u32 %v470_v29, %v469_v42  ;;  %v495_v29 = vrot.slane %v493_v8, 7  ;;  %v281_v8 = vld [vmem:[%s4358_s10 + $0x70] sm:$0xf] }
  0x6a   : > { %v685_v45 = vsel %vm4378_vm7, %v464_v35, %v684_v23  ;;  %v692_v22 = vsel %vm4378_vm7, %v481_v9, %v691_v7  ;;  %v698_v35 = vld [vmem:[#allocation2 + $0x9c] sm:$0xf]  ;;  %v518_v7 = vshrl.u32 %v280_v50, 16 }
  0x6b   : > { %686 = vst [vmem:[#allocation2 + $0x84] sm:$0xf] %v685_v45  ;;  %v473_v1 = vsel %vm4373_vm5, %v465_v41, %v472_v59  ;;  %693 = vst [vmem:[#allocation2 + $0x90] sm:$0xf] %v692_v22  ;;  %v498_v41 = vor.u32 %v496_v31, %v495_v29  ;;  %v499_v42 = vrot.slane %v495_v29, 4  ;;  %v4153_v45 = vld [vmem:[%s5523_s1 + $0x60] sm:$0xff]  }
  0x6c   : > { %687 = vst [vmem:[#allocation2 + $0x88] sm:$0xf] %v473_v1  ;;  %v4796_v9 = vld [vmem:[%s5523_s1 + $0x238] sm:$0xff]   ;;  %v4157_v22 = vld [vmem:[%s5523_s1 + $0x70] sm:$0xff]  }
  0x6d   : > { %v699_v59 = vsel %vm4378_vm7, %v498_v41, %v698_v35 }
  0x6e   : > { %700 = vst [vmem:[#allocation2 + $0x9c] sm:$0xf] %v699_v59 }
  0x6f   : > { %1847 = vmatmul.mubr.bf16.vlgmr.msra.gmra.mrb[32].mxu0 %v4450_v58  ;;  %v4691_v58 = vld [vmem:[%s5523_s1 + $0x210] sm:$0xff]  }
  0x70   : > { %3965 = vmatpush3.bf16.msra.mxu0 %v4622_v32  ;;  %1854 = vmatprep.mubr.bf16.mxu0 %v4486_v27 }
  0x71   : > { %1944 = vmatmul.mubr.bf16.vlgmr.msra.gmra.mrb[32].mxu1 %v4447_v57  ;;  %3966 = vmatprep.subr.bf16.mxu0 %v4676_v54  ;;  %v456_v57 = vsel %vm4373_vm5, %v448_v12, %v455_v14  ;;  %v482_v12 = vrot.slane %v478_v56, 4  ;;  %v491_v14 = vrot.slane %v486_v63, 4  ;;  %v4154_v56 = vld [vmem:[%s5523_s1 + $0x20] sm:$0xff]  }
  0x72   : > { %3693 = vmatpush3.bf16.msra.mxu1 %v4146_v33  ;;  %1951 = vmatprep.mubr.bf16.mxu1 %v4515_v2  ;;  %680 = vst [vmem:[#allocation2 + $0x7c] sm:$0xf] %v456_v57  ;;  %v501_v33 = vshrl.u32 %v278_v16, 16  ;;  %v4758_v57 = vld [vmem:[%s5523_s1 + $0x228] sm:$0xff]  }
  0x73   : > { %3694 = vmatprep.subr.bf16.mxu1 %v4147_v37  ;;  %v490_v23 = vsel %vm4373_vm5, %v482_v12, %v489_v13  ;;  %v696_v28 = vsel %vm4392_vm9, %v491_v14, %v695_v10  ;;  %v4152_v37 = vld [vmem:[%s5523_s1 + $0x18] sm:$0xff]   ;;  %v521_v10 = vshll.u32 %v280_v50, 16  ;;  %v4156_v12 = vld [vmem:[%s5523_s1 + $0x28] sm:$0xff]   ;;  %v516_v13 = vrot.slane %v512_v52, 4 }
  0x74   : > { %3967 = vmatpush3.bf16.msra.mxu0 %v4676_v54  ;;  %694 = vst [vmem:[#allocation2 + $0x94] sm:$0xf] %v490_v23  ;;  %697 = vst [vmem:[#allocation2 + $0x98] sm:$0x1] %v696_v28  ;;  %v503_v43 = vrot.slane %v501_v33, 7  ;;  %v520_v14 = vrot.slane %v518_v7, 7 }
  0x75   : > { %3968 = vmatprep.subr.bf16.mxu0 %v4691_v58  ;;  %v527_v23 = vshrl.u32 %v281_v8, 16  ;;  %v712_v33 = vld [vmem:[#allocation2 + $0xb4] sm:$0xf]  ;;  %v4162_v7 = vld [vmem:[%s5523_s1 + $0x140] sm:$0xff]  }
  0x76   : > { %3695 = vmatpush3.bf16.msra.mxu1 %v4148_v53  ;;  %v506_v48 = vor.u32 %v504_v34, %v503_v43  ;;  %v508_v49 = vrot.slane %v503_v43, 4  ;;  %v513_v53 = vshll.u32 %v279_v30, 16  ;;  %v523_v28 = vor.u32 %v521_v10, %v520_v14  ;;  %v4158_v34 = vld [vmem:[%s5523_s1 + $0x30] sm:$0xff]   ;;  %v4159_v43 = vld [vmem:[%s5523_s1 + $0x78] sm:$0xff]  }
  0x77   : > { %1855 = vmatmul.mubr.bf16.gmra.mrb[36].mxu0 %v4477_v21  ;;  %3696 = vmatprep.subr.bf16.mxu1 %v4149_v0  ;;  %v4734_v21 = vld [vmem:[%s5523_s1 + $0x220] sm:$0xff]   ;;  %v4155_v0 = vld [vmem:[%s5523_s1 + $0x68] sm:$0xff]   ;;  %v525_v29 = vrot.slane %v520_v14, 4  ;;  %v530_v30 = vshll.u32 %v281_v8, 16 }
  0x78   : > { %1862 = vmatprep.mubr.bf16.mxu0 %v4520_v4  ;;  %3969 = vmatpush3.bf16.msra.mxu0 %v4691_v58  ;;  %v703_v63 = vsel %vm4392_vm9, %v508_v49, %v702_v46  ;;  %v515_v1 = vor.u32 %v513_v53, %v512_v52  ;;  %v524_v35 = vsel %vm4373_vm5, %v516_v13, %v523_v28  ;;  %v4160_v49 = vld [vmem:[%s5523_s1 + $0xc0] sm:$0xff]   ;;  %v283_v53 = vld [vmem:[%s4358_s10 + $0x78] sm:$0xf] }
  0x79   : > { %1952 = vmatmul.mubr.bf16.gmra.mrb[36].mxu1 %v4483_v26  ;;  %3970 = vmatprep.subr.bf16.mxu0 %v4711_v40  ;;  %v4151_v26 = vld [vmem:[%s5523_s1 + $0x58] sm:$0xff]   ;;  %704 = vst [vmem:[#allocation2 + $0xa4] sm:$0x1] %v703_v63  ;;  %708 = vst [vmem:[#allocation2 + $0xac] sm:$0xf] %v524_v35  ;;  %v547_v13 = vshll.u32 %v283_v53, 16 }
  0x7a   : > { %1959 = vmatprep.mubr.bf16.mxu1 %v4553_v36  ;;  %3697 = vmatpush3.bf16.msra.mxu1 %v4150_v19  ;;  %v706_v16 = vsel %vm4378_vm7, %v515_v1, %v705_v5  ;;  %v282_v19 = vld [vmem:[%s4358_s10 + $0x74] sm:$0xf]  ;;  %v284_v63 = vld [vmem:[%s4358_s10 + $0x7c] sm:$0xf]  ;;  %v4840_v5 = vld [vmem:[#allocation2 + $0x6c] sm:$0xff]  }
  0x7b   : > { %3698 = vmatprep.subr.bf16.mxu1 %v4151_v26  ;;  %707 = vst [vmem:[#allocation2 + $0xa8] sm:$0xf] %v706_v16  ;;  %v709_v26 = vld [vmem:[#allocation2 + $0xb0] sm:$0x1]  ;;  %v535_v31 = vshrl.u32 %v282_v19, 16  ;;  %v538_v41 = vshll.u32 %v282_v19, 16 }
  0x7c   : > { %3971 = vmatpush3.bf16.msra.mxu0 %v4711_v40  ;;  %v552_v14 = vshrl.u32 %v284_v63, 16  ;;  %v555_v16 = vshll.u32 %v284_v63, 16  ;;  %v4879_v60 = vld [vmem:[#allocation2 + $0x78] sm:$0xff]   ;;  %v4167_v63 = vld [vmem:[%s5523_s1 + $0x88] sm:$0xff]  }
  0x7d   : > { %3972 = vmatprep.subr.bf16.mxu0 %v4734_v21  ;;  %v537_v46 = vrot.slane %v535_v31, 7 }
  0x7e   : > { %3699 = vmatpush3.bf16.msra.mxu1 %v4152_v37  ;;  %v710_v37 = vsel %vm4392_vm9, %v525_v29, %v709_v26  ;;  %v554_v28 = vrot.slane %v552_v14, 7  ;;  %v719_v29 = vld [vmem:[#allocation2 + $0xc0] sm:$0xf]  ;;  %v4927_v14 = vld [vmem:[#allocation2 + $0x90] sm:$0xff]  }
  0x7f   : > { %1863 = vmatmul.mubr.bf16.gmra.mrb[40].mxu0 %v4515_v2  ;;  %3700 = vmatprep.subr.bf16.mxu1 %v4153_v45  ;;  %v4776_v2 = vld [vmem:[%s5523_s1 + $0x230] sm:$0xff]   ;;  %711 = vst [vmem:[#allocation2 + $0xb0] sm:$0x1] %v710_v37  ;;  %v540_v59 = vor.u32 %v538_v41, %v537_v46  ;;  %v542_v50 = vrot.slane %v537_v46, 4 }
  0x80   : > { %1870 = vmatprep.mubr.bf16.mxu0 %v4559_v39  ;;  %3973 = vmatpush3.bf16.msra.mxu0 %v4734_v21  ;;  %v557_v31 = vor.u32 %v555_v16, %v554_v28  ;;  %v4171_v16 = vld [vmem:[%s5523_s1 + $0x90] sm:$0xff]  }
  0x81   : > { %1960 = vmatmul.mubr.bf16.gmra.mrb[40].mxu1 %v4517_v3  ;;  %3974 = vmatprep.subr.bf16.mxu0 %v4758_v57  ;;  %v507_v3 = vsel %vm4373_vm5, %v499_v42, %v506_v48  ;;  %v1148_v42 = vshll.u32 %v4657_v24, 16  ;;  %v716_v48 = vld [vmem:[#allocation2 + $0xbc] sm:$0x1] }
  0x82   : > { %1967 = vmatprep.mubr.bf16.mxu1 %v4596_v15  ;;  %3701 = vmatpush3.bf16.msra.mxu1 %v4154_v56  ;;  %701 = vst [vmem:[#allocation2 + $0xa0] sm:$0xf] %v507_v3  ;;  %v1146_v56 = vshrl.u32 %v4657_v24, 16  ;;  %v4161_v3 = vld [vmem:[%s5523_s1 + $0x38] sm:$0xff]   ;;  %v717_v10 = vsel %vm4392_vm9, %v542_v50, %v716_v48  ;;  %v4889_v50 = vld [vmem:[#allocation2 + $0x84] sm:$0xff]  }
  0x83   : > { %3702 = vmatprep.subr.bf16.mxu1 %v4155_v0  ;;  %v1150_v0 = vrot.slane %v1148_v42, 1  ;;  %718 = vst [vmem:[#allocation2 + $0xbc] sm:$0x1] %v717_v10  ;;  %v559_v42 = vrot.slane %v554_v28, 4  ;;  %v2312_v10 = vshrl.u32 %v4889_v50, 16  ;;  %v2326_v28 = vshll.u32 %v4927_v14, 16 }
  0x84   : > { %3975 = vmatpush3.bf16.msra.mxu0 %v4758_v57 }
  0x85   : > { %3976 = vmatprep.subr.bf16.mxu0 %v4776_v2 }
  0x86   : > { %3703 = vmatpush3.bf16.msra.mxu1 %v4156_v12  ;;  %v4851_v12 = vld [vmem:[#allocation2 + $0x74] ss:$0 sps:$4 sm:$0x11]  }
  0x87   : > { %1871 = vmatmul.mubr.bf16.gmra.mrb[44].mxu0 %v4553_v36  ;;  %3704 = vmatprep.subr.bf16.mxu1 %v4157_v22  ;;  %v529_v36 = vrot.slane %v527_v23, 7  ;;  %v1151_v22 = vor.u32 %v1150_v0, %v1146_v56  ;;  %v1174_v23 = vshll.u32 %v4840_v5, 16  ;;  %v1179_v37 = vshll.u32 %v4851_v12, 16  ;;  %v4168_v0 = vld [vmem:[%s5523_s1 + $0xd0] sm:$0xff]  }
  0x88   : > { %1878 = vmatprep.mubr.bf16.mxu0 %v4603_v18  ;;  %3977 = vmatpush3.bf16.msra.mxu0 %v4776_v2 }
  0x89   : > { %1968 = vmatmul.mubr.bf16.gmra.mrb[44].mxu1 %v4556_v38  ;;  %3978 = vmatprep.subr.bf16.mxu0 %v4796_v9  ;;  %v4820_v38 = vld [vmem:[#allocation2 + $0x68] ss:$0 sps:$4 sm:$0x11]   ;;  %v532_v44 = vor.u32 %v530_v30, %v529_v36  ;;  %v533_v45 = vrot.slane %v529_v36, 4  ;;  %v1176_v35 = vrot.slane %v1174_v23, 1  ;;  %v1181_v46 = vrot.slane %v1179_v37, 1 }
  0x8a   : > { %1975 = vmatprep.mubr.bf16.mxu1 %v4632_v55  ;;  %3705 = vmatpush3.bf16.msra.mxu1 %v4158_v34  ;;  %v1153_v1 = vshll.u32 %v4820_v38, 16  ;;  %v4944_v23 = vld [vmem:[#allocation2 + $0x98] ss:$0 sps:$4 sm:$0x11]   ;;  %v4965_v37 = vld [vmem:[#allocation2 + $0x9c] sm:$0xff]  }
  0x8b   : > { %3706 = vmatprep.subr.bf16.mxu1 %v4159_v43  ;;  %v713_v52 = vsel %vm4378_vm7, %v532_v44, %v712_v33  ;;  %v541_v8 = vsel %vm4373_vm5, %v533_v45, %v540_v59  ;;  %v1172_v33 = vshrl.u32 %v4840_v5, 16  ;;  %v1159_v43 = vrot.slane %v4820_v38, 1 }
  0x8c   : > { %3979 = vmatpush3.bf16.msra.mxu0 %v4796_v9  ;;  %714 = vst [vmem:[#allocation2 + $0xb4] sm:$0xf] %v713_v52  ;;  %715 = vst [vmem:[#allocation2 + $0xb8] sm:$0xf] %v541_v8  ;;  %v1155_v26 = vrot.slane %v1153_v1, 1  ;;  %v2300_v38 = vshrl.u32 %v4879_v60, 16 }
  0x8d   : > { %3756 = vmatprep.subr.bf16.mxu0 %v4160_v49  ;;  %v1177_v45 = vor.u32 %v1176_v35, %v1172_v33  ;;  %v4870_v47 = vsel %vm1103_vm8, %v1158_v51, %v1159_v43  ;;  %v4165_v52 = vld [vmem:[%s5523_s1 + $0x100] sm:$0xff]   ;;  %v4169_v1 = vld [vmem:[%s5523_s1 + $0x108] sm:$0xff]   ;;  %v4170_v8 = vld [vmem:[%s5523_s1 + $0x150] sm:$0xff]   ;;  %v2324_v33 = vshrl.u32 %v4927_v14, 16 }
  0x8e   : > { %3707 = vmatpush3.bf16.msra.mxu1 %v4161_v3  ;;  %v1156_v34 = vsel %vm998_vm2, %v1151_v22, %v1155_v26  ;;  %v2314_v3 = vshll.u32 %v4889_v50, 16  ;;  %v4178_v35 = vld [vmem:[%s5523_s1 + $0x160] sm:$0xff]   ;;  %v4180_v51 = vld [vmem:[%s5523_s1 + $0xe8] sm:$0xff]  }
  0x8f   : > { %1879 = vmatmul.mubr.bf16.gmra.mrb[48].mxu0 %v4596_v15  ;;  %3820 = vmatprep.subr.bf16.mxu1 %v4162_v7  ;;  %v544_v15 = vshrl.u32 %v283_v53, 16  ;;  %v4874_v48 = vsel %vm998_vm2, %v1177_v45, %v1181_v46  ;;  %v4166_v53 = vld [vmem:[%s5523_s1 + $0x148] sm:$0xff]   ;;  %v4181_v43 = vld [vmem:[%s5523_s1 + $0x120] sm:$0xff]  }
  0x90   : > { %1886 = vmatprep.mubr.bf16.mxu0 %v4638_v62  ;;  %v4981_v45 = vld [vmem:[#allocation2 + $0xa4] ss:$0 sps:$4 sm:$0x11]   ;;  %v4182_v46 = vld [vmem:[%s5523_s1 + $0x168] sm:$0xff]  }
  0x91   : > { %1976 = vmatmul.mubr.bf16.gmra.mrb[48].mxu1 %v4600_v17  ;;  %v546_v19 = vrot.slane %v544_v15, 7  ;;  %v2316_v15 = vrot.slane %v2314_v3, 1  ;;  %v4187_v3 = vld [vmem:[%s5523_s1 + $0xb0] sm:$0xff]  }
  0x92   : > { %1983 = vmatprep.mubr.bf16.mxu1 %v4651_v20 }
  0x93   : > { %v549_v30 = vor.u32 %v547_v13, %v546_v19  ;;  %v550_v36 = vrot.slane %v546_v19, 4  ;;  %v4173_v19 = vld [vmem:[%s5523_s1 + $0x110] sm:$0xff]   ;;  %v2317_v22 = vor.u32 %v2316_v15, %v2312_v10  ;;  %v4190_v15 = vld [vmem:[%s5523_s1 + $0xb8] sm:$0xff]  }
  0x94   : > { %v5022_v10 = vld [vmem:[#allocation2 + $0xb0] ss:$0 sps:$4 sm:$0x11]  }
  0x95   : > { %v720_v17 = vsel %vm4378_vm7, %v549_v30, %v719_v29  ;;  %v558_v41 = vsel %vm4373_vm5, %v550_v36, %v557_v31  ;;  %v4175_v29 = vld [vmem:[%s5523_s1 + $0x98] sm:$0xff]   ;;  %v4176_v30 = vld [vmem:[%s5523_s1 + $0xe0] sm:$0xff]  }
  0x96   : > { %721 = vst [vmem:[#allocation2 + $0xc0] sm:$0xf] %v720_v17  ;;  %722 = vst [vmem:[#allocation2 + $0xc4] sm:$0xf] %v558_v41  ;;  %v4177_v36 = vld [vmem:[%s5523_s1 + $0x118] sm:$0xff]   ;;  %v2328_v17 = vrot.slane %v2326_v28, 1 }
  0x97   : > { %1887 = vmatmul.mubr.bf16.gmra.mrb[52].mxu0 %v4632_v55  ;;  %v723_v55 = vld [vmem:[#allocation2 + $0xc8] sm:$0x1]  ;;  %v4179_v41 = vld [vmem:[%s5523_s1 + $0xa0] sm:$0xff]   ;;  %v5051_v28 = vld [vmem:[#allocation2 + $0xbc] ss:$0 sps:$4 sm:$0x11]  }
  0x98   : > { %1894 = vmatprep.mubr.bf16.mxu0 %v4660_v25  ;;  %v724_v44 = vsel %vm4392_vm9, %v559_v42, %v723_v55  ;;  %v1185_v42 = vrot.slane %v4851_v12, 1  ;;  %v2329_v55 = vor.u32 %v2328_v17, %v2324_v33  ;;  %v2338_v12 = vshll.u32 %v4965_v37, 16 }
  0x99   : > { %1984 = vmatmul.mubr.bf16.gmra.mrb[52].mxu1 %v4635_v61  ;;  %725 = vst [vmem:[#allocation2 + $0xc8] sm:$0x1] %v724_v44  ;;  %v4883_v61 = vld [vmem:[#allocation2 + $0x80] ss:$0 sps:$4 sm:$0x11]  }
  0x9a   : > { %1991 = vmatprep.mubr.bf16.mxu1 %v1156_v34  ;;  %v2307_v59 = vshll.u32 %v4883_v61, 16 }
  0x9c   : > { %v2309_v56 = vrot.slane %v2307_v59, 1  ;;  %v4185_v59 = vld [vmem:[%s5523_s1 + $0x128] sm:$0xff]  }
  0x9f   : > { %1895 = vmatmul.mubr.bf16.gmra.mrb[56].mxu0 %v4651_v20  ;;  %v2302_v20 = vshll.u32 %v4879_v60, 16 }
  0xa0   : > { %1902 = vmatprep.mubr.bf16.mxu0 %v4870_v47 }
  0xa1   : > { %1992 = vmatmul.mubr.bf16.gmra.mrb[56].mxu1 %v4657_v24  ;;  %v2304_v49 = vrot.slane %v2302_v20, 1  ;;  %v4183_v20 = vld [vmem:[%s5523_s1 + $0xa8] sm:$0xff]  }
  0xa2   : > { %1999 = vmatprep.mubr.bf16.mxu1 %v4874_v48 }
  0xa7   : > { %1903 = vmatmul.mubr.bf16.gmra.mrb[60].mxu0 %v1156_v34 }
  0xa8   : > { %3980 = vmatprep.mubr.bf16.mxu0 %v4486_v27  ;;  %v4163_v27 = vld [vmem:[%s5523_s1 + $0x80] sm:$0xff]  }
  0xa9   : > { %2000 = vmatmul.mubr.bf16.gmra.mrb[60].mxu1 %v4840_v5 }
  0xaa   : > { %2485 = vmatprep.mubr.bf16.mxu1 %v1156_v34  ;;  %v2331_v34 = vshll.u32 %v4944_v23, 16 }
  0xac   : > { %v2333_v44 = vrot.slane %v2331_v34, 1  ;;  %v2367_v34 = vshll.u32 %v5051_v28, 16 }
  0xaf   : > { %3981 = vmatmul.mubr.bf16.vlgmr.msra.gmra.mrb[64].mxu0 %v4520_v4  ;;  %v4164_v4 = vld [vmem:[%s5523_s1 + $0xc8] sm:$0xff]  }
  0xb0   : > { %3757 = vmatpush3.bf16.msra.mxu0 %v4163_v27  ;;  %3984 = vmatprep.mubr.bf16.mxu0 %v4559_v39  ;;  %v2305_v39 = vor.u32 %v2304_v49, %v2300_v38  ;;  %v4184_v49 = vld [vmem:[%s5523_s1 + $0xf0] sm:$0xff]   ;;  %v5001_v27 = vsel %vm998_vm2, %v2329_v55, %v2333_v44  ;;  %v4199_v44 = vld [vmem:[%s5523_s1 + $0x1e0] sm:$0xff]  }
  0xb1   : > { %2486 = vmatmul.mubr.bf16.vlgmr.msra.gmra.mrb[64].mxu1 %v4657_v24  ;;  %3758 = vmatprep.subr.bf16.mxu0 %v4164_v4  ;;  %v4906_v24 = vld [vmem:[#allocation2 + $0x8c] ss:$0 sps:$4 sm:$0x11]   ;;  %v2336_v4 = vshrl.u32 %v4965_v37, 16 }
  0xb2   : > { %3821 = vmatpush3.bf16.msra.mxu1 %v4165_v52  ;;  %2493 = vmatprep.mubr.bf16.mxu1 %v4874_v48  ;;  %v4920_v7 = vsel %vm998_vm2, %v2305_v39, %v2309_v56  ;;  %v2319_v13 = vshll.u32 %v4906_v24, 16  ;;  %v2340_v52 = vrot.slane %v2338_v12, 1  ;;  %v5005_v39 = vld [vmem:[#allocation2 + $0xa8] sm:$0xff]   ;;  %v4186_v56 = vld [vmem:[%s5523_s1 + $0x170] sm:$0xff]  }
  0xb3   : > { %3822 = vmatprep.subr.bf16.mxu1 %v4166_v53  ;;  %v2343_v53 = vshll.u32 %v4981_v45, 16 }
  0xb4   : > { %3759 = vmatpush3.bf16.msra.mxu0 %v4167_v63  ;;  %v2321_v26 = vrot.slane %v2319_v13, 1  ;;  %v4188_v63 = vld [vmem:[%s5523_s1 + $0xf8] sm:$0xff]   ;;  %v4191_v13 = vld [vmem:[%s5523_s1 + $0x1c0] sm:$0xff]  }
  0xb5   : > { %3760 = vmatprep.subr.bf16.mxu0 %v4168_v0  ;;  %v4189_v0 = vld [vmem:[%s5523_s1 + $0x130] sm:$0xff]  }
  0xb6   : > { %3823 = vmatpush3.bf16.msra.mxu1 %v4169_v1  ;;  %v4958_v31 = vsel %vm998_vm2, %v2317_v22, %v2321_v26  ;;  %v2341_v1 = vor.u32 %v2340_v52, %v2336_v4  ;;  %v5039_v22 = vld [vmem:[#allocation2 + $0xb4] sm:$0xff]   ;;  %v4192_v26 = vld [vmem:[%s5523_s1 + $0x180] sm:$0xff]  }
  0xb7   : > { %3985 = vmatmul.mubr.bf16.gmra.mrb[68].mxu0 %v4603_v18  ;;  %3824 = vmatprep.subr.bf16.mxu1 %v4170_v8  ;;  %v4172_v18 = vld [vmem:[%s5523_s1 + $0xd8] sm:$0xff]   ;;  %v2345_v8 = vrot.slane %v2343_v53, 1  ;;  %v2360_v33 = vshrl.u32 %v5039_v22, 16  ;;  %v4203_v52 = vld [vmem:[%s5523_s1 + $0x1f0] sm:$0xff]   ;;  %v2383_v53 = vrot.slane %v4927_v14, 1 }
  0xb8   : > { %3761 = vmatpush3.bf16.msra.mxu0 %v4171_v16  ;;  %3988 = vmatprep.mubr.bf16.mxu0 %v4638_v62  ;;  %v4174_v62 = vld [vmem:[%s5523_s1 + $0x158] sm:$0xff]  }
  0xb9   : > { %2494 = vmatmul.mubr.bf16.gmra.mrb[68].mxu1 %v4840_v5  ;;  %3762 = vmatprep.subr.bf16.mxu0 %v4172_v18  ;;  %v5035_v16 = vsel %vm998_vm2, %v2341_v1, %v2345_v8  ;;  %v2348_v18 = vshrl.u32 %v5005_v39, 16  ;;  %v2386_v1 = vrot.slane %v4965_v37, 1  ;;  %v2387_v8 = vrot.slane %v4981_v45, 1 }
  0xba   : > { %2501 = vmatprep.mubr.bf16.mxu1 %v4920_v7  ;;  %3825 = vmatpush3.bf16.msra.mxu1 %v4173_v19  ;;  %v2355_v19 = vshll.u32 %v5022_v10, 16 }
  0xbb   : > { %3826 = vmatprep.subr.bf16.mxu1 %v4174_v62 }
  0xbc   : > { %3763 = vmatpush3.bf16.msra.mxu0 %v4175_v29  ;;  %v2357_v62 = vrot.slane %v2355_v19, 1  ;;  %v4194_v29 = vld [vmem:[%s5523_s1 + $0x188] sm:$0xff]  }
  0xbd   : > { %3764 = vmatprep.subr.bf16.mxu0 %v4176_v30  ;;  %v4195_v30 = vld [vmem:[%s5523_s1 + $0x1d0] sm:$0xff]  }
  0xbe   : > { %3827 = vmatpush3.bf16.msra.mxu1 %v4177_v36 }
  0xbf   : > { %3989 = vmatmul.mubr.bf16.gmra.mrb[72].mxu0 %v4660_v25  ;;  %3828 = vmatprep.subr.bf16.mxu1 %v4178_v35  ;;  %v1184_v25 = vrot.slane %v4840_v5, 1  ;;  %v2377_v35 = vrot.slane %v4879_v60, 1 }
  0xc0   : > { %3765 = vmatpush3.bf16.msra.mxu0 %v4179_v41  ;;  %3992 = vmatprep.mubr.bf16.mxu0 %v4870_v47  ;;  %v2378_v41 = vrot.slane %v4883_v61, 1  ;;  %v4198_v61 = vld [vmem:[%s5523_s1 + $0x198] sm:$0xff]  }
  0xc1   : > { %2502 = vmatmul.mubr.bf16.gmra.mrb[72].mxu1 %v4879_v60  ;;  %3766 = vmatprep.subr.bf16.mxu0 %v4180_v51  ;;  %v4991_v38 = vsel %vm1103_vm8, %v1184_v25, %v1185_v42  ;;  %v4196_v25 = vld [vmem:[%s5523_s1 + $0x190] sm:$0xff]   ;;  %v4197_v42 = vld [vmem:[%s5523_s1 + $0x1d8] sm:$0xff]  }
  0xc2   : > { %2509 = vmatprep.mubr.bf16.mxu1 %v4958_v31  ;;  %3829 = vmatpush3.bf16.msra.mxu1 %v4181_v43  ;;  %v2369_v43 = vrot.slane %v2367_v34, 1  ;;  %v5078_v55 = vsel %vm1103_vm8, %v2377_v35, %v2378_v41 }
  0xc3   : > { %3830 = vmatprep.subr.bf16.mxu1 %v4182_v46  ;;  %v2380_v46 = vrot.slane %v4889_v50, 1 }
  0xc4   : > { %3767 = vmatpush3.bf16.msra.mxu0 %v4183_v20  ;;  %v2381_v20 = vrot.slane %v4906_v24, 1  ;;  %v4202_v24 = vld [vmem:[%s5523_s1 + $0x1a8] sm:$0xff]  }
  0xc5   : > { %3768 = vmatprep.subr.bf16.mxu0 %v4184_v49  ;;  %v4200_v49 = vld [vmem:[%s5523_s1 + $0x1a0] sm:$0xff]  }
  0xc6   : > { %3831 = vmatpush3.bf16.msra.mxu1 %v4185_v59  ;;  %v4201_v59 = vld [vmem:[%s5523_s1 + $0x1e8] sm:$0xff]   ;;  %v5102_v4 = vsel %vm1103_vm8, %v2380_v46, %v2381_v20 }
  0xc7   : > { %3993 = vmatmul.mubr.bf16.gmra.mrb[76].mxu0 %v4991_v38  ;;  %3832 = vmatprep.subr.bf16.mxu1 %v4186_v56  ;;  %v2384_v56 = vrot.slane %v4944_v23, 1  ;;  %v4206_v23 = vld [vmem:[%s5523_s1 + $0x1b8] sm:$0xff]  }
  0xc8   : > { %3769 = vmatpush3.bf16.msra.mxu0 %v4187_v3  ;;  %2582 = vmatprep.mubr.bf16.mxu0 %v4840_v5  ;;  %v2350_v5 = vshll.u32 %v5005_v39, 16  ;;  %v4204_v3 = vld [vmem:[%s5523_s1 + $0x1b0] sm:$0xff]  }
  0xc9   : > { %2510 = vmatmul.mubr.bf16.gmra.mrb[76].mxu1 %v4889_v50  ;;  %3770 = vmatprep.subr.bf16.mxu0 %v4188_v63  ;;  %v4205_v63 = vld [vmem:[%s5523_s1 + $0x1f8] sm:$0xff]  }
  0xca   : > { %2517 = vmatprep.mubr.bf16.mxu1 %v5001_v27  ;;  %3833 = vmatpush3.bf16.msra.mxu1 %v4189_v0  ;;  %v5123_v0 = vsel %vm1103_vm8, %v2383_v53, %v2384_v56 }
  0xcb   : > { %3834 = vmatprep.subr.bf16.mxu1 %v4584_v6  ;;  %v2352_v6 = vrot.slane %v2350_v5, 1  ;;  %v5139_v5 = vsel %vm1103_vm8, %v2386_v1, %v2387_v8 }
  0xcc   : > { %3771 = vmatpush3.bf16.msra.mxu0 %v4190_v15 }
  0xcd   : > { %3884 = vmatprep.subr.bf16.mxu0 %v4191_v13 }
  0xce   : > { %3835 = vmatpush3.bf16.msra.mxu1 %v4590_v11  ;;  %v4193_v11 = vld [vmem:[%s5523_s1 + $0x1c8] sm:$0xff]  }
  0xcf   : > { %2583 = vmatmul.mubr.bf16.vlgmr.msra.gmra.mrb[80].mxu0 %v4870_v47  ;;  %3996 = vmatprep.subr.bf16.mxu1 %v4622_v32  ;;  %v2353_v47 = vor.u32 %v2352_v6, %v2348_v18  ;;  %v2362_v32 = vshll.u32 %v5039_v22, 16  ;;  %v2389_v18 = vrot.slane %v5005_v39, 1  ;;  %v2390_v6 = vrot.slane %v5022_v10, 1 }
  0xd0   : > { %3885 = vmatpush3.bf16.msra.mxu0 %v4192_v26  ;;  %2590 = vmatprep.mubr.bf16.mxu0 %v4879_v60 }
  0xd1   : > { %2518 = vmatmul.mubr.bf16.gmra.mrb[80].mxu1 %v4927_v14  ;;  %3886 = vmatprep.subr.bf16.mxu0 %v4193_v11  ;;  %v5062_v36 = vsel %vm998_vm2, %v2353_v47, %v2357_v62  ;;  %v2364_v17 = vrot.slane %v2362_v32, 1  ;;  %v5154_v11 = vld [vmem:[#allocation2 + $0xc0] sm:$0xff]   ;;  %v2392_v62 = vrot.slane %v5039_v22, 1 }
  0xd2   : > { %2525 = vmatprep.mubr.bf16.mxu1 %v5035_v16 }
  0xd3   : > { %v2365_v51 = vor.u32 %v2364_v17, %v2360_v33 }
  0xd4   : > { %3887 = vmatpush3.bf16.msra.mxu0 %v4194_v29 }
  0xd5   : > { %3888 = vmatprep.subr.bf16.mxu0 %v4195_v30  ;;  %v5088_v12 = vsel %vm998_vm2, %v2365_v51, %v2369_v43 }
  0xd7   : > { %2591 = vmatmul.mubr.bf16.gmra.mrb[84].mxu0 %v4991_v38 }
  0xd8   : > { %2598 = vmatprep.mubr.bf16.mxu0 %v4889_v50  ;;  %3889 = vmatpush3.bf16.msra.mxu0 %v4196_v25 }
  0xd9   : > { %2526 = vmatmul.mubr.bf16.gmra.mrb[84].mxu1 %v4965_v37  ;;  %3890 = vmatprep.subr.bf16.mxu0 %v4197_v42 }
  0xda   : > { %2533 = vmatprep.mubr.bf16.mxu1 %v5062_v36 }
  0xdc   : > { %3891 = vmatpush3.bf16.msra.mxu0 %v4198_v61 }
  0xdd   : > { %3892 = vmatprep.subr.bf16.mxu0 %v4199_v44 }
  0xdf   : > { %2599 = vmatmul.mubr.bf16.gmra.mrb[88].mxu0 %v5078_v55 }
  0xe0   : > { %2606 = vmatprep.mubr.bf16.mxu0 %v4927_v14  ;;  %3893 = vmatpush3.bf16.msra.mxu0 %v4200_v49 }
  0xe1   : > { %2534 = vmatmul.mubr.bf16.gmra.mrb[88].mxu1 %v5005_v39  ;;  %3894 = vmatprep.subr.bf16.mxu0 %v4201_v59 }
  0xe2   : > { %2541 = vmatprep.mubr.bf16.mxu1 %v5088_v12 }
  0xe4   : > { %3895 = vmatpush3.bf16.msra.mxu0 %v4202_v24 }
  0xe5   : > { %3896 = vmatprep.subr.bf16.mxu0 %v4203_v52 }
  0xe7   : > { %2607 = vmatmul.mubr.bf16.gmra.mrb[92].mxu0 %v5102_v4 }
  0xe8   : > { %2614 = vmatprep.mubr.bf16.mxu0 %v4965_v37  ;;  %3897 = vmatpush3.bf16.msra.mxu0 %v4204_v3 }
  0xe9   : > { %2542 = vmatmul.mubr.bf16.gmra.mrb[92].mxu1 %v5039_v22  ;;  %3898 = vmatprep.subr.bf16.mxu0 %v4205_v63 }
  0xea   : > { %2679 = vmatprep.mubr.bf16.mxu1 %v4991_v38  ;;  %v4207_v38 = vld [vmem:[%s5523_s1 + $0x200] sm:$0xff]  }
  0xec   : > { %3899 = vmatpush3.bf16.msra.mxu0 %v4206_v23 }
  0xef   : > { %2615 = vmatmul.mubr.bf16.gmra.mrb[96].mxu0 %v5123_v0 }
  0xf0   : > { %2622 = vmatprep.mubr.bf16.mxu0 %v5005_v39 }
  0xf1   : > { %2680 = vmatmul.mubr.bf16.vlgmr.msra.gmra.mrb[96].mxu1 %v4874_v48 }
  0xf2   : > { %3997 = vmatpush3.bf16.msra.mxu1 %v4207_v38  ;;  %2687 = vmatprep.mubr.bf16.mxu1 %v5078_v55 }
  0xf3   : > { %3998 = vmatprep.subr.bf16.mxu1 %v4676_v54 }
  0xf6   : > { %3999 = vmatpush3.bf16.msra.mxu1 %v4676_v54  ;;  %v5152_v54 = vsel %vm1103_vm8, %v2389_v18, %v2390_v6 }
  0xf7   : > { %2623 = vmatmul.mubr.bf16.gmra.mrb[100].mxu0 %v5139_v5  ;;  %4000 = vmatprep.subr.bf16.mxu1 %v4691_v58 }
  0xf8   : > { %2630 = vmatprep.mubr.bf16.mxu0 %v5039_v22 }
  0xf9   : > { %2688 = vmatmul.mubr.bf16.gmra.mrb[100].mxu1 %v4920_v7 }
  0xfa   : > { %2695 = vmatprep.mubr.bf16.mxu1 %v5102_v4  ;;  %4001 = vmatpush3.bf16.msra.mxu1 %v4691_v58  ;;  %v2393_v58 = vrot.slane %v5051_v28, 1 }
  0xfb   : > { %v3436_v15 = vpop.f32.mrb[0].mxu0  ;;  %4002 = vmatprep.subr.bf16.mxu1 %v4711_v40 }
  0xfc   : > { %v3437_v13 = vpop.f32.mrb[1].mxu0  ;;  %v5169_v17 = vsel %vm1103_vm8, %v2392_v62, %v2393_v58  ;;  %v2423_v62 = vrot.slane %v5154_v11, 1 }
  0xfd   : > { %v3438_v45 = vadd.f32 %v3437_v13, %v3436_v15  ;;  %v3439_v48 = vpop.f32.mrb[2].mxu0  ;;  %v4142_v15 = vld [vmem:[#allocation2 + $0xc8] ss:$0 sps:$4 sm:$0x11]  }
  0xfe   : > { %v3440_v19 = vpop.f32.mrb[3].mxu0  ;;  %4003 = vmatpush3.bf16.msra.mxu1 %v4711_v40  ;;  %v2424_v58 = vrot.slane %v4142_v15, 1 }
  0xff   : > { %v3441_v26 = vadd.f32 %v3440_v19, %v3439_v48  ;;  %2631 = vmatmul.mubr.bf16.gmra.mrb[104].mxu0 %v5152_v54  ;;  %4004 = vmatprep.subr.bf16.mxu1 %v4734_v21 }
 0x100   : > { %2638 = vmatprep.mubr.bf16.mxu0 %v5154_v11 }
 0x101   : > { %2696 = vmatmul.mubr.bf16.gmra.mrb[104].mxu1 %v4958_v31 }
 0x102   : > { %2703 = vmatprep.mubr.bf16.mxu1 %v5123_v0  ;;  %4005 = vmatpush3.bf16.msra.mxu1 %v4734_v21 }
 0x103   : > { %v3500_v10 = vpop.f32.mrb[0].mxu1  ;;  %4006 = vmatprep.subr.bf16.mxu1 %v4758_v57 }
 0x104   : > { %v3501_v47 = vpop.f32.mrb[1].mxu1 }
 0x105   : > { %v3502_v32 = vadd.f32 %v3501_v47, %v3500_v10  ;;  %v3503_v29 = vpop.f32.mrb[2].mxu1  ;;  %v2413_v10 = vshll.u32 %v5154_v11, 16 }
 0x106   : > { %v3504_v30 = vpop.f32.mrb[3].mxu1  ;;  %4007 = vmatpush3.bf16.msra.mxu1 %v4758_v57 }
 0x107   : > { %v5165_v40 = vadd.f32 %v3502_v32, %v3438_v45  ;;  %v3505_v33 = vadd.f32 %v3504_v30, %v3503_v29  ;;  %2639 = vmatmul.mubr.bf16.gmra.mrb[108].mxu0 %v5169_v17  ;;  %4008 = vmatprep.subr.bf16.mxu1 %v4776_v2  ;;  %v2411_v30 = vshrl.u32 %v5154_v11, 16 }
 0x108   : > { %2776 = vmatprep.mubr.bf16.mxu0 %v4920_v7 }
 0x109   : > { %v5171_v34 = vadd.f32 %v3505_v33, %v3441_v26  ;;  %2704 = vmatmul.mubr.bf16.gmra.mrb[108].mxu1 %v5001_v27  ;;  %v2415_v33 = vrot.slane %v2413_v10, 1 }
 0x10a   : > { %v3442_v28 = vpop.f32.mrb[4].mxu0  ;;  %2711 = vmatprep.mubr.bf16.mxu1 %v5139_v5  ;;  %4009 = vmatpush3.bf16.msra.mxu1 %v4776_v2 }
 0x10b   : > { %v3506_v35 = vpop.f32.mrb[4].mxu1  ;;  %v3443_v41 = vpop.f32.mrb[5].mxu0  ;;  %4010 = vmatprep.subr.bf16.mxu1 %v4796_v9 }
 0x10c   : > { %v3444_v21 = vadd.f32 %v3443_v41, %v3442_v28  ;;  %v3507_v25 = vpop.f32.mrb[5].mxu1  ;;  %v3445_v42 = vpop.f32.mrb[6].mxu0  ;;  %v2418_v28 = vshll.u32 %v4142_v15, 16  ;;  %v5207_v41 = vsel %vm1103_vm8, %v2423_v62, %v2424_v58 }
 0x10d   : > { %v3508_v51 = vadd.f32 %v3507_v25, %v3506_v35  ;;  %v3509_v43 = vpop.f32.mrb[6].mxu1  ;;  %v3446_v61 = vpop.f32.mrb[7].mxu0 }
 0x10e   : > { %v3447_v44 = vadd.f32 %v3446_v61, %v3445_v42  ;;  %v3510_v46 = vpop.f32.mrb[7].mxu1  ;;  %4011 = vmatpush3.bf16.msra.mxu1 %v4796_v9 }
 0x10f   : > { %v5180_v57 = vadd.f32 %v3508_v51, %v3444_v21  ;;  %v3511_v20 = vadd.f32 %v3510_v46, %v3509_v43  ;;  %2777 = vmatmul.mubr.bf16.vlgmr.msra.gmra.mrb[112].mxu0 %v4879_v60  ;;  %v2420_v46 = vrot.slane %v2418_v28, 1 }
 0x110   : > { %2784 = vmatprep.mubr.bf16.mxu0 %v4958_v31 }
 0x111   : > { %v5183_v49 = vadd.f32 %v3511_v20, %v3447_v44  ;;  %2712 = vmatmul.mubr.bf16.gmra.mrb[112].mxu1 %v5035_v16  ;;  %v2416_v44 = vor.u32 %v2415_v33, %v2411_v30 }
 0x112   : > { %v3448_v59 = vpop.f32.mrb[8].mxu0  ;;  %2719 = vmatprep.mubr.bf16.mxu1 %v5152_v54 }
 0x113   : > { %v3512_v7 = vpop.f32.mrb[8].mxu1  ;;  %v3449_v24 = vpop.f32.mrb[9].mxu0 }
 0x114   : > { %v3450_v52 = vadd.f32 %v3449_v24, %v3448_v59  ;;  %v3513_v53 = vpop.f32.mrb[9].mxu1  ;;  %v3451_v56 = vpop.f32.mrb[10].mxu0 }
 0x115   : > { %v3514_v2 = vadd.f32 %v3513_v53, %v3512_v7  ;;  %v3515_v3 = vpop.f32.mrb[10].mxu1  ;;  %v3452_v63 = vpop.f32.mrb[11].mxu0 }
 0x116   : > { %v3453_v23 = vadd.f32 %v3452_v63, %v3451_v56  ;;  %v3516_v1 = vpop.f32.mrb[11].mxu1 }
 0x117   : > { %v5190_v8 = vadd.f32 %v3514_v2, %v3450_v52  ;;  %v3517_v9 = vadd.f32 %v3516_v1, %v3515_v3  ;;  %2785 = vmatmul.mubr.bf16.gmra.mrb[116].mxu0 %v4889_v50 }
 0x118   : > { %2792 = vmatprep.mubr.bf16.mxu0 %v5001_v27 }
 0x119   : > { %v5192_v60 = vadd.f32 %v3517_v9, %v3453_v23  ;;  %2720 = vmatmul.mubr.bf16.gmra.mrb[116].mxu1 %v5062_v36 }
 0x11a   : > { %v3454_v38 = vpop.f32.mrb[12].mxu0  ;;  %2727 = vmatprep.mubr.bf16.mxu1 %v5169_v17 }
 0x11b   : > { %v3518_v13 = vpop.f32.mrb[12].mxu1  ;;  %v3455_v31 = vpop.f32.mrb[13].mxu0 }
 0x11c   : > { %v3456_v45 = vadd.f32 %v3455_v31, %v3454_v38  ;;  %v3519_v48 = vpop.f32.mrb[13].mxu1  ;;  %v3457_v18 = vpop.f32.mrb[14].mxu0 }
 0x11d   : > { %v3520_v6 = vadd.f32 %v3519_v48, %v3518_v13  ;;  %v3521_v19 = vpop.f32.mrb[14].mxu1  ;;  %v3458_v26 = vpop.f32.mrb[15].mxu0 }
 0x11e   : > { %v3459_v47 = vadd.f32 %v3458_v26, %v3457_v18  ;;  %v3522_v50 = vpop.f32.mrb[15].mxu1  ;;  %v4144_v18 = vld [vmem:[#allocation2 + $0xd4] ss:$0 sps:$4 sm:$0x11]  }
 0x11f   : > { %v5200_v32 = vadd.f32 %v3520_v6, %v3456_v45  ;;  %v3523_v27 = vadd.f32 %v3522_v50, %v3521_v19  ;;  %2793 = vmatmul.mubr.bf16.gmra.mrb[120].mxu0 %v4927_v14  ;;  %v5220_v45 = vld [vmem:[#allocation2 + $0xcc] sm:$0xff]   ;;  %v2444_v33 = vshll.u32 %v4144_v18, 16 }
 0x120   : > { %2800 = vmatprep.mubr.bf16.mxu0 %v5035_v16  ;;  %v2421_v16 = vsel %vm998_vm2, %v2416_v44, %v2420_v46  ;;  %v2439_v6 = vshll.u32 %v5220_v45, 16 }
 0x121   : > { %v5202_v29 = vadd.f32 %v3523_v27, %v3459_v47  ;;  %2728 = vmatmul.mubr.bf16.gmra.mrb[120].mxu1 %v5088_v12 }
 0x122   : > { %v3460_v35 = vpop.f32.mrb[16].mxu0  ;;  %2735 = vmatprep.mubr.bf16.mxu1 %v5207_v41 }
 0x123   : > { %v3461_v21 = vpop.f32.mrb[17].mxu0  ;;  %v3524_v25 = vpop.f32.mrb[16].mxu1 }
 0x124   : > { %v3462_v42 = vadd.f32 %v3461_v21, %v3460_v35  ;;  %v3463_v51 = vpop.f32.mrb[18].mxu0  ;;  %v3525_v43 = vpop.f32.mrb[17].mxu1 }
 0x125   : > { %v3464_v61 = vpop.f32.mrb[19].mxu0  ;;  %v3526_v20 = vadd.f32 %v3525_v43, %v3524_v25  ;;  %v3527_v14 = vpop.f32.mrb[18].mxu1  ;;  %v2446_v25 = vrot.slane %v2444_v33, 1 }
 0x126   : > { %v3465_v59 = vadd.f32 %v3464_v61, %v3463_v51  ;;  %v3528_v7 = vpop.f32.mrb[19].mxu1 }
 0x127   : > { %v5212_v24 = vadd.f32 %v3526_v20, %v3462_v42  ;;  %v3529_v52 = vadd.f32 %v3528_v7, %v3527_v14  ;;  %2801 = vmatmul.mubr.bf16.gmra.mrb[124].mxu0 %v4965_v37 }
 0x128   : > { %2808 = vmatprep.mubr.bf16.mxu0 %v5062_v36 }
 0x129   : > { %v5215_v53 = vadd.f32 %v3529_v52, %v3465_v59  ;;  %2736 = vmatmul.mubr.bf16.gmra.mrb[124].mxu1 %v2421_v16 }
 0x12a   : > { %v3466_v56 = vpop.f32.mrb[20].mxu0  ;;  %4012 = vmatprep.mubr.bf16.mxu1 %v5078_v55 }
 0x12b   : > { %v3467_v2 = vpop.f32.mrb[21].mxu0  ;;  %v3530_v3 = vpop.f32.mrb[20].mxu1 }
 0x12c   : > { %v3468_v63 = vadd.f32 %v3467_v2, %v3466_v56  ;;  %v3469_v23 = vpop.f32.mrb[22].mxu0  ;;  %v3531_v1 = vpop.f32.mrb[21].mxu1  ;;  %v2449_v2 = vrot.slane %v5220_v45, 1 }
 0x12d   : > { %v3470_v9 = vpop.f32.mrb[23].mxu0  ;;  %v3532_v38 = vadd.f32 %v3531_v1, %v3530_v3  ;;  %v3533_v15 = vpop.f32.mrb[22].mxu1  ;;  %v2450_v3 = vrot.slane %v4144_v18, 1 }
 0x12e   : > { %v3471_v13 = vadd.f32 %v3470_v9, %v3469_v23  ;;  %v3534_v31 = vpop.f32.mrb[23].mxu1 }
 0x12f   : > { %v5222_v48 = vadd.f32 %v3532_v38, %v3468_v63  ;;  %v3535_v37 = vadd.f32 %v3534_v31, %v3533_v15  ;;  %2809 = vmatmul.mubr.bf16.gmra.mrb[128].mxu0 %v5005_v39  ;;  %v2437_v39 = vshrl.u32 %v5220_v45, 16 }
 0x130   : > { %2816 = vmatprep.mubr.bf16.mxu0 %v5088_v12  ;;  %v2441_v12 = vrot.slane %v2439_v6, 1 }
 0x131   : > { %v5225_v36 = vadd.f32 %v3535_v37, %v3471_v13  ;;  %4013 = vmatmul.mubr.bf16.vlgmr.msra.gmra.mrb[128].mxu1 %v5102_v4 }
 0x132   : > { %v3472_v55 = vpop.f32.mrb[24].mxu0  ;;  %4016 = vmatprep.mubr.bf16.mxu1 %v5123_v0  ;;  %v2442_v21 = vor.u32 %v2441_v12, %v2437_v39 }
 0x133   : > { %v3473_v19 = vpop.f32.mrb[25].mxu0  ;;  %v3536_v26 = vpop.f32.mrb[24].mxu1 }
 0x134   : > { %v3474_v10 = vadd.f32 %v3473_v19, %v3472_v55  ;;  %v3475_v47 = vpop.f32.mrb[26].mxu0  ;;  %v3537_v50 = vpop.f32.mrb[25].mxu1  ;;  %v2447_v14 = vsel %vm998_vm2, %v2442_v21, %v2446_v25 }
 0x135   : > { %v3476_v62 = vpop.f32.mrb[27].mxu0  ;;  %v3538_v58 = vadd.f32 %v3537_v50, %v3536_v26  ;;  %v3539_v27 = vpop.f32.mrb[26].mxu1 }
 0x136   : > { %v3477_v30 = vadd.f32 %v3476_v62, %v3475_v47  ;;  %v3540_v4 = vpop.f32.mrb[27].mxu1 }
 0x137   : > { %v5232_v28 = vadd.f32 %v3538_v58, %v3474_v10  ;;  %v3541_v35 = vadd.f32 %v3540_v4, %v3539_v27  ;;  %2817 = vmatmul.mubr.bf16.gmra.mrb[132].mxu0 %v5039_v22 }
 0x138   : > { %2824 = vmatprep.mubr.bf16.mxu0 %v2421_v16 }
 0x139   : > { %v5235_v0 = vadd.f32 %v3541_v35, %v3477_v30  ;;  %4017 = vmatmul.mubr.bf16.gmra.mrb[132].mxu1 %v5139_v5 }
 0x13a   : > { %v3478_v42 = vpop.f32.mrb[28].mxu0  ;;  %4020 = vmatprep.mubr.bf16.mxu1 %v5152_v54 }
 0x13b   : > { %v3479_v51 = vpop.f32.mrb[29].mxu0  ;;  %v3542_v43 = vpop.f32.mrb[28].mxu1 }
 0x13c   : > { %v3480_v61 = vadd.f32 %v3479_v51, %v3478_v42  ;;  %v3481_v44 = vpop.f32.mrb[30].mxu0  ;;  %v3543_v46 = vpop.f32.mrb[29].mxu1 }
 0x13d   : > { %v3482_v20 = vpop.f32.mrb[31].mxu0  ;;  %v3544_v59 = vadd.f32 %v3543_v46, %v3542_v43  ;;  %v3545_v22 = vpop.f32.mrb[30].mxu1 }
 0x13e   : > { %v3483_v7 = vadd.f32 %v3482_v20, %v3481_v44  ;;  %v3546_v52 = vpop.f32.mrb[31].mxu1 }
 0x13f   : > { %2825 = vmatmul.mubr.bf16.gmra.mrb[136].mxu0 %v5154_v11  ;;  %v5241_v5 = vadd.f32 %v3544_v59, %v3480_v61  ;;  %v3547_v16 = vadd.f32 %v3546_v52, %v3545_v22 }
 0x140   : > { %2832 = vmatprep.mubr.bf16.mxu0 %v2447_v14 }
 0x141   : > { %4021 = vmatmul.mubr.bf16.gmra.mrb[136].mxu1 %v5169_v17  ;;  %v5244_v54 = vadd.f32 %v3547_v16, %v3483_v7  ;;  %v2451_v17 = vsel %vm1103_vm8, %v2449_v2, %v2450_v3 }
 0x142   : > { %v3564_v56 = vpop.f32.mrb[32].mxu0  ;;  %4024 = vmatprep.mubr.bf16.mxu1 %v5207_v41 }
 0x143   : > { %v3565_v63 = vpop.f32.mrb[33].mxu0 }
 0x144   : > { %v3566_v23 = vadd.f32 %v3565_v63, %v3564_v56  ;;  %v3567_v1 = vpop.f32.mrb[34].mxu0  ;;  %v3628_v9 = vpop.f32.mrb[32].mxu1 }
 0x145   : > { %v3568_v38 = vpop.f32.mrb[35].mxu0  ;;  %v3629_v11 = vpop.f32.mrb[33].mxu1 }
 0x146   : > { %v1849_v15 = vadd.f32 %v3566_v23, %v5165_v40  ;;  %v3569_v13 = vadd.f32 %v3568_v38, %v3567_v1  ;;  %v3630_v31 = vadd.f32 %v3629_v11, %v3628_v9  ;;  %v3631_v37 = vpop.f32.mrb[34].mxu1 }
 0x147   : > { %v3632_v55 = vpop.f32.mrb[35].mxu1  ;;  %2833 = vmatmul.mubr.bf16.gmra.mrb[140].mxu0 %v5220_v45 }
 0x148   : > { %v1852_v41 = vadd.f32 %v3569_v13, %v5171_v34  ;;  %v3633_v6 = vadd.f32 %v3632_v55, %v3631_v37  ;;  %v5252_v18 = vadd.f32 %v3630_v31, %v1849_v15 }
 0x149   : > { %4025 = vmatmul.mubr.bf16.gmra.mrb[140].mxu1 %v2451_v17 }
 0x14a   : > { %v3570_v19 = vpop.f32.mrb[36].mxu0  ;;  %v5254_v26 = vadd.f32 %v3633_v6, %v1852_v41 }
 0x14b   : > { %v3571_v10 = vpop.f32.mrb[37].mxu0 }
 0x14c   : > { %v3572_v47 = vadd.f32 %v3571_v10, %v3570_v19  ;;  %v3573_v40 = vpop.f32.mrb[38].mxu0  ;;  %v3634_v50 = vpop.f32.mrb[36].mxu1 }
 0x14d   : > { %v3574_v62 = vpop.f32.mrb[39].mxu0  ;;  %v3635_v39 = vpop.f32.mrb[37].mxu1 }
 0x14e   : > { %v1857_v58 = vadd.f32 %v3572_v47, %v5180_v57  ;;  %v3575_v27 = vadd.f32 %v3574_v62, %v3573_v40  ;;  %v3636_v30 = vadd.f32 %v3635_v39, %v3634_v50  ;;  %v3637_v45 = vpop.f32.mrb[38].mxu1 }
 0x14f   : > { %v3638_v12 = vpop.f32.mrb[39].mxu1 }
 0x150   : > { %v1860_v34 = vadd.f32 %v3575_v27, %v5183_v49  ;;  %v3639_v33 = vadd.f32 %v3638_v12, %v3637_v45  ;;  %v5258_v4 = vadd.f32 %v3636_v30, %v1857_v58 }
 0x152   : > { %v3576_v35 = vpop.f32.mrb[40].mxu0  ;;  %v5260_v21 = vadd.f32 %v3639_v33, %v1860_v34 }
 0x153   : > { %v3577_v25 = vpop.f32.mrb[41].mxu0 }
 0x154   : > { %v3578_v42 = vadd.f32 %v3577_v25, %v3576_v35  ;;  %v3579_v51 = vpop.f32.mrb[42].mxu0  ;;  %v3640_v43 = vpop.f32.mrb[40].mxu1 }
 0x155   : > { %v3580_v61 = vpop.f32.mrb[43].mxu0  ;;  %v3641_v44 = vpop.f32.mrb[41].mxu1 }
 0x156   : > { %v1865_v57 = vadd.f32 %v3578_v42, %v5190_v8  ;;  %v3581_v46 = vadd.f32 %v3580_v61, %v3579_v51  ;;  %v3642_v20 = vadd.f32 %v3641_v44, %v3640_v43  ;;  %v3643_v14 = vpop.f32.mrb[42].mxu1 }
 0x157   : > { %v3644_v59 = vpop.f32.mrb[43].mxu1 }
 0x158   : > { %v1868_v49 = vadd.f32 %v3581_v46, %v5192_v60  ;;  %v3645_v22 = vadd.f32 %v3644_v59, %v3643_v14  ;;  %v5264_v7 = vadd.f32 %v3642_v20, %v1865_v57 }
 0x15a   : > { %v3582_v52 = vpop.f32.mrb[44].mxu0  ;;  %v5266_v16 = vadd.f32 %v3645_v22, %v1868_v49 }
 0x15b   : > { %v3583_v56 = vpop.f32.mrb[45].mxu0 }
 0x15c   : > { %v3584_v2 = vadd.f32 %v3583_v56, %v3582_v52  ;;  %v3585_v3 = vpop.f32.mrb[46].mxu0  ;;  %v3646_v63 = vpop.f32.mrb[44].mxu1 }
 0x15d   : > { %v3586_v23 = vpop.f32.mrb[47].mxu0  ;;  %v3647_v1 = vpop.f32.mrb[45].mxu1 }
 0x15e   : > { %v1873_v8 = vadd.f32 %v3584_v2, %v5200_v32  ;;  %v3587_v9 = vadd.f32 %v3586_v23, %v3585_v3  ;;  %v3648_v38 = vadd.f32 %v3647_v1, %v3646_v63  ;;  %v3649_v11 = vpop.f32.mrb[46].mxu1 }
 0x15f   : > { %v3650_v15 = vpop.f32.mrb[47].mxu1 }
 0x160   : > { %v1876_v60 = vadd.f32 %v3587_v9, %v5202_v29  ;;  %v3651_v13 = vadd.f32 %v3650_v15, %v3649_v11  ;;  %v5270_v31 = vadd.f32 %v3648_v38, %v1873_v8 }
 0x162   : > { %v3588_v37 = vpop.f32.mrb[48].mxu0  ;;  %v5272_v17 = vadd.f32 %v3651_v13, %v1876_v60 }
 0x163   : > { %v3589_v55 = vpop.f32.mrb[49].mxu0 }
 0x164   : > { %v3590_v41 = vadd.f32 %v3589_v55, %v3588_v37  ;;  %v3591_v6 = vpop.f32.mrb[50].mxu0  ;;  %v3652_v19 = vpop.f32.mrb[48].mxu1 }
 0x165   : > { %v3592_v10 = vpop.f32.mrb[51].mxu0  ;;  %v3653_v47 = vpop.f32.mrb[49].mxu1 }
 0x166   : > { %v1881_v32 = vadd.f32 %v3590_v41, %v5212_v24  ;;  %v3593_v40 = vadd.f32 %v3592_v10, %v3591_v6  ;;  %v3654_v50 = vadd.f32 %v3653_v47, %v3652_v19  ;;  %v3655_v62 = vpop.f32.mrb[50].mxu1 }
 0x167   : > { %v3656_v39 = vpop.f32.mrb[51].mxu1 }
 0x168   : > { %v1884_v29 = vadd.f32 %v3593_v40, %v5215_v53  ;;  %v3657_v58 = vadd.f32 %v3656_v39, %v3655_v62  ;;  %v5276_v27 = vadd.f32 %v3654_v50, %v1881_v32  ;;  %v5299_v50 = vld [vmem:[%s5524_s2] ss:$0 sm:$0xff] }
 0x16a   : > { %v3594_v30 = vpop.f32.mrb[52].mxu0  ;;  %v5278_v45 = vadd.f32 %v3657_v58, %v1884_v29  ;;  %v5307_v58 = vld [vmem:[%s5525_s3] ss:$0 sm:$0xff] }
 0x16b   : > { %v3595_v12 = vpop.f32.mrb[53].mxu0 }
 0x16c   : > { %v3596_v34 = vadd.f32 %v3595_v12, %v3594_v30  ;;  %v3597_v33 = vpop.f32.mrb[54].mxu0  ;;  %v3658_v35 = vpop.f32.mrb[52].mxu1 }
 0x16d   : > { %v3598_v25 = vpop.f32.mrb[55].mxu0  ;;  %v3659_v42 = vpop.f32.mrb[53].mxu1 }
 0x16e   : > { %v1889_v24 = vadd.f32 %v3596_v34, %v5222_v48  ;;  %v3599_v51 = vadd.f32 %v3598_v25, %v3597_v33  ;;  %v3660_v43 = vadd.f32 %v3659_v42, %v3658_v35  ;;  %v3661_v61 = vpop.f32.mrb[54].mxu1 }
 0x16f   : > { %v3662_v44 = vpop.f32.mrb[55].mxu1 }
 0x170   : > { %v1892_v53 = vadd.f32 %v3599_v51, %v5225_v36  ;;  %v3663_v57 = vadd.f32 %v3662_v44, %v3661_v61  ;;  %v5282_v46 = vadd.f32 %v3660_v43, %v1889_v24 }
 0x172   : > { %v3600_v20 = vpop.f32.mrb[56].mxu0  ;;  %v5284_v14 = vadd.f32 %v3663_v57, %v1892_v53 }
 0x173   : > { %v3601_v59 = vpop.f32.mrb[57].mxu0 }
 0x174   : > { %v3602_v49 = vadd.f32 %v3601_v59, %v3600_v20  ;;  %v3603_v22 = vpop.f32.mrb[58].mxu0  ;;  %v3664_v52 = vpop.f32.mrb[56].mxu1 }
 0x175   : > { %v3604_v56 = vpop.f32.mrb[59].mxu0  ;;  %v3665_v2 = vpop.f32.mrb[57].mxu1 }
 0x176   : > { %v1897_v48 = vadd.f32 %v3602_v49, %v5232_v28  ;;  %v3605_v3 = vadd.f32 %v3604_v56, %v3603_v22  ;;  %v3666_v63 = vadd.f32 %v3665_v2, %v3664_v52  ;;  %v3667_v23 = vpop.f32.mrb[58].mxu1 }
 0x177   : > { %v3668_v1 = vpop.f32.mrb[59].mxu1 }
 0x178   : > { %v1900_v36 = vadd.f32 %v3605_v3, %v5235_v0  ;;  %v3669_v8 = vadd.f32 %v3668_v1, %v3667_v23  ;;  %v5288_v9 = vadd.f32 %v3666_v63, %v1897_v48 }
 0x17a   : > { %v3606_v38 = vpop.f32.mrb[60].mxu0  ;;  %v5290_v11 = vadd.f32 %v3669_v8, %v1900_v36 }
 0x17b   : > { %v3607_v15 = vpop.f32.mrb[61].mxu0 }
 0x17c   : > { %v3608_v60 = vadd.f32 %v3607_v15, %v3606_v38  ;;  %v3609_v13 = vpop.f32.mrb[62].mxu0  ;;  %v3670_v37 = vpop.f32.mrb[60].mxu1 }
 0x17d   : > { %v3610_v55 = vpop.f32.mrb[63].mxu0  ;;  %v3671_v41 = vpop.f32.mrb[61].mxu1 }
 0x17e   : > { %v1905_v28 = vadd.f32 %v3608_v60, %v5241_v5  ;;  %v3611_v6 = vadd.f32 %v3610_v55, %v3609_v13  ;;  %v3672_v19 = vadd.f32 %v3671_v41, %v3670_v37  ;;  %v3673_v10 = vpop.f32.mrb[62].mxu1 }
 0x17f   : > { %v3674_v47 = vpop.f32.mrb[63].mxu1 }
 0x180   : > { %v1908_v0 = vadd.f32 %v3611_v6, %v5244_v54  ;;  %v3675_v32 = vadd.f32 %v3674_v47, %v3673_v10  ;;  %v5294_v40 = vadd.f32 %v3672_v19, %v1905_v28 }
 0x182   : > { %v3982_v62 = vpop.f32.mrb[64].mxu0  ;;  %v5301_v39 = vadd.f32 %v3675_v32, %v1908_v0 }
 0x183   : > { %v2051_v29 = vadd.f32 %v3982_v62, %v5258_v4  ;;  %v2042_v5 = vpop.f32.mrb[65].mxu0 }
 0x184   : > { %v2043_v54 = vadd.f32 %v2042_v5, %v5252_v18  ;;  %v3983_v30 = vpop.f32.mrb[66].mxu0  ;;  %v3708_v12 = vpop.f32.mrb[64].mxu1 }
 0x185   : > { %v2113_v34 = vmul.f32 %v5299_v50, %v2051_v29  ;;  %v2054_v33 = vadd.f32 %v3983_v30, %v5260_v21  ;;  %v2045_v35 = vpop.f32.mrb[67].mxu0  ;;  %v3709_v25 = vpop.f32.mrb[65].mxu1 }
 0x186   : > { %v2111_v42 = vmul.f32 %v5299_v50, %v2043_v54  ;;  %v2046_v4 = vadd.f32 %v2045_v35, %v5254_v26  ;;  %v5314_v24 = vadd.f32 %v3709_v25, %v3708_v12  ;;  %v3711_v51 = vpop.f32.mrb[66].mxu1 }
 0x187   : > { %v2135_v43 = vadd.f32 %v5307_v58, %v2113_v34  ;;  %v2114_v18 = vmul.f32 %v5299_v50, %v2054_v33  ;;  %v3712_v61 = vpop.f32.mrb[67].mxu1 }
 0x188   : > { %v2133_v44 = vadd.f32 %v5307_v58, %v2111_v42  ;;  %v2112_v53 = vmul.f32 %v5299_v50, %v2046_v4  ;;  %v5320_v21 = vadd.f32 %v3712_v61, %v3711_v51 }
 0x189   : > { %v2136_v57 = vadd.f32 %v5307_v58, %v2114_v18  ;;  %v2151_v59 = vmax.f32 %v2135_v43, 0.0 }
 0x18a   : > { %v2134_v20 = vadd.f32 %v5307_v58, %v2112_v53  ;;  %v3986_v26 = vpop.f32.mrb[68].mxu0  ;;  %v2149_v56 = vmax.f32 %v2133_v44, 0.0 }
 0x18b   : > { %v2152_v49 = vmax.f32 %v2136_v57, 0.0  ;;  %v2067_v22 = vadd.f32 %v3986_v26, %v5270_v31  ;;  %v2058_v52 = vpop.f32.mrb[69].mxu0 }
 0x18c   : > { %v2150_v2 = vmax.f32 %v2134_v20, 0.0  ;;  %v2059_v48 = vadd.f32 %v2058_v52, %v5264_v7  ;;  %v3987_v3 = vpop.f32.mrb[70].mxu0  ;;  %v3714_v63 = vpop.f32.mrb[68].mxu1 }
 0x18d   : > { %v3333_v23 = vpack.c.bf16 %v2152_v49, %v2151_v59  ;;  %v2117_v1 = vmul.f32 %v5299_v50, %v2067_v22  ;;  %v2070_v31 = vadd.f32 %v3987_v3, %v5272_v17  ;;  %v2061_v36 = vpop.f32.mrb[71].mxu0  ;;  %v3715_v8 = vpop.f32.mrb[69].mxu1 }
 0x18e   : > { %v3328_v38 = vpack.c.bf16 %v2150_v2, %v2149_v56  ;;  %v2115_v15 = vmul.f32 %v5299_v50, %v2059_v48  ;;  %v2062_v60 = vadd.f32 %v2061_v36, %v5266_v16  ;;  %v5337_v13 = vadd.f32 %v3715_v8, %v3714_v63  ;;  %v3717_v37 = vpop.f32.mrb[70].mxu1 }
 0x18f   : > { %3405 = vst [vmem:[%s5330_s22 + $0x8] sm:$0xff] %v3333_v23   ;;  %v2139_v7 = vadd.f32 %v5307_v58, %v2117_v1  ;;  %v2118_v55 = vmul.f32 %v5299_v50, %v2070_v31  ;;  %v3718_v41 = vpop.f32.mrb[71].mxu1 }
 0x190   : > { %3329 = vst [vmem:[%s5330_s22] sm:$0xff] %v3328_v38   ;;  %v2137_v28 = vadd.f32 %v5307_v58, %v2115_v15  ;;  %v2116_v17 = vmul.f32 %v5299_v50, %v2062_v60  ;;  %v5345_v6 = vadd.f32 %v3718_v41, %v3717_v37 }
 0x191   : > { %v2140_v19 = vadd.f32 %v5307_v58, %v2118_v55  ;;  %v2155_v47 = vmax.f32 %v2139_v7, 0.0 }
 0x192   : > { %v2138_v16 = vadd.f32 %v5307_v58, %v2116_v17  ;;  %v3990_v10 = vpop.f32.mrb[72].mxu0  ;;  %v2153_v29 = vmax.f32 %v2137_v28, 0.0 }
 0x193   : > { %v2156_v0 = vmax.f32 %v2140_v19, 0.0  ;;  %v2083_v32 = vadd.f32 %v3990_v10, %v5282_v46  ;;  %v2074_v62 = vpop.f32.mrb[73].mxu0 }
 0x194   : > { %v2154_v5 = vmax.f32 %v2138_v16, 0.0  ;;  %v2075_v54 = vadd.f32 %v2074_v62, %v5276_v27  ;;  %v3991_v30 = vpop.f32.mrb[74].mxu0  ;;  %v3720_v12 = vpop.f32.mrb[72].mxu1 }
 0x195   : > { %v3343_v34 = vpack.c.bf16 %v2156_v0, %v2155_v47  ;;  %v2121_v33 = vmul.f32 %v5299_v50, %v2083_v32  ;;  %v2086_v35 = vadd.f32 %v3991_v30, %v5284_v14  ;;  %v2077_v25 = vpop.f32.mrb[75].mxu0  ;;  %v3721_v42 = vpop.f32.mrb[73].mxu1 }
 0x196   : > { %v3338_v4 = vpack.c.bf16 %v2154_v5, %v2153_v29  ;;  %v2119_v51 = vmul.f32 %v5299_v50, %v2075_v54  ;;  %v2078_v46 = vadd.f32 %v2077_v25, %v5278_v45  ;;  %v5355_v43 = vadd.f32 %v3721_v42, %v3720_v12  ;;  %v3723_v18 = vpop.f32.mrb[74].mxu1 }
 0x197   : > { %3407 = vst [vmem:[%s5330_s22 + $0x18] sm:$0xff] %v3343_v34   ;;  %v2143_v27 = vadd.f32 %v5307_v58, %v2121_v33  ;;  %v2122_v61 = vmul.f32 %v5299_v50, %v2086_v35  ;;  %v3724_v44 = vpop.f32.mrb[75].mxu1 }
 0x198   : > { %3406 = vst [vmem:[%s5330_s22 + $0x10] sm:$0xff] %v3338_v4   ;;  %v2141_v53 = vadd.f32 %v5307_v58, %v2119_v51  ;;  %v2120_v14 = vmul.f32 %v5299_v50, %v2078_v46  ;;  %v5363_v57 = vadd.f32 %v3724_v44, %v3723_v18 }
 0x199   : > { %v2144_v20 = vadd.f32 %v5307_v58, %v2122_v61  ;;  %v2159_v59 = vmax.f32 %v2143_v27, 0.0 }
 0x19a   : > { %v2142_v45 = vadd.f32 %v5307_v58, %v2120_v14  ;;  %v3994_v26 = vpop.f32.mrb[76].mxu0  ;;  %v2157_v56 = vmax.f32 %v2141_v53, 0.0 }
 0x19b   : > { %v2160_v49 = vmax.f32 %v2144_v20, 0.0  ;;  %v2099_v22 = vadd.f32 %v3994_v26, %v5294_v40  ;;  %v2090_v52 = vpop.f32.mrb[77].mxu0 }
 0x19c   : > { %v2158_v2 = vmax.f32 %v2142_v45, 0.0  ;;  %v2091_v48 = vadd.f32 %v2090_v52, %v5288_v9  ;;  %v3995_v3 = vpop.f32.mrb[78].mxu0  ;;  %v3726_v63 = vpop.f32.mrb[76].mxu1 }
 0x19d   : > { %v3353_v23 = vpack.c.bf16 %v2160_v49, %v2159_v59  ;;  %v2125_v1 = vmul.f32 %v5299_v50, %v2099_v22  ;;  %v2102_v31 = vadd.f32 %v3995_v3, %v5301_v39  ;;  %v2093_v36 = vpop.f32.mrb[79].mxu0  ;;  %v3727_v8 = vpop.f32.mrb[77].mxu1 }
 0x19e   : > { %v3348_v38 = vpack.c.bf16 %v2158_v2, %v2157_v56  ;;  %v2123_v15 = vmul.f32 %v5299_v50, %v2091_v48  ;;  %v2094_v40 = vadd.f32 %v2093_v36, %v5290_v11  ;;  %v5373_v60 = vadd.f32 %v3727_v8, %v3726_v63  ;;  %v3729_v37 = vpop.f32.mrb[78].mxu1 }
 0x19f   : > { %3409 = vst [vmem:[%s5330_s22 + $0x28] sm:$0xff] %v3353_v23   ;;  %v2147_v9 = vadd.f32 %v5307_v58, %v2125_v1  ;;  %v2126_v7 = vmul.f32 %v5299_v50, %v2102_v31  ;;  %v3730_v55 = vpop.f32.mrb[79].mxu1 }
 0x1a0   : > { %3408 = vst [vmem:[%s5330_s22 + $0x20] sm:$0xff] %v3348_v38   ;;  %v2145_v41 = vadd.f32 %v5307_v58, %v2123_v15  ;;  %v2124_v39 = vmul.f32 %v5299_v50, %v2094_v40  ;;  %v5381_v28 = vadd.f32 %v3730_v55, %v3729_v37 }
 0x1a1   : > { %v2148_v17 = vadd.f32 %v5307_v58, %v2126_v7  ;;  %v2163_v16 = vmax.f32 %v2147_v9, 0.0 }
 0x1a2   : > { %v2146_v11 = vadd.f32 %v5307_v58, %v2124_v39  ;;  %v3772_v19 = vpop.f32.mrb[80].mxu0  ;;  %v2161_v0 = vmax.f32 %v2145_v41, 0.0 }
 0x1a3   : > { %v2164_v10 = vmax.f32 %v2148_v17, 0.0  ;;  %v3773_v47 = vpop.f32.mrb[81].mxu0 }
 0x1a4   : > { %v2162_v32 = vmax.f32 %v2146_v11, 0.0  ;;  %v3774_v62 = vadd.f32 %v3773_v47, %v3772_v19  ;;  %v3732_v29 = vpop.f32.mrb[80].mxu1  ;;  %v3775_v5 = vpop.f32.mrb[82].mxu0 }
 0x1a5   : > { %v3363_v54 = vpack.c.bf16 %v2164_v10, %v2163_v16  ;;  %v3733_v30 = vpop.f32.mrb[81].mxu1  ;;  %v3776_v12 = vpop.f32.mrb[83].mxu0 }
 0x1a6   : > { %v3358_v34 = vpack.c.bf16 %v2162_v32, %v2161_v0  ;;  %v5386_v33 = vadd.f32 %v3774_v62, %v5314_v24  ;;  %v3734_v35 = vadd.f32 %v3733_v30, %v3732_v29  ;;  %v3777_v25 = vadd.f32 %v3776_v12, %v3775_v5  ;;  %v3735_v42 = vpop.f32.mrb[82].mxu1 }
 0x1a7   : > { %3411 = vst [vmem:[%s5330_s22 + $0x38] sm:$0xff] %v3363_v54   ;;  %v3736_v4 = vpop.f32.mrb[83].mxu1 }
 0x1a8   : > { %3410 = vst [vmem:[%s5330_s22 + $0x30] sm:$0xff] %v3358_v34   ;;  %v2588_v51 = vadd.f32 %v3777_v25, %v5320_v21  ;;  %v3737_v46 = vadd.f32 %v3736_v4, %v3735_v42 }
 0x1aa   : > { %v3778_v18 = vpop.f32.mrb[84].mxu0 }
 0x1ab   : > { %v3779_v27 = vpop.f32.mrb[85].mxu0 }
 0x1ac   : > { %v3780_v61 = vadd.f32 %v3779_v27, %v3778_v18  ;;  %v3738_v44 = vpop.f32.mrb[84].mxu1  ;;  %v3781_v53 = vpop.f32.mrb[86].mxu0 }
 0x1ad   : > { %v3739_v14 = vpop.f32.mrb[85].mxu1  ;;  %v3782_v20 = vpop.f32.mrb[87].mxu0 }
 0x1ae   : > { %v5392_v45 = vadd.f32 %v3780_v61, %v5337_v13  ;;  %v3740_v24 = vadd.f32 %v3739_v14, %v3738_v44  ;;  %v3783_v26 = vadd.f32 %v3782_v20, %v3781_v53  ;;  %v3741_v59 = vpop.f32.mrb[86].mxu1 }
 0x1af   : > { %v3742_v49 = vpop.f32.mrb[87].mxu1 }
 0x1b0   : > { %v2596_v22 = vadd.f32 %v3783_v26, %v5345_v6  ;;  %v3743_v52 = vadd.f32 %v3742_v49, %v3741_v59 }
 0x1b2   : > { %v3784_v56 = vpop.f32.mrb[88].mxu0 }
 0x1b3   : > { %v3785_v21 = vpop.f32.mrb[89].mxu0 }
 0x1b4   : > { %v3786_v2 = vadd.f32 %v3785_v21, %v3784_v56  ;;  %v3744_v48 = vpop.f32.mrb[88].mxu1  ;;  %v3787_v3 = vpop.f32.mrb[90].mxu0 }
 0x1b5   : > { %v3745_v63 = vpop.f32.mrb[89].mxu1  ;;  %v3788_v23 = vpop.f32.mrb[91].mxu0 }
 0x1b6   : > { %v5396_v1 = vadd.f32 %v3786_v2, %v5355_v43  ;;  %v3746_v31 = vadd.f32 %v3745_v63, %v3744_v48  ;;  %v3789_v13 = vadd.f32 %v3788_v23, %v3787_v3  ;;  %v3747_v36 = vpop.f32.mrb[90].mxu1 }
 0x1b7   : > { %v3748_v8 = vpop.f32.mrb[91].mxu1 }
 0x1b8   : > { %v5399_v38 = vadd.f32 %v3789_v13, %v5363_v57  ;;  %v3749_v15 = vadd.f32 %v3748_v8, %v3747_v36 }
 0x1ba   : > { %v3790_v6 = vpop.f32.mrb[92].mxu0 }
 0x1bb   : > { %v3791_v40 = vpop.f32.mrb[93].mxu0 }
 0x1bc   : > { %v3792_v37 = vadd.f32 %v3791_v40, %v3790_v6  ;;  %v3750_v9 = vpop.f32.mrb[92].mxu1  ;;  %v3793_v7 = vpop.f32.mrb[94].mxu0 }
 0x1bd   : > { %v3751_v55 = vpop.f32.mrb[93].mxu1  ;;  %v3794_v41 = vpop.f32.mrb[95].mxu0 }
 0x1be   : > { %v5402_v39 = vadd.f32 %v3792_v37, %v5373_v60  ;;  %v3752_v43 = vadd.f32 %v3751_v55, %v3750_v9  ;;  %v3795_v17 = vadd.f32 %v3794_v41, %v3793_v7  ;;  %v3753_v11 = vpop.f32.mrb[94].mxu1 }
 0x1bf   : > { %v3754_v19 = vpop.f32.mrb[95].mxu1 }
 0x1c0   : > { %v5405_v16 = vadd.f32 %v3795_v17, %v5381_v28  ;;  %v3755_v57 = vadd.f32 %v3754_v19, %v3753_v11 }
 0x1c2   : > { %v3796_v10 = vpop.f32.mrb[96].mxu0 }
 0x1c3   : > { %v3797_v47 = vpop.f32.mrb[97].mxu0 }
 0x1c4   : > { %v3836_v0 = vpop.f32.mrb[96].mxu1  ;;  %v3798_v32 = vadd.f32 %v3797_v47, %v3796_v10  ;;  %v3799_v62 = vpop.f32.mrb[98].mxu0 }
 0x1c5   : > { %v3837_v29 = vpop.f32.mrb[97].mxu1  ;;  %v3800_v5 = vpop.f32.mrb[99].mxu0 }
 0x1c6   : > { %v5407_v54 = vadd.f32 %v3798_v32, %v3734_v35  ;;  %v3838_v30 = vadd.f32 %v3837_v29, %v3836_v0  ;;  %v3839_v60 = vpop.f32.mrb[98].mxu1  ;;  %v3801_v12 = vadd.f32 %v3800_v5, %v3799_v62 }
 0x1c7   : > { %v3840_v34 = vpop.f32.mrb[99].mxu1 }
 0x1c8   : > { %v2682_v25 = vadd.f32 %v3838_v30, %v5386_v33  ;;  %v5410_v42 = vadd.f32 %v3801_v12, %v3737_v46  ;;  %v3841_v28 = vadd.f32 %v3840_v34, %v3839_v60 }
 0x1ca   : > { %v5412_v4 = vadd.f32 %v3841_v28, %v2588_v51  ;;  %v3802_v18 = vpop.f32.mrb[100].mxu0 }
 0x1cb   : > { %v3803_v27 = vpop.f32.mrb[101].mxu0 }
 0x1cc   : > { %v3842_v61 = vpop.f32.mrb[100].mxu1  ;;  %v3804_v44 = vadd.f32 %v3803_v27, %v3802_v18  ;;  %v3805_v53 = vpop.f32.mrb[102].mxu0 }
 0x1cd   : > { %v3843_v14 = vpop.f32.mrb[101].mxu1  ;;  %v3806_v20 = vpop.f32.mrb[103].mxu0 }
 0x1ce   : > { %v5414_v35 = vadd.f32 %v3804_v44, %v3740_v24  ;;  %v3844_v26 = vadd.f32 %v3843_v14, %v3842_v61  ;;  %v3845_v59 = vpop.f32.mrb[102].mxu1  ;;  %v3807_v49 = vadd.f32 %v3806_v20, %v3805_v53 }
 0x1cf   : > { %v3846_v56 = vpop.f32.mrb[103].mxu1 }
 0x1d0   : > { %v2690_v33 = vadd.f32 %v3844_v26, %v5392_v45  ;;  %v5417_v46 = vadd.f32 %v3807_v49, %v3743_v52  ;;  %v3847_v21 = vadd.f32 %v3846_v56, %v3845_v59 }
 0x1d2   : > { %v5419_v51 = vadd.f32 %v3847_v21, %v2596_v22  ;;  %v3808_v2 = vpop.f32.mrb[104].mxu0 }
 0x1d3   : > { %v3809_v48 = vpop.f32.mrb[105].mxu0 }
 0x1d4   : > { %v3848_v3 = vpop.f32.mrb[104].mxu1  ;;  %v3810_v63 = vadd.f32 %v3809_v48, %v3808_v2  ;;  %v3811_v23 = vpop.f32.mrb[106].mxu0 }
 0x1d5   : > { %v3849_v13 = vpop.f32.mrb[105].mxu1  ;;  %v3812_v36 = vpop.f32.mrb[107].mxu0 }
 0x1d6   : > { %v5421_v24 = vadd.f32 %v3810_v63, %v3746_v31  ;;  %v3850_v8 = vadd.f32 %v3849_v13, %v3848_v3  ;;  %v3851_v6 = vpop.f32.mrb[106].mxu1  ;;  %v3813_v40 = vadd.f32 %v3812_v36, %v3811_v23 }
 0x1d7   : > { %v3852_v37 = vpop.f32.mrb[107].mxu1 }
 0x1d8   : > { %v2698_v45 = vadd.f32 %v3850_v8, %v5396_v1  ;;  %v5424_v52 = vadd.f32 %v3813_v40, %v3749_v15  ;;  %v3853_v9 = vadd.f32 %v3852_v37, %v3851_v6 }
 0x1da   : > { %v5427_v22 = vadd.f32 %v3853_v9, %v5399_v38  ;;  %v3814_v7 = vpop.f32.mrb[108].mxu0 }
 0x1db   : > { %v3815_v55 = vpop.f32.mrb[109].mxu0 }
 0x1dc   : > { %v3854_v41 = vpop.f32.mrb[108].mxu1  ;;  %v3816_v17 = vadd.f32 %v3815_v55, %v3814_v7  ;;  %v3817_v11 = vpop.f32.mrb[110].mxu0 }
 0x1dd   : > { %v3855_v19 = vpop.f32.mrb[109].mxu1  ;;  %v3818_v31 = vpop.f32.mrb[111].mxu0 }
 0x1de   : > { %v5429_v10 = vadd.f32 %v3816_v17, %v3752_v43  ;;  %v3856_v47 = vadd.f32 %v3855_v19, %v3854_v41  ;;  %v3857_v0 = vpop.f32.mrb[110].mxu1  ;;  %v3819_v32 = vadd.f32 %v3818_v31, %v3817_v11 }
 0x1df   : > { %v3858_v62 = vpop.f32.mrb[111].mxu1 }
 0x1e0   : > { %v2706_v1 = vadd.f32 %v3856_v47, %v5402_v39  ;;  %v5432_v15 = vadd.f32 %v3819_v32, %v3755_v57  ;;  %v3859_v29 = vadd.f32 %v3858_v62, %v3857_v0 }
 0x1e2   : > { %v5435_v38 = vadd.f32 %v3859_v29, %v5405_v16  ;;  %v3900_v5 = vpop.f32.mrb[112].mxu0 }
 0x1e3   : > { %v3901_v30 = vpop.f32.mrb[113].mxu0 }
 0x1e4   : > { %v3860_v60 = vpop.f32.mrb[112].mxu1  ;;  %v3902_v12 = vadd.f32 %v3901_v30, %v3900_v5  ;;  %v3903_v34 = vpop.f32.mrb[114].mxu0 }
 0x1e5   : > { %v3861_v28 = vpop.f32.mrb[113].mxu1  ;;  %v3904_v43 = vpop.f32.mrb[115].mxu0 }
 0x1e6   : > { %v3862_v18 = vadd.f32 %v3861_v28, %v3860_v60  ;;  %v3863_v27 = vpop.f32.mrb[114].mxu1  ;;  %v3905_v61 = vadd.f32 %v3904_v43, %v3903_v34  ;;  %v2779_v44 = vadd.f32 %v3902_v12, %v2682_v25 }
 0x1e7   : > { %v3864_v53 = vpop.f32.mrb[115].mxu1 }
 0x1e8   : > { %v5438_v39 = vadd.f32 %v3862_v18, %v5407_v54  ;;  %v3865_v57 = vadd.f32 %v3864_v53, %v3863_v27  ;;  %v5441_v14 = vadd.f32 %v3905_v61, %v5412_v4 }
 0x1ea   : > { %v5444_v16 = vadd.f32 %v3865_v57, %v5410_v42  ;;  %v3906_v20 = vpop.f32.mrb[116].mxu0 }
 0x1eb   : > { %v3907_v26 = vpop.f32.mrb[117].mxu0 }
 0x1ec   : > { %v3866_v59 = vpop.f32.mrb[116].mxu1  ;;  %v3908_v49 = vadd.f32 %v3907_v26, %v3906_v20  ;;  %v3909_v56 = vpop.f32.mrb[118].mxu0 }
 0x1ed   : > { %v3867_v21 = vpop.f32.mrb[117].mxu1  ;;  %v3910_v2 = vpop.f32.mrb[119].mxu0 }
 0x1ee   : > { %v3868_v48 = vadd.f32 %v3867_v21, %v3866_v59  ;;  %v3869_v25 = vpop.f32.mrb[118].mxu1  ;;  %v3911_v3 = vadd.f32 %v3910_v2, %v3909_v56  ;;  %v2787_v63 = vadd.f32 %v3908_v49, %v2690_v33 }
 0x1ef   : > { %v3870_v54 = vpop.f32.mrb[119].mxu1 }
 0x1f0   : > { %v5447_v23 = vadd.f32 %v3868_v48, %v5414_v35  ;;  %v3871_v4 = vadd.f32 %v3870_v54, %v3869_v25  ;;  %v2790_v13 = vadd.f32 %v3911_v3, %v5419_v51 }
 0x1f2   : > { %v5451_v42 = vadd.f32 %v3871_v4, %v5417_v46  ;;  %v3912_v36 = vpop.f32.mrb[120].mxu0 }
 0x1f3   : > { %v3913_v8 = vpop.f32.mrb[121].mxu0 }
 0x1f4   : > { %v3872_v6 = vpop.f32.mrb[120].mxu1  ;;  %v3914_v40 = vadd.f32 %v3913_v8, %v3912_v36  ;;  %v3915_v37 = vpop.f32.mrb[122].mxu0 }
 0x1f5   : > { %v3873_v9 = vpop.f32.mrb[121].mxu1  ;;  %v3916_v7 = vpop.f32.mrb[123].mxu0 }
 0x1f6   : > { %v3874_v55 = vadd.f32 %v3873_v9, %v3872_v6  ;;  %v3875_v41 = vpop.f32.mrb[122].mxu1  ;;  %v3917_v33 = vadd.f32 %v3916_v7, %v3915_v37  ;;  %v2795_v17 = vadd.f32 %v3914_v40, %v2698_v45 }
 0x1f7   : > { %v3876_v11 = vpop.f32.mrb[123].mxu1 }
 0x1f8   : > { %v5454_v35 = vadd.f32 %v3874_v55, %v5421_v24  ;;  %v3877_v19 = vadd.f32 %v3876_v11, %v3875_v41  ;;  %v5457_v51 = vadd.f32 %v3917_v33, %v5427_v22 }
 0x1fa   : > { %v5460_v46 = vadd.f32 %v3877_v19, %v5424_v52  ;;  %v3918_v31 = vpop.f32.mrb[124].mxu0 }
 0x1fb   : > { %v3919_v47 = vpop.f32.mrb[125].mxu0 }
 0x1fc   : > { %v3878_v0 = vpop.f32.mrb[124].mxu1  ;;  %v3920_v32 = vadd.f32 %v3919_v47, %v3918_v31  ;;  %v3921_v62 = vpop.f32.mrb[126].mxu0 }
 0x1fd   : > { %v3879_v29 = vpop.f32.mrb[125].mxu1  ;;  %v3922_v5 = vpop.f32.mrb[127].mxu0 }
 0x1fe   : > { %v3880_v30 = vadd.f32 %v3879_v29, %v3878_v0  ;;  %v3881_v45 = vpop.f32.mrb[126].mxu1  ;;  %v3923_v60 = vadd.f32 %v3922_v5, %v3921_v62  ;;  %v2803_v12 = vadd.f32 %v3920_v32, %v2706_v1 }
 0x1ff   : > { %v3882_v24 = vpop.f32.mrb[127].mxu1 }
 0x200   : > { %v5463_v34 = vadd.f32 %v3880_v30, %v5429_v10  ;;  %v3883_v22 = vadd.f32 %v3882_v24, %v3881_v45  ;;  %v2806_v28 = vadd.f32 %v3923_v60, %v5435_v38 }
 0x202   : > { %v5467_v52 = vadd.f32 %v3883_v22, %v5432_v15  ;;  %v3924_v43 = vpop.f32.mrb[128].mxu0 }
 0x203   : > { %v3925_v18 = vpop.f32.mrb[129].mxu0 }
 0x204   : > { %v4014_v27 = vpop.f32.mrb[128].mxu1  ;;  %v3926_v61 = vadd.f32 %v3925_v18, %v3924_v43  ;;  %v3927_v53 = vpop.f32.mrb[130].mxu0 }
 0x205   : > { %v2884_v57 = vadd.f32 %v4014_v27, %v2787_v63  ;;  %v2875_v20 = vpop.f32.mrb[129].mxu1  ;;  %v3928_v26 = vpop.f32.mrb[131].mxu0 }
 0x206   : > { %v2876_v59 = vadd.f32 %v2875_v20, %v2779_v44  ;;  %v4015_v1 = vpop.f32.mrb[130].mxu1  ;;  %v3929_v49 = vadd.f32 %v3928_v26, %v3927_v53  ;;  %v2811_v10 = vadd.f32 %v3926_v61, %v5438_v39 }
 0x207   : > { %v2940_v56 = vmul.f32 %v5299_v50, %v2884_v57  ;;  %v2887_v21 = vadd.f32 %v4015_v1, %v2790_v13  ;;  %v2878_v38 = vpop.f32.mrb[131].mxu1 }
 0x208   : > { %v2938_v15 = vmul.f32 %v5299_v50, %v2876_v59  ;;  %v2879_v2 = vadd.f32 %v2878_v38, %v5441_v14  ;;  %v2814_v48 = vadd.f32 %v3929_v49, %v5444_v16 }
 0x209   : > { %v2956_v25 = vadd.f32 %v5307_v58, %v2940_v56  ;;  %v2941_v3 = vmul.f32 %v5299_v50, %v2887_v21 }
 0x20a   : > { %v2954_v44 = vadd.f32 %v5307_v58, %v2938_v15  ;;  %v2939_v63 = vmul.f32 %v5299_v50, %v2879_v2  ;;  %v3930_v54 = vpop.f32.mrb[132].mxu0 }
 0x20b   : > { %v2957_v39 = vadd.f32 %v5307_v58, %v2941_v3  ;;  %v3931_v4 = vpop.f32.mrb[133].mxu0  ;;  %v2972_v14 = vmax.f32 %v2956_v25, 0.0 }
 0x20c   : > { %v2955_v13 = vadd.f32 %v5307_v58, %v2939_v63  ;;  %v4018_v36 = vpop.f32.mrb[132].mxu1  ;;  %v3932_v8 = vadd.f32 %v3931_v4, %v3930_v54  ;;  %v3933_v6 = vpop.f32.mrb[134].mxu0  ;;  %v2970_v40 = vmax.f32 %v2954_v44, 0.0 }
 0x20d   : > { %v2973_v16 = vmax.f32 %v2957_v39, 0.0  ;;  %v2900_v37 = vadd.f32 %v4018_v36, %v2803_v12  ;;  %v2891_v9 = vpop.f32.mrb[133].mxu1  ;;  %v3934_v7 = vpop.f32.mrb[135].mxu0 }
 0x20e   : > { %v2971_v55 = vmax.f32 %v2955_v13, 0.0  ;;  %v2892_v41 = vadd.f32 %v2891_v9, %v2795_v17  ;;  %v4019_v33 = vpop.f32.mrb[134].mxu1  ;;  %v3935_v11 = vadd.f32 %v3934_v7, %v3933_v6  ;;  %v2819_v19 = vadd.f32 %v3932_v8, %v5447_v23 }
 0x20f   : > { %v3373_v31 = vpack.c.bf16 %v2973_v16, %v2972_v14  ;;  %v2944_v47 = vmul.f32 %v5299_v50, %v2900_v37  ;;  %v2903_v0 = vadd.f32 %v4019_v33, %v2806_v28  ;;  %v2894_v32 = vpop.f32.mrb[135].mxu1 }
 0x210   : > { %v3368_v62 = vpack.c.bf16 %v2971_v55, %v2970_v40  ;;  %v2942_v29 = vmul.f32 %v5299_v50, %v2892_v41  ;;  %v2895_v5 = vadd.f32 %v2894_v32, %v5457_v51  ;;  %v2822_v30 = vadd.f32 %v3935_v11, %v5451_v42 }
 0x211   : > { %3413 = vst [vmem:[%s5330_s22 + $0x48] sm:$0xff] %v3373_v31   ;;  %v2960_v45 = vadd.f32 %v5307_v58, %v2944_v47  ;;  %v2945_v17 = vmul.f32 %v5299_v50, %v2903_v0 }
 0x212   : > { %3412 = vst [vmem:[%s5330_s22 + $0x40] sm:$0xff] %v3368_v62   ;;  %v2958_v23 = vadd.f32 %v5307_v58, %v2942_v29  ;;  %v2943_v60 = vmul.f32 %v5299_v50, %v2895_v5  ;;  %v3936_v12 = vpop.f32.mrb[136].mxu0 }
 0x213   : > { %v2961_v24 = vadd.f32 %v5307_v58, %v2945_v17  ;;  %v3937_v22 = vpop.f32.mrb[137].mxu0  ;;  %v2976_v42 = vmax.f32 %v2960_v45, 0.0 }
 0x214   : > { %v2959_v28 = vadd.f32 %v5307_v58, %v2943_v60  ;;  %v4022_v43 = vpop.f32.mrb[136].mxu1  ;;  %v3938_v51 = vadd.f32 %v3937_v22, %v3936_v12  ;;  %v3939_v18 = vpop.f32.mrb[138].mxu0  ;;  %v2974_v27 = vmax.f32 %v2958_v23, 0.0 }
 0x215   : > { %v2977_v61 = vmax.f32 %v2961_v24, 0.0  ;;  %v2916_v53 = vadd.f32 %v4022_v43, %v2819_v19  ;;  %v2907_v57 = vpop.f32.mrb[137].mxu1  ;;  %v3940_v20 = vpop.f32.mrb[139].mxu0 }
 0x216   : > { %v2975_v26 = vmax.f32 %v2959_v28, 0.0  ;;  %v2908_v59 = vadd.f32 %v2907_v57, %v2811_v10  ;;  %v4023_v1 = vpop.f32.mrb[138].mxu1  ;;  %v3941_v49 = vadd.f32 %v3940_v20, %v3939_v18  ;;  %v2827_v56 = vadd.f32 %v3938_v51, %v5454_v35 }
 0x217   : > { %v3383_v21 = vpack.c.bf16 %v2977_v61, %v2976_v42  ;;  %v2948_v38 = vmul.f32 %v5299_v50, %v2916_v53  ;;  %v2919_v15 = vadd.f32 %v4023_v1, %v2822_v30  ;;  %v2910_v2 = vpop.f32.mrb[139].mxu1 }
 0x218   : > { %v3378_v25 = vpack.c.bf16 %v2975_v26, %v2974_v27  ;;  %v2946_v3 = vmul.f32 %v5299_v50, %v2908_v59  ;;  %v2911_v44 = vadd.f32 %v2910_v2, %v2814_v48  ;;  %v2830_v63 = vadd.f32 %v3941_v49, %v5460_v46 }
 0x219   : > { %3415 = vst [vmem:[%s5330_s22 + $0x58] sm:$0xff] %v3383_v21   ;;  %v2964_v54 = vadd.f32 %v5307_v58, %v2948_v38  ;;  %v2949_v10 = vmul.f32 %v5299_v50, %v2919_v15 }
 0x21a   : > { %3414 = vst [vmem:[%s5330_s22 + $0x50] sm:$0xff] %v3378_v25   ;;  %v2962_v39 = vadd.f32 %v5307_v58, %v2946_v3  ;;  %v2947_v35 = vmul.f32 %v5299_v50, %v2911_v44  ;;  %v3942_v4 = vpop.f32.mrb[140].mxu0 }
 0x21b   : > { %v2965_v13 = vadd.f32 %v5307_v58, %v2949_v10  ;;  %v3943_v36 = vpop.f32.mrb[141].mxu0  ;;  %v2980_v46 = vmax.f32 %v2964_v54, 0.0 }
 0x21c   : > { %v2963_v8 = vadd.f32 %v5307_v58, %v2947_v35  ;;  %v4026_v6 = vpop.f32.mrb[140].mxu1  ;;  %v3944_v48 = vadd.f32 %v3943_v36, %v3942_v4  ;;  %v3945_v14 = vpop.f32.mrb[142].mxu0  ;;  %v2978_v40 = vmax.f32 %v2962_v39, 0.0 }
 0x21d   : > { %v2981_v16 = vmax.f32 %v2965_v13, 0.0  ;;  %v2923_v37 = vpop.f32.mrb[141].mxu1  ;;  %v3946_v9 = vpop.f32.mrb[143].mxu0 }
 0x21e   : > { %v2979_v7 = vmax.f32 %v2963_v8, 0.0  ;;  %v2835_v55 = vadd.f32 %v3944_v48, %v5463_v34  ;;  %v2924_v41 = vadd.f32 %v2923_v37, %v2827_v56  ;;  %v4027_v33 = vpop.f32.mrb[142].mxu1  ;;  %v3947_v11 = vadd.f32 %v3946_v9, %v3945_v14 }
 0x21f   : > { %v3393_v19 = vpack.c.bf16 %v2981_v16, %v2980_v46  ;;  %v2926_v31 = vpop.f32.mrb[143].mxu1 }
 0x220   : > { %v3388_v47 = vpack.c.bf16 %v2979_v7, %v2978_v40  ;;  %v2932_v0 = vadd.f32 %v4026_v6, %v2835_v55  ;;  %v2950_v32 = vmul.f32 %v5299_v50, %v2924_v41  ;;  %v2838_v62 = vadd.f32 %v3947_v11, %v5467_v52 }
 0x221   : > { %3417 = vst [vmem:[%s5330_s22 + $0x68] sm:$0xff] %v3393_v19   ;;  %v2927_v29 = vadd.f32 %v2926_v31, %v2830_v63 }
 0x222   : > { %3416 = vst [vmem:[%s5330_s22 + $0x60] sm:$0xff] %v3388_v47   ;;  %v2952_v5 = vmul.f32 %v5299_v50, %v2932_v0  ;;  %v2935_v30 = vadd.f32 %v4027_v33, %v2838_v62  ;;  %v2966_v34 = vadd.f32 %v5307_v58, %v2950_v32 }
 0x223   : > { %v2951_v45 = vmul.f32 %v5299_v50, %v2927_v29 }
 0x224   : > { %v2968_v17 = vadd.f32 %v5307_v58, %v2952_v5  ;;  %v2953_v23 = vmul.f32 %v5299_v50, %v2935_v30  ;;  %v2982_v12 = vmax.f32 %v2966_v34, 0.0 }
 0x225   : > { %v2967_v60 = vadd.f32 %v5307_v58, %v2951_v45 }
 0x226   : > { %v2969_v52 = vadd.f32 %v5307_v58, %v2953_v23  ;;  %v2984_v22 = vmax.f32 %v2968_v17, 0.0 }
 0x227   : > { %v2983_v24 = vmax.f32 %v2967_v60, 0.0 }
 0x228   : > { %v2985_v28 = vmax.f32 %v2969_v52, 0.0 }
 0x229   : > { %v3398_v43 = vpack.c.bf16 %v2983_v24, %v2982_v12 }
 0x22a   : > { %v3403_v51 = vpack.c.bf16 %v2985_v28, %v2984_v22 }
 0x22b   : > { %3418 = vst [vmem:[%s5330_s22 + $0x70] sm:$0xff] %v3398_v43  }
 0x22c   : > { %3419 = vst [vmem:[%s5330_s22 + $0x78] sm:$0xff] %v3403_v51  }
 0x22d PF: > { %s14_s15 = sadd.s32 1, %s4214_s15  }
 0x22e   : > { %p11_p4 = scmp.ge.s32.totalorder %s14_s15, 4  }
 0x230   :  { %13 = sbr.rel (!%p11_p4) target bundleno = 1 (0x1), region = 68 }

// kernel: decoder_forward.7
= control target key start
LH: loop header
LB: loop body
LE: loop exit
PB: predicated region body
PF: predicated region fallthrough
CT: control target
= control target key end

     0   :  { %v6853_v2 = vmov 0   ;;  %vm581_vm0 = vcmask 1043456   ;;  %vm824_vm1 = vsmask.f32 7424  ;;  %vm257_vm2 = vsmask.f32 256  ;;  %s10051_s0 = inlined_call_operand.vmem [shape: bf16[2,16,16,128], index: 0, kind: input, shape index: {}]   ;;  %s10052_s1 = inlined_call_operand.vmem [shape: bf16[1152,128], index: 1, kind: input, shape index: {}]   ;;  %s10053_s2 = inlined_call_operand.vmem [shape: f32[1,128], index: 2, kind: input, shape index: {}]   ;;  %s10054_s3 = inlined_call_operand.vmem [shape: f32[1,128], index: 3, kind: input, shape index: {}]   ;;  %s10055_s4 = inlined_call_operand.vmem [shape: f32[128,128], index: 4, kind: input, shape index: {}]   ;;  %s10056_s5 = inlined_call_operand.vmem [shape: f32[1,128], index: 5, kind: input, shape index: {}]   ;;  %s10057_s6 = inlined_call_operand.hbm [shape: f32[2,128], index: 6, kind: output, shape index: {}]  }
   0x1   :  { %v6515_v0 = vld [vmem:[%s10052_s1 + $0x40] sm:$0xff]   ;;  %171 = vst [vmem:[#allocation2] sm:$0xf] %v6853_v2  ;;  %172 = vst [vmem:[#allocation2 + $0x4] sm:$0xf] %v6853_v2  ;;  %v6519_v5 = vld [vmem:[%s10052_s1 + $0x48] sm:$0xff]  }
   0x2   :  { %v6516_v1 = vld [vmem:[%s10052_s1 + $0xc0] sm:$0xff]   ;;  %173 = vst [vmem:[#allocation2 + $0x8] sm:$0x1] %v6853_v2  ;;  %174 = vst [vmem:[#allocation2 + $0xc] sm:$0xf] %v6853_v2  ;;  %5218 = vmatprep.subr.bf16.mxu0 %v6515_v0  ;;  %v6520_v6 = vld [vmem:[%s10052_s1 + $0xc8] sm:$0xff]  }
   0x3   :  { %175 = vst [vmem:[#allocation2 + $0x10] sm:$0xf] %v6853_v2  ;;  %176 = vst [vmem:[#allocation2 + $0x14] sm:$0x1] %v6853_v2  ;;  %v6517_v3 = vld [vmem:[%s10052_s1] sm:$0xff]   ;;  %5282 = vmatprep.subr.bf16.mxu1 %v6516_v1  ;;  %v6521_v7 = vld [vmem:[%s10052_s1 + $0x8] sm:$0xff]  }
   0x4   :  { %177 = vst [vmem:[#allocation2 + $0x18] sm:$0xf] %v6853_v2  ;;  %178 = vst [vmem:[#allocation2 + $0x1c] sm:$0xf] %v6853_v2  ;;  %v6518_v4 = vld [vmem:[%s10052_s1 + $0x80] sm:$0xff]   ;;  %5219 = vmatpush3.bf16.msra.mxu0 %v6517_v3  ;;  %v6522_v8 = vld [vmem:[%s10052_s1 + $0x88] sm:$0xff]  }
   0x5   :  { %179 = vst [vmem:[#allocation2 + $0x20] sm:$0x1] %v6853_v2  ;;  %180 = vst [vmem:[#allocation2 + $0x24] sm:$0xf] %v6853_v2  ;;  %5283 = vmatpush3.bf16.msra.mxu1 %v6518_v4  ;;  %5220 = vmatprep.subr.bf16.mxu0 %v6519_v5  ;;  %v6523_v9 = vld [vmem:[%s10052_s1 + $0x50] sm:$0xff]   ;;  %v6527_v13 = vld [vmem:[%s10052_s1 + $0x58] sm:$0xff]  }
   0x6   :  { %181 = vst [vmem:[#allocation2 + $0x28] sm:$0xf] %v6853_v2  ;;  %182 = vst [vmem:[#allocation2 + $0x2c] sm:$0x1] %v6853_v2  ;;  %5284 = vmatprep.subr.bf16.mxu1 %v6520_v6  ;;  %v6524_v10 = vld [vmem:[%s10052_s1 + $0xd0] sm:$0xff]   ;;  %v6528_v14 = vld [vmem:[%s10052_s1 + $0xd8] sm:$0xff]  }
   0x7   :  { %183 = vst [vmem:[#allocation2 + $0x30] sm:$0xf] %v6853_v2  ;;  %184 = vst [vmem:[#allocation2 + $0x34] sm:$0xf] %v6853_v2  ;;  %v6525_v11 = vld [vmem:[%s10052_s1 + $0x10] sm:$0xff]   ;;  %v6529_v15 = vld [vmem:[%s10052_s1 + $0x18] sm:$0xff]  }
   0x8   :  { %185 = vst [vmem:[#allocation2 + $0x38] sm:$0x1] %v6853_v2  ;;  %186 = vst [vmem:[#allocation2 + $0x3c] sm:$0xf] %v6853_v2  ;;  %5221 = vmatpush3.bf16.msra.mxu0 %v6521_v7  ;;  %v6526_v12 = vld [vmem:[%s10052_s1 + $0x90] sm:$0xff]   ;;  %v6530_v16 = vld [vmem:[%s10052_s1 + $0x98] sm:$0xff]  }
   0x9   :  { %187 = vst [vmem:[#allocation2 + $0x40] sm:$0xf] %v6853_v2  ;;  %188 = vst [vmem:[#allocation2 + $0x44] sm:$0x1] %v6853_v2  ;;  %5285 = vmatpush3.bf16.msra.mxu1 %v6522_v8  ;;  %5222 = vmatprep.subr.bf16.mxu0 %v6523_v9  ;;  %v6531_v17 = vld [vmem:[%s10052_s1 + $0x60] sm:$0xff]   ;;  %v6535_v21 = vld [vmem:[%s10052_s1 + $0x68] sm:$0xff]  }
   0xa   :  { %189 = vst [vmem:[#allocation2 + $0x48] sm:$0xf] %v6853_v2  ;;  %190 = vst [vmem:[#allocation2 + $0x4c] sm:$0xf] %v6853_v2  ;;  %5286 = vmatprep.subr.bf16.mxu1 %v6524_v10  ;;  %v6532_v18 = vld [vmem:[%s10052_s1 + $0xe0] sm:$0xff]   ;;  %v6536_v22 = vld [vmem:[%s10052_s1 + $0xe8] sm:$0xff]  }
   0xb   :  { %191 = vst [vmem:[#allocation2 + $0x50] sm:$0x1] %v6853_v2  ;;  %192 = vst [vmem:[#allocation2 + $0x54] sm:$0xf] %v6853_v2  ;;  %v6533_v19 = vld [vmem:[%s10052_s1 + $0x20] sm:$0xff]   ;;  %v6537_v23 = vld [vmem:[%s10052_s1 + $0x28] sm:$0xff]  }
   0xc   :  { %193 = vst [vmem:[#allocation2 + $0x58] sm:$0xf] %v6853_v2  ;;  %194 = vst [vmem:[#allocation2 + $0x5c] sm:$0x1] %v6853_v2  ;;  %5223 = vmatpush3.bf16.msra.mxu0 %v6525_v11  ;;  %v6534_v20 = vld [vmem:[%s10052_s1 + $0xa0] sm:$0xff]   ;;  %v6538_v24 = vld [vmem:[%s10052_s1 + $0xa8] sm:$0xff]  }
   0xd   :  { %195 = vst [vmem:[#allocation2 + $0x60] sm:$0xf] %v6853_v2  ;;  %196 = vst [vmem:[#allocation2 + $0x64] sm:$0xf] %v6853_v2  ;;  %5287 = vmatpush3.bf16.msra.mxu1 %v6526_v12  ;;  %5224 = vmatprep.subr.bf16.mxu0 %v6527_v13  ;;  %v6539_v25 = vld [vmem:[%s10052_s1 + $0x70] sm:$0xff]   ;;  %v6543_v29 = vld [vmem:[%s10052_s1 + $0x78] sm:$0xff]  }
   0xe   :  { %197 = vst [vmem:[#allocation2 + $0x68] sm:$0x1] %v6853_v2  ;;  %198 = vst [vmem:[#allocation2 + $0x6c] sm:$0xf] %v6853_v2  ;;  %5288 = vmatprep.subr.bf16.mxu1 %v6528_v14  ;;  %v6540_v26 = vld [vmem:[%s10052_s1 + $0xf0] sm:$0xff]   ;;  %v6544_v30 = vld [vmem:[%s10052_s1 + $0xf8] sm:$0xff]  }
   0xf   :  { %199 = vst [vmem:[#allocation2 + $0x70] sm:$0xf] %v6853_v2  ;;  %200 = vst [vmem:[#allocation2 + $0x74] sm:$0x1] %v6853_v2  ;;  %v6541_v27 = vld [vmem:[%s10052_s1 + $0x30] sm:$0xff]   ;;  %v6545_v31 = vld [vmem:[%s10052_s1 + $0x38] sm:$0xff]  }
  0x10   :  { %201 = vst [vmem:[#allocation2 + $0x78] sm:$0xf] %v6853_v2  ;;  %202 = vst [vmem:[#allocation2 + $0x7c] sm:$0xf] %v6853_v2  ;;  %5225 = vmatpush3.bf16.msra.mxu0 %v6529_v15  ;;  %v6542_v28 = vld [vmem:[%s10052_s1 + $0xb0] sm:$0xff]   ;;  %v6546_v32 = vld [vmem:[%s10052_s1 + $0xb8] sm:$0xff]  }
  0x11   :  { %203 = vst [vmem:[#allocation2 + $0x80] sm:$0x1] %v6853_v2  ;;  %204 = vst [vmem:[#allocation2 + $0x84] sm:$0xf] %v6853_v2  ;;  %5289 = vmatpush3.bf16.msra.mxu1 %v6530_v16  ;;  %5226 = vmatprep.subr.bf16.mxu0 %v6531_v17  ;;  %v7043_v33 = vld [vmem:[#allocation2] sm:$0xff]   ;;  %vm588_vm6 = vcmask 1040384  }
  0x12   :  { %205 = vst [vmem:[#allocation2 + $0x88] sm:$0xf] %v6853_v2  ;;  %206 = vst [vmem:[#allocation2 + $0x8c] sm:$0x1] %v6853_v2  ;;  %5290 = vmatprep.subr.bf16.mxu1 %v6532_v18  ;;  %v225_v35 = vld [vmem:[%s10051_s0] sm:$0xf] }
  0x13   :  { %207 = vst [vmem:[#allocation2 + $0x90] sm:$0xf] %v6853_v2  ;;  %208 = vst [vmem:[#allocation2 + $0x94] sm:$0xf] %v6853_v2  ;;  %v226_v36 = vld [vmem:[%s10051_s0 + $0x4] sm:$0xf] }
  0x14   :  { %209 = vst [vmem:[#allocation2 + $0x98] sm:$0x1] %v6853_v2  ;;  %210 = vst [vmem:[#allocation2 + $0x9c] sm:$0xf] %v6853_v2  ;;  %5227 = vmatpush3.bf16.msra.mxu0 %v6533_v19  ;;  %v826_v37 = vshrl.u32 %v7043_v33, 16  ;;  %v828_v38 = vshll.u32 %v7043_v33, 16 }
  0x15   :  { %211 = vst [vmem:[#allocation2 + $0xa0] sm:$0xf] %v6853_v2  ;;  %212 = vst [vmem:[#allocation2 + $0xa4] sm:$0x1] %v6853_v2  ;;  %5291 = vmatpush3.bf16.msra.mxu1 %v6534_v20  ;;  %5228 = vmatprep.subr.bf16.mxu0 %v6535_v21  ;;  %vm258_vm3 = vsmask.f32 4368 }
  0x16   :  { %213 = vst [vmem:[#allocation2 + $0xa8] sm:$0xf] %v6853_v2  ;;  %214 = vst [vmem:[#allocation2 + $0xac] sm:$0xf] %v6853_v2  ;;  %5292 = vmatprep.subr.bf16.mxu1 %v6536_v22  ;;  %v6550_v40 = vld [vmem:[%s10052_s1 + $0x140] sm:$0xff]   ;;  %v261_v41 = vshrl.u32 %v225_v35, 16 }
  0x17   :  { %215 = vst [vmem:[#allocation2 + $0xb0] sm:$0x1] %v6853_v2  ;;  %216 = vst [vmem:[#allocation2 + $0xb4] sm:$0xf] %v6853_v2  ;;  %v264_v42 = vshll.u32 %v225_v35, 16  ;;  %v269_v43 = vshrl.u32 %v226_v36, 16 }
  0x18   :  { %217 = vst [vmem:[#allocation2 + $0xb8] sm:$0xf] %v6853_v2  ;;  %218 = vst [vmem:[#allocation2 + $0xbc] sm:$0x1] %v6853_v2  ;;  %5229 = vmatpush3.bf16.msra.mxu0 %v6537_v23  ;;  %v272_v44 = vshll.u32 %v226_v36, 16  ;;  %v830_v45 = vrot.slane %v828_v38, 1 }
  0x19   :  { %219 = vst [vmem:[#allocation2 + $0xc0] sm:$0xf] %v6853_v2  ;;  %220 = vst [vmem:[#allocation2 + $0xc4] sm:$0xf] %v6853_v2  ;;  %5293 = vmatpush3.bf16.msra.mxu1 %v6538_v24  ;;  %5230 = vmatprep.subr.bf16.mxu0 %v6539_v25  ;;  %vm582_vm4 = vsmask.f32 7938 }
  0x1a   :  { %221 = vst [vmem:[#allocation2 + $0xc8] sm:$0x1] %v6853_v2  ;;  %222 = vst [vmem:[#allocation2 + $0xcc] sm:$0xf] %v6853_v2  ;;  %5294 = vmatprep.subr.bf16.mxu1 %v6540_v26  ;;  %v584_v47 = vld [vmem:[#allocation2 + $0xc] sm:$0xf]  ;;  %v831_v54 = vor.u32 %v830_v45, %v826_v37 }
  0x1b   :  { %223 = vst [vmem:[#allocation2 + $0xd0] sm:$0xf] %v6853_v2  ;;  %224 = vst [vmem:[#allocation2 + $0xd4] sm:$0x1] %v6853_v2  ;;  %v7065_v48 = vld [vmem:[%s10051_s0 + $0x80] sm:$0xf] }
  0x1c   :  { %5231 = vmatpush3.bf16.msra.mxu0 %v6541_v27  ;;  %v7045_v34 = vld [vmem:[#allocation2 + $0x8] ss:$0 sps:$4 sm:$0x11]   ;;  %2777 = vst [vmem:[#allocation2] sm:$0xf] %v6853_v2  ;;  %vm7068_vm5 = vmor %vm257_vm2, %vm258_vm3  ;;  %v263_v50 = vrot.slane %v261_v41, 7 }
  0x1d   :  { %5295 = vmatpush3.bf16.msra.mxu1 %v6542_v28  ;;  %5232 = vmatprep.subr.bf16.mxu0 %v6543_v29  ;;  %2778 = vst [vmem:[#allocation2 + $0x4] sm:$0xf] %v6853_v2  ;;  %2779 = vst [vmem:[#allocation2 + $0x8] sm:$0x1] %v6853_v2  ;;  %v833_v39 = vshll.u32 %v7045_v34, 16  ;;  %v271_v51 = vrot.slane %v269_v43, 7 }
  0x1e   :  { %5296 = vmatprep.subr.bf16.mxu1 %v6544_v30  ;;  %v5150_v52 = vld [vmem:[%s10051_s0 + $0x84] sm:$0xf]  ;;  %v2865_v53 = vshrl.u32 %v7065_v48, 16  ;;  %vm7077_vm7 = vmand %vm581_vm0, %vm582_vm4  ;;  %v2868_v56 = vshll.u32 %v7065_v48, 16  ;;  %vm929_vm8 = vcmask 1046528   ;;  %v266_v59 = vor.u32 %v264_v42, %v263_v50  ;;  %v6556_v11 = vld [vmem:[%s10052_s1 + $0x148] sm:$0xff]  }
  0x1f   :  { %v835_v46 = vrot.slane %v833_v39, 1  ;;  %v2873_v57 = vshrl.u32 %v5150_v52, 16  ;;  %v6551_v58 = vld [vmem:[%s10052_s1 + $0x1c0] sm:$0xff]   ;;  %v267_v60 = vrot.slane %v263_v50, 4  ;;  %v274_v61 = vor.u32 %v272_v44, %v271_v51  ;;  %vm7092_vm9 = vmand %vm588_vm6, %vm257_vm2  ;;  %v590_v12 = vld [vmem:[#allocation2 + $0x14] sm:$0x1] }
  0x20   :  { %5233 = vmatpush3.bf16.msra.mxu0 %v6545_v31  ;;  %v7085_v62 = vrot.slane %v2865_v53, 7  ;;  %v2876_v1 = vshll.u32 %v5150_v52, 16  ;;  %v585_v5 = vsel %vm7077_vm7, %v266_v59, %v584_v47  ;;  %v930_v6 = vrot.slane %v7043_v33, 1  ;;  %v6552_v7 = vld [vmem:[%s10052_s1 + $0x100] sm:$0xff]   ;;  %v227_v13 = vld [vmem:[%s10051_s0 + $0x8] sm:$0xf] }
  0x21   :  { %5297 = vmatpush3.bf16.msra.mxu1 %v6546_v32  ;;  %5346 = vmatprep.subr.bf16.mxu0 %v6550_v40  ;;  %v836_v63 = vsel %vm824_vm1, %v831_v54, %v835_v46  ;;  %v7088_v0 = vrot.slane %v2873_v57, 7  ;;  %v275_v4 = vsel %vm7068_vm5, %v267_v60, %v274_v61  ;;  %586 = vst [vmem:[#allocation2 + $0xc] sm:$0xf] %v585_v5  ;;  %v931_v9 = vrot.slane %v7045_v34, 1  ;;  %v228_v14 = vld [vmem:[%s10051_s0 + $0xc] sm:$0xf] }
  0x22   :  { %5410 = vmatprep.subr.bf16.mxu1 %v6551_v58  ;;  %1478 = vmatprep.mubr.bf16.mxu0 %v836_v63  ;;  %587 = vst [vmem:[#allocation2 + $0x10] sm:$0xf] %v275_v4  ;;  %v2871_v8 = vrot.slane %v7085_v62, 4  ;;  %v276_v10 = vrot.slane %v271_v51, 4  ;;  %v278_v17 = vshrl.u32 %v227_v13, 16  ;;  %v281_v18 = vshll.u32 %v227_v13, 16 }
  0x23   :  { %1479 = vmatmul.mubr.bf16.vlgmr.msra.gmra.mrb[0].mxu0 %v7043_v33  ;;  %v2878_v15 = vor.u32 %v2876_v1, %v7088_v0  ;;  %v7122_v19 = vld [vmem:[%s10051_s0 + $0x88] sm:$0xf]  ;;  %v2880_v20 = vrot.slane %v7088_v0, 4  ;;  %v286_v21 = vshrl.u32 %v228_v14, 16  ;;  %v289_v22 = vshll.u32 %v228_v14, 16  ;;  %v6553_v30 = vld [vmem:[%s10052_s1 + $0x180] sm:$0xff]  }
  0x24   :  { %5347 = vmatpush3.bf16.msra.mxu0 %v6552_v7  ;;  %v591_v16 = vsel %vm7092_vm9, %v276_v10, %v590_v12  ;;  %v593_v23 = vld [vmem:[#allocation2 + $0x18] sm:$0xf]  ;;  %v5152_v24 = vld [vmem:[%s10051_s0 + $0x8c] sm:$0xf]  ;;  %v2882_v25 = vshrl.u32 %v7122_v19, 16  ;;  %v280_v26 = vrot.slane %v278_v17, 7  ;;  %v932_v39 = vsel %vm929_vm8, %v930_v6, %v931_v9 }
  0x25   :  { %5348 = vmatprep.subr.bf16.mxu0 %v6556_v11  ;;  %592 = vst [vmem:[#allocation2 + $0x14] sm:$0x1] %v591_v16  ;;  %v2885_v27 = vshll.u32 %v7122_v19, 16  ;;  %v2890_v28 = vshrl.u32 %v5152_v24, 16  ;;  %v2893_v29 = vshll.u32 %v5152_v24, 16  ;;  %v288_v31 = vrot.slane %v286_v21, 7 }
  0x26   :  { %v7133_v32 = vrot.slane %v2882_v25, 7  ;;  %v2879_v33 = vsel %vm7068_vm5, %v2871_v8, %v2878_v15  ;;  %v283_v34 = vor.u32 %v281_v18, %v280_v26  ;;  %v284_v35 = vrot.slane %v280_v26, 4  ;;  %v6557_v37 = vld [vmem:[%s10052_s1 + $0x1c8] sm:$0xff]   ;;  %v597_v58 = vld [vmem:[#allocation2 + $0x20] sm:$0x1]  ;;  %v6562_v60 = vld [vmem:[%s10052_s1 + $0x150] sm:$0xff]  }
  0x27   :  { %v7137_v36 = vrot.slane %v2890_v28, 7  ;;  %v291_v40 = vor.u32 %v289_v22, %v288_v31  ;;  %v6558_v43 = vld [vmem:[%s10052_s1 + $0x108] sm:$0xff]   ;;  %v293_v44 = vrot.slane %v288_v31, 4  ;;  %v2870_v54 = vor.u32 %v2868_v56, %v7085_v62  ;;  %v229_v59 = vld [vmem:[%s10051_s0 + $0x10] sm:$0xf] }
  0x28   :  { %v2888_v41 = vrot.slane %v7133_v32, 4  ;;  %v594_v42 = vsel %vm7077_vm7, %v283_v34, %v593_v23  ;;  %5349 = vmatpush3.bf16.msra.mxu0 %v6558_v43  ;;  %v6559_v53 = vld [vmem:[%s10052_s1 + $0x188] sm:$0xff]   ;;  %v230_v56 = vld [vmem:[%s10051_s0 + $0x14] sm:$0xf]  ;;  %v295_v62 = vshrl.u32 %v229_v59, 16  ;;  %v298_v5 = vshll.u32 %v229_v59, 16 }
  0x29   :  { %v7142_v38 = vld [vmem:[#allocation2 + $0xc] sm:$0xff]   ;;  %v292_v47 = vsel %vm7068_vm5, %v284_v35, %v291_v40  ;;  %595 = vst [vmem:[#allocation2 + $0x18] sm:$0xf] %v594_v42  ;;  %v2895_v52 = vor.u32 %v2893_v29, %v7137_v36  ;;  %v598_v48 = vsel %vm7092_vm9, %v293_v44, %v597_v58  ;;  %v303_v6 = vshrl.u32 %v230_v56, 16  ;;  %v600_v8 = vld [vmem:[#allocation2 + $0x24] sm:$0xf]  ;;  %5350 = vmatprep.subr.bf16.mxu0 %v6562_v60 }
  0x2a   :  { %2780 = vst [vmem:[#allocation2 + $0xc] sm:$0xf] %v6853_v2  ;;  %2781 = vst [vmem:[#allocation2 + $0x10] sm:$0xf] %v6853_v2  ;;  %1575 = vmatprep.mubr.bf16.mxu1 %v7142_v38  ;;  %v838_v45 = vshrl.u32 %v7142_v38, 16  ;;  %v840_v46 = vshll.u32 %v7142_v38, 16  ;;  %v2887_v0 = vor.u32 %v2885_v27, %v7133_v32 }
  0x2b   :  { %3187 = vst [vmem:[#allocation2 + $0x10] sm:$0xf] %v2879_v33  ;;  %v933_v50 = vrot.slane %v7142_v38, 1  ;;  %1576 = vmatmul.mubr.bf16.vlgmr.msra.gmra.mrb[0].mxu1 %v932_v39  ;;  %596 = vst [vmem:[#allocation2 + $0x1c] sm:$0xf] %v292_v47  ;;  %v6563_v1 = vld [vmem:[%s10052_s1 + $0x1d0] sm:$0xff]   ;;  %v2896_v11 = vsel %vm7068_vm5, %v2888_v41, %v2895_v52 }
  0x2c   :  { %v6554_v51 = vld [vmem:[#allocation2 + $0x14] ss:$0 sps:$4 sm:$0x11]   ;;  %5411 = vmatpush3.bf16.msra.mxu1 %v6553_v30  ;;  %v842_v57 = vrot.slane %v840_v46, 1  ;;  %599 = vst [vmem:[#allocation2 + $0x20] sm:$0x1] %v598_v48 }
  0x2d   :  { %2782 = vst [vmem:[#allocation2 + $0x14] sm:$0x1] %v6853_v2  ;;  %v845_v61 = vshll.u32 %v6554_v51, 16  ;;  %v934_v63 = vrot.slane %v6554_v51, 1  ;;  %5412 = vmatprep.subr.bf16.mxu1 %v6557_v37  ;;  %v306_v7 = vshll.u32 %v230_v56, 16  ;;  %v6564_v9 = vld [vmem:[%s10052_s1 + $0x110] sm:$0xff]  }
  0x2e   :  { %v843_v4 = vor.u32 %v842_v57, %v838_v45  ;;  %v297_v12 = vrot.slane %v295_v62, 7  ;;  %v7189_v13 = vld [vmem:[%s10051_s0 + $0x90] sm:$0xf]  ;;  %v5154_v14 = vld [vmem:[%s10051_s0 + $0x94] sm:$0xf]  ;;  %v305_v17 = vrot.slane %v303_v6, 7  ;;  %5351 = vmatpush3.bf16.msra.mxu0 %v6564_v9 }
  0x2f   :  { %v847_v10 = vrot.slane %v845_v61, 1  ;;  %v7195_v16 = vsel %vm929_vm8, %v933_v50, %v934_v63  ;;  %v2899_v18 = vshrl.u32 %v7189_v13, 16  ;;  %v2907_v21 = vshrl.u32 %v5154_v14, 16  ;;  %v6565_v26 = vld [vmem:[%s10052_s1 + $0x190] sm:$0xff]   ;;  %v6568_v47 = vld [vmem:[%s10052_s1 + $0x158] sm:$0xff]  }
  0x30   :  { %5413 = vmatpush3.bf16.msra.mxu1 %v6559_v53  ;;  %v300_v24 = vor.u32 %v298_v5, %v297_v12  ;;  %v301_v25 = vrot.slane %v297_v12, 4  ;;  %v308_v29 = vor.u32 %v306_v7, %v305_v17  ;;  %v2910_v33 = vshll.u32 %v5154_v14, 16  ;;  %v604_v52 = vld [vmem:[#allocation2 + $0x2c] sm:$0x1]  ;;  %v231_v19 = vld [vmem:[%s10051_s0 + $0x18] sm:$0xf]  ;;  %5352 = vmatprep.subr.bf16.mxu0 %v6568_v47 }
  0x31   :  { %v3184_v15 = vld [vmem:[#allocation2 + $0xc] sm:$0xf]  ;;  %v7201_v23 = vsel %vm824_vm1, %v843_v4, %v847_v10  ;;  %5414 = vmatprep.subr.bf16.mxu1 %v6563_v1  ;;  %v7209_v30 = vrot.slane %v2899_v18, 7  ;;  %v7211_v31 = vrot.slane %v2907_v21, 7  ;;  %v310_v46 = vrot.slane %v305_v17, 4  ;;  %v6569_v27 = vld [vmem:[%s10052_s1 + $0x1d8] sm:$0xff]  }
  0x32   :  { %v3185_v22 = vsel %vm7077_vm7, %v2870_v54, %v3184_v15  ;;  %1486 = vmatprep.mubr.bf16.mxu0 %v7201_v23  ;;  %v7207_v28 = vld [vmem:[#allocation2 + $0x18] sm:$0xff]   ;;  %v601_v35 = vsel %vm7077_vm7, %v300_v24, %v600_v8  ;;  %v309_v41 = vsel %vm7068_vm5, %v301_v25, %v308_v29  ;;  %v2897_v53 = vrot.slane %v7137_v36, 4  ;;  %v607_v48 = vld [vmem:[#allocation2 + $0x30] sm:$0xf]  ;;  %v6574_v18 = vld [vmem:[%s10052_s1 + $0x160] sm:$0xff]  }
  0x33   :  { %3186 = vst [vmem:[#allocation2 + $0xc] sm:$0xf] %v3185_v22  ;;  %2783 = vst [vmem:[#allocation2 + $0x18] sm:$0xf] %v6853_v2  ;;  %1487 = vmatmul.mubr.bf16.gmra.mrb[4].mxu0 %v7142_v38  ;;  %1583 = vmatprep.mubr.bf16.mxu1 %v7207_v28  ;;  %v850_v39 = vshrl.u32 %v7207_v28, 16  ;;  %v852_v40 = vshll.u32 %v7207_v28, 16  ;;  %v2912_v44 = vor.u32 %v2910_v33, %v7211_v31 }
  0x34   :  { %v3188_v34 = vld [vmem:[#allocation2 + $0x14] sm:$0x1]  ;;  %2784 = vst [vmem:[#allocation2 + $0x1c] sm:$0xf] %v6853_v2  ;;  %602 = vst [vmem:[#allocation2 + $0x24] sm:$0xf] %v601_v35  ;;  %5415 = vmatpush3.bf16.msra.mxu1 %v6565_v26  ;;  %v605_v54 = vsel %vm7092_vm9, %v310_v46, %v604_v52 }
  0x35   :  { %v3189_v37 = vsel %vm7092_vm9, %v2880_v20, %v3188_v34  ;;  %3194 = vst [vmem:[#allocation2 + $0x1c] sm:$0xf] %v2896_v11  ;;  %1584 = vmatmul.mubr.bf16.gmra.mrb[4].mxu1 %v7195_v16  ;;  %v6560_v38 = vld [vmem:[#allocation2 + $0x20] ss:$0 sps:$4 sm:$0x11]   ;;  %v854_v20 = vrot.slane %v852_v40, 1  ;;  %5416 = vmatprep.subr.bf16.mxu1 %v6569_v27 }
  0x36   :  { %3190 = vst [vmem:[#allocation2 + $0x14] sm:$0x1] %v3189_v37  ;;  %603 = vst [vmem:[#allocation2 + $0x28] sm:$0xf] %v309_v41  ;;  %v2905_v42 = vrot.slane %v7209_v30, 4  ;;  %v857_v43 = vshll.u32 %v6560_v38, 16 }
  0x37   :  { %2785 = vst [vmem:[#allocation2 + $0x20] sm:$0x1] %v6853_v2  ;;  %v936_v45 = vrot.slane %v7207_v28, 1  ;;  %v855_v50 = vor.u32 %v854_v20, %v850_v39  ;;  %v937_v51 = vrot.slane %v6560_v38, 1  ;;  %v232_v57 = vld [vmem:[%s10051_s0 + $0x1c] sm:$0xf] }
  0x38   :  { %v859_v32 = vrot.slane %v857_v43, 1  ;;  %v312_v58 = vshrl.u32 %v231_v19, 16  ;;  %606 = vst [vmem:[#allocation2 + $0x2c] sm:$0x1] %v605_v54  ;;  %v315_v60 = vshll.u32 %v231_v19, 16  ;;  %v320_v61 = vshrl.u32 %v232_v57, 16 }
  0x39   :  { %v323_v63 = vshll.u32 %v232_v57, 16  ;;  %v6570_v36 = vld [vmem:[%s10052_s1 + $0x118] sm:$0xff]   ;;  %v2913_v1 = vsel %vm7068_vm5, %v2905_v42, %v2912_v44  ;;  %v7272_v8 = vsel %vm929_vm8, %v936_v45, %v937_v51  ;;  %v2902_v12 = vshll.u32 %v7189_v13, 16  ;;  %v6575_v34 = vld [vmem:[%s10052_s1 + $0x1e0] sm:$0xff]  }
  0x3a   :  { %v3191_v59 = vld [vmem:[#allocation2 + $0x18] sm:$0xf]  ;;  %v7256_v62 = vsel %vm824_vm1, %v855_v50, %v859_v32  ;;  %v314_v4 = vrot.slane %v312_v58, 7  ;;  %v322_v9 = vrot.slane %v320_v61, 7  ;;  %v5156_v10 = vld [vmem:[%s10051_s0 + $0x9c] sm:$0xf]  ;;  %5353 = vmatpush3.bf16.msra.mxu0 %v6570_v36 }
  0x3b   :  { %v3192_v56 = vsel %vm7077_vm7, %v2887_v0, %v3191_v59  ;;  %v7263_v5 = vld [vmem:[%s10051_s0 + $0x98] sm:$0xf]  ;;  %1494 = vmatprep.mubr.bf16.mxu0 %v7256_v62  ;;  %v2914_v13 = vrot.slane %v7211_v31, 4  ;;  %v2924_v33 = vshrl.u32 %v5156_v10, 16  ;;  %5354 = vmatprep.subr.bf16.mxu0 %v6574_v18  ;;  %v2927_v39 = vshll.u32 %v5156_v10, 16  ;;  %v6576_v52 = vld [vmem:[%s10052_s1 + $0x120] sm:$0xff]  }
  0x3c   :  { %v6571_v6 = vld [vmem:[%s10052_s1 + $0x198] sm:$0xff]   ;;  %3193 = vst [vmem:[#allocation2 + $0x18] sm:$0xf] %v3192_v56  ;;  %1495 = vmatmul.mubr.bf16.gmra.mrb[8].mxu0 %v7207_v28  ;;  %v317_v14 = vor.u32 %v315_v60, %v314_v4  ;;  %v318_v15 = vrot.slane %v314_v4, 4  ;;  %v2916_v17 = vshrl.u32 %v7263_v5, 16  ;;  %v325_v24 = vor.u32 %v323_v63, %v322_v9  ;;  %v6577_v63 = vld [vmem:[%s10052_s1 + $0x1a0] sm:$0xff]  }
  0x3d   :  { %v7269_v7 = vld [vmem:[#allocation2 + $0x24] sm:$0xff]   ;;  %5417 = vmatpush3.bf16.msra.mxu1 %v6571_v6  ;;  %v2904_v40 = vor.u32 %v2902_v12, %v7209_v30  ;;  %v7304_v0 = vrot.slane %v2924_v33, 7  ;;  %v327_v20 = vrot.slane %v322_v9, 4  ;;  %v611_v45 = vld [vmem:[#allocation2 + $0x38] sm:$0x1]  ;;  %v2919_v32 = vshll.u32 %v7263_v5, 16 }
  0x3e   :  { %v3195_v11 = vld [vmem:[#allocation2 + $0x20] sm:$0x1]  ;;  %2786 = vst [vmem:[#allocation2 + $0x24] sm:$0xf] %v6853_v2  ;;  %2787 = vst [vmem:[#allocation2 + $0x28] sm:$0xf] %v6853_v2  ;;  %1591 = vmatprep.mubr.bf16.mxu1 %v7269_v7  ;;  %v608_v26 = vsel %vm7077_vm7, %v317_v14, %v607_v48  ;;  %v326_v37 = vsel %vm7068_vm5, %v318_v15, %v325_v24  ;;  %5418 = vmatprep.subr.bf16.mxu1 %v6575_v34 }
  0x3f   :  { %v3196_v21 = vsel %vm7092_vm9, %v2897_v53, %v3195_v11  ;;  %3201 = vst [vmem:[#allocation2 + $0x28] sm:$0xf] %v2913_v1  ;;  %v864_v22 = vshll.u32 %v7269_v7, 16  ;;  %1592 = vmatmul.mubr.bf16.gmra.mrb[8].mxu1 %v7272_v8  ;;  %v862_v25 = vshrl.u32 %v7269_v7, 16  ;;  %v7294_v29 = vrot.slane %v2916_v17, 7  ;;  %5355 = vmatpush3.bf16.msra.mxu0 %v6576_v52 }
  0x40   :  { %3197 = vst [vmem:[#allocation2 + $0x20] sm:$0x1] %v3196_v21  ;;  %609 = vst [vmem:[#allocation2 + $0x30] sm:$0xf] %v608_v26  ;;  %v939_v38 = vrot.slane %v7269_v7, 1  ;;  %v2929_v47 = vor.u32 %v2927_v39, %v7304_v0  ;;  %v612_v30 = vsel %vm7092_vm9, %v327_v20, %v611_v45  ;;  %v2931_v9 = vrot.slane %v7304_v0, 4 }
  0x41   :  { %v866_v35 = vrot.slane %v864_v22, 1  ;;  %v6566_v41 = vld [vmem:[#allocation2 + $0x2c] ss:$0 sps:$4 sm:$0x11]   ;;  %610 = vst [vmem:[#allocation2 + $0x34] sm:$0xf] %v326_v37  ;;  %5419 = vmatpush3.bf16.msra.mxu1 %v6577_v63  ;;  %v2921_v39 = vor.u32 %v2919_v32, %v7294_v29 }
  0x42   :  { %2788 = vst [vmem:[#allocation2 + $0x2c] sm:$0x1] %v6853_v2  ;;  %v869_v43 = vshll.u32 %v6566_v41, 16  ;;  %v2922_v44 = vrot.slane %v7294_v29, 4  ;;  %v940_v50 = vrot.slane %v6566_v41, 1  ;;  %v6580_v21 = vld [vmem:[%s10052_s1 + $0x168] sm:$0xff]  }
  0x43   :  { %v867_v42 = vor.u32 %v866_v35, %v862_v25  ;;  %v233_v51 = vld [vmem:[%s10051_s0 + $0x20] sm:$0xf]  ;;  %613 = vst [vmem:[#allocation2 + $0x38] sm:$0x1] %v612_v30  ;;  %v234_v53 = vld [vmem:[%s10051_s0 + $0x24] sm:$0xf]  ;;  %5356 = vmatprep.subr.bf16.mxu0 %v6580_v21 }
  0x44   :  { %v871_v27 = vrot.slane %v869_v43, 1  ;;  %v329_v54 = vshrl.u32 %v233_v51, 16  ;;  %v332_v57 = vshll.u32 %v233_v51, 16  ;;  %v337_v58 = vshrl.u32 %v234_v53, 16  ;;  %v614_v60 = vld [vmem:[#allocation2 + $0x3c] sm:$0xf] }
  0x45   :  { %v3198_v46 = vld [vmem:[#allocation2 + $0x24] sm:$0xf]  ;;  %v340_v59 = vshll.u32 %v234_v53, 16  ;;  %v7325_v61 = vld [vmem:[%s10051_s0 + $0xa0] sm:$0xf]  ;;  %v2930_v36 = vsel %vm7068_vm5, %v2922_v44, %v2929_v47  ;;  %v7343_v6 = vsel %vm929_vm8, %v939_v38, %v940_v50  ;;  %v6581_v29 = vld [vmem:[%s10052_s1 + $0x1e8] sm:$0xff]  }
  0x46   :  { %v3199_v19 = vsel %vm7077_vm7, %v2904_v40, %v3198_v46  ;;  %v7331_v48 = vsel %vm824_vm1, %v867_v42, %v871_v27  ;;  %v331_v56 = vrot.slane %v329_v54, 7  ;;  %v5158_v1 = vld [vmem:[%s10051_s0 + $0xa4] sm:$0xf]  ;;  %v2933_v4 = vshrl.u32 %v7325_v61, 16  ;;  %v235_v46 = vld [vmem:[%s10051_s0 + $0x28] sm:$0xf]  ;;  %5420 = vmatprep.subr.bf16.mxu1 %v6581_v29 }
  0x47   :  { %3200 = vst [vmem:[#allocation2 + $0x24] sm:$0xf] %v3199_v19  ;;  %1502 = vmatprep.mubr.bf16.mxu0 %v7331_v48  ;;  %v339_v10 = vrot.slane %v337_v58, 7  ;;  %v2941_v11 = vshrl.u32 %v5158_v1, 16  ;;  %v2936_v18 = vshll.u32 %v7325_v61, 16  ;;  %v2944_v31 = vshll.u32 %v5158_v1, 16 }
  0x48   :  { %v7340_v5 = vld [vmem:[#allocation2 + $0x30] sm:$0xff]   ;;  %1503 = vmatmul.mubr.bf16.gmra.mrb[12].mxu0 %v7269_v7  ;;  %v334_v14 = vor.u32 %v332_v57, %v331_v56  ;;  %v335_v15 = vrot.slane %v331_v56, 4  ;;  %v7349_v17 = vrot.slane %v2933_v4, 7  ;;  %v618_v45 = vld [vmem:[#allocation2 + $0x44] sm:$0x1]  ;;  %v346_v52 = vshrl.u32 %v235_v46, 16 }
  0x49   :  { %v3202_v12 = vld [vmem:[#allocation2 + $0x2c] sm:$0x1]  ;;  %2789 = vst [vmem:[#allocation2 + $0x30] sm:$0xf] %v6853_v2  ;;  %2790 = vst [vmem:[#allocation2 + $0x34] sm:$0xf] %v6853_v2  ;;  %1599 = vmatprep.mubr.bf16.mxu1 %v7340_v5  ;;  %v342_v26 = vor.u32 %v340_v59, %v339_v10 }
  0x4a   :  { %v3203_v22 = vsel %vm7092_vm9, %v2914_v13, %v3202_v12  ;;  %3208 = vst [vmem:[#allocation2 + $0x34] sm:$0xf] %v2930_v36  ;;  %v874_v24 = vshrl.u32 %v7340_v5, 16  ;;  %v876_v25 = vshll.u32 %v7340_v5, 16  ;;  %1600 = vmatmul.mubr.bf16.gmra.mrb[12].mxu1 %v7343_v6  ;;  %v615_v33 = vsel %vm7077_vm7, %v334_v14, %v614_v60  ;;  %v236_v51 = vld [vmem:[%s10051_s0 + $0x2c] sm:$0xf] }
  0x4b   :  { %3204 = vst [vmem:[#allocation2 + $0x2c] sm:$0x1] %v3203_v22  ;;  %v7365_v34 = vrot.slane %v2941_v11, 7  ;;  %v6572_v35 = vld [vmem:[#allocation2 + $0x38] ss:$0 sps:$4 sm:$0x11]   ;;  %v343_v37 = vsel %vm7068_vm5, %v335_v15, %v342_v26 }
  0x4c   :  { %v878_v13 = vrot.slane %v876_v25, 1  ;;  %616 = vst [vmem:[#allocation2 + $0x3c] sm:$0xf] %v615_v33  ;;  %2791 = vst [vmem:[#allocation2 + $0x38] sm:$0x1] %v6853_v2  ;;  %v2939_v40 = vrot.slane %v7349_v17, 4 }
  0x4d   :  { %617 = vst [vmem:[#allocation2 + $0x40] sm:$0xf] %v343_v37  ;;  %v344_v41 = vrot.slane %v339_v10, 4  ;;  %v881_v20 = vshll.u32 %v6572_v35, 16  ;;  %v942_v42 = vrot.slane %v7340_v5, 1  ;;  %v2946_v43 = vor.u32 %v2944_v31, %v7365_v34  ;;  %v6582_v57 = vld [vmem:[%s10052_s1 + $0x128] sm:$0xff]  }
  0x4e   :  { %v879_v38 = vor.u32 %v878_v13, %v874_v24  ;;  %v943_v44 = vrot.slane %v6572_v35, 1  ;;  %v349_v27 = vshll.u32 %v235_v46, 16  ;;  %v354_v32 = vshrl.u32 %v236_v51, 16  ;;  %v621_v54 = vld [vmem:[#allocation2 + $0x48] sm:$0xf]  ;;  %5357 = vmatpush3.bf16.msra.mxu0 %v6582_v57  ;;  %v6586_v35 = vld [vmem:[%s10052_s1 + $0x170] sm:$0xff]  }
  0x4f   :  { %v883_v50 = vrot.slane %v881_v20, 1  ;;  %v619_v30 = vsel %vm7092_vm9, %v344_v41, %v618_v45  ;;  %v357_v53 = vshll.u32 %v236_v51, 16  ;;  %v348_v59 = vrot.slane %v346_v52, 7  ;;  %v7396_v60 = vld [vmem:[%s10051_s0 + $0xa8] sm:$0xf]  ;;  %5358 = vmatprep.subr.bf16.mxu0 %v6586_v35  ;;  %v6587_v52 = vld [vmem:[%s10052_s1 + $0x1f0] sm:$0xff]  }
  0x50   :  { %v3205_v47 = vld [vmem:[#allocation2 + $0x30] sm:$0xf]  ;;  %620 = vst [vmem:[#allocation2 + $0x44] sm:$0x1] %v619_v30  ;;  %v5160_v63 = vld [vmem:[%s10051_s0 + $0xac] sm:$0xf]  ;;  %v2947_v56 = vsel %vm7068_vm5, %v2939_v40, %v2946_v43  ;;  %v7412_v14 = vsel %vm929_vm8, %v942_v42, %v943_v44 }
  0x51   :  { %v3206_v19 = vsel %vm7077_vm7, %v2921_v39, %v3205_v47  ;;  %v7391_v58 = vsel %vm824_vm1, %v879_v38, %v883_v50  ;;  %v6583_v36 = vld [vmem:[%s10052_s1 + $0x1a8] sm:$0xff]   ;;  %v356_v1 = vrot.slane %v354_v32, 7  ;;  %v2950_v4 = vshrl.u32 %v7396_v60, 16  ;;  %v625_v44 = vld [vmem:[#allocation2 + $0x50] sm:$0x1] }
  0x52   :  { %3207 = vst [vmem:[#allocation2 + $0x30] sm:$0xf] %v3206_v19  ;;  %1510 = vmatprep.mubr.bf16.mxu0 %v7391_v58  ;;  %v2958_v10 = vshrl.u32 %v5160_v63, 16  ;;  %v351_v15 = vor.u32 %v349_v27, %v348_v59  ;;  %v352_v21 = vrot.slane %v348_v59, 4  ;;  %5421 = vmatpush3.bf16.msra.mxu1 %v6583_v36  ;;  %v2961_v31 = vshll.u32 %v5160_v63, 16  ;;  %v6588_v57 = vld [vmem:[%s10052_s1 + $0x130] sm:$0xff]  }
  0x53   :  { %v3209_v11 = vld [vmem:[#allocation2 + $0x38] sm:$0x1]  ;;  %1511 = vmatmul.mubr.bf16.gmra.mrb[16].mxu0 %v7340_v5  ;;  %v359_v24 = vor.u32 %v357_v53, %v356_v1  ;;  %v7420_v25 = vrot.slane %v2950_v4, 7  ;;  %v2948_v13 = vrot.slane %v7365_v34, 4  ;;  %v2938_v38 = vor.u32 %v2936_v18, %v7349_v17  ;;  %v237_v45 = vld [vmem:[%s10051_s0 + $0x30] sm:$0xf]  ;;  %5422 = vmatprep.subr.bf16.mxu1 %v6587_v52 }
  0x54   :  { %v7408_v12 = vld [vmem:[#allocation2 + $0x3c] sm:$0xff]   ;;  %v3210_v22 = vsel %vm7092_vm9, %v2931_v9, %v3209_v11  ;;  %v7422_v26 = vrot.slane %v2958_v10, 7  ;;  %v622_v9 = vsel %vm7077_vm7, %v351_v15, %v621_v54  ;;  %v361_v29 = vrot.slane %v356_v1, 4  ;;  %v238_v61 = vld [vmem:[%s10051_s0 + $0x34] sm:$0xf]  ;;  %5359 = vmatpush3.bf16.msra.mxu0 %v6588_v57 }
  0x55   :  { %2792 = vst [vmem:[#allocation2 + $0x3c] sm:$0xf] %v6853_v2  ;;  %2793 = vst [vmem:[#allocation2 + $0x40] sm:$0xf] %v6853_v2  ;;  %1607 = vmatprep.mubr.bf16.mxu1 %v7408_v12  ;;  %v886_v33 = vshrl.u32 %v7408_v12, 16  ;;  %v888_v0 = vshll.u32 %v7408_v12, 16  ;;  %v360_v37 = vsel %vm7068_vm5, %v352_v21, %v359_v24 }
  0x56   :  { %3211 = vst [vmem:[#allocation2 + $0x38] sm:$0x1] %v3210_v22  ;;  %3215 = vst [vmem:[#allocation2 + $0x40] sm:$0xf] %v2947_v56  ;;  %1608 = vmatmul.mubr.bf16.gmra.mrb[16].mxu1 %v7412_v14  ;;  %v2956_v39 = vrot.slane %v7420_v25, 4  ;;  %v2963_v34 = vor.u32 %v2961_v31, %v7422_v26  ;;  %v945_v43 = vrot.slane %v7408_v12, 1  ;;  %v626_v27 = vsel %vm7092_vm9, %v361_v29, %v625_v44 }
  0x57   :  { %623 = vst [vmem:[#allocation2 + $0x48] sm:$0xf] %v622_v9  ;;  %v6578_v40 = vld [vmem:[#allocation2 + $0x44] ss:$0 sps:$4 sm:$0x11]   ;;  %v890_v41 = vrot.slane %v888_v0, 1 }
  0x58   :  { %624 = vst [vmem:[#allocation2 + $0x4c] sm:$0xf] %v360_v37  ;;  %2794 = vst [vmem:[#allocation2 + $0x44] sm:$0x1] %v6853_v2  ;;  %v893_v42 = vshll.u32 %v6578_v40, 16  ;;  %v946_v46 = vrot.slane %v6578_v40, 1  ;;  %v2964_v63 = vsel %vm7068_vm5, %v2956_v39, %v2963_v34 }
  0x59   :  { %v891_v20 = vor.u32 %v890_v41, %v886_v33  ;;  %v363_v17 = vshrl.u32 %v237_v45, 16  ;;  %v366_v18 = vshll.u32 %v237_v45, 16  ;;  %v371_v30 = vshrl.u32 %v238_v61, 16  ;;  %v628_v53 = vld [vmem:[#allocation2 + $0x54] sm:$0xf] }
  0x5a   :  { %v895_v50 = vrot.slane %v893_v42, 1  ;;  %v374_v51 = vshll.u32 %v238_v61, 16  ;;  %v7459_v54 = vld [vmem:[%s10051_s0 + $0xb0] sm:$0xf]  ;;  %627 = vst [vmem:[#allocation2 + $0x50] sm:$0x1] %v626_v27  ;;  %v7477_v10 = vsel %vm929_vm8, %v945_v43, %v946_v46 }
  0x5b   :  { %v365_v32 = vrot.slane %v363_v17, 7  ;;  %v373_v36 = vrot.slane %v371_v30, 7  ;;  %v5162_v56 = vld [vmem:[%s10051_s0 + $0xb4] sm:$0xf]  ;;  %v2967_v1 = vshrl.u32 %v7459_v54, 16  ;;  %v2953_v24 = vshll.u32 %v7396_v60, 16 }
  0x5c   :  { %v3212_v47 = vld [vmem:[#allocation2 + $0x3c] sm:$0xf]  ;;  %v7465_v59 = vsel %vm824_vm1, %v891_v20, %v895_v50  ;;  %v2975_v21 = vshrl.u32 %v5162_v56, 16  ;;  %v2978_v37 = vshll.u32 %v5162_v56, 16  ;;  %v2965_v46 = vrot.slane %v7422_v26, 4 }
  0x5d   :  { %v3213_v19 = vsel %vm7077_vm7, %v2938_v38, %v3212_v47  ;;  %1518 = vmatprep.mubr.bf16.mxu0 %v7465_v59  ;;  %v368_v11 = vor.u32 %v366_v18, %v365_v32  ;;  %v369_v15 = vrot.slane %v365_v32, 4  ;;  %v376_v33 = vor.u32 %v374_v51, %v373_v36  ;;  %v6589_v38 = vld [vmem:[%s10052_s1 + $0x1b0] sm:$0xff]   ;;  %v632_v42 = vld [vmem:[#allocation2 + $0x5c] sm:$0x1]  ;;  %v239_v61 = vld [vmem:[%s10051_s0 + $0x38] sm:$0xf] }
  0x5e   :  { %3214 = vst [vmem:[#allocation2 + $0x3c] sm:$0xf] %v3213_v19  ;;  %1519 = vmatmul.mubr.bf16.gmra.mrb[20].mxu0 %v7408_v12  ;;  %v7483_v0 = vrot.slane %v2967_v1, 7  ;;  %v7495_v40 = vrot.slane %v2975_v21, 7  ;;  %v2955_v41 = vor.u32 %v2953_v24, %v7420_v25  ;;  %v378_v20 = vrot.slane %v373_v36, 4  ;;  %5423 = vmatpush3.bf16.msra.mxu1 %v6589_v38  ;;  %v6592_v1 = vld [vmem:[%s10052_s1 + $0x178] sm:$0xff]  }
  0x5f   :  { %v7474_v4 = vld [vmem:[#allocation2 + $0x48] sm:$0xff]   ;;  %v3216_v22 = vld [vmem:[#allocation2 + $0x44] sm:$0x1]  ;;  %v629_v35 = vsel %vm7077_vm7, %v368_v11, %v628_v53  ;;  %v377_v39 = vsel %vm7068_vm5, %v369_v15, %v376_v33  ;;  %v240_v17 = vld [vmem:[%s10051_s0 + $0x3c] sm:$0xf]  ;;  %v380_v30 = vshrl.u32 %v239_v61, 16  ;;  %5360 = vmatprep.subr.bf16.mxu0 %v6592_v1 }
  0x60   :  { %2795 = vst [vmem:[#allocation2 + $0x48] sm:$0xf] %v6853_v2  ;;  %2796 = vst [vmem:[#allocation2 + $0x4c] sm:$0xf] %v6853_v2  ;;  %v3217_v9 = vsel %vm7092_vm9, %v2948_v13, %v3216_v22  ;;  %1615 = vmatprep.mubr.bf16.mxu1 %v7474_v4  ;;  %v900_v31 = vshll.u32 %v7474_v4, 16  ;;  %v898_v60 = vshrl.u32 %v7474_v4, 16  ;;  %v2980_v44 = vor.u32 %v2978_v37, %v7495_v40 }
  0x61   :  { %3222 = vst [vmem:[#allocation2 + $0x4c] sm:$0xf] %v2964_v63  ;;  %3218 = vst [vmem:[#allocation2 + $0x44] sm:$0x1] %v3217_v9  ;;  %1616 = vmatmul.mubr.bf16.gmra.mrb[20].mxu1 %v7477_v10  ;;  %v2973_v43 = vrot.slane %v7483_v0, 4  ;;  %v948_v29 = vrot.slane %v7474_v4, 1  ;;  %v633_v25 = vsel %vm7092_vm9, %v378_v20, %v632_v42 }
  0x62   :  { %630 = vst [vmem:[#allocation2 + $0x54] sm:$0xf] %v629_v35  ;;  %v902_v13 = vrot.slane %v900_v31, 1  ;;  %631 = vst [vmem:[#allocation2 + $0x58] sm:$0xf] %v377_v39  ;;  %v383_v26 = vshll.u32 %v239_v61, 16 }
  0x63   :  { %v6584_v34 = vld [vmem:[#allocation2 + $0x50] ss:$0 sps:$4 sm:$0x11]   ;;  %634 = vst [vmem:[#allocation2 + $0x5c] sm:$0x1] %v633_v25  ;;  %v388_v52 = vshrl.u32 %v240_v17, 16  ;;  %v2981_v63 = vsel %vm7068_vm5, %v2973_v43, %v2980_v44 }
  0x64   :  { %v903_v45 = vor.u32 %v902_v13, %v898_v60  ;;  %2797 = vst [vmem:[#allocation2 + $0x50] sm:$0x1] %v6853_v2  ;;  %v905_v47 = vshll.u32 %v6584_v34, 16  ;;  %v949_v50 = vrot.slane %v6584_v34, 1  ;;  %v391_v19 = vshll.u32 %v240_v17, 16  ;;  %v6593_v39 = vld [vmem:[%s10052_s1 + $0x1f8] sm:$0xff]  }
  0x65   :  { %v635_v27 = vld [vmem:[#allocation2 + $0x60] sm:$0xf]  ;;  %v7519_v32 = vld [vmem:[%s10051_s0 + $0xb8] sm:$0xf]  ;;  %v5164_v53 = vld [vmem:[%s10051_s0 + $0xbc] sm:$0xf]  ;;  %5424 = vmatprep.subr.bf16.mxu1 %v6593_v39 }
  0x66   :  { %v907_v57 = vrot.slane %v905_v47, 1  ;;  %v382_v36 = vrot.slane %v380_v30, 7  ;;  %v2984_v56 = vshrl.u32 %v7519_v32, 16  ;;  %v2970_v15 = vshll.u32 %v7459_v54, 16  ;;  %v6594_v25 = vld [vmem:[%s10052_s1 + $0x138] sm:$0xff]  }
  0x67   :  { %v3219_v18 = vld [vmem:[#allocation2 + $0x48] sm:$0xf]  ;;  %v7534_v21 = vsel %vm929_vm8, %v948_v29, %v949_v50  ;;  %v7536_v22 = vrot.slane %v388_v52, 7  ;;  %v2992_v24 = vshrl.u32 %v5164_v53, 16  ;;  %v2995_v20 = vshll.u32 %v5164_v53, 16  ;;  %5361 = vmatpush3.bf16.msra.mxu0 %v6594_v25 }
  0x68   :  { %v3220_v51 = vsel %vm7077_vm7, %v2955_v41, %v3219_v18  ;;  %v7539_v33 = vsel %vm824_vm1, %v903_v45, %v907_v57  ;;  %v385_v9 = vor.u32 %v383_v26, %v382_v36  ;;  %v386_v31 = vrot.slane %v382_v36, 4  ;;  %v6596_v26 = vld [vmem:[%s10052_s1 + $0x200] sm:$0xff]   ;;  %v642_v39 = vld [vmem:[#allocation2 + $0x6c] sm:$0xf] }
  0x69   :  { %3221 = vst [vmem:[#allocation2 + $0x48] sm:$0xf] %v3220_v51  ;;  %v7530_v11 = vld [vmem:[#allocation2 + $0x54] sm:$0xff]   ;;  %v7543_v35 = vrot.slane %v2984_v56, 7  ;;  %1526 = vmatprep.mubr.bf16.mxu0 %v7539_v33  ;;  %v393_v60 = vor.u32 %v391_v19, %v7536_v22  ;;  %v7557_v38 = vrot.slane %v2992_v24, 7  ;;  %v2972_v45 = vor.u32 %v2970_v15, %v7483_v0  ;;  %6323 = vmatprep.subr.bf16.mxu0 %v6596_v26 }
  0x6a   :  { %2798 = vst [vmem:[#allocation2 + $0x54] sm:$0xf] %v6853_v2  ;;  %2799 = vst [vmem:[#allocation2 + $0x58] sm:$0xf] %v6853_v2  ;;  %1623 = vmatprep.mubr.bf16.mxu1 %v7530_v11  ;;  %v910_v54 = vshrl.u32 %v7530_v11, 16  ;;  %v912_v37 = vshll.u32 %v7530_v11, 16  ;;  %1527 = vmatmul.mubr.bf16.gmra.mrb[24].mxu0 %v7474_v4  ;;  %v636_v41 = vsel %vm7077_vm7, %v385_v9, %v635_v27 }
  0x6b   :  { %3229 = vst [vmem:[#allocation2 + $0x58] sm:$0xf] %v2981_v63  ;;  %v3223_v13 = vld [vmem:[#allocation2 + $0x50] sm:$0x1]  ;;  %1624 = vmatmul.mubr.bf16.gmra.mrb[24].mxu1 %v7534_v21  ;;  %v394_v44 = vsel %vm7068_vm5, %v386_v31, %v393_v60  ;;  %637 = vst [vmem:[#allocation2 + $0x60] sm:$0xf] %v636_v41  ;;  %v2997_v18 = vor.u32 %v2995_v20, %v7557_v38 }
  0x6c   :  { %v3224_v42 = vsel %vm7092_vm9, %v2965_v46, %v3223_v13  ;;  %v6590_v34 = vld [vmem:[#allocation2 + $0x5c] ss:$0 sps:$4 sm:$0x11]   ;;  %v914_v43 = vrot.slane %v912_v37, 1  ;;  %638 = vst [vmem:[#allocation2 + $0x64] sm:$0xf] %v394_v44 }
  0x6d   :  { %3225 = vst [vmem:[#allocation2 + $0x50] sm:$0x1] %v3224_v42  ;;  %2800 = vst [vmem:[#allocation2 + $0x5c] sm:$0x1] %v6853_v2  ;;  %v2990_v29 = vrot.slane %v7543_v35, 4  ;;  %v917_v61 = vshll.u32 %v6590_v34, 16 }
  0x6e   :  { %v915_v46 = vor.u32 %v914_v43, %v910_v54  ;;  %v951_v17 = vrot.slane %v7530_v11, 1  ;;  %v952_v47 = vrot.slane %v6590_v34, 1  ;;  %v6595_v0 = vld [vmem:[%s10052_s1 + $0x1b8] sm:$0xff]   ;;  %v2982_v52 = vrot.slane %v7495_v40, 4  ;;  %v6659_v27 = vld [vmem:[%s10052_s1 + $0x40] sm:$0xff]   ;;  %v6597_v54 = vld [vmem:[%s10052_s1 + $0x208] sm:$0xff]  }
  0x6f   :  { %v919_v30 = vrot.slane %v917_v61, 1  ;;  %5425 = vmatpush3.bf16.msra.mxu1 %v6595_v0  ;;  %v2998_v53 = vsel %vm7068_vm5, %v2990_v29, %v2997_v18  ;;  %v395_v36 = vrot.slane %v7536_v22, 4  ;;  %v2987_v1 = vshll.u32 %v7519_v32, 16  ;;  %v639_v15 = vld [vmem:[#allocation2 + $0x68] sm:$0x1] }
  0x70   :  { %5490 = vmatprep.subr.bf16.mxu1 %v6659_v27  ;;  %v7593_v40 = vsel %vm929_vm8, %v951_v17, %v952_v47  ;;  %v241_v24 = vld [vmem:[%s10051_s0 + $0x40] sm:$0xf]  ;;  %v646_v41 = vld [vmem:[#allocation2 + $0x74] sm:$0x1]  ;;  %v5166_v20 = vld [vmem:[%s10051_s0 + $0xc4] sm:$0xf] }
  0x71   :  { %v3226_v50 = vld [vmem:[#allocation2 + $0x54] sm:$0xf]  ;;  %v7581_v19 = vsel %vm824_vm1, %v915_v46, %v919_v30  ;;  %v640_v22 = vsel %vm7092_vm9, %v395_v36, %v639_v15  ;;  %v2989_v32 = vor.u32 %v2987_v1, %v7543_v35  ;;  %v397_v9 = vshrl.u32 %v241_v24, 16  ;;  %v7620_v35 = vld [vmem:[%s10051_s0 + $0xc0] sm:$0xf]  ;;  %v6599_v1 = vld [vmem:[%s10052_s1 + $0x218] sm:$0xff]  }
  0x72   :  { %v3227_v51 = vsel %vm7077_vm7, %v2972_v45, %v3226_v50  ;;  %1534 = vmatprep.mubr.bf16.mxu0 %v7581_v19  ;;  %641 = vst [vmem:[#allocation2 + $0x68] sm:$0x1] %v640_v22  ;;  %v400_v31 = vshll.u32 %v241_v24, 16  ;;  %v3001_v43 = vshrl.u32 %v7620_v35, 16  ;;  %v3009_v44 = vshrl.u32 %v5166_v20, 16  ;;  %v6598_v46 = vld [vmem:[%s10052_s1 + $0x210] sm:$0xff]  }
  0x73   :  { %3228 = vst [vmem:[#allocation2 + $0x54] sm:$0xf] %v3227_v51  ;;  %v7589_v63 = vld [vmem:[#allocation2 + $0x60] sm:$0xff]   ;;  %1535 = vmatmul.mubr.bf16.gmra.mrb[28].mxu0 %v7530_v11  ;;  %v399_v13 = vrot.slane %v397_v9, 7  ;;  %v3012_v17 = vshll.u32 %v5166_v20, 16 }
  0x74   :  { %v3230_v57 = vld [vmem:[#allocation2 + $0x5c] sm:$0x1]  ;;  %2801 = vst [vmem:[#allocation2 + $0x60] sm:$0xf] %v6853_v2  ;;  %2802 = vst [vmem:[#allocation2 + $0x64] sm:$0xf] %v6853_v2  ;;  %1672 = vmatprep.mubr.bf16.mxu0 %v7195_v16  ;;  %1631 = vmatprep.mubr.bf16.mxu1 %v7589_v63 }
  0x75   :  { %v3231_v56 = vsel %vm7092_vm9, %v2982_v52, %v3230_v57  ;;  %3236 = vst [vmem:[#allocation2 + $0x64] sm:$0xf] %v2998_v53  ;;  %1632 = vmatmul.mubr.bf16.gmra.mrb[28].mxu1 %v7593_v40  ;;  %v242_v16 = vld [vmem:[%s10051_s0 + $0x44] sm:$0xf]  ;;  %v402_v29 = vor.u32 %v400_v31, %v399_v13  ;;  %v403_v25 = vrot.slane %v399_v13, 4  ;;  %v7639_v0 = vrot.slane %v3001_v43, 7 }
  0x76   :  { %3232 = vst [vmem:[#allocation2 + $0x5c] sm:$0x1] %v3231_v56  ;;  %1769 = vmatprep.mubr.bf16.mxu1 %v7256_v62  ;;  %v405_v37 = vshrl.u32 %v242_v16, 16  ;;  %v408_v60 = vshll.u32 %v242_v16, 16  ;;  %v243_v18 = vld [vmem:[%s10051_s0 + $0x48] sm:$0xf] }
  0x77   :  { %v643_v47 = vsel %vm7077_vm7, %v402_v29, %v642_v39  ;;  %v244_v50 = vld [vmem:[%s10051_s0 + $0x4c] sm:$0xf]  ;;  %v414_v30 = vshrl.u32 %v243_v18, 16  ;;  %v6660_v51 = vld [vmem:[%s10052_s1] sm:$0xff]   ;;  %v7654_v53 = vrot.slane %v3009_v44, 7  ;;  %v3007_v39 = vrot.slane %v7639_v0, 4 }
  0x78   :  { %v407_v34 = vrot.slane %v405_v37, 7  ;;  %644 = vst [vmem:[#allocation2 + $0x6c] sm:$0xf] %v643_v47  ;;  %v6661_v57 = vld [vmem:[%s10052_s1 + $0x48] sm:$0xff]   ;;  %v422_v56 = vshrl.u32 %v244_v50, 16  ;;  %v425_v15 = vshll.u32 %v244_v50, 16 }
  0x79   :  { %v7648_v52 = vld [vmem:[#allocation2 + $0x68] ss:$0 sps:$4 sm:$0x11]   ;;  %v416_v36 = vrot.slane %v414_v30, 7  ;;  %v649_v22 = vld [vmem:[#allocation2 + $0x78] sm:$0xf]  ;;  %v3014_v13 = vor.u32 %v3012_v17, %v7654_v53 }
  0x7a   :  { %v410_v61 = vor.u32 %v408_v60, %v407_v34  ;;  %2803 = vst [vmem:[#allocation2 + $0x68] sm:$0x1] %v6853_v2  ;;  %v7666_v24 = vld [vmem:[%s10051_s0 + $0xc8] sm:$0xf]  ;;  %v424_v9 = vrot.slane %v422_v56, 7  ;;  %v2999_v60 = vrot.slane %v7557_v38, 4 }
  0x7b   :  { %v3233_v42 = vld [vmem:[#allocation2 + $0x60] sm:$0xf]  ;;  %1673 = vmatmul.mubr.bf16.vlgmr.msra.gmra.mrb[32].mxu0 %v7201_v23  ;;  %v412_v23 = vrot.slane %v407_v34, 4  ;;  %v420_v16 = vrot.slane %v416_v36, 4  ;;  %v5168_v31 = vld [vmem:[%s10051_s0 + $0xcc] sm:$0xf]  ;;  %v3015_v30 = vsel %vm7068_vm5, %v3007_v39, %v3014_v13 }
  0x7c   :  { %v3234_v45 = vsel %vm7077_vm7, %v2989_v32, %v3233_v42  ;;  %6324 = vmatpush3.bf16.msra.mxu0 %v6596_v26  ;;  %1680 = vmatprep.mubr.bf16.mxu0 %v7272_v8  ;;  %v417_v26 = vshll.u32 %v243_v18, 16  ;;  %v6662_v37 = vld [vmem:[%s10052_s1 + $0x8] sm:$0xff]   ;;  %v3018_v20 = vshrl.u32 %v7666_v24, 16  ;;  %v427_v42 = vor.u32 %v425_v15, %v424_v9  ;;  %v6600_v44 = vld [vmem:[%s10052_s1 + $0x220] sm:$0xff]   ;;  %v7710_v47 = vld [vmem:[%s10051_s0 + $0xd0] sm:$0xf] }
  0x7d   :  { %3235 = vst [vmem:[#allocation2 + $0x60] sm:$0xf] %v3234_v45  ;;  %6325 = vmatprep.subr.bf16.mxu0 %v6597_v54  ;;  %1770 = vmatmul.mubr.bf16.vlgmr.msra.gmra.mrb[32].mxu1 %v7207_v28  ;;  %v411_v28 = vsel %vm7068_vm5, %v403_v25, %v410_v61  ;;  %v647_v27 = vsel %vm7092_vm9, %v412_v23, %v646_v41  ;;  %v653_v41 = vld [vmem:[#allocation2 + $0x80] sm:$0x1]  ;;  %v429_v34 = vrot.slane %v424_v9, 4  ;;  %v3026_v38 = vshrl.u32 %v5168_v31, 16 }
  0x7e   :  { %5491 = vmatpush3.bf16.msra.mxu1 %v6660_v51  ;;  %1777 = vmatprep.mubr.bf16.mxu1 %v7331_v48  ;;  %645 = vst [vmem:[#allocation2 + $0x70] sm:$0xf] %v411_v28  ;;  %648 = vst [vmem:[#allocation2 + $0x74] sm:$0x1] %v647_v27  ;;  %v419_v32 = vor.u32 %v417_v26, %v416_v36  ;;  %v7693_v45 = vrot.slane %v3018_v20, 7  ;;  %v3029_v29 = vshll.u32 %v5168_v31, 16 }
  0x7f   :  { %5492 = vmatprep.subr.bf16.mxu1 %v6661_v57  ;;  %v246_v25 = vld [vmem:[%s10051_s0 + $0x54] sm:$0xf]  ;;  %v654_v23 = vsel %vm7092_vm9, %v429_v34, %v653_v41  ;;  %v7704_v17 = vrot.slane %v3026_v38, 7  ;;  %v6665_v26 = vld [vmem:[%s10052_s1 + $0x58] sm:$0xff]   ;;  %v3004_v57 = vshll.u32 %v7620_v35, 16  ;;  %v6601_v35 = vld [vmem:[%s10052_s1 + $0x228] sm:$0xff]  }
  0x80   :  { %6326 = vmatpush3.bf16.msra.mxu0 %v6597_v54  ;;  %v7674_v54 = vld [vmem:[%s10051_s0 + $0x50] sm:$0xf]  ;;  %v650_v43 = vsel %vm7077_vm7, %v419_v32, %v649_v22  ;;  %655 = vst [vmem:[#allocation2 + $0x80] sm:$0x1] %v654_v23  ;;  %v3024_v36 = vrot.slane %v7693_v45, 4  ;;  %v439_v22 = vshrl.u32 %v246_v25, 16 }
  0x81   :  { %6327 = vmatprep.subr.bf16.mxu0 %v6598_v46  ;;  %651 = vst [vmem:[#allocation2 + $0x78] sm:$0xf] %v650_v43  ;;  %v431_v61 = vshrl.u32 %v7674_v54, 16  ;;  %v434_v18 = vshll.u32 %v7674_v54, 16  ;;  %v3237_v50 = vld [vmem:[#allocation2 + $0x68] sm:$0x1]  ;;  %v3031_v56 = vor.u32 %v3029_v29, %v7704_v17  ;;  %v3006_v41 = vor.u32 %v3004_v57, %v7639_v0 }
  0x82   :  { %5493 = vmatpush3.bf16.msra.mxu1 %v6662_v37  ;;  %v3238_v51 = vsel %vm7092_vm9, %v2999_v60, %v3237_v50  ;;  %v442_v32 = vshll.u32 %v246_v25, 16  ;;  %v3035_v9 = vshrl.u32 %v7710_v47, 16  ;;  %v6666_v31 = vld [vmem:[%s10052_s1 + $0x18] sm:$0xff]   ;;  %v3016_v54 = vrot.slane %v7654_v53, 4  ;;  %v6667_v13 = vld [vmem:[%s10052_s1 + $0x60] sm:$0xff]   ;;  %v6603_v53 = vld [vmem:[%s10052_s1 + $0x230] sm:$0xff]  }
  0x83   :  { %1681 = vmatmul.mubr.bf16.gmra.mrb[36].mxu0 %v7256_v62  ;;  %v6663_v62 = vld [vmem:[%s10052_s1 + $0x50] sm:$0xff]   ;;  %3239 = vst [vmem:[#allocation2 + $0x68] sm:$0x1] %v3238_v51  ;;  %v433_v15 = vrot.slane %v431_v61, 7  ;;  %v441_v39 = vrot.slane %v439_v22, 7  ;;  %v6668_v29 = vld [vmem:[%s10052_s1 + $0x20] sm:$0xff]  }
  0x84   :  { %1688 = vmatprep.mubr.bf16.mxu0 %v7343_v6  ;;  %5494 = vmatprep.subr.bf16.mxu1 %v6663_v62  ;;  %v660_v20 = vld [vmem:[#allocation2 + $0x8c] sm:$0x1]  ;;  %v247_v0 = vld [vmem:[%s10051_s0 + $0x58] sm:$0xf]  ;;  %v7807_v22 = vld [vmem:[%s10051_s0 + $0xdc] sm:$0xf] }
  0x85   :  { %6328 = vmatpush3.bf16.msra.mxu0 %v6598_v46  ;;  %1778 = vmatmul.mubr.bf16.gmra.mrb[36].mxu1 %v7269_v7  ;;  %v428_v46 = vsel %vm7068_vm5, %v420_v16, %v427_v42  ;;  %v6664_v7 = vld [vmem:[%s10052_s1 + $0x10] sm:$0xff]   ;;  %v436_v37 = vor.u32 %v434_v18, %v433_v15  ;;  %v437_v60 = vrot.slane %v433_v15, 4  ;;  %v3032_v42 = vsel %vm7068_vm5, %v3024_v36, %v3031_v56  ;;  %v6669_v18 = vld [vmem:[%s10052_s1 + $0x68] sm:$0xff]   ;;  %v6606_v57 = vld [vmem:[%s10052_s1 + $0x238] sm:$0xff]  }
  0x86   :  { %6329 = vmatprep.subr.bf16.mxu0 %v6599_v1  ;;  %1785 = vmatprep.mubr.bf16.mxu1 %v7391_v58  ;;  %652 = vst [vmem:[#allocation2 + $0x7c] sm:$0xf] %v428_v46  ;;  %v7723_v28 = vld [vmem:[#allocation2 + $0x6c] sm:$0xff]   ;;  %v7725_v27 = vld [vmem:[#allocation2 + $0x74] ss:$0 sps:$4 sm:$0x11]   ;;  %v444_v34 = vor.u32 %v442_v32, %v441_v39 }
  0x87   :  { %5495 = vmatpush3.bf16.msra.mxu1 %v6664_v7  ;;  %2804 = vst [vmem:[#allocation2 + $0x6c] sm:$0xf] %v6853_v2  ;;  %2805 = vst [vmem:[#allocation2 + $0x70] sm:$0xf] %v6853_v2  ;;  %v7736_v16 = vld [vmem:[%s10051_s0 + $0xd4] sm:$0xf] }
  0x88   :  { %5496 = vmatprep.subr.bf16.mxu1 %v6665_v26  ;;  %2806 = vst [vmem:[#allocation2 + $0x74] sm:$0x1] %v6853_v2  ;;  %3243 = vst [vmem:[#allocation2 + $0x70] sm:$0xf] %v3015_v30  ;;  %v3043_v62 = vshrl.u32 %v7736_v16, 16  ;;  %v446_v43 = vrot.slane %v441_v39, 4 }
  0x89   :  { %6330 = vmatpush3.bf16.msra.mxu0 %v6599_v1  ;;  %v656_v1 = vld [vmem:[#allocation2 + $0x84] sm:$0xf]  ;;  %v7773_v25 = vld [vmem:[#allocation2 + $0x80] ss:$0 sps:$4 sm:$0x11]   ;;  %v3046_v23 = vshll.u32 %v7736_v16, 16 }
  0x8a   :  { %6331 = vmatprep.subr.bf16.mxu0 %v6600_v44  ;;  %v657_v38 = vsel %vm7077_vm7, %v436_v37, %v656_v1  ;;  %v661_v61 = vsel %vm7092_vm9, %v446_v43, %v660_v20  ;;  %v7781_v46 = vrot.slane %v3043_v62, 7  ;;  %2809 = vst [vmem:[#allocation2 + $0x80] sm:$0x1] %v6853_v2  ;;  %v248_v30 = vld [vmem:[%s10051_s0 + $0x5c] sm:$0xf]  ;;  %v448_v56 = vshrl.u32 %v247_v0, 16 }
  0x8b   :  { %1689 = vmatmul.mubr.bf16.gmra.mrb[40].mxu0 %v7331_v48  ;;  %5497 = vmatpush3.bf16.msra.mxu1 %v6666_v31  ;;  %v3021_v48 = vshll.u32 %v7666_v24, 16  ;;  %658 = vst [vmem:[#allocation2 + $0x84] sm:$0xf] %v657_v38  ;;  %662 = vst [vmem:[#allocation2 + $0x8c] sm:$0x1] %v661_v61  ;;  %v6670_v32 = vld [vmem:[%s10052_s1 + $0x28] sm:$0xff]  }
  0x8c   :  { %1696 = vmatprep.mubr.bf16.mxu0 %v7412_v14  ;;  %5498 = vmatprep.subr.bf16.mxu1 %v6667_v13  ;;  %v7802_v15 = vld [vmem:[%s10051_s0 + $0xd8] sm:$0xf]  ;;  %v3048_v16 = vor.u32 %v3046_v23, %v7781_v46  ;;  %v456_v1 = vshrl.u32 %v248_v30, 16  ;;  %v6671_v31 = vld [vmem:[%s10052_s1 + $0x70] sm:$0xff]   ;;  %v459_v37 = vshll.u32 %v248_v30, 16  ;;  %v979_v39 = vshll.u32 %v7648_v52, 16 }
  0x8d   :  { %6332 = vmatpush3.bf16.msra.mxu0 %v6600_v44  ;;  %1786 = vmatmul.mubr.bf16.gmra.mrb[40].mxu1 %v7340_v5  ;;  %v7765_v24 = vld [vmem:[#allocation2 + $0x78] sm:$0xff]   ;;  %v7767_v44 = vrot.slane %v3035_v9, 7  ;;  %v445_v5 = vsel %vm7068_vm5, %v437_v60, %v444_v34  ;;  %v3023_v36 = vor.u32 %v3021_v48, %v7693_v45  ;;  %v974_v9 = vshll.u32 %v7589_v63, 16  ;;  %v663_v60 = vld [vmem:[#allocation2 + $0x90] sm:$0xf] }
  0x8e   :  { %6333 = vmatprep.subr.bf16.mxu0 %v6601_v35  ;;  %1793 = vmatprep.mubr.bf16.mxu1 %v7465_v59  ;;  %2807 = vst [vmem:[#allocation2 + $0x78] sm:$0xf] %v6853_v2  ;;  %2808 = vst [vmem:[#allocation2 + $0x7c] sm:$0xf] %v6853_v2  ;;  %v3240_v7 = vld [vmem:[#allocation2 + $0x6c] sm:$0xf] }
  0x8f   :  { %5499 = vmatpush3.bf16.msra.mxu1 %v6668_v29  ;;  %v3244_v50 = vld [vmem:[#allocation2 + $0x74] sm:$0x1]  ;;  %3250 = vst [vmem:[#allocation2 + $0x7c] sm:$0xf] %v3032_v42  ;;  %659 = vst [vmem:[#allocation2 + $0x88] sm:$0xf] %v445_v5  ;;  %v3241_v26 = vsel %vm7077_vm7, %v3006_v41, %v3240_v7 }
  0x90   :  { %5500 = vmatprep.subr.bf16.mxu1 %v6669_v18  ;;  %v3245_v51 = vsel %vm7092_vm9, %v3016_v54, %v3244_v50  ;;  %3242 = vst [vmem:[#allocation2 + $0x6c] sm:$0xf] %v3241_v26  ;;  %v3041_v45 = vrot.slane %v7767_v44, 4  ;;  %v450_v54 = vrot.slane %v448_v56, 7  ;;  %v458_v13 = vrot.slane %v456_v1, 7  ;;  %v6673_v5 = vld [vmem:[%s10052_s1 + $0x78] sm:$0xff]  }
  0x91   :  { %6334 = vmatpush3.bf16.msra.mxu0 %v6601_v35  ;;  %3246 = vst [vmem:[#allocation2 + $0x74] sm:$0x1] %v3245_v51  ;;  %v451_v35 = vshll.u32 %v247_v0, 16  ;;  %v667_v41 = vld [vmem:[#allocation2 + $0x98] sm:$0x1]  ;;  %v3052_v48 = vshrl.u32 %v7802_v15, 16 }
  0x92   :  { %6335 = vmatprep.subr.bf16.mxu0 %v6603_v53  ;;  %v3060_v20 = vshrl.u32 %v7807_v22, 16  ;;  %v454_v34 = vrot.slane %v450_v54, 4  ;;  %v249_v43 = vld [vmem:[%s10051_s0 + $0x60] sm:$0xf]  ;;  %v3049_v0 = vsel %vm7068_vm5, %v3041_v45, %v3048_v16  ;;  %v461_v29 = vor.u32 %v459_v37, %v458_v13  ;;  %v250_v56 = vld [vmem:[%s10051_s0 + $0x64] sm:$0xf] }
  0x93   :  { %1697 = vmatmul.mubr.bf16.gmra.mrb[44].mxu0 %v7391_v58  ;;  %5501 = vmatpush3.bf16.msra.mxu1 %v6670_v32  ;;  %v3033_v58 = vrot.slane %v7704_v17, 4  ;;  %v453_v42 = vor.u32 %v451_v35, %v450_v54  ;;  %v3063_v17 = vshll.u32 %v7807_v22, 16  ;;  %v3251_v38 = vld [vmem:[#allocation2 + $0x80] sm:$0x1]  ;;  %v463_v7 = vrot.slane %v458_v13, 4  ;;  %v6675_v54 = vld [vmem:[%s10052_s1 + $0x38] sm:$0xff]  }
  0x94   :  { %1704 = vmatprep.mubr.bf16.mxu0 %v7477_v10  ;;  %5502 = vmatprep.subr.bf16.mxu1 %v6671_v31  ;;  %v7844_v18 = vld [vmem:[#allocation2 + $0x8c] ss:$0 sps:$4 sm:$0x11]   ;;  %v7848_v30 = vrot.slane %v3052_v48, 7  ;;  %v3038_v26 = vshll.u32 %v7710_v47, 16  ;;  %v462_v51 = vsel %vm7068_vm5, %v454_v34, %v461_v29  ;;  %v972_v22 = vshrl.u32 %v7589_v63, 16 }
  0x95   :  { %6336 = vmatpush3.bf16.msra.mxu0 %v6603_v53  ;;  %1794 = vmatmul.mubr.bf16.gmra.mrb[44].mxu1 %v7408_v12  ;;  %v3247_v62 = vld [vmem:[#allocation2 + $0x78] sm:$0xf]  ;;  %v6672_v53 = vld [vmem:[%s10052_s1 + $0x30] sm:$0xff]   ;;  %v3252_v61 = vsel %vm7092_vm9, %v3033_v58, %v3251_v38  ;;  %v664_v50 = vsel %vm7077_vm7, %v453_v42, %v663_v60  ;;  %2812 = vst [vmem:[#allocation2 + $0x8c] sm:$0x1] %v6853_v2  ;;  %v6674_v32 = vld [vmem:[%s10052_s1 + $0xc0] sm:$0xff]  }
  0x96   :  { %6337 = vmatprep.subr.bf16.mxu0 %v6606_v57  ;;  %1801 = vmatprep.mubr.bf16.mxu1 %v7539_v33  ;;  %v3248_v12 = vsel %vm7077_vm7, %v3023_v36, %v3247_v62  ;;  %v7842_v23 = vld [vmem:[#allocation2 + $0x84] sm:$0xff]   ;;  %3253 = vst [vmem:[#allocation2 + $0x80] sm:$0x1] %v3252_v61  ;;  %665 = vst [vmem:[#allocation2 + $0x90] sm:$0xf] %v664_v50  ;;  %v7856_v36 = vrot.slane %v3060_v20, 7  ;;  %v668_v47 = vsel %vm7092_vm9, %v463_v7, %v667_v41 }
  0x97   :  { %5503 = vmatpush3.bf16.msra.mxu1 %v6672_v53  ;;  %3249 = vst [vmem:[#allocation2 + $0x78] sm:$0xf] %v3248_v12  ;;  %2810 = vst [vmem:[#allocation2 + $0x84] sm:$0xf] %v6853_v2  ;;  %v468_v45 = vshll.u32 %v249_v43, 16  ;;  %v976_v35 = vrot.slane %v974_v9, 1  ;;  %v3040_v48 = vor.u32 %v3038_v26, %v7767_v44 }
  0x98   :  { %5504 = vmatprep.subr.bf16.mxu1 %v6673_v5  ;;  %2811 = vst [vmem:[#allocation2 + $0x88] sm:$0xf] %v6853_v2  ;;  %666 = vst [vmem:[#allocation2 + $0x94] sm:$0xf] %v462_v51  ;;  %v7870_v16 = vld [vmem:[%s10051_s0 + $0xe0] sm:$0xf]  ;;  %v3065_v60 = vor.u32 %v3063_v17, %v7856_v36 }
  0x99   :  { %6338 = vmatpush3.bf16.msra.mxu0 %v6606_v57  ;;  %v465_v57 = vshrl.u32 %v249_v43, 16  ;;  %3257 = vst [vmem:[#allocation2 + $0x88] sm:$0xf] %v3049_v0  ;;  %v981_v1 = vrot.slane %v979_v39, 1  ;;  %v984_v31 = vrot.slane %v7589_v63, 1  ;;  %v985_v58 = vrot.slane %v7648_v52, 1 }
  0x9a   :  { %5554 = vmatprep.subr.bf16.mxu0 %v6674_v32  ;;  %669 = vst [vmem:[#allocation2 + $0x98] sm:$0x1] %v668_v47  ;;  %v5174_v37 = vld [vmem:[%s10051_s0 + $0xe4] sm:$0xf]  ;;  %v3058_v9 = vrot.slane %v7848_v30, 4  ;;  %v473_v13 = vshrl.u32 %v250_v56, 16  ;;  %v977_v61 = vor.u32 %v976_v35, %v972_v22 }
  0x9b   :  { %1705 = vmatmul.mubr.bf16.gmra.mrb[48].mxu0 %v7465_v59  ;;  %5505 = vmatpush3.bf16.msra.mxu1 %v6675_v54  ;;  %v6676_v59 = vld [vmem:[%s10052_s1 + $0x140] sm:$0xff]   ;;  %v467_v39 = vrot.slane %v465_v57, 7  ;;  %v251_v41 = vld [vmem:[%s10051_s0 + $0x68] sm:$0xf]  ;;  %v3050_v20 = vrot.slane %v7781_v46, 4  ;;  %v476_v62 = vshll.u32 %v250_v56, 16 }
  0x9c   :  { %1712 = vmatprep.mubr.bf16.mxu0 %v7534_v21  ;;  %5618 = vmatprep.subr.bf16.mxu1 %v6676_v59  ;;  %v670_v42 = vld [vmem:[#allocation2 + $0x9c] sm:$0xf]  ;;  %v3069_v34 = vshrl.u32 %v7870_v16, 16  ;;  %v998_v43 = vshrl.u32 %v7723_v28, 16  ;;  %v475_v12 = vrot.slane %v473_v13, 7  ;;  %v1000_v0 = vshll.u32 %v7723_v28, 16 }
  0x9d   :  { %1802 = vmatmul.mubr.bf16.gmra.mrb[48].mxu1 %v7474_v4  ;;  %v470_v53 = vor.u32 %v468_v45, %v467_v39  ;;  %v471_v17 = vrot.slane %v467_v39, 4  ;;  %v674_v38 = vld [vmem:[#allocation2 + $0xa4] sm:$0x1]  ;;  %v3077_v44 = vshrl.u32 %v5174_v37, 16  ;;  %v252_v46 = vld [vmem:[%s10051_s0 + $0x6c] sm:$0xf]  ;;  %v3066_v50 = vsel %vm7068_vm5, %v3058_v9, %v3065_v60 }
  0x9e   :  { %1809 = vmatprep.mubr.bf16.mxu1 %v7581_v19  ;;  %v7897_v29 = vrot.slane %v3069_v34, 7  ;;  %v482_v5 = vshrl.u32 %v251_v41, 16  ;;  %v3254_v4 = vld [vmem:[#allocation2 + $0x84] sm:$0xf]  ;;  %v3258_v7 = vld [vmem:[#allocation2 + $0x8c] sm:$0x1]  ;;  %v478_v26 = vor.u32 %v476_v62, %v475_v12 }
  0x9f   :  { %v671_v51 = vsel %vm7077_vm7, %v470_v53, %v670_v42  ;;  %v3255_v56 = vsel %vm7077_vm7, %v3040_v48, %v3254_v4  ;;  %v3259_v57 = vsel %vm7092_vm9, %v3050_v20, %v3258_v7  ;;  %v7910_v32 = vld [vmem:[#allocation2 + $0x90] sm:$0xff]   ;;  %v480_v47 = vrot.slane %v475_v12, 4  ;;  %v7933_v48 = vld [vmem:[%s10051_s0 + $0xe8] sm:$0xf] }
  0xa0   :  { %672 = vst [vmem:[#allocation2 + $0x9c] sm:$0xf] %v671_v51  ;;  %v3080_v22 = vshll.u32 %v5174_v37, 16  ;;  %3256 = vst [vmem:[#allocation2 + $0x84] sm:$0xf] %v3255_v56  ;;  %v3055_v35 = vshll.u32 %v7802_v15, 16  ;;  %v479_v54 = vsel %vm7068_vm5, %v471_v17, %v478_v26  ;;  %v7928_v15 = vsel %vm824_vm1, %v977_v61, %v981_v1 }
  0xa1   :  { %3260 = vst [vmem:[#allocation2 + $0x8c] sm:$0x1] %v3259_v57  ;;  %v7912_v45 = vld [vmem:[#allocation2 + $0x98] ss:$0 sps:$4 sm:$0x11]   ;;  %v1002_v59 = vrot.slane %v1000_v0, 1  ;;  %v675_v37 = vsel %vm7092_vm9, %v480_v47, %v674_v38 }
  0xa2   :  { %2813 = vst [vmem:[#allocation2 + $0x90] sm:$0xf] %v6853_v2  ;;  %2814 = vst [vmem:[#allocation2 + $0x94] sm:$0xf] %v6853_v2  ;;  %v1005_v9 = vshll.u32 %v7725_v27, 16  ;;  %v7924_v60 = vrot.slane %v3077_v44, 7 }
  0xa3   :  { %1713 = vmatmul.mubr.bf16.gmra.mrb[52].mxu0 %v7539_v33  ;;  %2815 = vst [vmem:[#allocation2 + $0x98] sm:$0x1] %v6853_v2  ;;  %3264 = vst [vmem:[#allocation2 + $0x94] sm:$0xf] %v3066_v50  ;;  %v484_v39 = vrot.slane %v482_v5, 7  ;;  %v485_v33 = vshll.u32 %v251_v41, 16  ;;  %v3057_v41 = vor.u32 %v3055_v35, %v7848_v30  ;;  %v1003_v38 = vor.u32 %v1002_v59, %v998_v43 }
  0xa4   :  { %673 = vst [vmem:[#allocation2 + $0xa0] sm:$0xf] %v479_v54  ;;  %1720 = vmatprep.mubr.bf16.mxu0 %v7593_v40  ;;  %676 = vst [vmem:[#allocation2 + $0xa4] sm:$0x1] %v675_v37  ;;  %v490_v13 = vshrl.u32 %v252_v46, 16  ;;  %v3075_v20 = vrot.slane %v7897_v29, 4  ;;  %v3082_v62 = vor.u32 %v3080_v22, %v7924_v60  ;;  %v7955_v43 = vsel %vm929_vm8, %v984_v31, %v985_v58 }
  0xa5   :  { %v493_v42 = vshll.u32 %v252_v46, 16  ;;  %v677_v34 = vld [vmem:[#allocation2 + $0xa8] sm:$0xf]  ;;  %v5176_v1 = vld [vmem:[%s10051_s0 + $0xec] sm:$0xf]  ;;  %1810 = vmatmul.mubr.bf16.gmra.mrb[52].mxu1 %v7530_v11  ;;  %v487_v53 = vor.u32 %v485_v33, %v484_v39  ;;  %v488_v17 = vrot.slane %v484_v39, 4 }
  0xa6   :  { %v492_v12 = vrot.slane %v490_v13, 7  ;;  %1817 = vmatprep.mubr.bf16.mxu1 %v7928_v15  ;;  %v1007_v0 = vrot.slane %v1005_v9, 1  ;;  %v3067_v44 = vrot.slane %v7856_v36, 4  ;;  %v681_v5 = vld [vmem:[#allocation2 + $0xb0] sm:$0x1]  ;;  %v3086_v46 = vshrl.u32 %v7933_v48, 16 }
  0xa7   :  { %v678_v7 = vsel %vm7077_vm7, %v487_v53, %v677_v34  ;;  %v3094_v11 = vshrl.u32 %v5176_v1, 16  ;;  %v253_v30 = vld [vmem:[%s10051_s0 + $0x70] sm:$0xf]  ;;  %v3083_v50 = vsel %vm7068_vm5, %v3075_v20, %v3082_v62  ;;  %v3097_v51 = vshll.u32 %v5176_v1, 16  ;;  %v254_v56 = vld [vmem:[%s10051_s0 + $0x74] sm:$0xf] }
  0xa8   :  { %v495_v61 = vor.u32 %v493_v42, %v492_v12  ;;  %v497_v4 = vrot.slane %v492_v12, 4  ;;  %679 = vst [vmem:[#allocation2 + $0xa8] sm:$0xf] %v678_v7  ;;  %v7959_v26 = vrot.slane %v3086_v46, 7  ;;  %v3072_v59 = vshll.u32 %v7870_v16, 16 }
  0xa9   :  { %v3261_v36 = vld [vmem:[#allocation2 + $0x90] sm:$0xf]  ;;  %v7972_v22 = vrot.slane %v3094_v11, 7  ;;  %v7984_v9 = vsel %vm824_vm1, %v1003_v38, %v1007_v0  ;;  %v499_v39 = vshrl.u32 %v253_v30, 16  ;;  %v502_v16 = vshll.u32 %v253_v30, 16 }
  0xaa   :  { %v3262_v52 = vsel %vm7077_vm7, %v3057_v41, %v3261_v36  ;;  %v3265_v57 = vld [vmem:[#allocation2 + $0x98] sm:$0x1]  ;;  %v496_v31 = vsel %vm7068_vm5, %v488_v17, %v495_v61  ;;  %v682_v58 = vsel %vm7092_vm9, %v497_v4, %v681_v5  ;;  %v7991_v37 = vld [vmem:[%s10051_s0 + $0xf0] sm:$0xf]  ;;  %v5178_v33 = vld [vmem:[%s10051_s0 + $0xf4] sm:$0xf]  ;;  %v3074_v34 = vor.u32 %v3072_v59, %v7897_v29 }
  0xab   :  { %v7966_v47 = vld [vmem:[#allocation2 + $0x9c] sm:$0xff]   ;;  %1721 = vmatmul.mubr.bf16.gmra.mrb[56].mxu0 %v7581_v19  ;;  %3263 = vst [vmem:[#allocation2 + $0x90] sm:$0xf] %v3262_v52  ;;  %v3266_v35 = vsel %vm7092_vm9, %v3067_v44, %v3265_v57  ;;  %v7977_v54 = vld [vmem:[#allocation2 + $0xa4] ss:$0 sps:$4 sm:$0x11]   ;;  %v3099_v20 = vor.u32 %v3097_v51, %v7972_v22 }
  0xac   :  { %2816 = vst [vmem:[#allocation2 + $0x9c] sm:$0xf] %v6853_v2  ;;  %2817 = vst [vmem:[#allocation2 + $0xa0] sm:$0xf] %v6853_v2  ;;  %1728 = vmatprep.mubr.bf16.mxu0 %v7955_v43  ;;  %v2070_v19 = vshll.u32 %v7765_v24, 16  ;;  %v3092_v13 = vrot.slane %v7959_v26, 4 }
  0xad   :  { %680 = vst [vmem:[#allocation2 + $0xac] sm:$0xf] %v496_v31  ;;  %683 = vst [vmem:[#allocation2 + $0xb0] sm:$0x1] %v682_v58  ;;  %1818 = vmatmul.mubr.bf16.gmra.mrb[56].mxu1 %v7589_v63  ;;  %v507_v62 = vshrl.u32 %v254_v56, 16  ;;  %v510_v42 = vshll.u32 %v254_v56, 16 }
  0xae   :  { %3267 = vst [vmem:[#allocation2 + $0x98] sm:$0x1] %v3266_v35  ;;  %2818 = vst [vmem:[#allocation2 + $0xa4] sm:$0x1] %v6853_v2  ;;  %1825 = vmatprep.mubr.bf16.mxu1 %v7984_v9  ;;  %v501_v1 = vrot.slane %v499_v39, 7  ;;  %v3103_v53 = vshrl.u32 %v7991_v37, 16  ;;  %v3100_v29 = vsel %vm7068_vm5, %v3092_v13, %v3099_v20 }
  0xaf   :  { %3271 = vst [vmem:[#allocation2 + $0xa0] sm:$0xf] %v3083_v50  ;;  %v684_v41 = vld [vmem:[#allocation2 + $0xb4] sm:$0xf]  ;;  %v2075_v17 = vshll.u32 %v7773_v25, 16  ;;  %v3084_v12 = vrot.slane %v7924_v60, 4 }
  0xb0   :  { %v509_v38 = vrot.slane %v507_v62, 7  ;;  %v3111_v0 = vshrl.u32 %v5178_v33, 16  ;;  %v504_v44 = vor.u32 %v502_v16, %v501_v1  ;;  %v505_v5 = vrot.slane %v501_v1, 4  ;;  %v688_v46 = vld [vmem:[#allocation2 + $0xbc] sm:$0x1] }
  0xb1   :  { %v8004_v61 = vrot.slane %v3103_v53, 7  ;;  %v3114_v4 = vshll.u32 %v5178_v33, 16  ;;  %v3089_v52 = vshll.u32 %v7933_v48, 16  ;;  %v2068_v58 = vshrl.u32 %v7765_v24, 16  ;;  %v256_v62 = vld [vmem:[%s10051_s0 + $0x7c] sm:$0xf] }
  0xb2   :  { %v512_v11 = vor.u32 %v510_v42, %v509_v38  ;;  %v685_v51 = vsel %vm7077_vm7, %v504_v44, %v684_v41  ;;  %v514_v31 = vrot.slane %v509_v38, 4  ;;  %v1010_v35 = vrot.slane %v7723_v28, 1  ;;  %v8057_v41 = vld [vmem:[%s10051_s0 + $0xfc] sm:$0xf] }
  0xb3   :  { %v3268_v7 = vld [vmem:[#allocation2 + $0x9c] sm:$0xf]  ;;  %1729 = vmatmul.mubr.bf16.gmra.mrb[60].mxu0 %v7928_v15  ;;  %686 = vst [vmem:[#allocation2 + $0xb4] sm:$0xf] %v685_v51  ;;  %v8028_v59 = vrot.slane %v3111_v0, 7  ;;  %v8031_v39 = vrot.slane %v2075_v17, 1 }
  0xb4   :  { %v3269_v30 = vsel %vm7077_vm7, %v3074_v34, %v3268_v7  ;;  %v8011_v60 = vld [vmem:[#allocation2 + $0xa8] sm:$0xff]   ;;  %v8013_v50 = vld [vmem:[#allocation2 + $0xb0] ss:$0 sps:$4 sm:$0x11]   ;;  %6339 = vmatprep.mubr.bf16.mxu0 %v7272_v8  ;;  %v513_v57 = vsel %vm7068_vm5, %v505_v5, %v512_v11  ;;  %v2072_v8 = vrot.slane %v2070_v19, 1  ;;  %v1011_v48 = vrot.slane %v7725_v27, 1 }
  0xb5   :  { %v3272_v36 = vld [vmem:[#allocation2 + $0xa4] sm:$0x1]  ;;  %3270 = vst [vmem:[#allocation2 + $0x9c] sm:$0xf] %v3269_v30  ;;  %2819 = vst [vmem:[#allocation2 + $0xa8] sm:$0xf] %v6853_v2  ;;  %1826 = vmatmul.mubr.bf16.gmra.mrb[60].mxu1 %v7723_v28  ;;  %v689_v16 = vsel %vm7092_vm9, %v514_v31, %v688_v46  ;;  %v3116_v20 = vor.u32 %v3114_v4, %v8028_v59  ;;  %v3091_v34 = vor.u32 %v3089_v52, %v7959_v26 }
  0xb6   :  { %v3273_v56 = vsel %vm7092_vm9, %v3084_v12, %v3272_v36  ;;  %2820 = vst [vmem:[#allocation2 + $0xac] sm:$0xf] %v6853_v2  ;;  %2821 = vst [vmem:[#allocation2 + $0xb0] sm:$0x1] %v6853_v2  ;;  %v255_v19 = vld [vmem:[%s10051_s0 + $0x78] sm:$0xf]  ;;  %2253 = vmatprep.mubr.bf16.mxu1 %v7928_v15  ;;  %v2073_v36 = vor.u32 %v2072_v8, %v2068_v58 }
  0xb7   :  { %3274 = vst [vmem:[#allocation2 + $0xa4] sm:$0x1] %v3273_v56  ;;  %3278 = vst [vmem:[#allocation2 + $0xac] sm:$0xf] %v3100_v29  ;;  %v2082_v33 = vshll.u32 %v7842_v23, 16  ;;  %v3109_v13 = vrot.slane %v8004_v61, 4 }
  0xb8   :  { %687 = vst [vmem:[#allocation2 + $0xb8] sm:$0xf] %v513_v57  ;;  %690 = vst [vmem:[#allocation2 + $0xbc] sm:$0x1] %v689_v16  ;;  %v2087_v42 = vshll.u32 %v7844_v18, 16  ;;  %v3101_v1 = vrot.slane %v7972_v22, 4 }
  0xb9   :  { %v8052_v15 = vld [vmem:[%s10051_s0 + $0xf8] sm:$0xf]  ;;  %v516_v53 = vshrl.u32 %v255_v19, 16  ;;  %v519_v17 = vshll.u32 %v255_v19, 16  ;;  %v3117_v26 = vsel %vm7068_vm5, %v3109_v13, %v3116_v20  ;;  %v691_v22 = vld [vmem:[#allocation2 + $0xc0] sm:$0xf] }
  0xba   :  { %v8065_v0 = vld [vmem:[%s10052_s1 + $0x80] sm:$0xff]   ;;  %v524_v4 = vshrl.u32 %v256_v62, 16  ;;  %v8078_v7 = vld [vmem:[%s10052_s1 + $0xc8] sm:$0xff]   ;;  %v2080_v29 = vshrl.u32 %v7842_v23, 16  ;;  %v527_v11 = vshll.u32 %v256_v62, 16  ;;  %v3120_v30 = vshrl.u32 %v8052_v15, 16 }
  0xbb   :  { %6340 = vmatmul.mubr.bf16.vlgmr.msra.gmra.mrb[64].mxu0 %v7343_v6  ;;  %v518_v46 = vrot.slane %v516_v53, 7  ;;  %v3128_v52 = vshrl.u32 %v8057_v41, 16  ;;  %v8093_v57 = vld [vmem:[%s10052_s1 + $0x100] sm:$0xff]   ;;  %v8103_v8 = vld [vmem:[%s10052_s1 + $0x88] sm:$0xff]   ;;  %v2089_v19 = vrot.slane %v2087_v42, 1  ;;  %v2094_v13 = vshll.u32 %v7910_v32, 16 }
  0xbc   :  { %v3275_v12 = vld [vmem:[#allocation2 + $0xa8] sm:$0xf]  ;;  %5555 = vmatpush3.bf16.msra.mxu0 %v8065_v0  ;;  %6343 = vmatprep.mubr.bf16.mxu0 %v7412_v14  ;;  %v3106_v14 = vshll.u32 %v7991_v37, 16  ;;  %v2084_v37 = vrot.slane %v2082_v33, 1  ;;  %v526_v31 = vrot.slane %v524_v4, 7  ;;  %v8098_v58 = vrot.slane %v3120_v30, 7 }
  0xbd   :  { %v3279_v38 = vld [vmem:[#allocation2 + $0xb0] sm:$0x1]  ;;  %v3276_v44 = vsel %vm7077_vm7, %v3091_v34, %v3275_v12  ;;  %5556 = vmatprep.subr.bf16.mxu0 %v8078_v7  ;;  %2254 = vmatmul.mubr.bf16.vlgmr.msra.gmra.mrb[64].mxu1 %v7589_v63  ;;  %v521_v56 = vor.u32 %v519_v17, %v518_v46  ;;  %v522_v63 = vrot.slane %v518_v46, 4  ;;  %v8109_v16 = vld [vmem:[%s10052_s1 + $0x148] sm:$0xff]   ;;  %v2092_v33 = vshrl.u32 %v7910_v32, 16 }
  0xbe   :  { %v3280_v6 = vsel %vm7092_vm9, %v3101_v1, %v3279_v38  ;;  %3277 = vst [vmem:[#allocation2 + $0xa8] sm:$0xf] %v3276_v44  ;;  %5619 = vmatpush3.bf16.msra.mxu1 %v8093_v57  ;;  %2261 = vmatprep.mubr.bf16.mxu1 %v7984_v9  ;;  %v8119_v62 = vld [vmem:[%s10052_s1 + $0xd0] sm:$0xff]   ;;  %v3108_v34 = vor.u32 %v3106_v14, %v8004_v61  ;;  %v695_v53 = vld [vmem:[#allocation2 + $0xc8] sm:$0x1]  ;;  %v2099_v42 = vshll.u32 %v7912_v45, 16 }
  0xbf   :  { %v8073_v5 = vld [vmem:[#allocation2 + $0xb4] sm:$0xff]   ;;  %3281 = vst [vmem:[#allocation2 + $0xb0] sm:$0x1] %v3280_v6  ;;  %v8087_v51 = vld [vmem:[#allocation2 + $0xbc] ss:$0 sps:$4 sm:$0x11]   ;;  %5620 = vmatprep.subr.bf16.mxu1 %v8109_v16  ;;  %v692_v20 = vsel %vm7077_vm7, %v521_v56, %v691_v22  ;;  %v529_v1 = vor.u32 %v527_v11, %v526_v31  ;;  %v2085_v56 = vor.u32 %v2084_v37, %v2080_v29 }
  0xc0   :  { %2822 = vst [vmem:[#allocation2 + $0xb4] sm:$0xf] %v6853_v2  ;;  %2823 = vst [vmem:[#allocation2 + $0xb8] sm:$0xf] %v6853_v2  ;;  %5557 = vmatpush3.bf16.msra.mxu0 %v8103_v8  ;;  %v3118_v17 = vrot.slane %v8028_v59, 4  ;;  %v8125_v12 = vrot.slane %v3128_v52, 7 }
  0xc1   :  { %3285 = vst [vmem:[#allocation2 + $0xb8] sm:$0xf] %v3117_v26  ;;  %2824 = vst [vmem:[#allocation2 + $0xbc] sm:$0x1] %v6853_v2  ;;  %5558 = vmatprep.subr.bf16.mxu0 %v8119_v62  ;;  %v3131_v38 = vshll.u32 %v8057_v41, 16  ;;  %v8132_v26 = vld [vmem:[%s10052_s1 + $0x108] sm:$0xff]   ;;  %v530_v61 = vsel %vm7068_vm5, %v522_v63, %v529_v1  ;;  %v8215_v49 = vsel %vm824_vm1, %v2085_v56, %v2089_v19 }
  0xc2   :  { %693 = vst [vmem:[#allocation2 + $0xc0] sm:$0xf] %v692_v20  ;;  %5621 = vmatpush3.bf16.msra.mxu1 %v8132_v26  ;;  %v3126_v22 = vrot.slane %v8098_v58, 4  ;;  %v531_v44 = vrot.slane %v526_v31, 4  ;;  %v8141_v59 = vld [vmem:[%s10052_s1 + $0x90] sm:$0xff]   ;;  %v8152_v6 = vld [vmem:[%s10052_s1 + $0xd8] sm:$0xff]  }
  0xc3   :  { %6344 = vmatmul.mubr.bf16.gmra.mrb[68].mxu0 %v7477_v10  ;;  %v8147_v10 = vsel %vm824_vm1, %v2073_v36, %v8031_v39  ;;  %694 = vst [vmem:[#allocation2 + $0xc4] sm:$0xf] %v530_v61  ;;  %v8158_v46 = vld [vmem:[%s10052_s1 + $0x150] sm:$0xff]   ;;  %v3133_v4 = vor.u32 %v3131_v38, %v8125_v12  ;;  %v8179_v36 = vld [vmem:[%s10052_s1 + $0x98] sm:$0xff]   ;;  %v8193_v63 = vld [vmem:[%s10052_s1 + $0xe0] sm:$0xff]   ;;  %v2096_v37 = vrot.slane %v2094_v13, 1 }
  0xc4   :  { %5559 = vmatpush3.bf16.msra.mxu0 %v8141_v59  ;;  %6347 = vmatprep.mubr.bf16.mxu0 %v7534_v21  ;;  %v696_v14 = vsel %vm7092_vm9, %v531_v44, %v695_v53  ;;  %v8171_v11 = vld [vmem:[%s10052_s1 + $0x110] sm:$0xff]   ;;  %v8187_v52 = vld [vmem:[%s10052_s1 + $0x158] sm:$0xff]   ;;  %v8225_v1 = vld [vmem:[%s10052_s1 + $0xe8] sm:$0xff]   ;;  %v8245_v53 = vsel %vm929_vm8, %v1010_v35, %v1011_v48  ;;  %v2101_v48 = vrot.slane %v2099_v42, 1  ;;  %v2106_v61 = vshll.u32 %v7966_v47, 16 }
  0xc5   :  { %5560 = vmatprep.subr.bf16.mxu0 %v8152_v6  ;;  %5622 = vmatprep.subr.bf16.mxu1 %v8158_v46  ;;  %10092 = vst [vmem:[#allocation6_spill] sm:$0xff] %v8171_v11  ;;  %697 = vst [vmem:[#allocation2 + $0xc8] sm:$0x1] %v696_v14  ;;  %v3134_v31 = vsel %vm7068_vm5, %v3126_v22, %v3133_v4  ;;  %v8202_v29 = vld [vmem:[%s10052_s1 + $0x118] sm:$0xff]   ;;  %v8220_v13 = vld [vmem:[#allocation2 + $0xcc] sm:$0xff]   ;;  %v2097_v35 = vor.u32 %v2096_v37, %v2092_v33  ;;  %v2104_v42 = vshrl.u32 %v7966_v47, 16 }
  0xc6   :  { %2262 = vmatmul.mubr.bf16.gmra.mrb[68].mxu1 %v7723_v28  ;;  %10093 = vst [vmem:[#allocation7_spill] sm:$0xff] %v8187_v52  ;;  %10094 = vst [vmem:[#allocation8_spill] sm:$0xff] %v8202_v29  ;;  %v8231_v19 = vld [vmem:[%s10052_s1 + $0x160] sm:$0xff]   ;;  %v8254_v38 = vld [vmem:[#allocation2 + $0xd4] ss:$0 sps:$4 sm:$0x11]  }
  0xc7   :  { %v3282_v41 = vld [vmem:[#allocation2 + $0xb4] sm:$0xf]  ;;  %2269 = vmatprep.mubr.bf16.mxu1 %v8147_v10  ;;  %5623 = vmatpush3.bf16.msra.mxu1 %v8171_v11  ;;  %10095 = vst [vmem:[#allocation9_spill] sm:$0xff] %v8231_v19  ;;  %2828 = vst [vmem:[#allocation2 + $0xcc] sm:$0xf] %v6853_v2  ;;  %v8259_v27 = vld [vmem:[%s10052_s1 + $0xa8] sm:$0xff]  }
  0xc8   :  { %v3283_v21 = vsel %vm7077_vm7, %v3108_v34, %v3282_v41  ;;  %v3286_v39 = vld [vmem:[#allocation2 + $0xbc] sm:$0x1]  ;;  %5561 = vmatpush3.bf16.msra.mxu0 %v8179_v36  ;;  %5624 = vmatprep.subr.bf16.mxu1 %v8187_v52  ;;  %v8210_v34 = vld [vmem:[%s10052_s1 + $0xa0] sm:$0xff]   ;;  %2829 = vst [vmem:[#allocation2 + $0xd0] sm:$0xf] %v6853_v2  ;;  %v8270_v22 = vld [vmem:[%s10052_s1 + $0x168] sm:$0xff]  }
  0xc9   :  { %3284 = vst [vmem:[#allocation2 + $0xb4] sm:$0xf] %v3283_v21  ;;  %v3287_v30 = vsel %vm7092_vm9, %v3118_v17, %v3286_v39  ;;  %5562 = vmatprep.subr.bf16.mxu0 %v8193_v63  ;;  %v8250_v17 = vld [vmem:[%s10052_s1 + $0x120] sm:$0xff]   ;;  %10097 = vst [vmem:[#allocation11_spill] sm:$0xff] %v8270_v22  ;;  %v8278_v33 = vld [vmem:[%s10052_s1 + $0xf0] sm:$0xff]   ;;  %v8297_v39 = vsel %vm824_vm1, %v2097_v35, %v2101_v48  ;;  %v2108_v4 = vrot.slane %v2106_v61, 1 }
  0xca   :  { %3288 = vst [vmem:[#allocation2 + $0xbc] sm:$0x1] %v3287_v30  ;;  %v8205_v20 = vld [vmem:[#allocation2 + $0xc0] sm:$0xff]   ;;  %10096 = vst [vmem:[#allocation10_spill] sm:$0xff] %v8250_v17  ;;  %v8286_v41 = vld [vmem:[%s10052_s1 + $0x128] sm:$0xff]   ;;  %v2111_v14 = vshll.u32 %v7977_v54, 16 }
  0xcb   :  { %6348 = vmatmul.mubr.bf16.gmra.mrb[72].mxu0 %v7593_v40  ;;  %5625 = vmatpush3.bf16.msra.mxu1 %v8202_v29  ;;  %2825 = vst [vmem:[#allocation2 + $0xc0] sm:$0xf] %v6853_v2  ;;  %2826 = vst [vmem:[#allocation2 + $0xc4] sm:$0xf] %v6853_v2  ;;  %v3123_v40 = vshll.u32 %v8052_v15, 16  ;;  %v8293_v21 = vld [vmem:[%s10052_s1 + $0xb0] sm:$0xff]  }
  0xcc   :  { %5563 = vmatpush3.bf16.msra.mxu0 %v8210_v34  ;;  %6351 = vmatprep.mubr.bf16.mxu0 %v7955_v43  ;;  %3292 = vst [vmem:[#allocation2 + $0xc4] sm:$0xf] %v3134_v31  ;;  %v8237_v15 = vld [vmem:[#allocation2 + $0xc8] ss:$0 sps:$4 sm:$0x11]   ;;  %10098 = vst [vmem:[#allocation12_spill] sm:$0xff] %v8286_v41 }
  0xcd   :  { %5564 = vmatprep.subr.bf16.mxu0 %v8225_v1  ;;  %5626 = vmatprep.subr.bf16.mxu1 %v8231_v19  ;;  %2827 = vst [vmem:[#allocation2 + $0xc8] sm:$0x1] %v6853_v2  ;;  %v3125_v44 = vor.u32 %v3123_v40, %v8098_v58  ;;  %2830 = vst [vmem:[#allocation2 + $0xd4] sm:$0x1] %v6853_v2  ;;  %v3135_v2 = vrot.slane %v8125_v12, 4  ;;  %v8306_v12 = vld [vmem:[%s10052_s1 + $0xf8] sm:$0xff]  }
  0xce   :  { %2270 = vmatmul.mubr.bf16.gmra.mrb[72].mxu1 %v7765_v24  ;;  %v8312_v56 = vld [vmem:[%s10052_s1 + $0x170] sm:$0xff]  }
  0xcf   :  { %2277 = vmatprep.mubr.bf16.mxu1 %v8215_v49  ;;  %5627 = vmatpush3.bf16.msra.mxu1 %v8250_v17  ;;  %10099 = vst [vmem:[#allocation13_spill] sm:$0xff] %v8312_v56 }
  0xd0   :  { %5565 = vmatpush3.bf16.msra.mxu0 %v8259_v27  ;;  %5628 = vmatprep.subr.bf16.mxu1 %v8270_v22 }
  0xd1   :  { %5566 = vmatprep.subr.bf16.mxu0 %v8278_v33 }
  0xd2   :  { %v3289_v58 = vld [vmem:[#allocation2 + $0xc0] sm:$0xf] }
  0xd3   :  { %6352 = vmatmul.mubr.bf16.gmra.mrb[76].mxu0 %v8245_v53  ;;  %5629 = vmatpush3.bf16.msra.mxu1 %v8286_v41  ;;  %v3290_v30 = vsel %vm7077_vm7, %v3125_v44, %v3289_v58 }
  0xd4   :  { %5567 = vmatpush3.bf16.msra.mxu0 %v8293_v21  ;;  %2350 = vmatprep.mubr.bf16.mxu0 %v7723_v28  ;;  %3291 = vst [vmem:[#allocation2 + $0xc0] sm:$0xf] %v3290_v30 }
  0xd5   :  { %5568 = vmatprep.subr.bf16.mxu0 %v8306_v12  ;;  %5630 = vmatprep.subr.bf16.mxu1 %v8312_v56 }
  0xd6   :  { %11 = vsyncpa [#allocation4], 0  ;;  %2278 = vmatmul.mubr.bf16.gmra.mrb[76].mxu1 %v7842_v23  ;;  %v3293_v55 = vld [vmem:[#allocation2 + $0xc8] sm:$0x1]  ;;  %v8320_v28 = vld [vmem:[%s10052_s1 + $0x130] sm:$0xff]   ;;  %v2109_v40 = vor.u32 %v2108_v4, %v2104_v42  ;;  %v2113_v35 = vrot.slane %v2111_v14, 1 }
  0xd7   :  { %2285 = vmatprep.mubr.bf16.mxu1 %v8297_v39  ;;  %10100 = vst [vmem:[#allocation14_spill] sm:$0xff] %v8320_v28  ;;  %5631 = vmatpush3.bf16.msra.mxu1 %v8320_v28  ;;  %v3294_v31 = vsel %vm7092_vm9, %v3135_v2, %v3293_v55  ;;  %v8328_v37 = vld [vmem:[%s10052_s1 + $0xb8] sm:$0xff]   ;;  %v2118_v48 = vshll.u32 %v8011_v60, 16  ;;  %v8341_v3 = vld [vmem:[%s10052_s1 + $0x1c0] sm:$0xff]   ;;  %v2123_v4 = vshll.u32 %v8013_v50, 16  ;;  %v8366_v14 = vld [vmem:[%s10052_s1 + $0x1c8] sm:$0xff]  }
  0xd8   :  { %5569 = vmatpush3.bf16.msra.mxu0 %v8328_v37  ;;  %v8335_v61 = vld [vmem:[%s10052_s1 + $0x178] sm:$0xff]   ;;  %3295 = vst [vmem:[#allocation2 + $0xc8] sm:$0x1] %v3294_v31  ;;  %v8354_v42 = vld [vmem:[%s10052_s1 + $0x180] sm:$0xff]   ;;  %v8358_v2 = vsel %vm824_vm1, %v2109_v40, %v2113_v35  ;;  %v8380_v55 = vld [vmem:[%s10052_s1 + $0x188] sm:$0xff]   ;;  %v2130_v35 = vshll.u32 %v8073_v5, 16 }
  0xd9   :  { %10101 = vst [vmem:[#allocation15_spill] sm:$0xff] %v8335_v61  ;;  %5632 = vmatprep.subr.bf16.mxu1 %v8335_v61  ;;  %5682 = vmatprep.subr.bf16.mxu0 %v8341_v3  ;;  %v8348_v44 = vld [vmem:[%s10052_s1 + $0x138] sm:$0xff]   ;;  %v2120_v58 = vrot.slane %v2118_v48, 1  ;;  %v8372_v30 = vld [vmem:[%s10052_s1 + $0x200] sm:$0xff]   ;;  %v2125_v40 = vrot.slane %v2123_v4, 1  ;;  %v8387_v48 = vld [vmem:[%s10052_s1 + $0x1d0] sm:$0xff]  }
  0xda   :  { %10102 = vst [vmem:[#allocation16_spill] sm:$0xff] %v8348_v44  ;;  %10103 = vst [vmem:[#allocation17_spill] sm:$0xff] %v8372_v30  ;;  %v2146_v61 = vrot.slane %v7773_v25, 1  ;;  %v2132_v4 = vrot.slane %v2130_v35, 1  ;;  %v2135_v56 = vshll.u32 %v8087_v51, 16  ;;  %v8408_v25 = vld [vmem:[%s10052_s1 + $0x1d8] sm:$0xff]  }
  0xdb   :  { %2351 = vmatmul.mubr.bf16.vlgmr.msra.gmra.mrb[80].mxu0 %v7955_v43  ;;  %5633 = vmatpush3.bf16.msra.mxu1 %v8348_v44  ;;  %v2116_v43 = vshrl.u32 %v8011_v60, 16  ;;  %10104 = vst [vmem:[#allocation18_spill] sm:$0xff] %v8387_v48  ;;  %v2145_v44 = vrot.slane %v7765_v24, 1  ;;  %10106 = vst [vmem:[#allocation20_spill] sm:$0xff] %v8408_v25  ;;  %v8419_v35 = vld [vmem:[%s10052_s1 + $0x198] sm:$0xff]   ;;  %v8425_v22 = vld [vmem:[%s10052_s1 + $0x1e0] sm:$0xff]  }
  0xdc   :  { %5683 = vmatpush3.bf16.msra.mxu0 %v8354_v42  ;;  %2358 = vmatprep.mubr.bf16.mxu0 %v7765_v24  ;;  %v2137_v41 = vrot.slane %v2135_v56, 1  ;;  %10107 = vst [vmem:[#allocation21_spill] sm:$0xff] %v8419_v35  ;;  %10108 = vst [vmem:[#allocation22_spill] sm:$0xff] %v8425_v22  ;;  %v2148_v56 = vrot.slane %v7842_v23, 1  ;;  %v2151_v17 = vrot.slane %v7910_v32, 1  ;;  %vm6855_vm10 = vmmov 0  }
  0xdd   :  { %5684 = vmatprep.subr.bf16.mxu0 %v8366_v14  ;;  %6355 = vmatprep.subr.bf16.mxu1 %v8372_v30  ;;  %v2121_v31 = vor.u32 %v2120_v58, %v2116_v43  ;;  %v8400_v43 = vld [vmem:[%s10052_s1 + $0x190] sm:$0xff]   ;;  %v2128_v58 = vshrl.u32 %v8073_v5, 16  ;;  %s6857_s27 = smov [#allocation3]  }
  0xde   :  { %2286 = vmatmul.mubr.bf16.gmra.mrb[80].mxu1 %v7910_v32  ;;  %10105 = vst [vmem:[#allocation19_spill] sm:$0xff] %v8400_v43  ;;  %s5031_s28 = sshll.u32 %s6857_s27, 4  ;;  %s5032_s28 = int_to_ptr.vmem [resolvable:$true] %s5031_s28 }
  0xdf   :  { %2293 = vmatprep.mubr.bf16.mxu1 %v8358_v2  ;;  %v8394_v28 = vsel %vm824_vm1, %v2121_v31, %v2125_v40  ;;  %v8414_v31 = vsel %vm929_vm8, %v2145_v44, %v2146_v61  ;;  %v2133_v40 = vor.u32 %v2132_v4, %v2128_v58  ;;  %v2149_v44 = vrot.slane %v7844_v18, 1  ;;  %v8438_v58 = vld [vmem:[%s10052_s1 + $0x1a0] sm:$0xff]   ;;  %v8444_v4 = vld [vmem:[%s10052_s1 + $0x1e8] sm:$0xff]   ;;  %s6829_s29 = scalar_lea.vmem %s5032_s28, 32  ;;  %p6834_p1 = scmp.lt.s32.totalorder %s5032_s28, %s5032_s28 }
  0xe0   :  { %5685 = vmatpush3.bf16.msra.mxu0 %v8380_v55  ;;  %10109 = vst [vmem:[#allocation23_spill] sm:$0xff] %v8438_v58  ;;  %10110 = vst [vmem:[#allocation24_spill] sm:$0xff] %v8444_v4  ;;  %p6830_p0 = scmp.ne.s32.totalorder %s5032_s28, %s6829_s29  ;;  %p6835_p2 = scmp.lt.s32.totalorder %s6829_s29, %s6829_s29 }
  0xe1   :  { %5686 = vmatprep.subr.bf16.mxu0 %v8387_v48  ;;  %v8430_v61 = vsel %vm824_vm1, %v2133_v40, %v2137_v41  ;;  %v8450_v18 = vsel %vm929_vm8, %v2148_v56, %v2149_v44  ;;  %v8455_v41 = vld [vmem:[%s10052_s1 + $0x1a8] sm:$0xff]   ;;  %v8461_v40 = vld [vmem:[%s10052_s1 + $0x1f0] sm:$0xff]  }
  0xe2   :  { %10111 = vst [vmem:[#allocation25_spill] sm:$0xff] %v8455_v41  ;;  %10112 = vst [vmem:[#allocation26_spill] sm:$0xff] %v8461_v40  ;;  %p6836_p3 = por %p6835_p2, %p6834_p1 }
  0xe3   :  { %2359 = vmatmul.mubr.bf16.gmra.mrb[84].mxu0 %v8245_v53 }
  0xe4   :  { %2366 = vmatprep.mubr.bf16.mxu0 %v7842_v23  ;;  %5687 = vmatpush3.bf16.msra.mxu0 %v8400_v43  ;;  %v6727_v43 = vld [vmem:[%s10052_s1 + $0x218] sm:$0xff]   ;;  %p6837_p4 = pnand %p6836_p3, %p6830_p0 }
  0xe5   :  { %5688 = vmatprep.subr.bf16.mxu0 %v8408_v25 }
  0xe6   :  { %2294 = vmatmul.mubr.bf16.gmra.mrb[84].mxu1 %v7966_v47 }
  0xe7   :  { %2301 = vmatprep.mubr.bf16.mxu1 %v8394_v28 }
  0xe8   :  { %5689 = vmatpush3.bf16.msra.mxu0 %v8419_v35 }
  0xe9   :  { %5690 = vmatprep.subr.bf16.mxu0 %v8425_v22  ;;  %v2152_v22 = vrot.slane %v7912_v45, 1 }
  0xeb   :  { %2367 = vmatmul.mubr.bf16.gmra.mrb[88].mxu0 %v8414_v31  ;;  %v8483_v45 = vsel %vm929_vm8, %v2151_v17, %v2152_v22  ;;  %v2154_v17 = vrot.slane %v7966_v47, 1  ;;  %v2155_v22 = vrot.slane %v7977_v54, 1  ;;  %v6725_v54 = vld [vmem:[%s10052_s1 + $0x208] sm:$0xff]  }
  0xec   :  { %2374 = vmatprep.mubr.bf16.mxu0 %v7910_v32  ;;  %5691 = vmatpush3.bf16.msra.mxu0 %v8438_v58 }
  0xed   :  { %5692 = vmatprep.subr.bf16.mxu0 %v8444_v4  ;;  %v8507_v29 = vsel %vm929_vm8, %v2154_v17, %v2155_v22 }
  0xee   :  { %2302 = vmatmul.mubr.bf16.gmra.mrb[88].mxu1 %v8011_v60 }
  0xef   :  { %2309 = vmatprep.mubr.bf16.mxu1 %v8430_v61 }
  0xf0   :  { %5693 = vmatpush3.bf16.msra.mxu0 %v8455_v41  ;;  %v8471_v41 = vld [vmem:[%s10052_s1 + $0x1b0] sm:$0xff]  }
  0xf1   :  { %5694 = vmatprep.subr.bf16.mxu0 %v8461_v40  ;;  %10113 = vst [vmem:[#allocation27_spill] sm:$0xff] %v8471_v41 }
  0xf3   :  { %2375 = vmatmul.mubr.bf16.gmra.mrb[92].mxu0 %v8450_v18 }
  0xf4   :  { %2382 = vmatprep.mubr.bf16.mxu0 %v7966_v47  ;;  %5695 = vmatpush3.bf16.msra.mxu0 %v8471_v41 }
  0xf6   :  { %v5234_v4 = vpop.f32.mrb[0].mxu0  ;;  %2310 = vmatmul.mubr.bf16.gmra.mrb[92].mxu1 %v8073_v5 }
  0xf7   :  { %v5235_v58 = vpop.f32.mrb[1].mxu0  ;;  %2447 = vmatprep.mubr.bf16.mxu1 %v8245_v53 }
  0xf8   :  { %v5236_v56 = vadd.f32 %v5235_v58, %v5234_v4  ;;  %v5237_v44 = vpop.f32.mrb[2].mxu0  ;;  %v8477_v58 = vld [vmem:[%s10052_s1 + $0x1f8] sm:$0xff]  }
  0xf9   :  { %v5238_v40 = vpop.f32.mrb[3].mxu0  ;;  %10114 = vst [vmem:[#allocation28_spill] sm:$0xff] %v8477_v58  ;;  %5696 = vmatprep.subr.bf16.mxu0 %v8477_v58  ;;  %v8488_v4 = vld [vmem:[%s10052_s1 + $0x1b8] sm:$0xff]  }
  0xfa   :  { %v5239_v35 = vadd.f32 %v5238_v40, %v5237_v44  ;;  %10115 = vst [vmem:[#allocation29_spill] sm:$0xff] %v8488_v4  ;;  %5697 = vmatpush3.bf16.msra.mxu0 %v8488_v4  ;;  %v8494_v40 = vld [vmem:[%s10052_s1 + $0x40] sm:$0xff]  }
  0xfb   :  { %10116 = vst [vmem:[#allocation30_spill] sm:$0xff] %v8494_v40  ;;  %5762 = vmatprep.subr.bf16.mxu0 %v8494_v40  ;;  %2383 = vmatmul.mubr.bf16.gmra.mrb[96].mxu0 %v8483_v45 }
  0xfc   :  { %2390 = vmatprep.mubr.bf16.mxu0 %v8011_v60 }
  0xfe   :  { %v5298_v53 = vpop.f32.mrb[0].mxu1  ;;  %2448 = vmatmul.mubr.bf16.vlgmr.msra.gmra.mrb[96].mxu1 %v7984_v9 }
  0xff   :  { %v5299_v44 = vpop.f32.mrb[1].mxu1  ;;  %6356 = vmatpush3.bf16.msra.mxu1 %v8372_v30  ;;  %2455 = vmatprep.mubr.bf16.mxu1 %v8414_v31 }
 0x100   :  { %v5300_v58 = vadd.f32 %v5299_v44, %v5298_v53  ;;  %v5301_v41 = vpop.f32.mrb[2].mxu1  ;;  %6357 = vmatprep.subr.bf16.mxu1 %v6725_v54 }
 0x101   :  { %v5302_v4 = vpop.f32.mrb[3].mxu1 }
 0x102   :  { %v8504_v40 = vadd.f32 %v5300_v58, %v5236_v56  ;;  %v5303_v19 = vadd.f32 %v5302_v4, %v5301_v41  ;;  %v2157_v56 = vrot.slane %v8011_v60, 1  ;;  %v2158_v41 = vrot.slane %v8013_v50, 1  ;;  %v6726_v58 = vld [vmem:[%s10052_s1 + $0x210] sm:$0xff]  }
 0x103   :  { %2391 = vmatmul.mubr.bf16.gmra.mrb[100].mxu0 %v8507_v29  ;;  %6358 = vmatpush3.bf16.msra.mxu1 %v6725_v54 }
 0x104   :  { %v8512_v53 = vadd.f32 %v5303_v19, %v5239_v35  ;;  %2398 = vmatprep.mubr.bf16.mxu0 %v8073_v5  ;;  %6359 = vmatprep.subr.bf16.mxu1 %v6726_v58  ;;  %v8524_v50 = vsel %vm929_vm8, %v2157_v56, %v2158_v41  ;;  %v2161_v56 = vrot.slane %v8087_v51, 1  ;;  %v6728_v41 = vld [vmem:[%s10052_s1 + $0x220] sm:$0xff]  }
 0x106   :  { %v5240_v9 = vpop.f32.mrb[4].mxu0  ;;  %2456 = vmatmul.mubr.bf16.gmra.mrb[100].mxu1 %v8147_v10 }
 0x107   :  { %v5241_v4 = vpop.f32.mrb[5].mxu0  ;;  %2463 = vmatprep.mubr.bf16.mxu1 %v8450_v18  ;;  %6360 = vmatpush3.bf16.msra.mxu1 %v6726_v58  ;;  %v2160_v58 = vrot.slane %v8073_v5, 1 }
 0x108   :  { %v5304_v17 = vpop.f32.mrb[4].mxu1  ;;  %v5242_v22 = vadd.f32 %v5241_v4, %v5240_v9  ;;  %v5243_v19 = vpop.f32.mrb[6].mxu0  ;;  %6361 = vmatprep.subr.bf16.mxu1 %v6727_v43 }
 0x109   :  { %v5305_v35 = vpop.f32.mrb[5].mxu1  ;;  %v5244_v44 = vpop.f32.mrb[7].mxu0 }
 0x10a   :  { %v5306_v54 = vadd.f32 %v5305_v35, %v5304_v17  ;;  %v5307_v30 = vpop.f32.mrb[6].mxu1  ;;  %v5245_v25 = vadd.f32 %v5244_v44, %v5243_v19  ;;  %v8543_v19 = vsel %vm929_vm8, %v2160_v58, %v2161_v56  ;;  %v6729_v44 = vld [vmem:[%s10052_s1 + $0x228] sm:$0xff]   ;;  %v6730_v58 = vld [vmem:[%s10052_s1 + $0x230] sm:$0xff]  }
 0x10b   :  { %v5308_v9 = vpop.f32.mrb[7].mxu1  ;;  %2399 = vmatmul.mubr.bf16.gmra.mrb[104].mxu0 %v8524_v50  ;;  %6362 = vmatpush3.bf16.msra.mxu1 %v6727_v43 }
 0x10c   :  { %v5309_v4 = vadd.f32 %v5308_v9, %v5307_v30  ;;  %v8529_v52 = vadd.f32 %v5306_v54, %v5242_v22  ;;  %2406 = vmatprep.mubr.bf16.mxu0 %v8205_v20  ;;  %6363 = vmatprep.subr.bf16.mxu1 %v6728_v41 }
 0x10e   :  { %v8532_v11 = vadd.f32 %v5309_v4, %v5245_v25  ;;  %2464 = vmatmul.mubr.bf16.gmra.mrb[104].mxu1 %v8215_v49 }
 0x10f   :  { %v5246_v17 = vpop.f32.mrb[8].mxu0  ;;  %2471 = vmatprep.mubr.bf16.mxu1 %v8483_v45  ;;  %6364 = vmatpush3.bf16.msra.mxu1 %v6728_v41 }
 0x110   :  { %v5247_v30 = vpop.f32.mrb[9].mxu0  ;;  %6365 = vmatprep.subr.bf16.mxu1 %v6729_v44 }
 0x111   :  { %v5248_v25 = vadd.f32 %v5247_v30, %v5246_v17  ;;  %v5249_v22 = vpop.f32.mrb[10].mxu0 }
 0x112   :  { %v5310_v43 = vpop.f32.mrb[8].mxu1  ;;  %v5250_v51 = vpop.f32.mrb[11].mxu0 }
 0x113   :  { %v5311_v35 = vpop.f32.mrb[9].mxu1  ;;  %v5251_v4 = vadd.f32 %v5250_v51, %v5249_v22  ;;  %2407 = vmatmul.mubr.bf16.gmra.mrb[108].mxu0 %v8543_v19  ;;  %6366 = vmatpush3.bf16.msra.mxu1 %v6729_v44 }
 0x114   :  { %v5312_v54 = vadd.f32 %v5311_v35, %v5310_v43  ;;  %v5313_v9 = vpop.f32.mrb[10].mxu1  ;;  %2544 = vmatprep.mubr.bf16.mxu0 %v8147_v10  ;;  %6367 = vmatprep.subr.bf16.mxu1 %v6730_v58  ;;  %v8566_v35 = vld [vmem:[%s10052_s1] sm:$0xff]  }
 0x115   :  { %v5314_v48 = vpop.f32.mrb[11].mxu1  ;;  %10117 = vst [vmem:[#allocation31_spill] sm:$0xff] %v8566_v35 }
 0x116   :  { %v5315_v41 = vadd.f32 %v5314_v48, %v5313_v9  ;;  %v8549_v17 = vadd.f32 %v5312_v54, %v5248_v25  ;;  %2472 = vmatmul.mubr.bf16.gmra.mrb[108].mxu1 %v8297_v39  ;;  %v6731_v48 = vld [vmem:[%s10052_s1 + $0x238] sm:$0xff]   ;;  %v8573_v54 = vld [vmem:[%s10052_s1 + $0x48] sm:$0xff]  }
 0x117   :  { %2479 = vmatprep.mubr.bf16.mxu1 %v8507_v29  ;;  %6368 = vmatpush3.bf16.msra.mxu1 %v6730_v58  ;;  %10118 = vst [vmem:[#allocation32_spill] sm:$0xff] %v8573_v54 }
 0x118   :  { %v8555_v56 = vadd.f32 %v5315_v41, %v5251_v4  ;;  %6369 = vmatprep.subr.bf16.mxu1 %v6731_v48  ;;  %v6734_v41 = vld [vmem:[%s10052_s1 + $0xc0] sm:$0xff]  }
 0x11b   :  { %v5252_v30 = vpop.f32.mrb[12].mxu0  ;;  %2545 = vmatmul.mubr.bf16.vlgmr.msra.gmra.mrb[112].mxu0 %v7765_v24  ;;  %6370 = vmatpush3.bf16.msra.mxu1 %v6731_v48 }
 0x11c   :  { %v5253_v43 = vpop.f32.mrb[13].mxu0  ;;  %5763 = vmatpush3.bf16.msra.mxu0 %v8566_v35  ;;  %2552 = vmatprep.mubr.bf16.mxu0 %v8215_v49  ;;  %v2186_v35 = vshll.u32 %v8237_v15, 16 }
 0x11d   :  { %v5316_v10 = vpop.f32.mrb[12].mxu1  ;;  %v5254_v25 = vadd.f32 %v5253_v43, %v5252_v30  ;;  %v5255_v22 = vpop.f32.mrb[14].mxu0  ;;  %5764 = vmatprep.subr.bf16.mxu0 %v8573_v54  ;;  %5826 = vmatprep.subr.bf16.mxu1 %v6734_v41  ;;  %v8586_v30 = vld [vmem:[%s10052_s1 + $0x8] sm:$0xff]   ;;  %v6736_v43 = vld [vmem:[%s10052_s1 + $0x50] sm:$0xff]   ;;  %v2179_v54 = vshrl.u32 %v8205_v20, 16 }
 0x11e   :  { %v5317_v51 = vpop.f32.mrb[13].mxu1  ;;  %v5256_v44 = vpop.f32.mrb[15].mxu0  ;;  %2480 = vmatmul.mubr.bf16.gmra.mrb[112].mxu1 %v8358_v2  ;;  %10119 = vst [vmem:[#allocation33_spill] sm:$0xff] %v8586_v30 }
 0x11f   :  { %v5318_v24 = vadd.f32 %v5317_v51, %v5316_v10  ;;  %v5319_v9 = vpop.f32.mrb[14].mxu1  ;;  %v5257_v4 = vadd.f32 %v5256_v44, %v5255_v22  ;;  %2487 = vmatprep.mubr.bf16.mxu1 %v8524_v50  ;;  %v6738_v44 = vld [vmem:[%s10052_s1 + $0x58] sm:$0xff]  }
 0x120   :  { %v5320_v49 = vpop.f32.mrb[15].mxu1  ;;  %5765 = vmatpush3.bf16.msra.mxu0 %v8586_v30 }
 0x121   :  { %v5321_v58 = vadd.f32 %v5320_v49, %v5319_v9  ;;  %v8581_v48 = vadd.f32 %v5318_v24, %v5254_v25  ;;  %5766 = vmatprep.subr.bf16.mxu0 %v6736_v43  ;;  %v6737_v25 = vld [vmem:[%s10052_s1 + $0x10] sm:$0xff]   ;;  %v2192_v43 = vrot.slane %v8237_v15, 1 }
 0x123   :  { %v8592_v10 = vadd.f32 %v5321_v58, %v5257_v4  ;;  %2553 = vmatmul.mubr.bf16.gmra.mrb[116].mxu0 %v7842_v23  ;;  %v2181_v4 = vshll.u32 %v8205_v20, 16  ;;  %v2191_v58 = vrot.slane %v8205_v20, 1 }
 0x124   :  { %2560 = vmatprep.mubr.bf16.mxu0 %v8297_v39  ;;  %5767 = vmatpush3.bf16.msra.mxu0 %v6737_v25  ;;  %v6739_v25 = vld [vmem:[%s10052_s1 + $0x18] sm:$0xff]  }
 0x125   :  { %10120 = vst [vmem:[#allocation34_spill] sm:$0xff] %v8592_v10  ;;  %5768 = vmatprep.subr.bf16.mxu0 %v6738_v44 }
 0x126   :  { %v5258_v22 = vpop.f32.mrb[16].mxu0  ;;  %2488 = vmatmul.mubr.bf16.gmra.mrb[116].mxu1 %v8394_v28 }
 0x127   :  { %v5259_v51 = vpop.f32.mrb[17].mxu0  ;;  %2495 = vmatprep.mubr.bf16.mxu1 %v8543_v19 }
 0x128   :  { %v5260_v24 = vadd.f32 %v5259_v51, %v5258_v22  ;;  %v5261_v9 = vpop.f32.mrb[18].mxu0  ;;  %5769 = vmatpush3.bf16.msra.mxu0 %v6739_v25  ;;  %v6740_v51 = vld [vmem:[%s10052_s1 + $0x60] sm:$0xff]   ;;  %v8619_v25 = vsel %vm929_vm8, %v2191_v58, %v2192_v43  ;;  %v6744_v58 = vld [vmem:[%s10052_s1 + $0x70] sm:$0xff]  }
 0x129   :  { %v5322_v23 = vpop.f32.mrb[16].mxu1  ;;  %v5262_v39 = vpop.f32.mrb[19].mxu0  ;;  %5770 = vmatprep.subr.bf16.mxu0 %v6740_v51 }
 0x12a   :  { %v5323_v41 = vpop.f32.mrb[17].mxu1  ;;  %v5263_v49 = vadd.f32 %v5262_v39, %v5261_v9  ;;  %v2183_v39 = vrot.slane %v2181_v4, 1 }
 0x12b   :  { %v5324_v44 = vadd.f32 %v5323_v41, %v5322_v23  ;;  %v5325_v22 = vpop.f32.mrb[18].mxu1  ;;  %2561 = vmatmul.mubr.bf16.gmra.mrb[120].mxu0 %v7910_v32  ;;  %v6741_v23 = vld [vmem:[%s10052_s1 + $0x20] sm:$0xff]   ;;  %v6742_v32 = vld [vmem:[%s10052_s1 + $0x68] sm:$0xff]  }
 0x12c   :  { %v5326_v30 = vpop.f32.mrb[19].mxu1  ;;  %2568 = vmatprep.mubr.bf16.mxu0 %v8358_v2  ;;  %5771 = vmatpush3.bf16.msra.mxu0 %v6741_v23  ;;  %v2184_v15 = vor.u32 %v2183_v39, %v2179_v54  ;;  %v6743_v2 = vld [vmem:[%s10052_s1 + $0x28] sm:$0xff]   ;;  %v6745_v23 = vld [vmem:[%s10052_s1 + $0x30] sm:$0xff]  }
 0x12d   :  { %v5327_v9 = vadd.f32 %v5326_v30, %v5325_v22  ;;  %v8616_v10 = vadd.f32 %v5324_v44, %v5260_v24  ;;  %5772 = vmatprep.subr.bf16.mxu0 %v6742_v32  ;;  %v2188_v24 = vrot.slane %v2186_v35, 1 }
 0x12e   :  { %2496 = vmatmul.mubr.bf16.gmra.mrb[120].mxu1 %v8430_v61 }
 0x12f   :  { %v8628_v30 = vadd.f32 %v5327_v9, %v5263_v49  ;;  %2503 = vmatprep.mubr.bf16.mxu1 %v8619_v25  ;;  %v2189_v22 = vsel %vm824_vm1, %v2184_v15, %v2188_v24 }
 0x130   :  { %5773 = vmatpush3.bf16.msra.mxu0 %v6743_v2  ;;  %v6748_v2 = vld [vmem:[%s10052_s1 + $0x140] sm:$0xff]  }
 0x131   :  { %v5264_v4 = vpop.f32.mrb[20].mxu0  ;;  %5774 = vmatprep.subr.bf16.mxu0 %v6744_v58 }
 0x132   :  { %v5265_v41 = vpop.f32.mrb[21].mxu0 }
 0x133   :  { %v5266_v43 = vadd.f32 %v5265_v41, %v5264_v4  ;;  %v5267_v44 = vpop.f32.mrb[22].mxu0  ;;  %2569 = vmatmul.mubr.bf16.gmra.mrb[124].mxu0 %v7966_v47  ;;  %v6746_v4 = vld [vmem:[%s10052_s1 + $0x78] sm:$0xff]   ;;  %v2207_v41 = vshll.u32 %v8220_v13, 16 }
 0x134   :  { %v5328_v49 = vpop.f32.mrb[20].mxu1  ;;  %v5268_v54 = vpop.f32.mrb[23].mxu0  ;;  %2576 = vmatprep.mubr.bf16.mxu0 %v8394_v28  ;;  %5775 = vmatpush3.bf16.msra.mxu0 %v6745_v23  ;;  %v6747_v28 = vld [vmem:[%s10052_s1 + $0x38] sm:$0xff]  }
 0x135   :  { %v5329_v35 = vpop.f32.mrb[21].mxu1  ;;  %v5269_v39 = vadd.f32 %v5268_v54, %v5267_v44  ;;  %5776 = vmatprep.subr.bf16.mxu0 %v6746_v4  ;;  %v8667_v4 = vld [vmem:[#allocation2] sm:$0xff]  }
 0x136   :  { %v5330_v51 = vadd.f32 %v5329_v35, %v5328_v49  ;;  %v5331_v9 = vpop.f32.mrb[22].mxu1  ;;  %2504 = vmatmul.mubr.bf16.gmra.mrb[124].mxu1 %v2189_v22 }
 0x137   :  { %v5332_v32 = vpop.f32.mrb[23].mxu1  ;;  %6371 = vmatprep.mubr.bf16.mxu1 %v8414_v31 }
 0x138   :  { %v5333_v47 = vadd.f32 %v5332_v32, %v5331_v9  ;;  %v8647_v15 = vadd.f32 %v5330_v51, %v5266_v43  ;;  %5777 = vmatpush3.bf16.msra.mxu0 %v6747_v28  ;;  %v2205_v9 = vshrl.u32 %v8220_v13, 16  ;;  %v8676_v28 = vld [vmem:[#allocation2 + $0x8] ss:$0 sps:$4 sm:$0x11]  }
 0x139   :  { %5890 = vmatprep.subr.bf16.mxu0 %v6748_v2  ;;  %v3425_v2 = vshll.u32 %v8667_v4, 16 }
 0x13a   :  { %v8653_v24 = vadd.f32 %v5333_v47, %v5269_v39  ;;  %v2209_v39 = vrot.slane %v2207_v41, 1 }
 0x13b   :  { %2577 = vmatmul.mubr.bf16.gmra.mrb[128].mxu0 %v8011_v60 }
 0x13c   :  { %2584 = vmatprep.mubr.bf16.mxu0 %v8430_v61 }
 0x13d   :  { %v5270_v58 = vpop.f32.mrb[24].mxu0 }
 0x13e   :  { %v5334_v31 = vpop.f32.mrb[24].mxu1  ;;  %6372 = vmatmul.mubr.bf16.vlgmr.msra.gmra.mrb[128].mxu1 %v8450_v18  ;;  %v5271_v49 = vpop.f32.mrb[25].mxu0  ;;  %v2212_v18 = vshll.u32 %v8254_v38, 16 }
 0x13f   :  { %v5335_v43 = vpop.f32.mrb[25].mxu1  ;;  %5827 = vmatpush3.bf16.msra.mxu1 %v8065_v0  ;;  %v5272_v44 = vadd.f32 %v5271_v49, %v5270_v58  ;;  %v5273_v54 = vpop.f32.mrb[26].mxu0  ;;  %6375 = vmatprep.mubr.bf16.mxu1 %v8483_v45  ;;  %v3423_v49 = vshrl.u32 %v8667_v4, 16 }
 0x140   :  { %v5336_v35 = vadd.f32 %v5335_v43, %v5334_v31  ;;  %v5337_v51 = vpop.f32.mrb[26].mxu1  ;;  %5828 = vmatprep.subr.bf16.mxu1 %v8078_v7  ;;  %v5274_v60 = vpop.f32.mrb[27].mxu0  ;;  %v2210_v7 = vor.u32 %v2209_v39, %v2205_v9  ;;  %v2214_v47 = vrot.slane %v2212_v18, 1  ;;  %v3427_v43 = vrot.slane %v3425_v2, 1 }
 0x141   :  { %v5338_v61 = vpop.f32.mrb[27].mxu1  ;;  %v5275_v23 = vadd.f32 %v5274_v60, %v5273_v54  ;;  %v8686_v54 = vld [vmem:[#allocation2 + $0xc] sm:$0xff]  }
 0x142   :  { %v5339_v32 = vadd.f32 %v5338_v61, %v5337_v51  ;;  %v8669_v0 = vadd.f32 %v5336_v35, %v5272_v44  ;;  %v2215_v31 = vsel %vm824_vm1, %v2210_v7, %v2214_v47  ;;  %v3430_v44 = vshll.u32 %v8676_v28, 16  ;;  %v8704_v47 = vld [vmem:[#allocation2 + $0x18] sm:$0xff]  }
 0x143   :  { %5829 = vmatpush3.bf16.msra.mxu1 %v8103_v8  ;;  %2585 = vmatmul.mubr.bf16.gmra.mrb[132].mxu0 %v8073_v5  ;;  %v3428_v60 = vor.u32 %v3427_v43, %v3423_v49 }
 0x144   :  { %v8673_v45 = vadd.f32 %v5339_v32, %v5275_v23  ;;  %5830 = vmatprep.subr.bf16.mxu1 %v8119_v62  ;;  %2592 = vmatprep.mubr.bf16.mxu0 %v2189_v22  ;;  %v3432_v61 = vrot.slane %v3430_v44, 1  ;;  %v8694_v23 = vld [vmem:[#allocation2 + $0x14] ss:$0 sps:$4 sm:$0x11]   ;;  %v3437_v32 = vshll.u32 %v8686_v54, 16  ;;  %v3449_v44 = vshll.u32 %v8704_v47, 16 }
 0x146   :  { %6376 = vmatmul.mubr.bf16.gmra.mrb[132].mxu1 %v8507_v29  ;;  %v5276_v41 = vpop.f32.mrb[28].mxu0 }
 0x147   :  { %5831 = vmatpush3.bf16.msra.mxu1 %v8141_v59  ;;  %v5277_v58 = vpop.f32.mrb[29].mxu0  ;;  %6379 = vmatprep.mubr.bf16.mxu1 %v8524_v50 }
 0x148   :  { %v5278_v5 = vadd.f32 %v5277_v58, %v5276_v41  ;;  %5832 = vmatprep.subr.bf16.mxu1 %v8152_v6  ;;  %v5279_v8 = vpop.f32.mrb[30].mxu0  ;;  %v5340_v62 = vpop.f32.mrb[28].mxu1  ;;  %v3433_v58 = vsel %vm824_vm1, %v3428_v60, %v3432_v61  ;;  %v3447_v61 = vshrl.u32 %v8704_v47, 16 }
 0x149   :  { %v5280_v22 = vpop.f32.mrb[31].mxu0  ;;  %v5341_v29 = vpop.f32.mrb[29].mxu1 }
 0x14a   :  { %v5281_v35 = vadd.f32 %v5280_v22, %v5279_v8  ;;  %v5342_v59 = vadd.f32 %v5341_v29, %v5340_v62  ;;  %v5343_v51 = vpop.f32.mrb[30].mxu1  ;;  %v3439_v8 = vrot.slane %v3437_v32, 1  ;;  %v3442_v62 = vshll.u32 %v8694_v23, 16 }
 0x14b   :  { %5833 = vmatpush3.bf16.msra.mxu1 %v8179_v36  ;;  %2593 = vmatmul.mubr.bf16.gmra.mrb[136].mxu0 %v8205_v20  ;;  %v5344_v6 = vpop.f32.mrb[31].mxu1  ;;  %v2218_v20 = vrot.slane %v8254_v38, 1 }
 0x14c   :  { %5834 = vmatprep.subr.bf16.mxu1 %v8193_v63  ;;  %2600 = vmatprep.mubr.bf16.mxu0 %v2215_v31  ;;  %v5345_v50 = vadd.f32 %v5344_v6, %v5343_v51  ;;  %v8691_v9 = vadd.f32 %v5342_v59, %v5278_v5  ;;  %v2217_v63 = vrot.slane %v8220_v13, 1  ;;  %v3444_v51 = vrot.slane %v3442_v62, 1 }
 0x14d   :  { %v3530_v62 = vrot.slane %v8694_v23, 1 }
 0x14e   :  { %6380 = vmatmul.mubr.bf16.gmra.mrb[136].mxu1 %v8543_v19  ;;  %v5362_v39 = vpop.f32.mrb[32].mxu0  ;;  %v8701_v18 = vadd.f32 %v5345_v50, %v5281_v35  ;;  %v8716_v35 = vld [vmem:[#allocation2 + $0x20] ss:$0 sps:$4 sm:$0x11]  }
 0x14f   :  { %5835 = vmatpush3.bf16.msra.mxu1 %v8210_v34  ;;  %v5363_v36 = vpop.f32.mrb[33].mxu0  ;;  %6383 = vmatprep.mubr.bf16.mxu1 %v8619_v25  ;;  %v3435_v34 = vshrl.u32 %v8686_v54, 16 }
 0x150   :  { %v5364_v7 = vadd.f32 %v5363_v36, %v5362_v39  ;;  %5836 = vmatprep.subr.bf16.mxu1 %v8225_v1  ;;  %v5365_v19 = vpop.f32.mrb[34].mxu0  ;;  %v5426_v2 = vpop.f32.mrb[32].mxu1  ;;  %v2219_v1 = vsel %vm929_vm8, %v2217_v63, %v2218_v20  ;;  %v3451_v39 = vrot.slane %v3449_v44, 1  ;;  %v8729_v63 = vld [vmem:[#allocation2 + $0x24] sm:$0xff]  }
 0x151   :  { %v5366_v41 = vpop.f32.mrb[35].mxu0  ;;  %v5427_v5 = vpop.f32.mrb[33].mxu1 }
 0x152   :  { %v5367_v25 = vadd.f32 %v5366_v41, %v5365_v19  ;;  %v1675_v38 = vadd.f32 %v5364_v7, %v8504_v40  ;;  %v5428_v22 = vadd.f32 %v5427_v5, %v5426_v2  ;;  %v5429_v31 = vpop.f32.mrb[34].mxu1 }
 0x153   :  { %5837 = vmatpush3.bf16.msra.mxu1 %v8259_v27  ;;  %2601 = vmatmul.mubr.bf16.gmra.mrb[140].mxu0 %v8220_v13  ;;  %v5430_v43 = vpop.f32.mrb[35].mxu1  ;;  %v3440_v27 = vor.u32 %v3439_v8, %v3435_v34  ;;  %v8743_v8 = vld [vmem:[#allocation2 + $0x2c] ss:$0 sps:$4 sm:$0x11]  }
 0x154   :  { %v1678_v49 = vadd.f32 %v5367_v25, %v8512_v53  ;;  %5838 = vmatprep.subr.bf16.mxu1 %v8278_v33  ;;  %3642 = vmatprep.mubr.bf16.mxu0 %v3433_v58  ;;  %v5431_v29 = vadd.f32 %v5430_v43, %v5429_v31  ;;  %v8718_v40 = vadd.f32 %v5428_v22, %v1675_v38  ;;  %v3526_v53 = vrot.slane %v8667_v4, 1  ;;  %v8756_v31 = vld [vmem:[#allocation2 + $0x30] sm:$0xff]  }
 0x155   :  { %v3527_v33 = vrot.slane %v8676_v28, 1  ;;  %v8733_v28 = vsel %vm824_vm1, %v3440_v27, %v3444_v51  ;;  %v3459_v43 = vshrl.u32 %v8729_v63, 16  ;;  %v3466_v44 = vshll.u32 %v8743_v8, 16 }
 0x156   :  { %6384 = vmatmul.mubr.bf16.gmra.mrb[140].mxu1 %v2219_v1  ;;  %v5368_v59 = vpop.f32.mrb[36].mxu0  ;;  %v8724_v6 = vadd.f32 %v5431_v29, %v1678_v49 }
 0x157   :  { %5839 = vmatpush3.bf16.msra.mxu1 %v8293_v21  ;;  %v5369_v13 = vpop.f32.mrb[37].mxu0  ;;  %3739 = vmatprep.mubr.bf16.mxu1 %v8686_v54  ;;  %v3454_v21 = vshll.u32 %v8716_v35, 16 }
 0x158   :  { %v5370_v50 = vadd.f32 %v5369_v13, %v5368_v59  ;;  %5840 = vmatprep.subr.bf16.mxu1 %v8306_v12  ;;  %v5371_v60 = vpop.f32.mrb[38].mxu0  ;;  %v5432_v32 = vpop.f32.mrb[36].mxu1  ;;  %v3528_v12 = vsel %vm929_vm8, %v3526_v53, %v3527_v33  ;;  %v10121_v53 = vld [vmem:[#allocation18_spill] sm:$0xff] }
 0x159   :  { %v5372_v36 = vpop.f32.mrb[39].mxu0  ;;  %v5433_v7 = vpop.f32.mrb[37].mxu1  ;;  %v3456_v25 = vrot.slane %v3454_v21, 1  ;;  %v3533_v21 = vrot.slane %v8716_v35, 1 }
 0x15a   :  { %v1683_v20 = vadd.f32 %v5370_v50, %v8529_v52  ;;  %v5373_v19 = vadd.f32 %v5372_v36, %v5371_v60  ;;  %v5434_v2 = vadd.f32 %v5433_v7, %v5432_v32  ;;  %v5435_v41 = vpop.f32.mrb[38].mxu1  ;;  %v3452_v52 = vor.u32 %v3451_v39, %v3447_v61  ;;  %v10122_v50 = vld [vmem:[#allocation6_spill] sm:$0xff] }
 0x15b   :  { %5841 = vmatpush3.bf16.msra.mxu1 %v8328_v37  ;;  %3643 = vmatmul.mubr.bf16.vlgmr.msra.gmra.mrb[144].mxu0 %v8667_v4  ;;  %v5436_v34 = vpop.f32.mrb[39].mxu1  ;;  %v3461_v37 = vshll.u32 %v8729_v63, 16  ;;  %v3468_v61 = vrot.slane %v3466_v44, 1  ;;  %v3532_v36 = vrot.slane %v8704_v47, 1 }
 0x15c   :  { %v1686_v58 = vadd.f32 %v5373_v19, %v8532_v11  ;;  %5954 = vmatprep.subr.bf16.mxu1 %v8341_v3  ;;  %5891 = vmatpush3.bf16.msra.mxu0 %v8093_v57  ;;  %v5437_v5 = vadd.f32 %v5436_v34, %v5435_v41  ;;  %v8746_v4 = vadd.f32 %v5434_v2, %v1683_v20  ;;  %v3529_v57 = vrot.slane %v8686_v54, 1  ;;  %v10124_v20 = vld [vmem:[#allocation19_spill] sm:$0xff]  ;;  %v10125_v41 = vld [vmem:[#allocation20_spill] sm:$0xff] }
 0x15d   :  { %3650 = vmatprep.mubr.bf16.mxu0 %v8733_v28  ;;  %5892 = vmatprep.subr.bf16.mxu0 %v8109_v16  ;;  %v3463_v23 = vrot.slane %v3461_v37, 1  ;;  %v8794_v37 = vld [vmem:[#allocation2 + $0x3c] sm:$0xff]  }
 0x15e   :  { %3740 = vmatmul.mubr.bf16.vlgmr.msra.gmra.mrb[144].mxu1 %v3528_v12  ;;  %v5374_v11 = vpop.f32.mrb[40].mxu0  ;;  %v8752_v38 = vadd.f32 %v5437_v5, %v1686_v58  ;;  %v8767_v51 = vsel %vm929_vm8, %v3529_v57, %v3530_v62  ;;  %v3471_v12 = vshrl.u32 %v8756_v31, 16  ;;  %v10127_v62 = vld [vmem:[#allocation9_spill] sm:$0xff] }
 0x15f   :  { %5955 = vmatpush3.bf16.msra.mxu1 %v8354_v42  ;;  %v5375_v3 = vpop.f32.mrb[41].mxu0  ;;  %3747 = vmatprep.mubr.bf16.mxu1 %v8704_v47  ;;  %v8759_v42 = vsel %vm824_vm1, %v3452_v52, %v3456_v25  ;;  %v3464_v60 = vor.u32 %v3463_v23, %v3459_v43  ;;  %v10126_v25 = vld [vmem:[#allocation8_spill] sm:$0xff]  ;;  %v10129_v43 = vld [vmem:[#allocation34_spill] sm:$0xff] }
 0x160   :  { %v5376_v16 = vadd.f32 %v5375_v3, %v5374_v11  ;;  %v5377_v22 = vpop.f32.mrb[42].mxu0  ;;  %5956 = vmatprep.subr.bf16.mxu1 %v8366_v14  ;;  %5893 = vmatpush3.bf16.msra.mxu0 %v8132_v26  ;;  %v5438_v1 = vpop.f32.mrb[40].mxu1 }
 0x161   :  { %v5378_v49 = vpop.f32.mrb[43].mxu0  ;;  %5894 = vmatprep.subr.bf16.mxu0 %v8158_v46  ;;  %v5439_v59 = vpop.f32.mrb[41].mxu1  ;;  %v8790_v5 = vsel %vm824_vm1, %v3464_v60, %v3468_v61  ;;  %v3536_v60 = vrot.slane %v8743_v8, 1  ;;  %v10133_v61 = vld [vmem:[#allocation23_spill] sm:$0xff] }
 0x162   :  { %v1691_v29 = vadd.f32 %v5376_v16, %v8549_v17  ;;  %v5379_v14 = vadd.f32 %v5378_v49, %v5377_v22  ;;  %v5440_v27 = vadd.f32 %v5439_v59, %v5438_v1  ;;  %v5441_v26 = vpop.f32.mrb[42].mxu1  ;;  %v3473_v17 = vshll.u32 %v8756_v31, 16  ;;  %v10128_v49 = vld [vmem:[#allocation21_spill] sm:$0xff] }
 0x163   :  { %3651 = vmatmul.mubr.bf16.gmra.mrb[148].mxu0 %v8686_v54  ;;  %5957 = vmatpush3.bf16.msra.mxu1 %v8380_v55  ;;  %v5442_v13 = vpop.f32.mrb[43].mxu1  ;;  %v8775_v54 = vld [vmem:[#allocation2 + $0x38] ss:$0 sps:$4 sm:$0x11]   ;;  %v8800_v1 = vsel %vm929_vm8, %v3532_v36, %v3533_v21  ;;  %v8820_v36 = vld [vmem:[#allocation2 + $0x48] sm:$0xff]  }
 0x164   :  { %v1694_v46 = vadd.f32 %v5379_v14, %v8555_v56  ;;  %3658 = vmatprep.mubr.bf16.mxu0 %v8759_v42  ;;  %5958 = vmatprep.subr.bf16.mxu1 %v10121_v53  ;;  %v5443_v33 = vadd.f32 %v5442_v13, %v5441_v26  ;;  %v8777_v39 = vadd.f32 %v5440_v27, %v1691_v29  ;;  %v10123_v56 = vld [vmem:[#allocation7_spill] sm:$0xff]  ;;  %v3475_v58 = vrot.slane %v3473_v17, 1  ;;  %v10131_v27 = vld [vmem:[#allocation10_spill] sm:$0xff]  ;;  %v10134_v21 = vld [vmem:[#allocation24_spill] sm:$0xff] }
 0x165   :  { %5895 = vmatpush3.bf16.msra.mxu0 %v10122_v50  ;;  %v3478_v35 = vshll.u32 %v8775_v54, 16  ;;  %v8807_v26 = vld [vmem:[#allocation2 + $0x44] ss:$0 sps:$4 sm:$0x11]   ;;  %v3535_v50 = vrot.slane %v8729_v63, 1 }
 0x166   :  { %3748 = vmatmul.mubr.bf16.gmra.mrb[148].mxu1 %v8767_v51  ;;  %v5380_v55 = vpop.f32.mrb[44].mxu0  ;;  %5896 = vmatprep.subr.bf16.mxu0 %v10123_v56  ;;  %v8785_v7 = vadd.f32 %v5443_v33, %v1694_v46  ;;  %v3476_v29 = vor.u32 %v3475_v58, %v3471_v12  ;;  %v3485_v46 = vshll.u32 %v8794_v37, 16  ;;  %v10132_v17 = vld [vmem:[#allocation11_spill] sm:$0xff]  ;;  %v3490_v8 = vshll.u32 %v8807_v26, 16  ;;  %v10135_v58 = vld [vmem:[#allocation12_spill] sm:$0xff] }
 0x167   :  { %v5381_v32 = vpop.f32.mrb[45].mxu0  ;;  %3755 = vmatprep.mubr.bf16.mxu1 %v8729_v63  ;;  %5959 = vmatpush3.bf16.msra.mxu1 %v10124_v20  ;;  %v3480_v14 = vrot.slane %v3478_v35, 1  ;;  %v10136_v35 = vld [vmem:[#allocation13_spill] sm:$0xff] }
 0x168   :  { %v5382_v19 = vadd.f32 %v5381_v32, %v5380_v55  ;;  %v5383_v2 = vpop.f32.mrb[46].mxu0  ;;  %5960 = vmatprep.subr.bf16.mxu1 %v10125_v41  ;;  %v5444_v34 = vpop.f32.mrb[44].mxu1  ;;  %v3483_v41 = vshrl.u32 %v8794_v37, 16  ;;  %v3487_v12 = vrot.slane %v3485_v46, 1  ;;  %v3538_v46 = vrot.slane %v8756_v31, 1 }
 0x169   :  { %v5384_v52 = vpop.f32.mrb[47].mxu0  ;;  %5897 = vmatpush3.bf16.msra.mxu0 %v10126_v25  ;;  %v5445_v3 = vpop.f32.mrb[45].mxu1 }
 0x16a   :  { %v1699_v11 = vadd.f32 %v5382_v19, %v8581_v48  ;;  %v5385_v57 = vadd.f32 %v5384_v52, %v5383_v2  ;;  %5898 = vmatprep.subr.bf16.mxu0 %v10127_v62  ;;  %v5446_v16 = vadd.f32 %v5445_v3, %v5444_v34  ;;  %v5447_v22 = vpop.f32.mrb[46].mxu1  ;;  %v10130_v48 = vld [vmem:[#allocation22_spill] sm:$0xff]  ;;  %v8824_v2 = vsel %vm824_vm1, %v3476_v29, %v3480_v14  ;;  %v10137_v62 = vld [vmem:[#allocation25_spill] sm:$0xff]  ;;  %v8840_v29 = vld [vmem:[#allocation2 + $0x50] ss:$0 sps:$4 sm:$0x11]  }
 0x16b   :  { %3659 = vmatmul.mubr.bf16.gmra.mrb[152].mxu0 %v8704_v47  ;;  %5961 = vmatpush3.bf16.msra.mxu1 %v10128_v49  ;;  %v5448_v44 = vpop.f32.mrb[47].mxu1  ;;  %v10138_v49 = vld [vmem:[#allocation26_spill] sm:$0xff] }
 0x16c   :  { %v1702_v23 = vadd.f32 %v5385_v57, %v10129_v43  ;;  %3666 = vmatprep.mubr.bf16.mxu0 %v8790_v5  ;;  %5962 = vmatprep.subr.bf16.mxu1 %v10130_v48  ;;  %v5449_v59 = vadd.f32 %v5448_v44, %v5447_v22  ;;  %v8810_v13 = vadd.f32 %v5446_v16, %v1699_v11  ;;  %v3492_v44 = vrot.slane %v3490_v8, 1  ;;  %v10139_v48 = vld [vmem:[#allocation14_spill] sm:$0xff] }
 0x16d   :  { %5899 = vmatpush3.bf16.msra.mxu0 %v10131_v27  ;;  %v8833_v57 = vsel %vm929_vm8, %v3535_v50, %v3536_v60 }
 0x16e   :  { %3756 = vmatmul.mubr.bf16.gmra.mrb[152].mxu1 %v8800_v1  ;;  %v5386_v53 = vpop.f32.mrb[48].mxu0  ;;  %5900 = vmatprep.subr.bf16.mxu0 %v10132_v17  ;;  %v8818_v55 = vadd.f32 %v5449_v59, %v1702_v23  ;;  %v3488_v23 = vor.u32 %v3487_v12, %v3483_v41  ;;  %v10141_v17 = vld [vmem:[#allocation27_spill] sm:$0xff]  ;;  %v3502_v41 = vshll.u32 %v8840_v29, 16  ;;  %v8859_v12 = vld [vmem:[#allocation2 + $0x54] sm:$0xff]  }
 0x16f   :  { %v5387_v33 = vpop.f32.mrb[49].mxu0  ;;  %3763 = vmatprep.mubr.bf16.mxu1 %v8756_v31  ;;  %5963 = vmatpush3.bf16.msra.mxu1 %v10133_v61  ;;  %v3495_v61 = vshrl.u32 %v8820_v36, 16 }
 0x170   :  { %v5388_v56 = vadd.f32 %v5387_v33, %v5386_v53  ;;  %v5389_v32 = vpop.f32.mrb[50].mxu0  ;;  %5964 = vmatprep.subr.bf16.mxu1 %v10134_v21  ;;  %v5450_v20 = vpop.f32.mrb[48].mxu1  ;;  %v3539_v53 = vrot.slane %v8775_v54, 1  ;;  %v10143_v54 = vld [vmem:[#allocation16_spill] sm:$0xff] }
 0x171   :  { %v5390_v19 = vpop.f32.mrb[51].mxu0  ;;  %5901 = vmatpush3.bf16.msra.mxu0 %v10135_v58  ;;  %v5451_v52 = vpop.f32.mrb[49].mxu1 }
 0x172   :  { %v1707_v34 = vadd.f32 %v5388_v56, %v8616_v10  ;;  %v5391_v25 = vadd.f32 %v5390_v19, %v5389_v32  ;;  %5902 = vmatprep.subr.bf16.mxu0 %v10136_v35  ;;  %v5452_v11 = vadd.f32 %v5451_v52, %v5450_v20  ;;  %v5453_v3 = vpop.f32.mrb[50].mxu1  ;;  %v3497_v10 = vshll.u32 %v8820_v36, 16  ;;  %v10142_v32 = vld [vmem:[#allocation28_spill] sm:$0xff]  ;;  %v10144_v52 = vld [vmem:[#allocation17_spill] sm:$0xff] }
 0x173   :  { %3667 = vmatmul.mubr.bf16.gmra.mrb[156].mxu0 %v8729_v63  ;;  %5965 = vmatpush3.bf16.msra.mxu1 %v10137_v62  ;;  %v5454_v22 = vpop.f32.mrb[51].mxu1  ;;  %v8856_v19 = vsel %vm824_vm1, %v3488_v23, %v3492_v44  ;;  %v3509_v23 = vshll.u32 %v8859_v12, 16 }
 0x174   :  { %v1710_v16 = vadd.f32 %v5391_v25, %v8628_v30  ;;  %3674 = vmatprep.mubr.bf16.mxu0 %v8824_v2  ;;  %5966 = vmatprep.subr.bf16.mxu1 %v10138_v49  ;;  %v5455_v43 = vadd.f32 %v5454_v22, %v5453_v3  ;;  %v8843_v59 = vadd.f32 %v5452_v11, %v1707_v34  ;;  %v10140_v30 = vld [vmem:[#allocation15_spill] sm:$0xff]  ;;  %v3499_v56 = vrot.slane %v3497_v10, 1  ;;  %v10145_v3 = vld [vmem:[#allocation29_spill] sm:$0xff] }
 0x175   :  { %5903 = vmatpush3.bf16.msra.mxu0 %v10139_v48  ;;  %v8866_v11 = vsel %vm929_vm8, %v3538_v46, %v3539_v53  ;;  %v3504_v49 = vrot.slane %v3502_v41, 1 }
 0x176   :  { %3764 = vmatmul.mubr.bf16.gmra.mrb[156].mxu1 %v8833_v57  ;;  %v5392_v14 = vpop.f32.mrb[52].mxu0  ;;  %5904 = vmatprep.subr.bf16.mxu0 %v10140_v30  ;;  %v8851_v33 = vadd.f32 %v5455_v43, %v1710_v16  ;;  %v3500_v22 = vor.u32 %v3499_v56, %v3495_v61  ;;  %v8872_v43 = vld [vmem:[#allocation2 + $0x5c] ss:$0 sps:$4 sm:$0x11]   ;;  %v3542_v30 = vrot.slane %v8807_v26, 1  ;;  %v3507_v61 = vshrl.u32 %v8859_v12, 16 }
 0x177   :  { %v5393_v27 = vpop.f32.mrb[53].mxu0  ;;  %3771 = vmatprep.mubr.bf16.mxu1 %v8794_v37  ;;  %5967 = vmatpush3.bf16.msra.mxu1 %v10141_v17  ;;  %v3511_v56 = vrot.slane %v3509_v23, 1 }
 0x178   :  { %v5394_v50 = vadd.f32 %v5393_v27, %v5392_v14  ;;  %v5395_v60 = vpop.f32.mrb[54].mxu0  ;;  %5968 = vmatprep.subr.bf16.mxu1 %v10142_v32  ;;  %v5456_v21 = vpop.f32.mrb[52].mxu1  ;;  %v3514_v32 = vshll.u32 %v8872_v43, 16 }
 0x179   :  { %v5396_v20 = vpop.f32.mrb[55].mxu0  ;;  %5905 = vmatpush3.bf16.msra.mxu0 %v10143_v54  ;;  %v5457_v58 = vpop.f32.mrb[53].mxu1 }
 0x17a   :  { %v1715_v8 = vadd.f32 %v5394_v50, %v8647_v15  ;;  %v5397_v34 = vadd.f32 %v5396_v20, %v5395_v60  ;;  %6387 = vmatprep.subr.bf16.mxu0 %v10144_v52  ;;  %v5458_v25 = vadd.f32 %v5457_v58, %v5456_v21  ;;  %v5459_v35 = vpop.f32.mrb[54].mxu1  ;;  %v10146_v15 = vld [vmem:[#allocation30_spill] sm:$0xff]  ;;  %v8884_v60 = vsel %vm824_vm1, %v3500_v22, %v3504_v49 }
 0x17b   :  { %3675 = vmatmul.mubr.bf16.gmra.mrb[160].mxu0 %v8756_v31  ;;  %5969 = vmatpush3.bf16.msra.mxu1 %v10145_v3  ;;  %v5460_v16 = vpop.f32.mrb[55].mxu1  ;;  %v3545_v22 = vrot.slane %v8840_v29, 1  ;;  %v8911_v29 = vld [vmem:[#allocation2 + $0x60] sm:$0xff]  }
 0x17c   :  { %v1718_v62 = vadd.f32 %v5397_v34, %v8653_v24  ;;  %3682 = vmatprep.mubr.bf16.mxu0 %v8856_v19  ;;  %6034 = vmatprep.subr.bf16.mxu1 %v10146_v15  ;;  %v5461_v10 = vadd.f32 %v5460_v16, %v5459_v35  ;;  %v8875_v44 = vadd.f32 %v5458_v25, %v1715_v8  ;;  %v3541_v24 = vrot.slane %v8794_v37, 1 }
 0x17d   :  { %v3512_v25 = vor.u32 %v3511_v56, %v3507_v61  ;;  %v3516_v35 = vrot.slane %v3514_v32, 1  ;;  %v3544_v16 = vrot.slane %v8820_v36, 1 }
 0x17e   :  { %3772 = vmatmul.mubr.bf16.gmra.mrb[160].mxu1 %v8866_v11  ;;  %v5398_v48 = vpop.f32.mrb[56].mxu0  ;;  %v8881_v27 = vadd.f32 %v5461_v10, %v1718_v62  ;;  %v8891_v8 = vsel %vm929_vm8, %v3541_v24, %v3542_v30 }
 0x17f   :  { %v5399_v14 = vpop.f32.mrb[57].mxu0  ;;  %3779 = vmatprep.mubr.bf16.mxu1 %v8820_v36 }
 0x180   :  { %v5400_v46 = vadd.f32 %v5399_v14, %v5398_v48  ;;  %v5401_v53 = vpop.f32.mrb[58].mxu0  ;;  %v5462_v17 = vpop.f32.mrb[56].mxu1  ;;  %v8904_v48 = vsel %vm824_vm1, %v3512_v25, %v3516_v35 }
 0x181   :  { %v5402_v50 = vpop.f32.mrb[59].mxu0  ;;  %v5463_v20 = vpop.f32.mrb[57].mxu1 }
 0x182   :  { %v1723_v21 = vadd.f32 %v5400_v46, %v8669_v0  ;;  %v5403_v41 = vadd.f32 %v5402_v50, %v5401_v53  ;;  %v5464_v54 = vadd.f32 %v5463_v20, %v5462_v17  ;;  %v5465_v26 = vpop.f32.mrb[58].mxu1  ;;  %v8909_v17 = vsel %vm929_vm8, %v3544_v16, %v3545_v22 }
 0x183   :  { %3683 = vmatmul.mubr.bf16.gmra.mrb[164].mxu0 %v8794_v37  ;;  %v5466_v34 = vpop.f32.mrb[59].mxu1 }
 0x184   :  { %v1726_v58 = vadd.f32 %v5403_v41, %v8673_v45  ;;  %3690 = vmatprep.mubr.bf16.mxu0 %v8884_v60  ;;  %v5467_v52 = vadd.f32 %v5466_v34, %v5465_v26  ;;  %v8895_v3 = vadd.f32 %v5464_v54, %v1723_v21  ;;  %v3548_v54 = vrot.slane %v8872_v43, 1 }
 0x186   :  { %3780 = vmatmul.mubr.bf16.gmra.mrb[164].mxu1 %v8891_v8  ;;  %v5404_v0 = vpop.f32.mrb[60].mxu0  ;;  %v8901_v15 = vadd.f32 %v5467_v52, %v1726_v58  ;;  %v8933_v52 = vld [vmem:[%s10054_s3] ss:$0 sm:$0xff] }
 0x187   :  { %v5405_v62 = vpop.f32.mrb[61].mxu0  ;;  %3787 = vmatprep.mubr.bf16.mxu1 %v8859_v12 }
 0x188   :  { %v5406_v45 = vadd.f32 %v5405_v62, %v5404_v0  ;;  %v5407_v10 = vpop.f32.mrb[62].mxu0  ;;  %v5468_v49 = vpop.f32.mrb[60].mxu1 }
 0x189   :  { %v5408_v23 = vpop.f32.mrb[63].mxu0  ;;  %v5469_v24 = vpop.f32.mrb[61].mxu1 }
 0x18a   :  { %v1731_v14 = vadd.f32 %v5406_v45, %v8691_v9  ;;  %v5409_v30 = vadd.f32 %v5408_v23, %v5407_v10  ;;  %v5470_v46 = vadd.f32 %v5469_v24, %v5468_v49  ;;  %v5471_v53 = vpop.f32.mrb[62].mxu1  ;;  %v8921_v9 = vld [vmem:[%s10053_s2] ss:$0 sm:$0xff] }
 0x18b   :  { %3691 = vmatmul.mubr.bf16.gmra.mrb[168].mxu0 %v8820_v36  ;;  %v5472_v61 = vpop.f32.mrb[63].mxu1 }
 0x18c   :  { %v1734_v50 = vadd.f32 %v5409_v30, %v8701_v18  ;;  %3698 = vmatprep.mubr.bf16.mxu0 %v8904_v48  ;;  %v5473_v56 = vadd.f32 %v5472_v61, %v5471_v53  ;;  %v8915_v32 = vadd.f32 %v5470_v46, %v1731_v14  ;;  %v3547_v18 = vrot.slane %v8859_v12, 1 }
 0x18e   :  { %3788 = vmatmul.mubr.bf16.gmra.mrb[168].mxu1 %v8909_v17  ;;  %v6341_v21 = vpop.f32.mrb[64].mxu0  ;;  %v8927_v26 = vadd.f32 %v5473_v56, %v1734_v50  ;;  %v8943_v45 = vsel %vm929_vm8, %v3547_v18, %v3548_v54 }
 0x18f   :  { %v1877_v20 = vadd.f32 %v6341_v21, %v8746_v4  ;;  %v1868_v41 = vpop.f32.mrb[65].mxu0  ;;  %3795 = vmatprep.mubr.bf16.mxu1 %v8911_v29 }
 0x190   :  { %v1869_v58 = vadd.f32 %v1868_v41, %v8718_v40  ;;  %v6342_v34 = vpop.f32.mrb[66].mxu0  ;;  %v5506_v4 = vpop.f32.mrb[64].mxu1 }
 0x191   :  { %v1939_v25 = vmul.f32 %v8921_v9, %v1877_v20  ;;  %v1880_v35 = vadd.f32 %v6342_v34, %v8752_v38  ;;  %v1871_v0 = vpop.f32.mrb[67].mxu0  ;;  %v5507_v16 = vpop.f32.mrb[65].mxu1 }
 0x192   :  { %v1937_v62 = vmul.f32 %v8921_v9, %v1869_v58  ;;  %v1872_v43 = vadd.f32 %v1871_v0, %v8724_v6  ;;  %v8939_v22 = vadd.f32 %v5507_v16, %v5506_v4  ;;  %v5509_v40 = vpop.f32.mrb[66].mxu1 }
 0x193   :  { %3699 = vmatmul.mubr.bf16.gmra.mrb[172].mxu0 %v8859_v12  ;;  %v1940_v49 = vmul.f32 %v8921_v9, %v1880_v35  ;;  %v5510_v23 = vpop.f32.mrb[67].mxu1  ;;  %v1961_v14 = vadd.f32 %v8933_v52, %v1939_v25 }
 0x194   :  { %v1959_v10 = vadd.f32 %v8933_v52, %v1937_v62  ;;  %v1938_v38 = vmul.f32 %v8921_v9, %v1872_v43  ;;  %3836 = vmatprep.mubr.bf16.mxu0 %v8767_v51  ;;  %v8950_v6 = vadd.f32 %v5510_v23, %v5509_v40 }
 0x195   :  { %v1962_v61 = vadd.f32 %v8933_v52, %v1940_v49  ;;  %v1977_v20 = vmax.f32 %v1961_v14, 0.0 }
 0x196   :  { %v1960_v24 = vadd.f32 %v8933_v52, %v1938_v38  ;;  %3796 = vmatmul.mubr.bf16.gmra.mrb[172].mxu1 %v8943_v45  ;;  %v6345_v30 = vpop.f32.mrb[68].mxu0  ;;  %v1975_v50 = vmax.f32 %v1959_v10, 0.0  ;;  %v8971_v10 = vld [vmem:[%s10052_s1 + $0x200] sm:$0xff]  }
 0x197   :  { %v1893_v46 = vadd.f32 %v6345_v30, %v8810_v13  ;;  %v1884_v53 = vpop.f32.mrb[69].mxu0  ;;  %3933 = vmatprep.mubr.bf16.mxu1 %v8759_v42  ;;  %v10147_v30 = vld [vmem:[#allocation31_spill] sm:$0xff] }
 0x198   :  { %v1976_v56 = vmax.f32 %v1960_v24, 0.0  ;;  %v1885_v51 = vadd.f32 %v1884_v53, %v8777_v39  ;;  %v6346_v21 = vpop.f32.mrb[70].mxu0  ;;  %v1978_v39 = vmax.f32 %v1962_v61, 0.0 }
 0x199   :  { %v5512_v41 = vpop.f32.mrb[68].mxu1  ;;  %v1896_v18 = vadd.f32 %v6346_v21, %v8818_v55  ;;  %v1887_v54 = vpop.f32.mrb[71].mxu0  ;;  %v1943_v34 = vmul.f32 %v8921_v9, %v1893_v46 }
 0x19a   :  { %v1991_v58 = vadd.f32 %v1976_v56, %v1975_v50  ;;  %v1941_v13 = vmul.f32 %v8921_v9, %v1885_v51  ;;  %v5513_v25 = vpop.f32.mrb[69].mxu1  ;;  %v1888_v4 = vadd.f32 %v1887_v54, %v8785_v7 }
 0x19b   :  { %v8962_v35 = vadd.f32 %v5513_v25, %v5512_v41  ;;  %v1944_v0 = vmul.f32 %v8921_v9, %v1896_v18  ;;  %v5515_v62 = vpop.f32.mrb[70].mxu1  ;;  %3837 = vmatmul.mubr.bf16.vlgmr.msra.gmra.mrb[176].mxu0 %v8733_v28  ;;  %v6750_v28 = vld [vmem:[%s10052_s1 + $0x208] sm:$0xff]   ;;  %v1965_v49 = vadd.f32 %v8933_v52, %v1943_v34 }
 0x19c   :  { %v1992_v16 = vadd.f32 %v1991_v58, %v1977_v20  ;;  %v1963_v55 = vadd.f32 %v8933_v52, %v1941_v13  ;;  %v1942_v43 = vmul.f32 %v8921_v9, %v1888_v4  ;;  %v5516_v40 = vpop.f32.mrb[71].mxu1  ;;  %6388 = vmatpush3.bf16.msra.mxu0 %v8971_v10  ;;  %3844 = vmatprep.mubr.bf16.mxu0 %v8800_v1  ;;  %v10148_v20 = vld [vmem:[#allocation32_spill] sm:$0xff] }
 0x19d   :  { %v8975_v7 = vadd.f32 %v5516_v40, %v5515_v62  ;;  %6389 = vmatprep.subr.bf16.mxu0 %v6750_v28  ;;  %v1966_v61 = vadd.f32 %v8933_v52, %v1944_v0  ;;  %v1981_v58 = vmax.f32 %v1965_v49, 0.0 }
 0x19e   :  { %v1979_v38 = vmax.f32 %v1963_v55, 0.0  ;;  %v1993_v23 = vadd.f32 %v1992_v16, %v1978_v39  ;;  %v1964_v14 = vadd.f32 %v8933_v52, %v1942_v43  ;;  %3934 = vmatmul.mubr.bf16.vlgmr.msra.gmra.mrb[176].mxu1 %v8704_v47  ;;  %v6349_v24 = vpop.f32.mrb[72].mxu0 }
 0x19f   :  { %6035 = vmatpush3.bf16.msra.mxu1 %v10147_v30  ;;  %v1909_v46 = vadd.f32 %v6349_v24, %v8875_v44  ;;  %v1900_v53 = vpop.f32.mrb[73].mxu0  ;;  %3941 = vmatprep.mubr.bf16.mxu1 %v8790_v5  ;;  %v6751_v44 = vld [vmem:[%s10052_s1 + $0x210] sm:$0xff]   ;;  %v1982_v39 = vmax.f32 %v1966_v61, 0.0  ;;  %v6753_v24 = vld [vmem:[%s10052_s1 + $0x218] sm:$0xff]  }
 0x1a0   :  { %v1994_v50 = vadd.f32 %v1993_v23, %v1979_v38  ;;  %v1980_v56 = vmax.f32 %v1964_v14, 0.0  ;;  %v1901_v51 = vadd.f32 %v1900_v53, %v8843_v59  ;;  %v6350_v21 = vpop.f32.mrb[74].mxu0  ;;  %6036 = vmatprep.subr.bf16.mxu1 %v10148_v20  ;;  %6390 = vmatpush3.bf16.msra.mxu0 %v6750_v28  ;;  %v6754_v53 = vld [vmem:[%s10052_s1 + $0x10] sm:$0xff]  }
 0x1a1   :  { %v1947_v47 = vmul.f32 %v8921_v9, %v1909_v46  ;;  %v5518_v41 = vpop.f32.mrb[72].mxu1  ;;  %v1912_v18 = vadd.f32 %v6350_v21, %v8881_v27  ;;  %v1903_v54 = vpop.f32.mrb[75].mxu0  ;;  %6391 = vmatprep.subr.bf16.mxu0 %v6751_v44  ;;  %v10149_v27 = vld [vmem:[#allocation33_spill] sm:$0xff] }
 0x1a2   :  { %v1995_v34 = vadd.f32 %v1994_v50, %v1980_v56  ;;  %v1945_v13 = vmul.f32 %v8921_v9, %v1901_v51  ;;  %v5519_v59 = vpop.f32.mrb[73].mxu1  ;;  %v1904_v25 = vadd.f32 %v1903_v54, %v8851_v33  ;;  %v6752_v33 = vld [vmem:[%s10052_s1 + $0x50] sm:$0xff]   ;;  %v6755_v21 = vld [vmem:[%s10052_s1 + $0x58] sm:$0xff]  }
 0x1a3   :  { %v8996_v4 = vadd.f32 %v5519_v59, %v5518_v41  ;;  %v1948_v0 = vmul.f32 %v8921_v9, %v1912_v18  ;;  %v5521_v62 = vpop.f32.mrb[74].mxu1  ;;  %3845 = vmatmul.mubr.bf16.gmra.mrb[180].mxu0 %v8759_v42  ;;  %6037 = vmatpush3.bf16.msra.mxu1 %v10149_v27  ;;  %v1969_v28 = vadd.f32 %v8933_v52, %v1947_v47 }
 0x1a4   :  { %v1996_v16 = vadd.f32 %v1995_v34, %v1981_v58  ;;  %v1967_v55 = vadd.f32 %v8933_v52, %v1945_v13  ;;  %v1946_v43 = vmul.f32 %v8921_v9, %v1904_v25  ;;  %v5522_v40 = vpop.f32.mrb[75].mxu1  ;;  %3852 = vmatprep.mubr.bf16.mxu0 %v8833_v57  ;;  %6038 = vmatprep.subr.bf16.mxu1 %v6752_v33  ;;  %v6756_v34 = vld [vmem:[%s10052_s1 + $0x220] sm:$0xff]   ;;  %v6757_v25 = vld [vmem:[%s10052_s1 + $0x18] sm:$0xff]  }
 0x1a5   :  { %v9008_v49 = vadd.f32 %v5522_v40, %v5521_v62  ;;  %6392 = vmatpush3.bf16.msra.mxu0 %v6751_v44  ;;  %v1970_v61 = vadd.f32 %v8933_v52, %v1948_v0 }
 0x1a6   :  { %v1983_v42 = vmax.f32 %v1967_v55, 0.0  ;;  %v1997_v38 = vadd.f32 %v1996_v16, %v1982_v39  ;;  %v1968_v23 = vadd.f32 %v8933_v52, %v1946_v43  ;;  %3942 = vmatmul.mubr.bf16.gmra.mrb[180].mxu1 %v8729_v63  ;;  %v6353_v14 = vpop.f32.mrb[76].mxu0  ;;  %6393 = vmatprep.subr.bf16.mxu0 %v6753_v24  ;;  %v6758_v16 = vld [vmem:[%s10052_s1 + $0x60] sm:$0xff]  }
 0x1a7   :  { %v1925_v30 = vadd.f32 %v6353_v14, %v8915_v32  ;;  %v1916_v46 = vpop.f32.mrb[77].mxu0  ;;  %3949 = vmatprep.mubr.bf16.mxu1 %v8824_v2  ;;  %6039 = vmatpush3.bf16.msra.mxu1 %v6754_v53  ;;  %v1985_v32 = vmax.f32 %v1969_v28, 0.0  ;;  %v1986_v0 = vmax.f32 %v1970_v61, 0.0  ;;  %v6759_v28 = vld [vmem:[%s10052_s1 + $0x228] sm:$0xff]  }
 0x1a8   :  { %v1998_v50 = vadd.f32 %v1997_v38, %v1983_v42  ;;  %v1984_v63 = vmax.f32 %v1968_v23, 0.0  ;;  %v1917_v56 = vadd.f32 %v1916_v46, %v8895_v3  ;;  %v6354_v51 = vpop.f32.mrb[78].mxu0  ;;  %6040 = vmatprep.subr.bf16.mxu1 %v6755_v21  ;;  %v6760_v38 = vld [vmem:[%s10052_s1 + $0x20] sm:$0xff]   ;;  %v6761_v46 = vld [vmem:[%s10052_s1 + $0x68] sm:$0xff]  }
 0x1a9   :  { %v5524_v20 = vpop.f32.mrb[76].mxu1  ;;  %v1928_v47 = vadd.f32 %v6354_v51, %v8927_v26  ;;  %v1919_v41 = vpop.f32.mrb[79].mxu0  ;;  %6394 = vmatpush3.bf16.msra.mxu0 %v6753_v24  ;;  %v1951_v54 = vmul.f32 %v8921_v9, %v1925_v30 }
 0x1aa   :  { %v1999_v18 = vadd.f32 %v1998_v50, %v1984_v63  ;;  %v1949_v44 = vmul.f32 %v8921_v9, %v1917_v56  ;;  %v5525_v58 = vpop.f32.mrb[77].mxu1  ;;  %v1920_v3 = vadd.f32 %v1919_v41, %v8901_v15  ;;  %6395 = vmatprep.subr.bf16.mxu0 %v6756_v34 }
 0x1ab   :  { %v9032_v13 = vadd.f32 %v5525_v58, %v5524_v20  ;;  %v1952_v59 = vmul.f32 %v8921_v9, %v1928_v47  ;;  %v5527_v26 = vpop.f32.mrb[78].mxu1  ;;  %3853 = vmatmul.mubr.bf16.gmra.mrb[184].mxu0 %v8790_v5  ;;  %6041 = vmatpush3.bf16.msra.mxu1 %v6757_v25  ;;  %v1973_v55 = vadd.f32 %v8933_v52, %v1951_v54  ;;  %v6763_v47 = vld [vmem:[%s10052_s1 + $0x28] sm:$0xff]   ;;  %v6766_v25 = vld [vmem:[%s10052_s1 + $0x30] sm:$0xff]  }
 0x1ac   :  { %v2000_v62 = vadd.f32 %v1999_v18, %v1985_v32  ;;  %v1971_v15 = vadd.f32 %v8933_v52, %v1949_v44  ;;  %v1950_v27 = vmul.f32 %v8921_v9, %v1920_v3  ;;  %v5528_v39 = vpop.f32.mrb[79].mxu1  ;;  %3860 = vmatprep.mubr.bf16.mxu0 %v8866_v11  ;;  %6042 = vmatprep.subr.bf16.mxu1 %v6758_v16  ;;  %v6764_v44 = vld [vmem:[%s10052_s1 + $0x70] sm:$0xff]  }
 0x1ad   :  { %v9045_v5 = vadd.f32 %v5528_v39, %v5527_v26  ;;  %6396 = vmatpush3.bf16.msra.mxu0 %v6756_v34  ;;  %v1974_v14 = vadd.f32 %v8933_v52, %v1952_v59  ;;  %v1989_v61 = vmax.f32 %v1973_v55, 0.0  ;;  %v9089_v59 = vld [vmem:[#allocation2 + $0x68] ss:$0 sps:$4 sm:$0x11]   ;;  %v3570_v26 = vshll.u32 %v8911_v29, 16 }
 0x1ae   :  { %v1987_v43 = vmax.f32 %v1971_v15, 0.0  ;;  %v2001_v40 = vadd.f32 %v2000_v62, %v1986_v0  ;;  %v1972_v33 = vadd.f32 %v8933_v52, %v1950_v27  ;;  %3950 = vmatmul.mubr.bf16.gmra.mrb[184].mxu1 %v8756_v31  ;;  %v5570_v9 = vpop.f32.mrb[80].mxu0  ;;  %6397 = vmatprep.subr.bf16.mxu0 %v6759_v28  ;;  %v6762_v52 = vld [vmem:[%s10052_s1 + $0x230] sm:$0xff]   ;;  %v6767_v62 = vld [vmem:[%s10052_s1 + $0x78] sm:$0xff]  }
 0x1af   :  { %v5571_v42 = vpop.f32.mrb[81].mxu0  ;;  %3957 = vmatprep.mubr.bf16.mxu1 %v8856_v19  ;;  %6043 = vmatpush3.bf16.msra.mxu1 %v6760_v38  ;;  %v1990_v41 = vmax.f32 %v1974_v14, 0.0  ;;  %v9116_v14 = vld [vmem:[#allocation2 + $0x6c] sm:$0xff]  }
 0x1b0   :  { %v2002_v23 = vadd.f32 %v2001_v40, %v1987_v43  ;;  %v1988_v24 = vmax.f32 %v1972_v33, 0.0  ;;  %v5572_v30 = vadd.f32 %v5571_v42, %v5570_v9  ;;  %v5573_v31 = vpop.f32.mrb[82].mxu0  ;;  %6044 = vmatprep.subr.bf16.mxu1 %v6761_v46  ;;  %v6768_v43 = vld [vmem:[%s10052_s1 + $0xc0] sm:$0xff]   ;;  %v3568_v9 = vshrl.u32 %v8911_v29, 16 }
 0x1b1   :  { %v5530_v53 = vpop.f32.mrb[80].mxu1  ;;  %v5574_v50 = vpop.f32.mrb[83].mxu0  ;;  %6398 = vmatpush3.bf16.msra.mxu0 %v6759_v28  ;;  %v3572_v28 = vrot.slane %v3570_v26, 1  ;;  %v3575_v42 = vshll.u32 %v9089_v59, 16  ;;  %v3580_v26 = vrot.slane %v8911_v29, 1 }
 0x1b2   :  { %v2003_v63 = vadd.f32 %v2002_v23, %v1988_v24  ;;  %v5531_v56 = vpop.f32.mrb[81].mxu1  ;;  %v9062_v51 = vadd.f32 %v5572_v30, %v8939_v22  ;;  %v5575_v21 = vadd.f32 %v5574_v50, %v5573_v31  ;;  %6399 = vmatprep.subr.bf16.mxu0 %v6762_v52 }
 0x1b3   :  { %v9067_v32 = vadd.f32 %v5531_v56, %v5530_v53  ;;  %v5533_v20 = vpop.f32.mrb[82].mxu1  ;;  %3861 = vmatmul.mubr.bf16.gmra.mrb[188].mxu0 %v8824_v2  ;;  %6045 = vmatpush3.bf16.msra.mxu1 %v6763_v47  ;;  %v3573_v46 = vor.u32 %v3572_v28, %v3568_v9 }
 0x1b4   :  { %v2004_v18 = vadd.f32 %v2003_v63, %v1989_v61  ;;  %v5534_v22 = vpop.f32.mrb[83].mxu1  ;;  %v9074_v54 = vadd.f32 %v5575_v21, %v8950_v6  ;;  %3868 = vmatprep.mubr.bf16.mxu0 %v8891_v8  ;;  %6046 = vmatprep.subr.bf16.mxu1 %v6764_v44  ;;  %v6765_v6 = vld [vmem:[%s10052_s1 + $0x238] sm:$0xff]   ;;  %v9125_v61 = vld [vmem:[#allocation2 + $0x74] ss:$0 sps:$4 sm:$0x11]   ;;  %v3596_v63 = vshll.u32 %v9116_v14, 16 }
 0x1b5   :  { %v9080_v58 = vadd.f32 %v5534_v22, %v5533_v20  ;;  %6400 = vmatpush3.bf16.msra.mxu0 %v6762_v52 }
 0x1b6   :  { %v9082_v2 = vadd.f32 %v2004_v18, %v1990_v41  ;;  %3958 = vmatmul.mubr.bf16.gmra.mrb[188].mxu1 %v8794_v37  ;;  %v5576_v3 = vpop.f32.mrb[84].mxu0  ;;  %6401 = vmatprep.subr.bf16.mxu0 %v6765_v6 }
 0x1b7   :  { %v5577_v34 = vpop.f32.mrb[85].mxu0  ;;  %3965 = vmatprep.mubr.bf16.mxu1 %v8884_v60  ;;  %6047 = vmatpush3.bf16.msra.mxu1 %v6766_v25  ;;  %v3581_v25 = vrot.slane %v9089_v59, 1 }
 0x1b8   :  { %v5578_v0 = vadd.f32 %v5577_v34, %v5576_v3  ;;  %v5579_v37 = vpop.f32.mrb[86].mxu0  ;;  %6048 = vmatprep.subr.bf16.mxu1 %v6767_v62  ;;  %v3594_v3 = vshrl.u32 %v9116_v14, 16 }
 0x1b9   :  { %v5536_v15 = vpop.f32.mrb[84].mxu1  ;;  %v5580_v27 = vpop.f32.mrb[87].mxu0  ;;  %6402 = vmatpush3.bf16.msra.mxu0 %v6765_v6  ;;  %v3598_v6 = vrot.slane %v3596_v63, 1 }
 0x1ba   :  { %v5537_v39 = vpop.f32.mrb[85].mxu1  ;;  %v9099_v16 = vadd.f32 %v5578_v0, %v8962_v35  ;;  %v5581_v55 = vadd.f32 %v5580_v27, %v5579_v37  ;;  %6098 = vmatprep.subr.bf16.mxu0 %v6768_v43  ;;  %v6769_v35 = vld [vmem:[%s10052_s1 + $0x38] sm:$0xff]  }
 0x1bb   :  { %v9104_v40 = vadd.f32 %v5537_v39, %v5536_v15  ;;  %v5539_v33 = vpop.f32.mrb[86].mxu1  ;;  %3869 = vmatmul.mubr.bf16.gmra.mrb[192].mxu0 %v8856_v19  ;;  %6049 = vmatpush3.bf16.msra.mxu1 %v6769_v35  ;;  %v6770_v19 = vld [vmem:[%s10052_s1 + $0x140] sm:$0xff]   ;;  %v3599_v62 = vor.u32 %v3598_v6, %v3594_v3 }
 0x1bc   :  { %v5540_v38 = vpop.f32.mrb[87].mxu1  ;;  %v9113_v23 = vadd.f32 %v5581_v55, %v8975_v7  ;;  %3876 = vmatprep.mubr.bf16.mxu0 %v8909_v17  ;;  %6162 = vmatprep.subr.bf16.mxu1 %v6770_v19  ;;  %v3577_v7 = vrot.slane %v3575_v42, 1  ;;  %v9147_v55 = vsel %vm929_vm8, %v3580_v26, %v3581_v25  ;;  %v9182_v6 = vld [vmem:[#allocation2 + $0x80] ss:$0 sps:$4 sm:$0x11]  }
 0x1bd   :  { %v9121_v24 = vadd.f32 %v5540_v38, %v5539_v33 }
 0x1be   :  { %3966 = vmatmul.mubr.bf16.gmra.mrb[192].mxu1 %v8820_v36  ;;  %v5582_v30 = vpop.f32.mrb[88].mxu0  ;;  %v3578_v18 = vsel %vm824_vm1, %v3573_v46, %v3577_v7 }
 0x1bf   :  { %v5583_v31 = vpop.f32.mrb[89].mxu0  ;;  %3973 = vmatprep.mubr.bf16.mxu1 %v8904_v48 }
 0x1c0   :  { %v5584_v53 = vadd.f32 %v5583_v31, %v5582_v30  ;;  %v5585_v50 = vpop.f32.mrb[90].mxu0 }
 0x1c1   :  { %v5542_v56 = vpop.f32.mrb[88].mxu1  ;;  %v5586_v21 = vpop.f32.mrb[91].mxu0 }
 0x1c2   :  { %v5543_v52 = vpop.f32.mrb[89].mxu1  ;;  %v9129_v20 = vadd.f32 %v5584_v53, %v8996_v4  ;;  %v5587_v47 = vadd.f32 %v5586_v21, %v5585_v50  ;;  %v3601_v4 = vshll.u32 %v9125_v61, 16 }
 0x1c3   :  { %v9131_v36 = vadd.f32 %v5543_v52, %v5542_v56  ;;  %v5545_v41 = vpop.f32.mrb[90].mxu1  ;;  %3877 = vmatmul.mubr.bf16.gmra.mrb[196].mxu0 %v8884_v60  ;;  %v9169_v56 = vld [vmem:[#allocation2 + $0x78] sm:$0xff]  }
 0x1c4   :  { %v5546_v22 = vpop.f32.mrb[91].mxu1  ;;  %v9136_v44 = vadd.f32 %v5587_v47, %v9008_v49  ;;  %3884 = vmatprep.mubr.bf16.mxu0 %v8943_v45  ;;  %v3603_v15 = vrot.slane %v3601_v4, 1 }
 0x1c5   :  { %v9141_v34 = vadd.f32 %v5546_v22, %v5545_v41 }
 0x1c6   :  { %3974 = vmatmul.mubr.bf16.gmra.mrb[196].mxu1 %v8859_v12  ;;  %v5588_v60 = vpop.f32.mrb[92].mxu0  ;;  %v9160_v35 = vsel %vm824_vm1, %v3599_v62, %v3603_v15  ;;  %v4227_v62 = vshll.u32 %v9182_v6, 16 }
 0x1c7   :  { %v5589_v0 = vpop.f32.mrb[93].mxu0  ;;  %3981 = vmatprep.mubr.bf16.mxu1 %v3578_v18 }
 0x1c8   :  { %v5590_v49 = vadd.f32 %v5589_v0, %v5588_v60  ;;  %v5591_v37 = vpop.f32.mrb[94].mxu0 }
 0x1c9   :  { %v5548_v27 = vpop.f32.mrb[92].mxu1  ;;  %v5592_v39 = vpop.f32.mrb[95].mxu0 }
 0x1ca   :  { %v5549_v43 = vpop.f32.mrb[93].mxu1  ;;  %v9150_v33 = vadd.f32 %v5590_v49, %v9032_v13  ;;  %v5593_v9 = vadd.f32 %v5592_v39, %v5591_v37  ;;  %v9198_v39 = vld [vmem:[#allocation2 + $0x84] sm:$0xff]  }
 0x1cb   :  { %v9152_v59 = vadd.f32 %v5549_v43, %v5548_v27  ;;  %v5551_v12 = vpop.f32.mrb[94].mxu1  ;;  %3885 = vmatmul.mubr.bf16.gmra.mrb[200].mxu0 %v8904_v48 }
 0x1cc   :  { %v5552_v28 = vpop.f32.mrb[95].mxu1  ;;  %v9156_v42 = vadd.f32 %v5593_v9, %v9045_v5  ;;  %3892 = vmatprep.mubr.bf16.mxu0 %v9147_v55  ;;  %v6772_v9 = vld [vmem:[%s10052_s1 + $0xc8] sm:$0xff]  }
 0x1cd   :  { %v9162_v38 = vadd.f32 %v5552_v28, %v5551_v12 }
 0x1ce   :  { %3982 = vmatmul.mubr.bf16.gmra.mrb[200].mxu1 %v8911_v29  ;;  %v5594_v13 = vpop.f32.mrb[96].mxu0 }
 0x1cf   :  { %v5595_v19 = vpop.f32.mrb[97].mxu0  ;;  %3989 = vmatprep.mubr.bf16.mxu1 %v9160_v35 }
 0x1d0   :  { %v5596_v30 = vadd.f32 %v5595_v19, %v5594_v13  ;;  %v5597_v31 = vpop.f32.mrb[98].mxu0  ;;  %v4229_v13 = vrot.slane %v4227_v62, 1  ;;  %v9264_v62 = vld [vmem:[#allocation2 + $0x98] ss:$0 sps:$4 sm:$0x11]  }
 0x1d1   :  { %v5634_v48 = vpop.f32.mrb[96].mxu1  ;;  %v5598_v46 = vpop.f32.mrb[99].mxu0 }
 0x1d2   :  { %v9167_v5 = vadd.f32 %v5596_v30, %v9067_v32  ;;  %v5635_v7 = vpop.f32.mrb[97].mxu1  ;;  %v5599_v53 = vadd.f32 %v5598_v46, %v5597_v31  ;;  %v9220_v31 = vld [vmem:[#allocation2 + $0x8c] ss:$0 sps:$4 sm:$0x11]  }
 0x1d3   :  { %v5636_v50 = vadd.f32 %v5635_v7, %v5634_v48  ;;  %v5637_v63 = vpop.f32.mrb[98].mxu1  ;;  %3893 = vmatmul.mubr.bf16.gmra.mrb[204].mxu0 %v3578_v18  ;;  %v4234_v48 = vshll.u32 %v9198_v39, 16 }
 0x1d4   :  { %v9172_v21 = vadd.f32 %v5599_v53, %v9080_v58  ;;  %v5638_v52 = vpop.f32.mrb[99].mxu1  ;;  %6403 = vmatprep.mubr.bf16.mxu0 %v8800_v1  ;;  %v4222_v58 = vshll.u32 %v9169_v56, 16  ;;  %v6776_v53 = vld [vmem:[%s10052_s1 + $0xd0] sm:$0xff]  }
 0x1d5   :  { %v9176_v47 = vadd.f32 %v5636_v50, %v9062_v51  ;;  %v5639_v41 = vadd.f32 %v5638_v52, %v5637_v63 }
 0x1d6   :  { %3990 = vmatmul.mubr.bf16.gmra.mrb[204].mxu1 %v9116_v14  ;;  %v5600_v32 = vpop.f32.mrb[100].mxu0 }
 0x1d7   :  { %v9180_v22 = vadd.f32 %v5639_v41, %v9074_v54  ;;  %v5601_v3 = vpop.f32.mrb[101].mxu0  ;;  %4405 = vmatprep.mubr.bf16.mxu1 %v3578_v18  ;;  %v4220_v54 = vshrl.u32 %v9169_v56, 16  ;;  %v4224_v18 = vrot.slane %v4222_v58, 1 }
 0x1d8   :  { %v5602_v4 = vadd.f32 %v5601_v3, %v5600_v32  ;;  %v5603_v26 = vpop.f32.mrb[102].mxu0  ;;  %v6777_v3 = vld [vmem:[%s10052_s1 + $0x108] sm:$0xff]  }
 0x1d9   :  { %v5640_v25 = vpop.f32.mrb[100].mxu1  ;;  %v5604_v1 = vpop.f32.mrb[103].mxu0 }
 0x1da   :  { %v9186_v51 = vadd.f32 %v5602_v4, %v9104_v40  ;;  %v5641_v60 = vpop.f32.mrb[101].mxu1  ;;  %v5605_v0 = vadd.f32 %v5604_v1, %v5603_v26  ;;  %v6771_v40 = vld [vmem:[%s10052_s1 + $0x80] sm:$0xff]   ;;  %v9236_v4 = vld [vmem:[#allocation2 + $0x90] sm:$0xff]   ;;  %v4236_v1 = vrot.slane %v4234_v48, 1 }
 0x1db   :  { %v5642_v49 = vadd.f32 %v5641_v60, %v5640_v25  ;;  %v5643_v37 = vpop.f32.mrb[102].mxu1  ;;  %6404 = vmatmul.mubr.bf16.vlgmr.msra.gmra.mrb[208].mxu0 %v8833_v57  ;;  %v6778_v25 = vld [vmem:[%s10052_s1 + $0x90] sm:$0xff]   ;;  %v4239_v60 = vshll.u32 %v9220_v31, 16 }
 0x1dc   :  { %v9192_v15 = vadd.f32 %v5605_v0, %v9121_v24  ;;  %v5644_v27 = vpop.f32.mrb[103].mxu1  ;;  %6099 = vmatpush3.bf16.msra.mxu0 %v6771_v40  ;;  %6407 = vmatprep.mubr.bf16.mxu0 %v8866_v11  ;;  %v6773_v11 = vld [vmem:[%s10052_s1 + $0x100] sm:$0xff]  }
 0x1dd   :  { %v9201_v57 = vadd.f32 %v5642_v49, %v9099_v16  ;;  %v5645_v43 = vadd.f32 %v5644_v27, %v5643_v37  ;;  %6100 = vmatprep.subr.bf16.mxu0 %v6772_v9  ;;  %v4225_v16 = vor.u32 %v4224_v18, %v4220_v54  ;;  %v6780_v37 = vld [vmem:[%s10052_s1 + $0x150] sm:$0xff]   ;;  %v4246_v27 = vshll.u32 %v9236_v4, 16  ;;  %v6782_v9 = vld [vmem:[%s10052_s1 + $0x98] sm:$0xff]  }
 0x1de   :  { %4406 = vmatmul.mubr.bf16.vlgmr.msra.gmra.mrb[208].mxu1 %v8911_v29  ;;  %v5606_v24 = vpop.f32.mrb[104].mxu0  ;;  %v6774_v29 = vld [vmem:[%s10052_s1 + $0x88] sm:$0xff]  }
 0x1df   :  { %v9208_v12 = vadd.f32 %v5645_v43, %v9113_v23  ;;  %6163 = vmatpush3.bf16.msra.mxu1 %v6773_v11  ;;  %v5607_v28 = vpop.f32.mrb[105].mxu0  ;;  %4413 = vmatprep.mubr.bf16.mxu1 %v9160_v35  ;;  %v6775_v23 = vld [vmem:[%s10052_s1 + $0x148] sm:$0xff]   ;;  %v9234_v58 = vsel %vm824_vm1, %v4225_v16, %v4229_v13  ;;  %v6783_v11 = vld [vmem:[%s10052_s1 + $0x158] sm:$0xff]   ;;  %v6784_v13 = vld [vmem:[%s10052_s1 + $0xe0] sm:$0xff]  }
 0x1e0   :  { %v5608_v19 = vadd.f32 %v5607_v28, %v5606_v24  ;;  %v5609_v30 = vpop.f32.mrb[106].mxu0  ;;  %6101 = vmatpush3.bf16.msra.mxu0 %v6774_v29  ;;  %6164 = vmatprep.subr.bf16.mxu1 %v6775_v23  ;;  %v4241_v24 = vrot.slane %v4239_v60, 1 }
 0x1e1   :  { %v5646_v46 = vpop.f32.mrb[104].mxu1  ;;  %v5610_v7 = vpop.f32.mrb[107].mxu0  ;;  %6102 = vmatprep.subr.bf16.mxu0 %v6776_v53  ;;  %v4248_v53 = vrot.slane %v4246_v27, 1  ;;  %v9322_v27 = vld [vmem:[#allocation2 + $0xa4] ss:$0 sps:$4 sm:$0x11]  }
 0x1e2   :  { %v9227_v50 = vadd.f32 %v5608_v19, %v9131_v36  ;;  %v5647_v63 = vpop.f32.mrb[105].mxu1  ;;  %v5611_v52 = vadd.f32 %v5610_v7, %v5609_v30  ;;  %v4244_v7 = vshrl.u32 %v9236_v4, 16 }
 0x1e3   :  { %v5648_v41 = vadd.f32 %v5647_v63, %v5646_v46  ;;  %v5649_v32 = vpop.f32.mrb[106].mxu1  ;;  %6408 = vmatmul.mubr.bf16.gmra.mrb[212].mxu0 %v8891_v8  ;;  %6165 = vmatpush3.bf16.msra.mxu1 %v6777_v3  ;;  %v4232_v8 = vshrl.u32 %v9198_v39, 16  ;;  %v6785_v46 = vld [vmem:[%s10052_s1 + $0x118] sm:$0xff]   ;;  %v4251_v63 = vshll.u32 %v9264_v62, 16  ;;  %v3607_v3 = vrot.slane %v9125_v61, 1 }
 0x1e4   :  { %v9239_v26 = vadd.f32 %v5611_v52, %v9141_v34  ;;  %v5650_v36 = vpop.f32.mrb[107].mxu1  ;;  %6103 = vmatpush3.bf16.msra.mxu0 %v6778_v25  ;;  %6411 = vmatprep.mubr.bf16.mxu0 %v8909_v17  ;;  %v6779_v34 = vld [vmem:[%s10052_s1 + $0xd8] sm:$0xff]  }
 0x1e5   :  { %v9248_v0 = vadd.f32 %v5648_v41, %v9129_v20  ;;  %v5651_v49 = vadd.f32 %v5650_v36, %v5649_v32  ;;  %6104 = vmatprep.subr.bf16.mxu0 %v6779_v34  ;;  %6166 = vmatprep.subr.bf16.mxu1 %v6780_v37  ;;  %v6781_v20 = vld [vmem:[%s10052_s1 + $0x110] sm:$0xff]   ;;  %v6786_v41 = vld [vmem:[%s10052_s1 + $0xa0] sm:$0xff]   ;;  %v3606_v32 = vrot.slane %v9116_v14, 1  ;;  %v4253_v34 = vrot.slane %v4251_v63, 1 }
 0x1e6   :  { %4414 = vmatmul.mubr.bf16.gmra.mrb[212].mxu1 %v9116_v14  ;;  %v5612_v17 = vpop.f32.mrb[108].mxu0  ;;  %v9297_v36 = vld [vmem:[#allocation2 + $0x9c] sm:$0xff]   ;;  %v4263_v63 = vshll.u32 %v9322_v27, 16 }
 0x1e7   :  { %v9258_v54 = vadd.f32 %v5651_v49, %v9136_v44  ;;  %v5613_v18 = vpop.f32.mrb[109].mxu0  ;;  %4421 = vmatprep.mubr.bf16.mxu1 %v9234_v58  ;;  %6167 = vmatpush3.bf16.msra.mxu1 %v6781_v20  ;;  %v4237_v44 = vor.u32 %v4236_v1, %v4232_v8  ;;  %v6787_v8 = vld [vmem:[%s10052_s1 + $0xe8] sm:$0xff]   ;;  %v6788_v1 = vld [vmem:[%s10052_s1 + $0x160] sm:$0xff]  }
 0x1e8   :  { %v5614_v40 = vadd.f32 %v5613_v18, %v5612_v17  ;;  %v5615_v43 = vpop.f32.mrb[110].mxu0  ;;  %6105 = vmatpush3.bf16.msra.mxu0 %v6782_v9  ;;  %6168 = vmatprep.subr.bf16.mxu1 %v6783_v11  ;;  %v6789_v37 = vld [vmem:[%s10052_s1 + $0x120] sm:$0xff]   ;;  %v6790_v20 = vld [vmem:[%s10052_s1 + $0xa8] sm:$0xff]  }
 0x1e9   :  { %v5652_v28 = vpop.f32.mrb[108].mxu1  ;;  %v5616_v16 = vpop.f32.mrb[111].mxu0  ;;  %6106 = vmatprep.subr.bf16.mxu0 %v6784_v13 }
 0x1ea   :  { %v9277_v19 = vadd.f32 %v5614_v40, %v9152_v59  ;;  %v5653_v30 = vpop.f32.mrb[109].mxu1  ;;  %v5617_v29 = vadd.f32 %v5616_v16, %v5615_v43  ;;  %v4258_v40 = vshll.u32 %v9297_v36, 16  ;;  %v6791_v43 = vld [vmem:[%s10052_s1 + $0x168] sm:$0xff]  }
 0x1eb   :  { %v5654_v23 = vadd.f32 %v5653_v30, %v5652_v28  ;;  %v5655_v48 = vpop.f32.mrb[110].mxu1  ;;  %6412 = vmatmul.mubr.bf16.gmra.mrb[216].mxu0 %v8943_v45  ;;  %6169 = vmatpush3.bf16.msra.mxu1 %v6785_v46  ;;  %v9293_v45 = vsel %vm824_vm1, %v4237_v44, %v4241_v24  ;;  %v6792_v24 = vld [vmem:[%s10052_s1 + $0xf0] sm:$0xff]  }
 0x1ec   :  { %v9286_v52 = vadd.f32 %v5617_v29, %v9162_v38  ;;  %v5656_v59 = vpop.f32.mrb[111].mxu1  ;;  %6107 = vmatpush3.bf16.msra.mxu0 %v6786_v41  ;;  %6415 = vmatprep.mubr.bf16.mxu0 %v9147_v55 }
 0x1ed   :  { %v9300_v38 = vadd.f32 %v5654_v23, %v9150_v33  ;;  %v5657_v25 = vadd.f32 %v5656_v59, %v5655_v48  ;;  %6108 = vmatprep.subr.bf16.mxu0 %v6787_v8  ;;  %6170 = vmatprep.subr.bf16.mxu1 %v6788_v1  ;;  %v4249_v33 = vor.u32 %v4248_v53, %v4244_v7  ;;  %v6793_v23 = vld [vmem:[%s10052_s1 + $0x128] sm:$0xff]   ;;  %v4256_v7 = vshrl.u32 %v9297_v36, 16 }
 0x1ee   :  { %4422 = vmatmul.mubr.bf16.gmra.mrb[216].mxu1 %v9169_v56  ;;  %v5698_v60 = vpop.f32.mrb[112].mxu0  ;;  %v9341_v48 = vld [vmem:[#allocation2 + $0xa8] sm:$0xff]   ;;  %v4260_v53 = vrot.slane %v4258_v40, 1  ;;  %v6800_v40 = vld [vmem:[%s10052_s1 + $0x1c0] sm:$0xff]  }
 0x1ef   :  { %v9310_v61 = vadd.f32 %v5657_v25, %v9156_v42  ;;  %v5699_v49 = vpop.f32.mrb[113].mxu0  ;;  %4429 = vmatprep.mubr.bf16.mxu1 %v9293_v45  ;;  %6171 = vmatpush3.bf16.msra.mxu1 %v6789_v37  ;;  %v9320_v42 = vsel %vm929_vm8, %v3606_v32, %v3607_v3  ;;  %v9336_v29 = vsel %vm824_vm1, %v4249_v33, %v4253_v34  ;;  %v6795_v3 = vld [vmem:[%s10052_s1 + $0xf8] sm:$0xff]   ;;  %v4270_v1 = vshll.u32 %v9341_v48, 16 }
 0x1f0   :  { %v5700_v17 = vadd.f32 %v5699_v49, %v5698_v60  ;;  %v5701_v18 = vpop.f32.mrb[114].mxu0  ;;  %6109 = vmatpush3.bf16.msra.mxu0 %v6790_v20  ;;  %6172 = vmatprep.subr.bf16.mxu1 %v6791_v43  ;;  %v6797_v60 = vld [vmem:[%s10052_s1 + $0x130] sm:$0xff]   ;;  %v6798_v34 = vld [vmem:[%s10052_s1 + $0xb8] sm:$0xff]   ;;  %v4265_v37 = vrot.slane %v4263_v63, 1 }
 0x1f1   :  { %v5658_v9 = vpop.f32.mrb[112].mxu1  ;;  %v5702_v44 = vpop.f32.mrb[115].mxu0  ;;  %6110 = vmatprep.subr.bf16.mxu0 %v6792_v24 }
 0x1f2   :  { %v5659_v11 = vpop.f32.mrb[113].mxu1  ;;  %v5703_v28 = vadd.f32 %v5702_v44, %v5701_v18  ;;  %v9332_v16 = vadd.f32 %v5700_v17, %v9176_v47  ;;  %v6794_v47 = vld [vmem:[%s10052_s1 + $0xb0] sm:$0xff]   ;;  %v6799_v17 = vld [vmem:[%s10052_s1 + $0x178] sm:$0xff]  }
 0x1f3   :  { %v5660_v13 = vadd.f32 %v5659_v11, %v5658_v9  ;;  %v5661_v30 = vpop.f32.mrb[114].mxu1  ;;  %6416 = vmatmul.mubr.bf16.gmra.mrb[220].mxu0 %v9320_v42  ;;  %6173 = vmatpush3.bf16.msra.mxu1 %v6793_v23  ;;  %v6801_v23 = vld [vmem:[%s10052_s1 + $0x138] sm:$0xff]  }
 0x1f4   :  { %v5662_v46 = vpop.f32.mrb[115].mxu1  ;;  %6111 = vmatpush3.bf16.msra.mxu0 %v6794_v47  ;;  %4502 = vmatprep.mubr.bf16.mxu0 %v9116_v14  ;;  %v9350_v59 = vadd.f32 %v5703_v28, %v9180_v22  ;;  %v6796_v14 = vld [vmem:[%s10052_s1 + $0x170] sm:$0xff]   ;;  %v4268_v28 = vshrl.u32 %v9341_v48, 16 }
 0x1f5   :  { %v9353_v41 = vadd.f32 %v5660_v13, %v9167_v5  ;;  %v5663_v32 = vadd.f32 %v5662_v46, %v5661_v30  ;;  %6112 = vmatprep.subr.bf16.mxu0 %v6795_v3  ;;  %6174 = vmatprep.subr.bf16.mxu1 %v6796_v14  ;;  %v9366_v5 = vld [vmem:[#allocation2 + $0xb0] ss:$0 sps:$4 sm:$0x11]   ;;  %v4272_v13 = vrot.slane %v4270_v1, 1 }
 0x1f6   :  { %4430 = vmatmul.mubr.bf16.gmra.mrb[220].mxu1 %v9198_v39  ;;  %v5704_v25 = vpop.f32.mrb[116].mxu0  ;;  %v4275_v30 = vshll.u32 %v9366_v5, 16 }
 0x1f7   :  { %v9363_v22 = vadd.f32 %v5663_v32, %v9172_v21  ;;  %v5705_v8 = vpop.f32.mrb[117].mxu0  ;;  %4437 = vmatprep.mubr.bf16.mxu1 %v9336_v29  ;;  %6175 = vmatpush3.bf16.msra.mxu1 %v6797_v60  ;;  %v4261_v21 = vor.u32 %v4260_v53, %v4256_v7  ;;  %v9400_v7 = vld [vmem:[#allocation2 + $0xb4] sm:$0xff]   ;;  %v6803_v32 = vld [vmem:[%s10052_s1 + $0x1c8] sm:$0xff]  }
 0x1f8   :  { %v5706_v49 = vadd.f32 %v5705_v8, %v5704_v25  ;;  %v5707_v33 = vpop.f32.mrb[118].mxu0  ;;  %6113 = vmatpush3.bf16.msra.mxu0 %v6798_v34  ;;  %6176 = vmatprep.subr.bf16.mxu1 %v6799_v17  ;;  %v4273_v25 = vor.u32 %v4272_v13, %v4268_v28  ;;  %v6804_v60 = vld [vmem:[%s10052_s1 + $0x188] sm:$0xff]  }
 0x1f9   :  { %v5664_v18 = vpop.f32.mrb[116].mxu1  ;;  %v5708_v20 = vpop.f32.mrb[119].mxu0  ;;  %6226 = vmatprep.subr.bf16.mxu0 %v6800_v40  ;;  %v9394_v47 = vsel %vm824_vm1, %v4261_v21, %v4265_v37 }
 0x1fa   :  { %v5665_v43 = vpop.f32.mrb[117].mxu1  ;;  %v5709_v9 = vadd.f32 %v5708_v20, %v5707_v33  ;;  %v9382_v44 = vadd.f32 %v5706_v49, %v9201_v57  ;;  %v6802_v57 = vld [vmem:[%s10052_s1 + $0x180] sm:$0xff]   ;;  %v9417_v49 = vld [vmem:[#allocation2 + $0xbc] ss:$0 sps:$4 sm:$0x11]  }
 0x1fb   :  { %v5666_v24 = vadd.f32 %v5665_v43, %v5664_v18  ;;  %v5667_v11 = vpop.f32.mrb[118].mxu1  ;;  %4503 = vmatmul.mubr.bf16.vlgmr.msra.gmra.mrb[224].mxu0 %v9147_v55  ;;  %6177 = vmatpush3.bf16.msra.mxu1 %v6801_v23  ;;  %v4297_v43 = vrot.slane %v9169_v56, 1  ;;  %v4287_v13 = vshll.u32 %v9417_v49, 16 }
 0x1fc   :  { %v5668_v46 = vpop.f32.mrb[119].mxu1  ;;  %6227 = vmatpush3.bf16.msra.mxu0 %v6802_v57  ;;  %4510 = vmatprep.mubr.bf16.mxu0 %v9169_v56  ;;  %v9398_v55 = vadd.f32 %v5709_v9, %v9208_v12  ;;  %v4298_v9 = vrot.slane %v9182_v6, 1 }
 0x1fd   :  { %v9403_v53 = vadd.f32 %v5666_v24, %v9186_v51  ;;  %v5669_v63 = vadd.f32 %v5668_v46, %v5667_v11  ;;  %6228 = vmatprep.subr.bf16.mxu0 %v6803_v32  ;;  %6419 = vmatprep.subr.bf16.mxu1 %v8971_v10  ;;  %v4277_v51 = vrot.slane %v4275_v30, 1  ;;  %v4282_v10 = vshll.u32 %v9400_v7, 16  ;;  %v6806_v11 = vld [vmem:[%s10052_s1 + $0x190] sm:$0xff]   ;;  %v6807_v46 = vld [vmem:[%s10052_s1 + $0x1d8] sm:$0xff]  }
 0x1fe   :  { %4438 = vmatmul.mubr.bf16.gmra.mrb[224].mxu1 %v9236_v4  ;;  %v5710_v3 = vpop.f32.mrb[120].mxu0 }
 0x1ff   :  { %v9411_v14 = vadd.f32 %v5669_v63, %v9192_v15  ;;  %v5711_v12 = vpop.f32.mrb[121].mxu0  ;;  %4445 = vmatprep.mubr.bf16.mxu1 %v9394_v47  ;;  %v6805_v15 = vld [vmem:[%s10052_s1 + $0x1d0] sm:$0xff]   ;;  %v9428_v40 = vsel %vm824_vm1, %v4273_v25, %v4277_v51  ;;  %v4284_v28 = vrot.slane %v4282_v10, 1  ;;  %v4289_v25 = vrot.slane %v4287_v13, 1  ;;  %v6808_v51 = vld [vmem:[%s10052_s1 + $0x198] sm:$0xff]  }
 0x200   :  { %v5712_v8 = vadd.f32 %v5711_v12, %v5710_v3  ;;  %v5713_v1 = vpop.f32.mrb[122].mxu0  ;;  %6229 = vmatpush3.bf16.msra.mxu0 %v6804_v60 }
 0x201   :  { %v5670_v33 = vpop.f32.mrb[120].mxu1  ;;  %v5714_v34 = vpop.f32.mrb[123].mxu0  ;;  %6230 = vmatprep.subr.bf16.mxu0 %v6805_v15 }
 0x202   :  { %v5671_v21 = vpop.f32.mrb[121].mxu1  ;;  %v5715_v37 = vadd.f32 %v5714_v34, %v5713_v1  ;;  %v9424_v17 = vadd.f32 %v5712_v8, %v9248_v0  ;;  %v4280_v0 = vshrl.u32 %v9400_v7, 16 }
 0x203   :  { %v5672_v18 = vadd.f32 %v5671_v21, %v5670_v33  ;;  %v5673_v20 = vpop.f32.mrb[122].mxu1  ;;  %4511 = vmatmul.mubr.bf16.gmra.mrb[228].mxu0 %v9320_v42 }
 0x204   :  { %v5674_v24 = vpop.f32.mrb[123].mxu1  ;;  %4518 = vmatprep.mubr.bf16.mxu0 %v9198_v39  ;;  %6231 = vmatpush3.bf16.msra.mxu0 %v6806_v11  ;;  %v9439_v30 = vadd.f32 %v5715_v37, %v9258_v54  ;;  %v4285_v12 = vor.u32 %v4284_v28, %v4280_v0  ;;  %v6811_v11 = vld [vmem:[%s10052_s1 + $0x1e8] sm:$0xff]  }
 0x205   :  { %v9442_v23 = vadd.f32 %v5672_v18, %v9227_v50  ;;  %v5675_v6 = vadd.f32 %v5674_v24, %v5673_v20  ;;  %6232 = vmatprep.subr.bf16.mxu0 %v6807_v46  ;;  %v9453_v50 = vsel %vm929_vm8, %v4297_v43, %v4298_v9  ;;  %v4300_v18 = vrot.slane %v9198_v39, 1 }
 0x206   :  { %4446 = vmatmul.mubr.bf16.gmra.mrb[228].mxu1 %v9297_v36  ;;  %v5716_v57 = vpop.f32.mrb[124].mxu0  ;;  %v9466_v37 = vsel %vm824_vm1, %v4285_v12, %v4289_v25  ;;  %v4301_v20 = vrot.slane %v9220_v31, 1 }
 0x207   :  { %v9449_v63 = vadd.f32 %v5675_v6, %v9239_v26  ;;  %v5717_v32 = vpop.f32.mrb[125].mxu0  ;;  %4453 = vmatprep.mubr.bf16.mxu1 %v9428_v40  ;;  %v6809_v26 = vld [vmem:[%s10052_s1 + $0x1e0] sm:$0xff]   ;;  %v6812_v6 = vld [vmem:[%s10052_s1 + $0x1a8] sm:$0xff]  }
 0x208   :  { %v5718_v54 = vadd.f32 %v5717_v32, %v5716_v57  ;;  %v5719_v3 = vpop.f32.mrb[126].mxu0  ;;  %6233 = vmatpush3.bf16.msra.mxu0 %v6808_v51 }
 0x209   :  { %v5676_v8 = vpop.f32.mrb[124].mxu1  ;;  %v5720_v1 = vpop.f32.mrb[127].mxu0  ;;  %6234 = vmatprep.subr.bf16.mxu0 %v6809_v26  ;;  %v4303_v26 = vrot.slane %v9236_v4, 1 }
 0x20a   :  { %v5677_v60 = vpop.f32.mrb[125].mxu1  ;;  %v5721_v10 = vadd.f32 %v5720_v1, %v5719_v3  ;;  %v9462_v33 = vadd.f32 %v5718_v54, %v9300_v38  ;;  %v6810_v38 = vld [vmem:[%s10052_s1 + $0x1a0] sm:$0xff]  }
 0x20b   :  { %v5678_v34 = vadd.f32 %v5677_v60, %v5676_v8  ;;  %v5679_v15 = vpop.f32.mrb[126].mxu1  ;;  %4519 = vmatmul.mubr.bf16.gmra.mrb[232].mxu0 %v9453_v50  ;;  %v4304_v60 = vrot.slane %v9264_v62, 1  ;;  %v6816_v62 = vld [vmem:[%s10052_s1 + $0x1f8] sm:$0xff]  }
 0x20c   :  { %v5680_v21 = vpop.f32.mrb[127].mxu1  ;;  %4526 = vmatprep.mubr.bf16.mxu0 %v9236_v4  ;;  %v9472_v43 = vadd.f32 %v5721_v10, %v9310_v61  ;;  %6235 = vmatpush3.bf16.msra.mxu0 %v6810_v38 }
 0x20d   :  { %v9478_v9 = vadd.f32 %v5678_v34, %v9277_v19  ;;  %v5681_v24 = vadd.f32 %v5680_v21, %v5679_v15  ;;  %6236 = vmatprep.subr.bf16.mxu0 %v6811_v11  ;;  %v9489_v19 = vsel %vm929_vm8, %v4300_v18, %v4301_v20  ;;  %v9528_v15 = vld [vmem:[%s10054_s3] ss:$0 sm:$0xff]  ;;  %v9535_v11 = vsel %vm929_vm8, %v4303_v26, %v4304_v60 }
 0x20e   :  { %4454 = vmatmul.mubr.bf16.gmra.mrb[232].mxu1 %v9341_v48  ;;  %v5722_v31 = vpop.f32.mrb[128].mxu0 }
 0x20f   :  { %v9485_v61 = vadd.f32 %v5681_v24, %v9286_v52  ;;  %v5723_v0 = vpop.f32.mrb[129].mxu0  ;;  %4461 = vmatprep.mubr.bf16.mxu1 %v9466_v37  ;;  %v6813_v52 = vld [vmem:[%s10052_s1 + $0x1f0] sm:$0xff]  }
 0x210   :  { %v5724_v28 = vadd.f32 %v5723_v0, %v5722_v31  ;;  %v5725_v13 = vpop.f32.mrb[130].mxu0  ;;  %6237 = vmatpush3.bf16.msra.mxu0 %v6812_v6  ;;  %v6818_v31 = vld [vmem:[%s10052_s1 + $0x1b8] sm:$0xff]  }
 0x211   :  { %v6373_v46 = vpop.f32.mrb[128].mxu1  ;;  %v5726_v57 = vpop.f32.mrb[131].mxu0  ;;  %6238 = vmatprep.subr.bf16.mxu0 %v6813_v52 }
 0x212   :  { %v2652_v32 = vadd.f32 %v6373_v46, %v9382_v44  ;;  %v2643_v54 = vpop.f32.mrb[129].mxu1  ;;  %v5727_v3 = vadd.f32 %v5726_v57, %v5725_v13  ;;  %v9499_v12 = vadd.f32 %v5724_v28, %v9353_v41  ;;  %v6814_v41 = vld [vmem:[%s10052_s1 + $0x1b0] sm:$0xff]  }
 0x213   :  { %v2644_v25 = vadd.f32 %v2643_v54, %v9332_v16  ;;  %v6374_v51 = vpop.f32.mrb[130].mxu1  ;;  %4527 = vmatmul.mubr.bf16.gmra.mrb[236].mxu0 %v9489_v19  ;;  %v9516_v16 = vld [vmem:[%s10053_s2] ss:$0 sm:$0xff] }
 0x214   :  { %v2655_v8 = vadd.f32 %v6374_v51, %v9398_v55  ;;  %v2646_v1 = vpop.f32.mrb[131].mxu1  ;;  %4534 = vmatprep.mubr.bf16.mxu0 %v9297_v36  ;;  %v9508_v44 = vadd.f32 %v5727_v3, %v9363_v22  ;;  %6239 = vmatpush3.bf16.msra.mxu0 %v6814_v41  ;;  %v2708_v55 = vmul.f32 %v9516_v16, %v2652_v32  ;;  %v4306_v32 = vrot.slane %v9297_v36, 1 }
 0x215   :  { %v2706_v10 = vmul.f32 %v9516_v16, %v2644_v25  ;;  %v2647_v34 = vadd.f32 %v2646_v1, %v9350_v59  ;;  %6240 = vmatprep.subr.bf16.mxu0 %v6816_v62 }
 0x216   :  { %4462 = vmatmul.mubr.bf16.gmra.mrb[236].mxu1 %v9400_v7  ;;  %v5728_v22 = vpop.f32.mrb[132].mxu0  ;;  %v2709_v18 = vmul.f32 %v9516_v16, %v2655_v8  ;;  %v2724_v0 = vadd.f32 %v9528_v15, %v2708_v55 }
 0x217   :  { %v2722_v21 = vadd.f32 %v9528_v15, %v2706_v10  ;;  %v2707_v20 = vmul.f32 %v9516_v16, %v2647_v34  ;;  %v5729_v59 = vpop.f32.mrb[133].mxu0  ;;  %4599 = vmatprep.mubr.bf16.mxu1 %v9320_v42 }
 0x218   :  { %v5730_v38 = vadd.f32 %v5729_v59, %v5728_v22  ;;  %v5731_v24 = vpop.f32.mrb[134].mxu0  ;;  %6241 = vmatpush3.bf16.msra.mxu0 %v6818_v31  ;;  %v2725_v3 = vadd.f32 %v9528_v15, %v2709_v18  ;;  %v2740_v41 = vmax.f32 %v2724_v0, 0.0 }
 0x219   :  { %v2723_v28 = vadd.f32 %v9528_v15, %v2707_v20  ;;  %v6377_v13 = vpop.f32.mrb[132].mxu1  ;;  %v5732_v6 = vpop.f32.mrb[135].mxu0  ;;  %v2738_v54 = vmax.f32 %v2722_v21, 0.0 }
 0x21a   :  { %v2668_v46 = vadd.f32 %v6377_v13, %v9462_v33  ;;  %v2659_v57 = vpop.f32.mrb[133].mxu1  ;;  %v5733_v42 = vadd.f32 %v5732_v6, %v5731_v24  ;;  %v2587_v52 = vadd.f32 %v5730_v38, %v9403_v53  ;;  %v4307_v53 = vrot.slane %v9322_v27, 1  ;;  %v6819_v27 = vld [vmem:[%s10052_s1 + $0x200] sm:$0xff]   ;;  %v6820_v38 = vld [vmem:[%s10052_s1 + $0x208] sm:$0xff]  }
 0x21b   :  { %v2739_v25 = vmax.f32 %v2723_v28, 0.0  ;;  %v2660_v51 = vadd.f32 %v2659_v57, %v9424_v17  ;;  %v6378_v8 = vpop.f32.mrb[134].mxu1  ;;  %4535 = vmatmul.mubr.bf16.gmra.mrb[240].mxu0 %v9535_v11  ;;  %v2741_v22 = vmax.f32 %v2725_v3, 0.0 }
 0x21c   :  { %v2712_v1 = vmul.f32 %v9516_v16, %v2668_v46  ;;  %v2671_v26 = vadd.f32 %v6378_v8, %v9472_v43  ;;  %v2662_v33 = vpop.f32.mrb[135].mxu1  ;;  %v2590_v60 = vadd.f32 %v5733_v42, %v9411_v14  ;;  %4542 = vmatprep.mubr.bf16.mxu0 %v9341_v48 }
 0x21d   :  { %v2754_v55 = vadd.f32 %v2739_v25, %v2738_v54  ;;  %v2710_v10 = vmul.f32 %v9516_v16, %v2660_v51  ;;  %v2663_v17 = vadd.f32 %v2662_v33, %v9439_v30  ;;  %v4309_v54 = vrot.slane %v9341_v48, 1 }
 0x21e   :  { %v2713_v34 = vmul.f32 %v9516_v16, %v2671_v26  ;;  %4600 = vmatmul.mubr.bf16.vlgmr.msra.gmra.mrb[240].mxu1 %v9160_v35  ;;  %v5734_v62 = vpop.f32.mrb[136].mxu0  ;;  %v2728_v30 = vadd.f32 %v9528_v15, %v2712_v1  ;;  %v9565_v35 = vsel %vm929_vm8, %v4306_v32, %v4307_v53  ;;  %v6821_v53 = vld [vmem:[%s10052_s1 + $0x210] sm:$0xff]  }
 0x21f   :  { %v2755_v43 = vadd.f32 %v2754_v55, %v2740_v41  ;;  %v2726_v21 = vadd.f32 %v9528_v15, %v2710_v10  ;;  %v2711_v14 = vmul.f32 %v9516_v16, %v2663_v17  ;;  %6420 = vmatpush3.bf16.msra.mxu1 %v6819_v27  ;;  %v5735_v18 = vpop.f32.mrb[137].mxu0  ;;  %4607 = vmatprep.mubr.bf16.mxu1 %v9453_v50  ;;  %v6822_v27 = vld [vmem:[%s10052_s1 + $0x218] sm:$0xff]  }
 0x220   :  { %v5736_v20 = vadd.f32 %v5735_v18, %v5734_v62  ;;  %v5737_v59 = vpop.f32.mrb[138].mxu0  ;;  %6421 = vmatprep.subr.bf16.mxu1 %v6820_v38  ;;  %v2729_v3 = vadd.f32 %v9528_v15, %v2713_v34  ;;  %v2744_v1 = vmax.f32 %v2728_v30, 0.0 }
 0x221   :  { %v2742_v24 = vmax.f32 %v2726_v21, 0.0  ;;  %v2756_v31 = vadd.f32 %v2755_v43, %v2741_v22  ;;  %v2727_v0 = vadd.f32 %v9528_v15, %v2711_v14  ;;  %v6381_v28 = vpop.f32.mrb[136].mxu1  ;;  %v5738_v13 = vpop.f32.mrb[139].mxu0 }
 0x222   :  { %v2684_v6 = vadd.f32 %v6381_v28, %v2587_v52  ;;  %v2675_v46 = vpop.f32.mrb[137].mxu1  ;;  %v5739_v57 = vadd.f32 %v5738_v13, %v5737_v59  ;;  %v2595_v42 = vadd.f32 %v5736_v20, %v9442_v23  ;;  %v4310_v23 = vrot.slane %v9366_v5, 1 }
 0x223   :  { %v2757_v32 = vadd.f32 %v2756_v31, %v2742_v24  ;;  %v2743_v25 = vmax.f32 %v2727_v0, 0.0  ;;  %v2676_v51 = vadd.f32 %v2675_v46, %v9499_v12  ;;  %v6382_v8 = vpop.f32.mrb[138].mxu1  ;;  %4543 = vmatmul.mubr.bf16.gmra.mrb[244].mxu0 %v9565_v35  ;;  %6422 = vmatpush3.bf16.msra.mxu1 %v6820_v38  ;;  %v2745_v17 = vmax.f32 %v2729_v3, 0.0 }
 0x224   :  { %v2687_v26 = vadd.f32 %v6382_v8, %v2590_v60  ;;  %v2678_v33 = vpop.f32.mrb[139].mxu1  ;;  %v2598_v52 = vadd.f32 %v5739_v57, %v9449_v63  ;;  %4550 = vmatprep.mubr.bf16.mxu0 %v9400_v7  ;;  %6423 = vmatprep.subr.bf16.mxu1 %v6821_v53  ;;  %v2716_v12 = vmul.f32 %v9516_v16, %v2684_v6  ;;  %v4312_v13 = vrot.slane %v9400_v7, 1 }
 0x225   :  { %v2758_v41 = vadd.f32 %v2757_v32, %v2743_v25  ;;  %v2714_v55 = vmul.f32 %v9516_v16, %v2676_v51  ;;  %v2679_v10 = vadd.f32 %v2678_v33, %v9508_v44  ;;  %v9591_v14 = vsel %vm929_vm8, %v4309_v54, %v4310_v23  ;;  %v9593_v44 = vld [vmem:[#allocation2 + $0xc0] sm:$0xff]  }
 0x226   :  { %v2717_v60 = vmul.f32 %v9516_v16, %v2687_v26  ;;  %4608 = vmatmul.mubr.bf16.gmra.mrb[244].mxu1 %v9234_v58  ;;  %v5740_v63 = vpop.f32.mrb[140].mxu0  ;;  %v2732_v18 = vadd.f32 %v9528_v15, %v2716_v12  ;;  %v4313_v6 = vrot.slane %v9417_v49, 1 }
 0x227   :  { %v2759_v34 = vadd.f32 %v2758_v41, %v2744_v1  ;;  %v2730_v5 = vadd.f32 %v9528_v15, %v2714_v55  ;;  %v2715_v62 = vmul.f32 %v9516_v16, %v2679_v10  ;;  %v5741_v22 = vpop.f32.mrb[141].mxu0  ;;  %4615 = vmatprep.mubr.bf16.mxu1 %v9489_v19  ;;  %6424 = vmatpush3.bf16.msra.mxu1 %v6821_v53 }
 0x228   :  { %v5742_v43 = vadd.f32 %v5741_v22, %v5740_v63  ;;  %v5743_v21 = vpop.f32.mrb[142].mxu0  ;;  %6425 = vmatprep.subr.bf16.mxu1 %v6822_v27  ;;  %v2733_v57 = vadd.f32 %v9528_v15, %v2717_v60  ;;  %v2748_v49 = vmax.f32 %v2732_v18, 0.0 }
 0x229   :  { %v2746_v30 = vmax.f32 %v2730_v5, 0.0  ;;  %v2760_v20 = vadd.f32 %v2759_v34, %v2745_v17  ;;  %v2731_v59 = vadd.f32 %v9528_v15, %v2715_v62  ;;  %v6385_v38 = vpop.f32.mrb[140].mxu1  ;;  %v5744_v24 = vpop.f32.mrb[143].mxu0  ;;  %v6824_v62 = vld [vmem:[%s10052_s1 + $0x228] sm:$0xff]  }
 0x22a   :  { %v2603_v31 = vadd.f32 %v5742_v43, %v9478_v9  ;;  %v2691_v0 = vpop.f32.mrb[141].mxu1  ;;  %v5745_v28 = vadd.f32 %v5744_v24, %v5743_v21  ;;  %v6823_v9 = vld [vmem:[%s10052_s1 + $0x220] sm:$0xff]   ;;  %v2749_v41 = vmax.f32 %v2733_v57, 0.0 }
 0x22b   :  { %v2761_v46 = vadd.f32 %v2760_v20, %v2746_v30  ;;  %v2747_v54 = vmax.f32 %v2731_v59, 0.0  ;;  %v2692_v32 = vadd.f32 %v2691_v0, %v2595_v42  ;;  %v6386_v3 = vpop.f32.mrb[142].mxu1  ;;  %4551 = vmatmul.mubr.bf16.gmra.mrb[248].mxu0 %v9591_v14  ;;  %6426 = vmatpush3.bf16.msra.mxu1 %v6822_v27 }
 0x22c   :  { %v2700_v25 = vadd.f32 %v6385_v38, %v2603_v31  ;;  %v2606_v51 = vadd.f32 %v5745_v28, %v9485_v61  ;;  %v2694_v8 = vpop.f32.mrb[143].mxu1  ;;  %4558 = vmatprep.mubr.bf16.mxu0 %v9593_v44  ;;  %6427 = vmatprep.subr.bf16.mxu1 %v6823_v9  ;;  %v9614_v61 = vsel %vm929_vm8, %v4312_v13, %v4313_v6 }
 0x22d   :  { %v2762_v1 = vadd.f32 %v2761_v46, %v2747_v54  ;;  %v2718_v26 = vmul.f32 %v9516_v16, %v2692_v32  ;;  %v2695_v42 = vadd.f32 %v2694_v8, %v2598_v52  ;;  %v2006_v52 = vrot.slane %v9082_v2, 4  ;;  %v6825_v46 = vld [vmem:[%s10052_s1 + $0x230] sm:$0xff]  }
 0x22e   :  { %v2720_v33 = vmul.f32 %v9516_v16, %v2700_v25  ;;  %v2703_v23 = vadd.f32 %v6386_v3, %v2606_v51  ;;  %4616 = vmatmul.mubr.bf16.gmra.mrb[248].mxu1 %v9293_v45  ;;  %v5778_v53 = vpop.f32.mrb[144].mxu0 }
 0x22f   :  { %v2763_v12 = vadd.f32 %v2762_v1, %v2748_v49  ;;  %v2734_v55 = vadd.f32 %v9528_v15, %v2718_v26  ;;  %v2719_v10 = vmul.f32 %v9516_v16, %v2695_v42  ;;  %v5779_v60 = vpop.f32.mrb[145].mxu0  ;;  %4623 = vmatprep.mubr.bf16.mxu1 %v9535_v11  ;;  %6428 = vmatpush3.bf16.msra.mxu1 %v6823_v9  ;;  %v6826_v49 = vld [vmem:[%s10052_s1 + $0x238] sm:$0xff]  }
 0x230   :  { %v2736_v63 = vadd.f32 %v9528_v15, %v2720_v33  ;;  %v2721_v17 = vmul.f32 %v9516_v16, %v2703_v23  ;;  %v5780_v34 = vadd.f32 %v5779_v60, %v5778_v53  ;;  %v5781_v5 = vpop.f32.mrb[146].mxu0  ;;  %6429 = vmatprep.subr.bf16.mxu1 %v6824_v62  ;;  %v2007_v13 = vadd.f32 %v2006_v52, %v9082_v2 }
 0x231   :  { %v2750_v22 = vmax.f32 %v2734_v55, 0.0  ;;  %v2764_v43 = vadd.f32 %v2763_v12, %v2749_v41  ;;  %v2735_v21 = vadd.f32 %v9528_v15, %v2719_v10  ;;  %v5842_v27 = vpop.f32.mrb[144].mxu1  ;;  %v5782_v18 = vpop.f32.mrb[147].mxu0 }
 0x232   :  { %v2737_v30 = vadd.f32 %v9528_v15, %v2721_v17  ;;  %v5843_v20 = vpop.f32.mrb[145].mxu1  ;;  %v5783_v59 = vadd.f32 %v5782_v18, %v5781_v5  ;;  %v2752_v38 = vmax.f32 %v2736_v63, 0.0  ;;  %v2008_v1 = vrot.slane %v2007_v13, 2 }
 0x233   :  { %v2765_v24 = vadd.f32 %v2764_v43, %v2750_v22  ;;  %v2751_v31 = vmax.f32 %v2735_v21, 0.0  ;;  %v5844_v0 = vadd.f32 %v5843_v20, %v5842_v27  ;;  %v5845_v28 = vpop.f32.mrb[146].mxu1  ;;  %4559 = vmatmul.mubr.bf16.gmra.mrb[252].mxu0 %v9614_v61  ;;  %6430 = vmatpush3.bf16.msra.mxu1 %v6824_v62 }
 0x234   :  { %v5846_v6 = vpop.f32.mrb[147].mxu1  ;;  %4696 = vmatprep.mubr.bf16.mxu0 %v9234_v58  ;;  %6431 = vmatprep.subr.bf16.mxu1 %v6825_v46  ;;  %v2753_v57 = vmax.f32 %v2737_v30, 0.0  ;;  %v2009_v60 = vadd.f32 %v2008_v1, %v2007_v13 }
 0x235   :  { %v2766_v54 = vadd.f32 %v2765_v24, %v2751_v31  ;;  %v9633_v32 = vadd.f32 %v5844_v0, %v5780_v34  ;;  %v5847_v3 = vadd.f32 %v5846_v6, %v5845_v28  ;;  %v6656_v0 = vld [vmem:[#allocation2 + $0xc8] ss:$0 sps:$4 sm:$0x11]  }
 0x236   :  { %4624 = vmatmul.mubr.bf16.gmra.mrb[252].mxu1 %v9336_v29  ;;  %v5784_v25 = vpop.f32.mrb[148].mxu0  ;;  %v2010_v21 = vrot.slane %v2009_v60, 1 }
 0x237   :  { %v2767_v51 = vadd.f32 %v2766_v54, %v2752_v38  ;;  %v9636_v8 = vadd.f32 %v5847_v3, %v5783_v59  ;;  %v5785_v2 = vpop.f32.mrb[149].mxu0  ;;  %4631 = vmatprep.mubr.bf16.mxu1 %v9565_v35  ;;  %6432 = vmatpush3.bf16.msra.mxu1 %v6825_v46 }
 0x238   :  { %v5786_v58 = vadd.f32 %v5785_v2, %v5784_v25  ;;  %v5787_v9 = vpop.f32.mrb[150].mxu0  ;;  %6433 = vmatprep.subr.bf16.mxu1 %v6826_v49  ;;  %v2011_v28 = vadd.f32 %v2010_v21, %v2009_v60  ;;  %v4333_v25 = vshll.u32 %v9593_v44, 16  ;;  %v4343_v2 = vrot.slane %v9593_v44, 1 }
 0x239   :  { %v2768_v26 = vadd.f32 %v2767_v51, %v2753_v57  ;;  %v5848_v42 = vpop.f32.mrb[148].mxu1  ;;  %v5788_v33 = vpop.f32.mrb[151].mxu0 }
 0x23a   :  { %v5849_v23 = vpop.f32.mrb[149].mxu1  ;;  %v5789_v53 = vadd.f32 %v5788_v33, %v5787_v9 }
 0x23b   :  { %v2769_v41 = vrot.slane %v2768_v26, 4  ;;  %v5850_v12 = vadd.f32 %v5849_v23, %v5848_v42  ;;  %v5851_v55 = vpop.f32.mrb[150].mxu1  ;;  %4697 = vmatmul.mubr.bf16.vlgmr.msra.gmra.mrb[0].mxu0 %v9169_v56  ;;  %6434 = vmatpush3.bf16.msra.mxu1 %v6826_v49  ;;  %v4338_v23 = vshll.u32 %v6656_v0, 16 }
 0x23c   :  { %v5852_v10 = vpop.f32.mrb[151].mxu1  ;;  %4704 = vmatprep.mubr.bf16.mxu0 %v9293_v45 }
 0x23d   :  { %v2770_v52 = vadd.f32 %v2769_v41, %v2768_v26  ;;  %v9644_v63 = vadd.f32 %v5850_v12, %v5786_v58  ;;  %v5853_v17 = vadd.f32 %v5852_v10, %v5851_v55  ;;  %v4344_v58 = vrot.slane %v6656_v0, 1 }
 0x23e   :  { %4632 = vmatmul.mubr.bf16.gmra.mrb[0].mxu1 %v9394_v47  ;;  %v5790_v34 = vpop.f32.mrb[152].mxu0  ;;  %v4335_v41 = vrot.slane %v4333_v25, 1 }
 0x23f   :  { %v2771_v5 = vrot.slane %v2770_v52, 2  ;;  %v9647_v62 = vadd.f32 %v5853_v17, %v5789_v53  ;;  %v5791_v22 = vpop.f32.mrb[153].mxu0  ;;  %4639 = vmatprep.mubr.bf16.mxu1 %v9591_v14  ;;  %v4331_v53 = vshrl.u32 %v9593_v44, 16  ;;  %v9665_v55 = vsel %vm929_vm8, %v4343_v2, %v4344_v58 }
 0x240   :  { %v5792_v43 = vadd.f32 %v5791_v22, %v5790_v34  ;;  %v5793_v56 = vpop.f32.mrb[154].mxu0 }
 0x241   :  { %v2772_v27 = vadd.f32 %v2771_v5, %v2770_v52  ;;  %v5854_v18 = vpop.f32.mrb[152].mxu1  ;;  %v5794_v45 = vpop.f32.mrb[155].mxu0  ;;  %v4336_v5 = vor.u32 %v4335_v41, %v4331_v53 }
 0x242   :  { %v5855_v30 = vpop.f32.mrb[153].mxu1  ;;  %v5795_v20 = vadd.f32 %v5794_v45, %v5793_v56 }
 0x243   :  { %v2773_v59 = vrot.slane %v2772_v27, 1  ;;  %v5856_v38 = vadd.f32 %v5855_v30, %v5854_v18  ;;  %v5857_v24 = vpop.f32.mrb[154].mxu1  ;;  %4705 = vmatmul.mubr.bf16.gmra.mrb[4].mxu0 %v9198_v39 }
 0x244   :  { %v5858_v31 = vpop.f32.mrb[155].mxu1  ;;  %4712 = vmatprep.mubr.bf16.mxu0 %v9336_v29 }
 0x245   :  { %v2774_v13 = vadd.f32 %v2773_v59, %v2772_v27  ;;  %v9652_v6 = vadd.f32 %v5856_v38, %v5792_v43  ;;  %v5859_v46 = vadd.f32 %v5858_v31, %v5857_v24 }
 0x246   :  { %4640 = vmatmul.mubr.bf16.gmra.mrb[4].mxu1 %v9428_v40  ;;  %v5796_v57 = vpop.f32.mrb[156].mxu0 }
 0x247   :  { %v9655_v54 = vadd.f32 %v5859_v46, %v5795_v20  ;;  %v5797_v3 = vpop.f32.mrb[157].mxu0  ;;  %4647 = vmatprep.mubr.bf16.mxu1 %v9614_v61  ;;  %v9659_v39 = vadd.f32 %v2774_v13, %v2011_v28 }
 0x248   :  { %v5798_v51 = vadd.f32 %v5797_v3, %v5796_v57  ;;  %v5799_v29 = vpop.f32.mrb[158].mxu0  ;;  %v9682_v3 = vld [vmem:[#allocation2 + $0xcc] sm:$0xff]  }
 0x249   :  { %v5860_v9 = vpop.f32.mrb[156].mxu1  ;;  %v5800_v49 = vpop.f32.mrb[159].mxu0 }
 0x24a   :  { %v5861_v1 = vpop.f32.mrb[157].mxu1  ;;  %v5801_v26 = vadd.f32 %v5800_v49, %v5799_v29 }
 0x24b   :  { %v5862_v42 = vadd.f32 %v5861_v1, %v5860_v9  ;;  %v5863_v33 = vpop.f32.mrb[158].mxu1  ;;  %4713 = vmatmul.mubr.bf16.gmra.mrb[8].mxu0 %v9236_v4  ;;  %v4340_v4 = vrot.slane %v4338_v23, 1  ;;  %v9688_v9 = vld [vmem:[#allocation2 + $0xd4] ss:$0 sps:$4 sm:$0x11]  }
 0x24c   :  { %v5864_v12 = vpop.f32.mrb[159].mxu1  ;;  %4720 = vmatprep.mubr.bf16.mxu0 %v9394_v47  ;;  %v4364_v41 = vshll.u32 %v9688_v9, 16 }
 0x24d   :  { %v9668_v10 = vadd.f32 %v5862_v42, %v5798_v51  ;;  %v5865_v60 = vadd.f32 %v5864_v12, %v5863_v33  ;;  %v4341_v30 = vsel %vm824_vm1, %v4336_v5, %v4340_v4 }
 0x24e   :  { %4648 = vmatmul.mubr.bf16.gmra.mrb[8].mxu1 %v9466_v37  ;;  %v5802_v52 = vpop.f32.mrb[160].mxu0 }
 0x24f   :  { %v9671_v17 = vadd.f32 %v5865_v60, %v5801_v26  ;;  %v5803_v34 = vpop.f32.mrb[161].mxu0  ;;  %4655 = vmatprep.mubr.bf16.mxu1 %v9665_v55 }
 0x250   :  { %v5804_v22 = vadd.f32 %v5803_v34, %v5802_v52  ;;  %v5805_v43 = vpop.f32.mrb[162].mxu0 }
 0x251   :  { %v5866_v56 = vpop.f32.mrb[160].mxu1  ;;  %v5806_v21 = vpop.f32.mrb[163].mxu0 }
 0x252   :  { %v5867_v27 = vpop.f32.mrb[161].mxu1  ;;  %v5807_v18 = vadd.f32 %v5806_v21, %v5805_v43 }
 0x253   :  { %v5868_v47 = vadd.f32 %v5867_v27, %v5866_v56  ;;  %v5869_v45 = vpop.f32.mrb[162].mxu1  ;;  %4721 = vmatmul.mubr.bf16.gmra.mrb[12].mxu0 %v9297_v36 }
 0x254   :  { %v5870_v20 = vpop.f32.mrb[163].mxu1  ;;  %4728 = vmatprep.mubr.bf16.mxu0 %v9428_v40 }
 0x255   :  { %v9677_v59 = vadd.f32 %v5868_v47, %v5804_v22  ;;  %v5871_v38 = vadd.f32 %v5870_v20, %v5869_v45  ;;  %v4366_v22 = vrot.slane %v4364_v41, 1 }
 0x256   :  { %4656 = vmatmul.mubr.bf16.gmra.mrb[12].mxu1 %v4341_v30  ;;  %v5808_v24 = vpop.f32.mrb[164].mxu0 }
 0x257   :  { %v9679_v31 = vadd.f32 %v5871_v38, %v5807_v18  ;;  %v5809_v0 = vpop.f32.mrb[165].mxu0  ;;  %6435 = vmatprep.mubr.bf16.mxu1 %v9453_v50  ;;  %v4359_v50 = vshll.u32 %v9682_v3, 16 }
 0x258   :  { %v5810_v28 = vadd.f32 %v5809_v0, %v5808_v24  ;;  %v5811_v13 = vpop.f32.mrb[166].mxu0 }
 0x259   :  { %v5872_v46 = vpop.f32.mrb[164].mxu1  ;;  %v5812_v57 = vpop.f32.mrb[167].mxu0  ;;  %v4361_v53 = vrot.slane %v4359_v50, 1 }
 0x25a   :  { %v5873_v36 = vpop.f32.mrb[165].mxu1  ;;  %v5813_v25 = vadd.f32 %v5812_v57, %v5811_v13  ;;  %v4370_v57 = vrot.slane %v9688_v9, 1 }
 0x25b   :  { %v5874_v51 = vadd.f32 %v5873_v36, %v5872_v46  ;;  %v5875_v40 = vpop.f32.mrb[166].mxu1  ;;  %4729 = vmatmul.mubr.bf16.gmra.mrb[16].mxu0 %v9341_v48  ;;  %v4369_v36 = vrot.slane %v9682_v3, 1 }
 0x25c   :  { %v5876_v29 = vpop.f32.mrb[167].mxu1  ;;  %4736 = vmatprep.mubr.bf16.mxu0 %v9466_v37  ;;  %v4357_v37 = vshrl.u32 %v9682_v3, 16 }
 0x25d   :  { %v9686_v2 = vadd.f32 %v5874_v51, %v5810_v28  ;;  %v5877_v58 = vadd.f32 %v5876_v29, %v5875_v40 }
 0x25e   :  { %6436 = vmatmul.mubr.bf16.vlgmr.msra.gmra.mrb[16].mxu1 %v9489_v19  ;;  %v5814_v49 = vpop.f32.mrb[168].mxu0  ;;  %v4362_v5 = vor.u32 %v4361_v53, %v4357_v37 }
 0x25f   :  { %v9692_v1 = vadd.f32 %v5877_v58, %v5813_v25  ;;  %v5815_v26 = vpop.f32.mrb[169].mxu0  ;;  %6439 = vmatprep.mubr.bf16.mxu1 %v9535_v11 }
 0x260   :  { %v5816_v42 = vadd.f32 %v5815_v26, %v5814_v49  ;;  %v5817_v48 = vpop.f32.mrb[170].mxu0  ;;  %v4371_v26 = vsel %vm929_vm8, %v4369_v36, %v4370_v57 }
 0x261   :  { %v5878_v33 = vpop.f32.mrb[168].mxu1  ;;  %v5818_v23 = vpop.f32.mrb[171].mxu0 }
 0x262   :  { %v5879_v12 = vpop.f32.mrb[169].mxu1  ;;  %v5819_v60 = vadd.f32 %v5818_v23, %v5817_v48 }
 0x263   :  { %v5880_v52 = vadd.f32 %v5879_v12, %v5878_v33  ;;  %v5881_v34 = vpop.f32.mrb[170].mxu1  ;;  %4737 = vmatmul.mubr.bf16.gmra.mrb[20].mxu0 %v9400_v7  ;;  %v4367_v7 = vsel %vm824_vm1, %v4362_v5, %v4366_v22 }
 0x264   :  { %v5882_v19 = vpop.f32.mrb[171].mxu1  ;;  %4744 = vmatprep.mubr.bf16.mxu0 %v4341_v30 }
 0x265   :  { %v9698_v4 = vadd.f32 %v5880_v52, %v5816_v42  ;;  %v5883_v11 = vadd.f32 %v5882_v19, %v5881_v34 }
 0x266   :  { %6440 = vmatmul.mubr.bf16.gmra.mrb[20].mxu1 %v9565_v35  ;;  %v5820_v43 = vpop.f32.mrb[172].mxu0 }
 0x267   :  { %v9701_v56 = vadd.f32 %v5883_v11, %v5819_v60  ;;  %v5821_v21 = vpop.f32.mrb[173].mxu0  ;;  %6443 = vmatprep.mubr.bf16.mxu1 %v9591_v14 }
 0x268   :  { %v5822_v27 = vadd.f32 %v5821_v21, %v5820_v43  ;;  %v5823_v18 = vpop.f32.mrb[174].mxu0 }
 0x269   :  { %v5884_v47 = vpop.f32.mrb[172].mxu1  ;;  %v5824_v45 = vpop.f32.mrb[175].mxu0 }
 0x26a   :  { %v5885_v30 = vpop.f32.mrb[173].mxu1  ;;  %v5825_v20 = vadd.f32 %v5824_v45, %v5823_v18 }
 0x26b   :  { %v5886_v38 = vadd.f32 %v5885_v30, %v5884_v47  ;;  %v5887_v24 = vpop.f32.mrb[174].mxu1  ;;  %4745 = vmatmul.mubr.bf16.gmra.mrb[24].mxu0 %v9593_v44 }
 0x26c   :  { %v5888_v0 = vpop.f32.mrb[175].mxu1  ;;  %4752 = vmatprep.mubr.bf16.mxu0 %v4367_v7 }
 0x26d   :  { %v9706_v35 = vadd.f32 %v5886_v38, %v5822_v27  ;;  %v5889_v28 = vadd.f32 %v5888_v0, %v5887_v24 }
 0x26e   :  { %6444 = vmatmul.mubr.bf16.gmra.mrb[24].mxu1 %v9614_v61  ;;  %v5906_v14 = vpop.f32.mrb[176].mxu0 }
 0x26f   :  { %v9709_v13 = vadd.f32 %v5889_v28, %v5825_v20  ;;  %v5907_v46 = vpop.f32.mrb[177].mxu0  ;;  %6447 = vmatprep.mubr.bf16.mxu1 %v9665_v55 }
 0x270   :  { %v5908_v25 = vadd.f32 %v5907_v46, %v5906_v14  ;;  %v5909_v51 = vpop.f32.mrb[178].mxu0 }
 0x271   :  { %v5970_v44 = vpop.f32.mrb[176].mxu1  ;;  %v5910_v40 = vpop.f32.mrb[179].mxu0 }
 0x272   :  { %v3839_v29 = vadd.f32 %v5908_v25, %v9633_v32  ;;  %v5971_v58 = vpop.f32.mrb[177].mxu1  ;;  %v5911_v50 = vadd.f32 %v5910_v40, %v5909_v51 }
 0x273   :  { %v5972_v49 = vadd.f32 %v5971_v58, %v5970_v44  ;;  %v5973_v61 = vpop.f32.mrb[178].mxu1  ;;  %4753 = vmatmul.mubr.bf16.gmra.mrb[28].mxu0 %v9682_v3 }
 0x274   :  { %v3842_v9 = vadd.f32 %v5911_v50, %v9636_v8  ;;  %v5974_v42 = vpop.f32.mrb[179].mxu1 }
 0x275   :  { %v5975_v55 = vadd.f32 %v5974_v42, %v5973_v61  ;;  %v9718_v48 = vadd.f32 %v5972_v49, %v3839_v29 }
 0x276   :  { %6448 = vmatmul.mubr.bf16.gmra.mrb[28].mxu1 %v4371_v26  ;;  %v5912_v33 = vpop.f32.mrb[180].mxu0 }
 0x277   :  { %v5913_v23 = vpop.f32.mrb[181].mxu0  ;;  %v9720_v37 = vadd.f32 %v5975_v55, %v3842_v9 }
 0x278   :  { %v5914_v32 = vadd.f32 %v5913_v23, %v5912_v33  ;;  %v5915_v53 = vpop.f32.mrb[182].mxu0 }
 0x279   :  { %v5976_v41 = vpop.f32.mrb[180].mxu1  ;;  %v5916_v12 = vpop.f32.mrb[183].mxu0 }
 0x27a   :  { %v3847_v60 = vadd.f32 %v5914_v32, %v9644_v63  ;;  %v5977_v3 = vpop.f32.mrb[181].mxu1  ;;  %v5917_v52 = vadd.f32 %v5916_v12, %v5915_v53 }
 0x27b   :  { %v5978_v34 = vadd.f32 %v5977_v3, %v5976_v41  ;;  %v5979_v19 = vpop.f32.mrb[182].mxu1 }
 0x27c   :  { %v3850_v8 = vadd.f32 %v5917_v52, %v9647_v62  ;;  %v5980_v11 = vpop.f32.mrb[183].mxu1 }
 0x27d   :  { %v5981_v5 = vadd.f32 %v5980_v11, %v5979_v19  ;;  %v9724_v22 = vadd.f32 %v5978_v34, %v3847_v60 }
 0x27e   :  { %v5918_v43 = vpop.f32.mrb[184].mxu0 }
 0x27f   :  { %v5919_v21 = vpop.f32.mrb[185].mxu0  ;;  %v9726_v27 = vadd.f32 %v5981_v5, %v3850_v8 }
 0x280   :  { %v5920_v18 = vadd.f32 %v5919_v21, %v5918_v43  ;;  %v5921_v47 = vpop.f32.mrb[186].mxu0 }
 0x281   :  { %v5982_v45 = vpop.f32.mrb[184].mxu1  ;;  %v5922_v7 = vpop.f32.mrb[187].mxu0 }
 0x282   :  { %v3855_v63 = vadd.f32 %v5920_v18, %v9652_v6  ;;  %v5983_v30 = vpop.f32.mrb[185].mxu1  ;;  %v5923_v20 = vadd.f32 %v5922_v7, %v5921_v47 }
 0x283   :  { %v5984_v38 = vadd.f32 %v5983_v30, %v5982_v45  ;;  %v5985_v24 = vpop.f32.mrb[186].mxu1 }
 0x284   :  { %v3858_v62 = vadd.f32 %v5923_v20, %v9655_v54  ;;  %v5986_v0 = vpop.f32.mrb[187].mxu1 }
 0x285   :  { %v5987_v28 = vadd.f32 %v5986_v0, %v5985_v24  ;;  %v9730_v14 = vadd.f32 %v5984_v38, %v3855_v63 }
 0x286   :  { %v5924_v46 = vpop.f32.mrb[188].mxu0 }
 0x287   :  { %v5925_v57 = vpop.f32.mrb[189].mxu0  ;;  %v9732_v36 = vadd.f32 %v5987_v28, %v3858_v62 }
 0x288   :  { %v5926_v25 = vadd.f32 %v5925_v57, %v5924_v46  ;;  %v5927_v51 = vpop.f32.mrb[190].mxu0 }
 0x289   :  { %v5988_v44 = vpop.f32.mrb[188].mxu1  ;;  %v5928_v40 = vpop.f32.mrb[191].mxu0 }
 0x28a   :  { %v3863_v6 = vadd.f32 %v5926_v25, %v9668_v10  ;;  %v5989_v29 = vpop.f32.mrb[189].mxu1  ;;  %v5929_v58 = vadd.f32 %v5928_v40, %v5927_v51 }
 0x28b   :  { %v5990_v50 = vadd.f32 %v5989_v29, %v5988_v44  ;;  %v5991_v49 = vpop.f32.mrb[190].mxu1 }
 0x28c   :  { %v3866_v54 = vadd.f32 %v5929_v58, %v9671_v17  ;;  %v5992_v61 = vpop.f32.mrb[191].mxu1 }
 0x28d   :  { %v5993_v26 = vadd.f32 %v5992_v61, %v5991_v49  ;;  %v9736_v9 = vadd.f32 %v5990_v50, %v3863_v6 }
 0x28e   :  { %v5930_v42 = vpop.f32.mrb[192].mxu0 }
 0x28f   :  { %v5931_v55 = vpop.f32.mrb[193].mxu0  ;;  %v9738_v33 = vadd.f32 %v5993_v26, %v3866_v54 }
 0x290   :  { %v5932_v23 = vadd.f32 %v5931_v55, %v5930_v42  ;;  %v5933_v32 = vpop.f32.mrb[194].mxu0 }
 0x291   :  { %v5994_v53 = vpop.f32.mrb[192].mxu1  ;;  %v5934_v41 = vpop.f32.mrb[195].mxu0 }
 0x292   :  { %v3871_v10 = vadd.f32 %v5932_v23, %v9677_v59  ;;  %v5995_v12 = vpop.f32.mrb[193].mxu1  ;;  %v5935_v60 = vadd.f32 %v5934_v41, %v5933_v32 }
 0x293   :  { %v5996_v3 = vadd.f32 %v5995_v12, %v5994_v53  ;;  %v5997_v52 = vpop.f32.mrb[194].mxu1 }
 0x294   :  { %v3874_v17 = vadd.f32 %v5935_v60, %v9679_v31  ;;  %v5998_v34 = vpop.f32.mrb[195].mxu1 }
 0x295   :  { %v5999_v19 = vadd.f32 %v5998_v34, %v5997_v52  ;;  %v9742_v8 = vadd.f32 %v5996_v3, %v3871_v10 }
 0x296   :  { %v5936_v11 = vpop.f32.mrb[196].mxu0 }
 0x297   :  { %v5937_v5 = vpop.f32.mrb[197].mxu0  ;;  %v9744_v43 = vadd.f32 %v5999_v19, %v3874_v17 }
 0x298   :  { %v5938_v21 = vadd.f32 %v5937_v5, %v5936_v11  ;;  %v5939_v18 = vpop.f32.mrb[198].mxu0 }
 0x299   :  { %v6000_v47 = vpop.f32.mrb[196].mxu1  ;;  %v5940_v45 = vpop.f32.mrb[199].mxu0 }
 0x29a   :  { %v3879_v59 = vadd.f32 %v5938_v21, %v9686_v2  ;;  %v6001_v7 = vpop.f32.mrb[197].mxu1  ;;  %v5941_v63 = vadd.f32 %v5940_v45, %v5939_v18  ;;  %v4932_v21 = vld [vmem:[%s10055_s4 + $0x8] sm:$0xff] }
 0x29b   :  { %v6002_v30 = vadd.f32 %v6001_v7, %v6000_v47  ;;  %v6003_v20 = vpop.f32.mrb[198].mxu1  ;;  %v6854_v47 = vmov 0.0|0.0  }
 0x29c   :  { %v3882_v31 = vadd.f32 %v5941_v63, %v9692_v1  ;;  %v6004_v38 = vpop.f32.mrb[199].mxu1  ;;  %6486 = vmatprep.subr.bf16.mxu0 %v6854_v47 }
 0x29d   :  { %v6005_v24 = vadd.f32 %v6004_v38, %v6003_v20  ;;  %v9748_v62 = vadd.f32 %v6002_v30, %v3879_v59 }
 0x29e   :  { %v5942_v0 = vpop.f32.mrb[200].mxu0 }
 0x29f   :  { %v5943_v28 = vpop.f32.mrb[201].mxu0  ;;  %v9750_v46 = vadd.f32 %v6005_v24, %v3882_v31 }
 0x2a0   :  { %v5944_v57 = vadd.f32 %v5943_v28, %v5942_v0  ;;  %v5945_v25 = vpop.f32.mrb[202].mxu0 }
 0x2a1   :  { %v6006_v51 = vpop.f32.mrb[200].mxu1  ;;  %v5946_v44 = vpop.f32.mrb[203].mxu0 }
 0x2a2   :  { %v3887_v2 = vadd.f32 %v5944_v57, %v9698_v4  ;;  %v6007_v40 = vpop.f32.mrb[201].mxu1  ;;  %v5947_v6 = vadd.f32 %v5946_v44, %v5945_v25 }
 0x2a3   :  { %v6008_v29 = vadd.f32 %v6007_v40, %v6006_v51  ;;  %v6009_v58 = vpop.f32.mrb[202].mxu1 }
 0x2a4   :  { %v3890_v1 = vadd.f32 %v5947_v6, %v9701_v56  ;;  %v6010_v50 = vpop.f32.mrb[203].mxu1 }
 0x2a5   :  { %v6011_v49 = vadd.f32 %v6010_v50, %v6009_v58  ;;  %v9754_v54 = vadd.f32 %v6008_v29, %v3887_v2 }
 0x2a6   :  { %v5948_v61 = vpop.f32.mrb[204].mxu0 }
 0x2a7   :  { %v5949_v26 = vpop.f32.mrb[205].mxu0  ;;  %v9756_v42 = vadd.f32 %v6011_v49, %v3890_v1 }
 0x2a8   :  { %v5950_v55 = vadd.f32 %v5949_v26, %v5948_v61  ;;  %v5951_v23 = vpop.f32.mrb[206].mxu0 }
 0x2a9   :  { %v6012_v32 = vpop.f32.mrb[204].mxu1  ;;  %v5952_v53 = vpop.f32.mrb[207].mxu0 }
 0x2aa   :  { %v3895_v4 = vadd.f32 %v5950_v55, %v9706_v35  ;;  %v6013_v41 = vpop.f32.mrb[205].mxu1  ;;  %v5953_v10 = vadd.f32 %v5952_v53, %v5951_v23  ;;  %v4931_v35 = vld [vmem:[%s10055_s4] sm:$0xff] }
 0x2ab   :  { %v6014_v12 = vadd.f32 %v6013_v41, %v6012_v32  ;;  %v6015_v60 = vpop.f32.mrb[206].mxu1  ;;  %v6487_v45 = vpack.c.bf16 %v4932_v21, %v4931_v35 }
 0x2ac   :  { %v3898_v56 = vadd.f32 %v5953_v10, %v9709_v13  ;;  %v6016_v3 = vpop.f32.mrb[207].mxu1 }
 0x2ad   :  { %v6017_v52 = vadd.f32 %v6016_v3, %v6015_v60  ;;  %v9760_v17 = vadd.f32 %v6014_v12, %v3895_v4  ;;  %6488 = vmatpush3.bf16.msra.mxu0 %v6487_v45  ;;  %v4934_v45 = vld [vmem:[%s10055_s4 + $0x18] sm:$0xff] }
 0x2ae   :  { %v6405_v34 = vpop.f32.mrb[208].mxu0  ;;  %6489 = vmatprep.subr.bf16.mxu0 %v6854_v47 }
 0x2af   :  { %v4041_v19 = vadd.f32 %v6405_v34, %v9724_v22  ;;  %v4032_v11 = vpop.f32.mrb[209].mxu0  ;;  %v9763_v5 = vadd.f32 %v6017_v52, %v3898_v56 }
 0x2b0   :  { %v4033_v13 = vadd.f32 %v4032_v11, %v9718_v48  ;;  %v6406_v18 = vpop.f32.mrb[210].mxu0 }
 0x2b1   :  { %v4097_v22 = vmul.f32 %v9516_v16, %v4041_v19  ;;  %v6050_v59 = vpop.f32.mrb[208].mxu1  ;;  %v4044_v7 = vadd.f32 %v6406_v18, %v9726_v27  ;;  %v4035_v63 = vpop.f32.mrb[211].mxu0  ;;  %v4933_v18 = vld [vmem:[%s10055_s4 + $0x10] sm:$0xff] }
 0x2b2   :  { %v4095_v30 = vmul.f32 %v9516_v16, %v4033_v13  ;;  %v6051_v20 = vpop.f32.mrb[209].mxu1  ;;  %v4036_v31 = vadd.f32 %v4035_v63, %v9720_v37 }
 0x2b3   :  { %v9777_v38 = vadd.f32 %v6051_v20, %v6050_v59  ;;  %v6053_v48 = vpop.f32.mrb[210].mxu1  ;;  %v4098_v0 = vmul.f32 %v9516_v16, %v4044_v7  ;;  %v4113_v27 = vadd.f32 %v9528_v15, %v4097_v22 }
 0x2b4   :  { %v4111_v24 = vadd.f32 %v9528_v15, %v4095_v30  ;;  %v4096_v28 = vmul.f32 %v9516_v16, %v4036_v31  ;;  %v6054_v57 = vpop.f32.mrb[211].mxu1  ;;  %v6490_v30 = vpack.c.bf16 %v4934_v45, %v4933_v18 }
 0x2b5   :  { %v9784_v25 = vadd.f32 %v6054_v57, %v6053_v48  ;;  %v4114_v6 = vadd.f32 %v9528_v15, %v4098_v0  ;;  %v4129_v50 = vmax.f32 %v4113_v27, 0.0 }
 0x2b6   :  { %v4112_v51 = vadd.f32 %v9528_v15, %v4096_v28  ;;  %v6409_v37 = vpop.f32.mrb[212].mxu0  ;;  %v4127_v40 = vmax.f32 %v4111_v24, 0.0  ;;  %6491 = vmatpush3.bf16.msra.mxu0 %v6490_v30 }
 0x2b7   :  { %v4057_v44 = vadd.f32 %v6409_v37, %v9736_v9  ;;  %v4048_v2 = vpop.f32.mrb[213].mxu0  ;;  %6492 = vmatprep.subr.bf16.mxu0 %v6854_v47 }
 0x2b8   :  { %v4128_v29 = vmax.f32 %v4112_v51, 0.0  ;;  %v4049_v58 = vadd.f32 %v4048_v2, %v9730_v14  ;;  %v6410_v1 = vpop.f32.mrb[214].mxu0  ;;  %v4130_v14 = vmax.f32 %v4114_v6, 0.0 }
 0x2b9   :  { %v6056_v49 = vpop.f32.mrb[212].mxu1  ;;  %v4060_v61 = vadd.f32 %v6410_v1, %v9738_v33  ;;  %v4051_v26 = vpop.f32.mrb[215].mxu0  ;;  %v4101_v23 = vmul.f32 %v9516_v16, %v4057_v44  ;;  %v9801_v33 = vld [vmem:[%s10053_s2] ss:$0 sm:$0xff] }
 0x2ba   :  { %v4143_v55 = vadd.f32 %v4128_v29, %v4127_v40  ;;  %v4099_v32 = vmul.f32 %v9516_v16, %v4049_v58  ;;  %v6057_v53 = vpop.f32.mrb[213].mxu1  ;;  %v4052_v9 = vadd.f32 %v4051_v26, %v9732_v36  ;;  %v9809_v36 = vld [vmem:[%s10054_s3] ss:$0 sm:$0xff] }
 0x2bb   :  { %v9794_v4 = vadd.f32 %v6057_v53, %v6056_v49  ;;  %v4102_v41 = vmul.f32 %v9516_v16, %v4060_v61  ;;  %v6059_v10 = vpop.f32.mrb[214].mxu1  ;;  %v4117_v16 = vadd.f32 %v9809_v36, %v4101_v23  ;;  %v4935_v23 = vld [vmem:[%s10055_s4 + $0x20] sm:$0xff] }
 0x2bc   :  { %v4144_v12 = vadd.f32 %v4143_v55, %v4129_v50  ;;  %v4115_v60 = vadd.f32 %v9528_v15, %v4099_v32  ;;  %v4100_v56 = vmul.f32 %v9801_v33, %v4052_v9  ;;  %v6060_v3 = vpop.f32.mrb[215].mxu1  ;;  %v4936_v32 = vld [vmem:[%s10055_s4 + $0x28] sm:$0xff] }
 0x2bd   :  { %v9804_v52 = vadd.f32 %v6060_v3, %v6059_v10  ;;  %v4118_v35 = vadd.f32 %v9809_v36, %v4102_v41  ;;  %v4133_v24 = vmax.f32 %v4117_v16, 0.0 }
 0x2be   :  { %v4131_v34 = vmax.f32 %v4115_v60, 0.0  ;;  %v4145_v19 = vadd.f32 %v4144_v12, %v4130_v14  ;;  %v4116_v15 = vadd.f32 %v9809_v36, %v4100_v56  ;;  %v6413_v11 = vpop.f32.mrb[216].mxu0  ;;  %v6493_v14 = vpack.c.bf16 %v4936_v32, %v4935_v23 }
 0x2bf   :  { %v4073_v21 = vadd.f32 %v6413_v11, %v9748_v62  ;;  %v4064_v13 = vpop.f32.mrb[217].mxu0  ;;  %v4134_v44 = vmax.f32 %v4118_v35, 0.0 }
 0x2c0   :  { %v4146_v22 = vadd.f32 %v4145_v19, %v4131_v34  ;;  %v4132_v59 = vmax.f32 %v4116_v15, 0.0  ;;  %v4065_v7 = vadd.f32 %v4064_v13, %v9742_v8  ;;  %v6414_v63 = vpop.f32.mrb[218].mxu0  ;;  %6494 = vmatpush3.bf16.msra.mxu0 %v6493_v14 }
 0x2c1   :  { %v4105_v20 = vmul.f32 %v9801_v33, %v4073_v21  ;;  %v6062_v31 = vpop.f32.mrb[216].mxu1  ;;  %v4076_v62 = vadd.f32 %v6414_v63, %v9750_v46  ;;  %v4067_v48 = vpop.f32.mrb[219].mxu0  ;;  %6495 = vmatprep.subr.bf16.mxu0 %v6854_v47 }
 0x2c2   :  { %v4147_v0 = vadd.f32 %v4146_v22, %v4132_v59  ;;  %v4103_v28 = vmul.f32 %v9801_v33, %v4065_v7  ;;  %v6063_v57 = vpop.f32.mrb[217].mxu1  ;;  %v4068_v27 = vadd.f32 %v4067_v48, %v9744_v43  ;;  %v4938_v48 = vld [vmem:[%s10055_s4 + $0x38] sm:$0xff] }
 0x2c3   :  { %v9826_v51 = vadd.f32 %v6063_v57, %v6062_v31  ;;  %v4106_v8 = vmul.f32 %v9801_v33, %v4076_v62  ;;  %v6065_v37 = vpop.f32.mrb[218].mxu1  ;;  %v4121_v29 = vadd.f32 %v9809_v36, %v4105_v20  ;;  %v4937_v62 = vld [vmem:[%s10055_s4 + $0x30] sm:$0xff] }
 0x2c4   :  { %v4148_v2 = vadd.f32 %v4147_v0, %v4133_v24  ;;  %v4119_v46 = vadd.f32 %v9809_v36, %v4103_v28  ;;  %v4104_v40 = vmul.f32 %v9801_v33, %v4068_v27  ;;  %v6066_v6 = vpop.f32.mrb[219].mxu1  ;;  %v6496_v27 = vpack.c.bf16 %v4938_v48, %v4937_v62 }
 0x2c5   :  { %v9833_v58 = vadd.f32 %v6066_v6, %v6065_v37  ;;  %v4122_v61 = vadd.f32 %v9809_v36, %v4106_v8  ;;  %v4137_v12 = vmax.f32 %v4121_v29, 0.0 }
 0x2c6   :  { %v4135_v43 = vmax.f32 %v4119_v46, 0.0  ;;  %v4149_v1 = vadd.f32 %v4148_v2, %v4134_v44  ;;  %v4120_v50 = vadd.f32 %v9809_v36, %v4104_v40  ;;  %v6417_v49 = vpop.f32.mrb[220].mxu0  ;;  %6497 = vmatpush3.bf16.msra.mxu0 %v6496_v27  ;;  %v6856_v27 = vmov 0.0  }
 0x2c7   :  { %v4089_v26 = vadd.f32 %v6417_v49, %v9760_v17  ;;  %v4080_v55 = vpop.f32.mrb[221].mxu0  ;;  %v4138_v21 = vmax.f32 %v4122_v61, 0.0  ;;  %6498 = vmatprep.subr.bf16.mxu0 %v6854_v47  ;;  %6483 = vmatprep.mubr.msk.f32.mxu0 %vm6855_vm10, %v6856_v27 }
 0x2c8   :  { %v4150_v53 = vadd.f32 %v4149_v1, %v4135_v43  ;;  %v4136_v9 = vmax.f32 %v4120_v50, 0.0  ;;  %v4081_v41 = vadd.f32 %v4080_v55, %v9754_v54  ;;  %v6418_v10 = vpop.f32.mrb[222].mxu0 }
 0x2c9   :  { %v6068_v60 = vpop.f32.mrb[220].mxu1  ;;  %v4092_v56 = vadd.f32 %v6418_v10, %v9763_v5  ;;  %v4083_v17 = vpop.f32.mrb[223].mxu0  ;;  %v4109_v16 = vmul.f32 %v9801_v33, %v4089_v26 }
 0x2ca   :  { %v4151_v3 = vadd.f32 %v4150_v53, %v4136_v9  ;;  %v4107_v34 = vmul.f32 %v9801_v33, %v4081_v41  ;;  %v6069_v19 = vpop.f32.mrb[221].mxu1  ;;  %v4084_v15 = vadd.f32 %v4083_v17, %v9756_v42 }
 0x2cb   :  { %v9849_v11 = vadd.f32 %v6069_v19, %v6068_v60  ;;  %v4110_v54 = vmul.f32 %v9801_v33, %v4092_v56  ;;  %v6071_v35 = vpop.f32.mrb[222].mxu1  ;;  %v4125_v59 = vadd.f32 %v9809_v36, %v4109_v16  ;;  %v4940_v60 = vld [vmem:[%s10055_s4 + $0x48] sm:$0xff] }
 0x2cc   :  { %v4152_v13 = vadd.f32 %v4151_v3, %v4137_v12  ;;  %v4123_v5 = vadd.f32 %v9809_v36, %v4107_v34  ;;  %v4108_v18 = vmul.f32 %v9801_v33, %v4084_v15  ;;  %v6072_v45 = vpop.f32.mrb[223].mxu1  ;;  %v4941_v15 = vld [vmem:[%s10055_s4 + $0x50] sm:$0xff] }
 0x2cd   :  { %v9855_v22 = vadd.f32 %v6072_v45, %v6071_v35  ;;  %v4126_v20 = vadd.f32 %v9809_v36, %v4110_v54  ;;  %v4141_v44 = vmax.f32 %v4125_v59, 0.0  ;;  %v4942_v54 = vld [vmem:[%s10055_s4 + $0x58] sm:$0xff] }
 0x2ce   :  { %v4139_v42 = vmax.f32 %v4123_v5, 0.0  ;;  %v4153_v7 = vadd.f32 %v4152_v13, %v4138_v21  ;;  %v4124_v63 = vadd.f32 %v9809_v36, %v4108_v18  ;;  %v6114_v30 = vpop.f32.mrb[224].mxu0  ;;  %v6502_v21 = vpack.c.bf16 %v4942_v54, %v4941_v15 }
 0x2cf   :  { %v6115_v31 = vpop.f32.mrb[225].mxu0  ;;  %v4142_v1 = vmax.f32 %v4126_v20, 0.0 }
 0x2d0   :  { %v4154_v24 = vadd.f32 %v4153_v7, %v4139_v42  ;;  %v4140_v0 = vmax.f32 %v4124_v63, 0.0  ;;  %v6116_v28 = vadd.f32 %v6115_v31, %v6114_v30  ;;  %v6117_v57 = vpop.f32.mrb[226].mxu0  ;;  %v4943_v7 = vld [vmem:[%s10055_s4 + $0x60] sm:$0xff]  ;;  %v4944_v63 = vld [vmem:[%s10055_s4 + $0x68] sm:$0xff] }
 0x2d1   :  { %v6074_v8 = vpop.f32.mrb[224].mxu1  ;;  %v6118_v37 = vpop.f32.mrb[227].mxu0  ;;  %v6505_v31 = vpack.c.bf16 %v4944_v63, %v4943_v7 }
 0x2d2   :  { %v4155_v2 = vadd.f32 %v4154_v24, %v4140_v0  ;;  %v6075_v46 = vpop.f32.mrb[225].mxu1  ;;  %v9867_v40 = vadd.f32 %v6116_v28, %v9777_v38  ;;  %v6119_v6 = vadd.f32 %v6118_v37, %v6117_v57  ;;  %v4945_v24 = vld [vmem:[%s10055_s4 + $0x70] sm:$0xff]  ;;  %v4946_v0 = vld [vmem:[%s10055_s4 + $0x78] sm:$0xff] }
 0x2d3   :  { %v9869_v29 = vadd.f32 %v6075_v46, %v6074_v8  ;;  %v6077_v43 = vpop.f32.mrb[226].mxu1  ;;  %v6508_v57 = vpack.c.bf16 %v4946_v0, %v4945_v24 }
 0x2d4   :  { %v4156_v50 = vadd.f32 %v4155_v2, %v4141_v44  ;;  %v6078_v49 = vpop.f32.mrb[227].mxu1  ;;  %v9873_v61 = vadd.f32 %v6119_v6, %v9784_v25  ;;  %v4939_v25 = vld [vmem:[%s10055_s4 + $0x40] sm:$0xff] }
 0x2d5   :  { %v9875_v26 = vadd.f32 %v6078_v49, %v6077_v43  ;;  %v6499_v3 = vpack.c.bf16 %v4940_v60, %v4939_v25 }
 0x2d6   :  { %v9877_v55 = vadd.f32 %v4156_v50, %v4142_v1  ;;  %v6120_v23 = vpop.f32.mrb[228].mxu0 }
 0x2d7   :  { %v6121_v38 = vpop.f32.mrb[229].mxu0  ;;  %6500 = vmatpush3.bf16.msra.mxu0 %v6499_v3 }
 0x2d8   :  { %v6122_v32 = vadd.f32 %v6121_v38, %v6120_v23  ;;  %v6123_v53 = vpop.f32.mrb[230].mxu0  ;;  %6501 = vmatprep.subr.bf16.mxu0 %v6854_v47 }
 0x2d9   :  { %v6080_v9 = vpop.f32.mrb[228].mxu1  ;;  %v6124_v41 = vpop.f32.mrb[231].mxu0 }
 0x2da   :  { %v6081_v10 = vpop.f32.mrb[229].mxu1  ;;  %v9880_v14 = vadd.f32 %v6122_v32, %v9794_v4  ;;  %v6125_v12 = vadd.f32 %v6124_v41, %v6123_v53 }
 0x2db   :  { %v9888_v56 = vadd.f32 %v6081_v10, %v6080_v9  ;;  %v6083_v17 = vpop.f32.mrb[230].mxu1  ;;  %6503 = vmatpush3.bf16.msra.mxu0 %v6502_v21 }
 0x2dc   :  { %v6084_v16 = vpop.f32.mrb[231].mxu1  ;;  %v9891_v34 = vadd.f32 %v6125_v12, %v9804_v52  ;;  %6504 = vmatprep.subr.bf16.mxu0 %v6854_v47 }
 0x2dd   :  { %v9893_v19 = vadd.f32 %v6084_v16, %v6083_v17 }
 0x2de   :  { %v6126_v4 = vpop.f32.mrb[232].mxu0 }
 0x2df   :  { %v6127_v35 = vpop.f32.mrb[233].mxu0  ;;  %6506 = vmatpush3.bf16.msra.mxu0 %v6505_v31 }
 0x2e0   :  { %v6128_v13 = vadd.f32 %v6127_v35, %v6126_v4  ;;  %v6129_v5 = vpop.f32.mrb[234].mxu0  ;;  %6507 = vmatprep.subr.bf16.mxu0 %v6854_v47 }
 0x2e1   :  { %v6086_v52 = vpop.f32.mrb[232].mxu1  ;;  %v6130_v18 = vpop.f32.mrb[235].mxu0 }
 0x2e2   :  { %v6087_v45 = vpop.f32.mrb[233].mxu1  ;;  %v9903_v59 = vadd.f32 %v6128_v13, %v9826_v51  ;;  %v6131_v42 = vadd.f32 %v6130_v18, %v6129_v5 }
 0x2e3   :  { %v9912_v30 = vadd.f32 %v6087_v45, %v6086_v52  ;;  %v6089_v20 = vpop.f32.mrb[234].mxu1  ;;  %6509 = vmatpush3.bf16.msra.mxu0 %v6508_v57 }
 0x2e4   :  { %v6090_v62 = vpop.f32.mrb[235].mxu1  ;;  %v9915_v48 = vadd.f32 %v6131_v42, %v9833_v58 }
 0x2e5   :  { %v9917_v51 = vadd.f32 %v6090_v62, %v6089_v20 }
 0x2e6   :  { %v6132_v28 = vpop.f32.mrb[236].mxu0 }
 0x2e7   :  { %v6133_v58 = vpop.f32.mrb[237].mxu0 }
 0x2e8   :  { %v6134_v8 = vadd.f32 %v6133_v58, %v6132_v28  ;;  %v6135_v37 = vpop.f32.mrb[238].mxu0 }
 0x2e9   :  { %v6092_v44 = vpop.f32.mrb[236].mxu1  ;;  %v6136_v2 = vpop.f32.mrb[239].mxu0 }
 0x2ea   :  { %v6093_v46 = vpop.f32.mrb[237].mxu1  ;;  %v9927_v6 = vadd.f32 %v6134_v8, %v9849_v11  ;;  %v6137_v43 = vadd.f32 %v6136_v2, %v6135_v37 }
 0x2eb   :  { %v6094_v1 = vadd.f32 %v6093_v46, %v6092_v44  ;;  %v6095_v50 = vpop.f32.mrb[238].mxu1 }
 0x2ec   :  { %v6096_v49 = vpop.f32.mrb[239].mxu1  ;;  %v9930_v47 = vadd.f32 %v6137_v43, %v9855_v22 }
 0x2ed   :  { %v6097_v23 = vadd.f32 %v6096_v49, %v6095_v50 }
 0x2ee   :  { %v6138_v38 = vpop.f32.mrb[240].mxu0 }
 0x2ef   :  { %v6139_v32 = vpop.f32.mrb[241].mxu0 }
 0x2f0   :  { %v6140_v53 = vadd.f32 %v6139_v32, %v6138_v38  ;;  %v6141_v9 = vpop.f32.mrb[242].mxu0 }
 0x2f1   :  { %v6178_v41 = vpop.f32.mrb[240].mxu1  ;;  %v6142_v10 = vpop.f32.mrb[243].mxu0 }
 0x2f2   :  { %v9933_v12 = vadd.f32 %v6140_v53, %v9869_v29  ;;  %v6179_v25 = vpop.f32.mrb[241].mxu1  ;;  %v6143_v11 = vadd.f32 %v6142_v10, %v6141_v9 }
 0x2f3   :  { %v6180_v60 = vadd.f32 %v6179_v25, %v6178_v41  ;;  %v6181_v17 = vpop.f32.mrb[242].mxu1 }
 0x2f4   :  { %v9936_v3 = vadd.f32 %v6143_v11, %v9875_v26  ;;  %v6182_v16 = vpop.f32.mrb[243].mxu1 }
 0x2f5   :  { %v4602_v22 = vadd.f32 %v6180_v60, %v9867_v40  ;;  %v6183_v4 = vadd.f32 %v6182_v16, %v6181_v17 }
 0x2f6   :  { %v6144_v15 = vpop.f32.mrb[244].mxu0 }
 0x2f7   :  { %v4605_v54 = vadd.f32 %v6183_v4, %v9873_v61  ;;  %v6145_v35 = vpop.f32.mrb[245].mxu0 }
 0x2f8   :  { %v6146_v21 = vadd.f32 %v6145_v35, %v6144_v15  ;;  %v6147_v13 = vpop.f32.mrb[246].mxu0 }
 0x2f9   :  { %v6184_v5 = vpop.f32.mrb[244].mxu1  ;;  %v6148_v29 = vpop.f32.mrb[247].mxu0 }
 0x2fa   :  { %v9941_v52 = vadd.f32 %v6146_v21, %v9888_v56  ;;  %v6185_v18 = vpop.f32.mrb[245].mxu1  ;;  %v6149_v45 = vadd.f32 %v6148_v29, %v6147_v13 }
 0x2fb   :  { %v6186_v42 = vadd.f32 %v6185_v18, %v6184_v5  ;;  %v6187_v26 = vpop.f32.mrb[246].mxu1 }
 0x2fc   :  { %v9944_v7 = vadd.f32 %v6149_v45, %v9893_v19  ;;  %v6188_v40 = vpop.f32.mrb[247].mxu1 }
 0x2fd   :  { %v4610_v63 = vadd.f32 %v6186_v42, %v9880_v14  ;;  %v6189_v20 = vadd.f32 %v6188_v40, %v6187_v26 }
 0x2fe   :  { %v6150_v61 = vpop.f32.mrb[248].mxu0 }
 0x2ff   :  { %v4613_v31 = vadd.f32 %v6189_v20, %v9891_v34  ;;  %v6151_v62 = vpop.f32.mrb[249].mxu0 }
 0x300   :  { %v6152_v24 = vadd.f32 %v6151_v62, %v6150_v61  ;;  %v6153_v0 = vpop.f32.mrb[250].mxu0 }
 0x301   :  { %v6190_v28 = vpop.f32.mrb[248].mxu1  ;;  %v6154_v56 = vpop.f32.mrb[251].mxu0 }
 0x302   :  { %v9949_v57 = vadd.f32 %v6152_v24, %v9912_v30  ;;  %v6191_v27 = vpop.f32.mrb[249].mxu1  ;;  %v6155_v58 = vadd.f32 %v6154_v56, %v6153_v0 }
 0x303   :  { %v6192_v8 = vadd.f32 %v6191_v27, %v6190_v28  ;;  %v6193_v19 = vpop.f32.mrb[250].mxu1 }
 0x304   :  { %v9952_v37 = vadd.f32 %v6155_v58, %v9917_v51  ;;  %v6194_v14 = vpop.f32.mrb[251].mxu1 }
 0x305   :  { %v4618_v44 = vadd.f32 %v6192_v8, %v9903_v59  ;;  %v6195_v2 = vadd.f32 %v6194_v14, %v6193_v19 }
 0x306   :  { %v6156_v34 = vpop.f32.mrb[252].mxu0 }
 0x307   :  { %v4621_v46 = vadd.f32 %v6195_v2, %v9915_v48  ;;  %v6157_v43 = vpop.f32.mrb[253].mxu0 }
 0x308   :  { %v6158_v50 = vadd.f32 %v6157_v43, %v6156_v34  ;;  %v6159_v49 = vpop.f32.mrb[254].mxu0 }
 0x309   :  { %v6196_v38 = vpop.f32.mrb[252].mxu1  ;;  %v6160_v30 = vpop.f32.mrb[255].mxu0 }
 0x30a   :  { %v9956_v32 = vadd.f32 %v6158_v50, %v6094_v1  ;;  %v6197_v53 = vpop.f32.mrb[253].mxu1  ;;  %v6161_v9 = vadd.f32 %v6160_v30, %v6159_v49 }
 0x30b   :  { %v6198_v41 = vadd.f32 %v6197_v53, %v6196_v38  ;;  %v6199_v10 = vpop.f32.mrb[254].mxu1 }
 0x30c   :  { %v9958_v51 = vadd.f32 %v6161_v9, %v6097_v23  ;;  %v6200_v25 = vpop.f32.mrb[255].mxu1 }
 0x30d   :  { %v4626_v59 = vadd.f32 %v6198_v41, %v9927_v6  ;;  %v6201_v11 = vadd.f32 %v6200_v25, %v6199_v10 }
 0x30e   :  { %v6242_v60 = vpop.f32.mrb[0].mxu0 }
 0x30f   :  { %v4629_v48 = vadd.f32 %v6201_v11, %v9930_v47  ;;  %v6243_v17 = vpop.f32.mrb[1].mxu0 }
 0x310   :  { %v6244_v16 = vadd.f32 %v6243_v17, %v6242_v60  ;;  %v6245_v4 = vpop.f32.mrb[2].mxu0 }
 0x311   :  { %v6202_v15 = vpop.f32.mrb[0].mxu1  ;;  %v6246_v35 = vpop.f32.mrb[3].mxu0 }
 0x312   :  { %v6203_v1 = vpop.f32.mrb[1].mxu1  ;;  %v6247_v21 = vadd.f32 %v6246_v35, %v6245_v4  ;;  %v9962_v13 = vadd.f32 %v6244_v16, %v4602_v22 }
 0x313   :  { %v6204_v5 = vadd.f32 %v6203_v1, %v6202_v15  ;;  %v6205_v29 = vpop.f32.mrb[2].mxu1 }
 0x314   :  { %v6206_v23 = vpop.f32.mrb[3].mxu1  ;;  %v9964_v18 = vadd.f32 %v6247_v21, %v4605_v54 }
 0x315   :  { %v4634_v6 = vadd.f32 %v6204_v5, %v9933_v12  ;;  %v6207_v45 = vadd.f32 %v6206_v23, %v6205_v29 }
 0x316   :  { %v6248_v42 = vpop.f32.mrb[4].mxu0 }
 0x317   :  { %v4637_v47 = vadd.f32 %v6207_v45, %v9936_v3  ;;  %v6249_v26 = vpop.f32.mrb[5].mxu0 }
 0x318   :  { %v6250_v40 = vadd.f32 %v6249_v26, %v6248_v42  ;;  %v6251_v20 = vpop.f32.mrb[6].mxu0 }
 0x319   :  { %v6208_v61 = vpop.f32.mrb[4].mxu1  ;;  %v6252_v62 = vpop.f32.mrb[7].mxu0 }
 0x31a   :  { %v6209_v24 = vpop.f32.mrb[5].mxu1  ;;  %v6253_v0 = vadd.f32 %v6252_v62, %v6251_v20  ;;  %v4707_v22 = vadd.f32 %v6250_v40, %v4610_v63 }
 0x31b   :  { %v6210_v28 = vadd.f32 %v6209_v24, %v6208_v61  ;;  %v6211_v56 = vpop.f32.mrb[6].mxu1 }
 0x31c   :  { %v6212_v27 = vpop.f32.mrb[7].mxu1  ;;  %v4710_v58 = vadd.f32 %v6253_v0, %v4613_v31 }
 0x31d   :  { %v9969_v54 = vadd.f32 %v6210_v28, %v9941_v52  ;;  %v6213_v12 = vadd.f32 %v6212_v27, %v6211_v56 }
 0x31e   :  { %v6254_v8 = vpop.f32.mrb[8].mxu0 }
 0x31f   :  { %v9972_v19 = vadd.f32 %v6213_v12, %v9944_v7  ;;  %v6255_v3 = vpop.f32.mrb[9].mxu0 }
 0x320   :  { %v6256_v14 = vadd.f32 %v6255_v3, %v6254_v8  ;;  %v6257_v2 = vpop.f32.mrb[10].mxu0 }
 0x321   :  { %v6214_v34 = vpop.f32.mrb[8].mxu1  ;;  %v6258_v43 = vpop.f32.mrb[11].mxu0 }
 0x322   :  { %v6215_v50 = vpop.f32.mrb[9].mxu1  ;;  %v6259_v49 = vadd.f32 %v6258_v43, %v6257_v2  ;;  %v4715_v63 = vadd.f32 %v6256_v14, %v4618_v44 }
 0x323   :  { %v6216_v38 = vadd.f32 %v6215_v50, %v6214_v34  ;;  %v6217_v30 = vpop.f32.mrb[10].mxu1 }
 0x324   :  { %v6218_v53 = vpop.f32.mrb[11].mxu1  ;;  %v9974_v31 = vadd.f32 %v6259_v49, %v4621_v46 }
 0x325   :  { %v9977_v52 = vadd.f32 %v6216_v38, %v9949_v57  ;;  %v6219_v9 = vadd.f32 %v6218_v53, %v6217_v30 }
 0x326   :  { %v6260_v41 = vpop.f32.mrb[12].mxu0 }
 0x327   :  { %v9980_v7 = vadd.f32 %v6219_v9, %v9952_v37  ;;  %v6261_v10 = vpop.f32.mrb[13].mxu0 }
 0x328   :  { %v6262_v25 = vadd.f32 %v6261_v10, %v6260_v41  ;;  %v6263_v11 = vpop.f32.mrb[14].mxu0 }
 0x329   :  { %v6220_v60 = vpop.f32.mrb[12].mxu1  ;;  %v6264_v17 = vpop.f32.mrb[15].mxu0 }
 0x32a   :  { %v6221_v16 = vpop.f32.mrb[13].mxu1  ;;  %v6265_v44 = vadd.f32 %v6264_v17, %v6263_v11  ;;  %v4723_v4 = vadd.f32 %v6262_v25, %v4626_v59 }
 0x32b   :  { %v6222_v15 = vadd.f32 %v6221_v16, %v6220_v60  ;;  %v6223_v35 = vpop.f32.mrb[14].mxu1 }
 0x32c   :  { %v6224_v46 = vpop.f32.mrb[15].mxu1  ;;  %v4726_v1 = vadd.f32 %v6265_v44, %v4629_v48 }
 0x32d   :  { %v9983_v57 = vadd.f32 %v6222_v15, %v9956_v32  ;;  %v6225_v21 = vadd.f32 %v6224_v46, %v6223_v35 }
 0x32e   :  { %v6266_v5 = vpop.f32.mrb[16].mxu0 }
 0x32f   :  { %v9986_v37 = vadd.f32 %v6225_v21, %v9958_v51  ;;  %v6267_v29 = vpop.f32.mrb[17].mxu0 }
 0x330   :  { %v6268_v23 = vadd.f32 %v6267_v29, %v6266_v5  ;;  %v6269_v45 = vpop.f32.mrb[18].mxu0 }
 0x331   :  { %v6437_v42 = vpop.f32.mrb[16].mxu1  ;;  %v6270_v26 = vpop.f32.mrb[19].mxu0 }
 0x332   :  { %v4804_v40 = vadd.f32 %v6437_v42, %v4707_v22  ;;  %v4795_v20 = vpop.f32.mrb[17].mxu1  ;;  %v6271_v59 = vadd.f32 %v6270_v26, %v6269_v45  ;;  %v4731_v61 = vadd.f32 %v6268_v23, %v4634_v6 }
 0x333   :  { %v4796_v62 = vadd.f32 %v4795_v20, %v9962_v13  ;;  %v6438_v48 = vpop.f32.mrb[18].mxu1 }
 0x334   :  { %v4807_v24 = vadd.f32 %v6438_v48, %v4710_v58  ;;  %v4798_v32 = vpop.f32.mrb[19].mxu1  ;;  %v9989_v0 = vadd.f32 %v6271_v59, %v4637_v47  ;;  %v4860_v28 = vmul.f32 %v9801_v33, %v4804_v40 }
 0x335   :  { %v4858_v51 = vmul.f32 %v9801_v33, %v4796_v62  ;;  %v4799_v56 = vadd.f32 %v4798_v32, %v9964_v18 }
 0x336   :  { %v6272_v27 = vpop.f32.mrb[20].mxu0  ;;  %v4861_v22 = vmul.f32 %v9801_v33, %v4807_v24  ;;  %v4876_v58 = vadd.f32 %v9809_v36, %v4860_v28 }
 0x337   :  { %v4874_v12 = vadd.f32 %v9809_v36, %v4858_v51  ;;  %v4859_v6 = vmul.f32 %v9801_v33, %v4799_v56  ;;  %v6273_v8 = vpop.f32.mrb[21].mxu0 }
 0x338   :  { %v6274_v13 = vadd.f32 %v6273_v8, %v6272_v27  ;;  %v6275_v3 = vpop.f32.mrb[22].mxu0  ;;  %v4877_v38 = vadd.f32 %v9809_v36, %v4861_v22  ;;  %v4892_v60 = vmax.f32 %v4876_v58, 0.0 }
 0x339   :  { %v4875_v47 = vadd.f32 %v9809_v36, %v4859_v6  ;;  %v6441_v14 = vpop.f32.mrb[20].mxu1  ;;  %v6276_v2 = vpop.f32.mrb[23].mxu0  ;;  %v4890_v49 = vmax.f32 %v4874_v12, 0.0 }
 0x33a   :  { %v4820_v34 = vadd.f32 %v6441_v14, %v4723_v4  ;;  %v4811_v43 = vpop.f32.mrb[21].mxu1  ;;  %v6277_v50 = vadd.f32 %v6276_v2, %v6275_v3  ;;  %v4739_v18 = vadd.f32 %v6274_v13, %v9969_v54  ;;  %v4893_v15 = vmax.f32 %v4877_v38, 0.0 }
 0x33b   :  { %v4891_v30 = vmax.f32 %v4875_v47, 0.0  ;;  %v4812_v53 = vadd.f32 %v4811_v43, %v4715_v63  ;;  %v6442_v9 = vpop.f32.mrb[22].mxu1 }
 0x33c   :  { %v4864_v41 = vmul.f32 %v9801_v33, %v4820_v34  ;;  %v4823_v10 = vadd.f32 %v6442_v9, %v4726_v1  ;;  %v4814_v25 = vpop.f32.mrb[23].mxu1  ;;  %v4742_v11 = vadd.f32 %v6277_v50, %v9972_v19 }
 0x33d   :  { %v4906_v17 = vadd.f32 %v4891_v30, %v4890_v49  ;;  %v4862_v16 = vmul.f32 %v9801_v33, %v4812_v53  ;;  %v4815_v44 = vadd.f32 %v4814_v25, %v9974_v31 }
 0x33e   :  { %v4865_v54 = vmul.f32 %v9801_v33, %v4823_v10  ;;  %v6278_v4 = vpop.f32.mrb[24].mxu0  ;;  %v4880_v1 = vadd.f32 %v9809_v36, %v4864_v41 }
 0x33f   :  { %v4907_v35 = vadd.f32 %v4906_v17, %v4892_v60  ;;  %v4878_v63 = vadd.f32 %v9809_v36, %v4862_v16  ;;  %v4863_v46 = vmul.f32 %v9801_v33, %v4815_v44  ;;  %v6279_v21 = vpop.f32.mrb[25].mxu0 }
 0x340   :  { %v6280_v5 = vadd.f32 %v6279_v21, %v6278_v4  ;;  %v6281_v19 = vpop.f32.mrb[26].mxu0  ;;  %v4881_v26 = vadd.f32 %v9809_v36, %v4865_v54  ;;  %v4896_v51 = vmax.f32 %v4880_v1, 0.0 }
 0x341   :  { %v4894_v29 = vmax.f32 %v4878_v63, 0.0  ;;  %v4908_v23 = vadd.f32 %v4907_v35, %v4893_v15  ;;  %v4879_v45 = vadd.f32 %v9809_v36, %v4863_v46  ;;  %v6445_v42 = vpop.f32.mrb[24].mxu1  ;;  %v6282_v31 = vpop.f32.mrb[27].mxu0 }
 0x342   :  { %v4836_v40 = vadd.f32 %v6445_v42, %v4739_v18  ;;  %v4827_v20 = vpop.f32.mrb[25].mxu1  ;;  %v6283_v59 = vadd.f32 %v6282_v31, %v6281_v19  ;;  %v4747_v62 = vadd.f32 %v6280_v5, %v9977_v52  ;;  %v4897_v3 = vmax.f32 %v4881_v26, 0.0 }
 0x343   :  { %v4909_v48 = vadd.f32 %v4908_v23, %v4894_v29  ;;  %v4895_v24 = vmax.f32 %v4879_v45, 0.0  ;;  %v4828_v32 = vadd.f32 %v4827_v20, %v4731_v61  ;;  %v6446_v28 = vpop.f32.mrb[26].mxu1 }
 0x344   :  { %v4839_v56 = vadd.f32 %v6446_v28, %v4742_v11  ;;  %v4830_v27 = vpop.f32.mrb[27].mxu1  ;;  %v4750_v12 = vadd.f32 %v6283_v59, %v9980_v7  ;;  %v4868_v6 = vmul.f32 %v9801_v33, %v4836_v40 }
 0x345   :  { %v4910_v22 = vadd.f32 %v4909_v48, %v4895_v24  ;;  %v4866_v8 = vmul.f32 %v9801_v33, %v4828_v32  ;;  %v4831_v13 = vadd.f32 %v4830_v27, %v9989_v0 }
 0x346   :  { %v6284_v58 = vpop.f32.mrb[28].mxu0  ;;  %v4869_v61 = vmul.f32 %v9801_v33, %v4839_v56  ;;  %v4884_v7 = vadd.f32 %v9809_v36, %v4868_v6 }
 0x347   :  { %v4911_v47 = vadd.f32 %v4910_v22, %v4896_v51  ;;  %v4882_v52 = vadd.f32 %v9809_v36, %v4866_v8  ;;  %v4867_v14 = vmul.f32 %v9801_v33, %v4831_v13  ;;  %v6285_v2 = vpop.f32.mrb[29].mxu0 }
 0x348   :  { %v6286_v34 = vadd.f32 %v6285_v2, %v6284_v58  ;;  %v6287_v43 = vpop.f32.mrb[30].mxu0  ;;  %v4885_v10 = vadd.f32 %v9809_v36, %v4869_v61  ;;  %v4900_v54 = vmax.f32 %v4884_v7, 0.0 }
 0x349   :  { %v4898_v50 = vmax.f32 %v4882_v52, 0.0  ;;  %v4912_v18 = vadd.f32 %v4911_v47, %v4897_v3  ;;  %v4883_v49 = vadd.f32 %v9809_v36, %v4867_v14  ;;  %v6449_v38 = vpop.f32.mrb[28].mxu1  ;;  %v6288_v0 = vpop.f32.mrb[31].mxu0  ;;  %v2776_v3 = vmul.f32 0.00390625, %v9659_v39  ;;  %v5217_v47 = vld [vmem:[%s10056_s5] ss:$0 sm:$0xff] }
 0x34a   :  { %v4755_v30 = vadd.f32 %v6286_v34, %v9983_v57  ;;  %v4843_v53 = vpop.f32.mrb[29].mxu1  ;;  %v6289_v9 = vadd.f32 %v6288_v0, %v6287_v43  ;;  %v4901_v46 = vmax.f32 %v4885_v10, 0.0 }
 0x34b   :  { %v4913_v41 = vadd.f32 %v4912_v18, %v4898_v50  ;;  %v4899_v25 = vmax.f32 %v4883_v49, 0.0  ;;  %v4844_v11 = vadd.f32 %v4843_v53, %v4747_v62  ;;  %v6450_v60 = vpop.f32.mrb[30].mxu1 }
 0x34c   :  { %v4852_v17 = vadd.f32 %v6449_v38, %v4755_v30  ;;  %v4758_v16 = vadd.f32 %v6289_v9, %v9986_v37  ;;  %v4846_v44 = vpop.f32.mrb[31].mxu1  ;;  %v4158_v37 = vrot.slane %v9877_v55, 4 }
 0x34d   :  { %v4914_v4 = vadd.f32 %v4913_v41, %v4899_v25  ;;  %v4870_v15 = vmul.f32 %v9801_v33, %v4844_v11  ;;  %v4847_v35 = vadd.f32 %v4846_v44, %v4750_v12 }
 0x34e   :  { %v4872_v63 = vmul.f32 %v9801_v33, %v4852_v17  ;;  %v4855_v57 = vadd.f32 %v6450_v60, %v4758_v16  ;;  %v4159_v59 = vadd.f32 %v4158_v37, %v9877_v55 }
 0x34f   :  { %v4915_v21 = vadd.f32 %v4914_v4, %v4900_v54  ;;  %v4886_v1 = vadd.f32 %v9809_v36, %v4870_v15  ;;  %v4871_v5 = vmul.f32 %v9801_v33, %v4847_v35 }
 0x350   :  { %v4888_v19 = vadd.f32 %v9809_v36, %v4872_v63  ;;  %v4873_v29 = vmul.f32 %v9801_v33, %v4855_v57  ;;  %v4160_v32 = vrot.slane %v4159_v59, 2 }
 0x351   :  { %v4902_v23 = vmax.f32 %v4886_v1, 0.0  ;;  %v4916_v45 = vadd.f32 %v4915_v21, %v4901_v46  ;;  %v4887_v42 = vadd.f32 %v9809_v36, %v4871_v5 }
 0x352   :  { %v4889_v31 = vadd.f32 %v9809_v36, %v4873_v29  ;;  %v4904_v26 = vmax.f32 %v4888_v19, 0.0  ;;  %v4161_v33 = vadd.f32 %v4160_v32, %v4159_v59 }
 0x353   :  { %v4917_v40 = vadd.f32 %v4916_v45, %v4902_v23  ;;  %v4903_v20 = vmax.f32 %v4887_v42, 0.0 }
 0x354   :  { %v4905_v62 = vmax.f32 %v4889_v31, 0.0  ;;  %v4162_v12 = vrot.slane %v4161_v33, 1 }
 0x355   :  { %v4918_v48 = vadd.f32 %v4917_v40, %v4903_v20 }
 0x356   :  { %v4163_v8 = vadd.f32 %v4162_v12, %v4161_v33 }
 0x357   :  { %v4919_v24 = vadd.f32 %v4918_v48, %v4904_v26 }
 0x359   :  { %v4920_v28 = vadd.f32 %v4919_v24, %v4905_v62 }
 0x35b   :  { %v4921_v51 = vrot.slane %v4920_v28, 4 }
 0x35d   :  { %v4922_v56 = vadd.f32 %v4921_v51, %v4920_v28 }
 0x35f   :  { %v4923_v27 = vrot.slane %v4922_v56, 2 }
 0x361   :  { %v4924_v22 = vadd.f32 %v4923_v27, %v4922_v56 }
 0x363   :  { %v4925_v6 = vrot.slane %v4924_v22, 1 }
 0x365   :  { %v4926_v13 = vadd.f32 %v4925_v6, %v4924_v22 }
 0x367   :  { %v4927_v36 = vadd.f32 %v4926_v13, %v4163_v8 }
 0x369   :  { %v4928_v58 = vmul.f32 0.00390625, %v4927_v36 }
 0x36b   :  { %v4930_v55 = vsel %vm588_vm6, %v2776_v3, %v4928_v58 }
 0x36c   :  { %6484 = vmatmul.mubr.f32.vlgmr.msra.gmra.mrb[32].mxu0 %v4930_v55 }
 0x43f   :  { %v5020_v52 = vpop.f32.mrb[32].mxu0 }
 0x440   :  { %v5021_v61 = vadd.f32 %v5217_v47, %v5020_v52  ;;  %v6485_v14 = vpop.f32.mrb[33].mxu0 }
 0x442   :  { %5024 = vst [vmem:[#allocation3] sm:$0x3] %v5021_v61 }
 0x443   :  { %6840 = shalt.err (!%p6837_p4)
}
 0x444   :  { %s6841_s7 = scalar_lea.hbm %s10057_s6, 32 }
 0x445   :  { %p6842_p5 = scmp.ne.s32.totalorder %s10057_s6, %s6841_s7  ;;  %p6845_p6 = scmp.lt.u32.totalorder %s6841_s7, %s10057_s6 }
 0x447   :  { %p6847_p7 = pnand %p6845_p6, %p6842_p5 }
 0x449   :  { %6850 = shalt.err (!%p6847_p7)
}
 0x44a   :  { %5034 = dma.vmem_to_hbm [thread:$0]  %s5032_s28, 32, %s10057_s6, [#allocation4]  }
 0x44b   :  { %6851 = dma.done.wait [#allocation4], 32  }
 0x44c   :  { %6852 = vsyncadd [#allocation4], 4294967264 }
 0x44d   :  { %5038 = vsyncpa [#allocation4], 1 }

</bundles_post_ra>
